<compile_context>
chip_gen: v7x
topology: tpu7x:2x2x1
jax: 0.10.0
libtpu: 0.0.40
codegen_flags: <defaults>
</compile_context>

<pallas_src>
import numpy as np
import jax
import jax.numpy as jnp
from jax.experimental import pallas as pl
from jax.experimental.pallas import tpu as pltpu

# ---- module hyper-parameters (PyTorch defaults) ----
D = 6                 # number of hidden layers
W = 128               # hidden width
FREQS = 10            # positional-encoding frequencies
IN_CH = 3 + 3 * FREQS * 2          # 63 (deformation_dim = 0)
OUT_CH = 3
SKIPS = (4,)
PAD = 128             # lane-padded channel width


def _round_up(x, m):
    return ((x + m - 1) // m) * m


def _nbytes(a):
    return int(np.prod(a.shape)) * np.dtype(a.dtype).itemsize


def _bf16_elementwise_ok():
    """bf16 VALU exists on v6e / v7x; v5e (and older) keep the f32 path."""
    try:
        kind = jax.devices()[0].device_kind.lower()
    except Exception:
        return False
    if "tpu" not in kind:
        return False
    return not any(g in kind for g in ("v2", "v3", "v4", "v5"))


def make_derf_kernel(elem_dtype):
    """Kernel factory; elem_dtype is the bias-add / ReLU / skip-add dtype."""

    def derf_kernel(xyz_ref, fmat_ref, phase_ref,
                    w01, b0, w1, b1, w2, b2, w3, b3,
                    w4h, b4, w5, b5, wout, bout,
                    out_ref):
        """One row-tile of the DeRF forward (embedding + 6-layer MLP + out)."""
        xyz = xyz_ref[...].astype(jnp.float32)                     # (tm, 3)

        # ---- lane-dense NeRF positional encoding (f32, VPU only) ----
        # proj[:, c] = phase_c + sum_j fmat[j, c] * x_j.  The cos phase (pi/2)
        # is folded directly into the projection; it is 0 on identity and
        # padded lanes so this is numerically identical to adding it later.
        # Phases reach 2^9*|x| ~ 512 rad -> this block MUST stay f32.
        fm = fmat_ref[...]                                          # (3, PAD)
        proj = (phase_ref[...]
                + xyz[:, 0:1] * fm[0:1, :]
                + xyz[:, 1:2] * fm[1:2, :]
                + xyz[:, 2:3] * fm[2:3, :])                         # (tm, PAD)
        lane = jax.lax.broadcasted_iota(jnp.int32, (1, PAD), 1)
        # cos(x) == sin(x + pi/2); identity lanes (0..2) pass through.
        enc = jnp.where(lane < 3, proj, jnp.sin(proj))              # (tm, PAD) f32

        def mm(a, w_ref):
            # bf16 MXU matmul with f32 accumulation.  The astype is a no-op
            # when activations are already bf16 (v6e/v7x elementwise path).
            return jnp.dot(a.astype(jnp.bfloat16), w_ref[...],
                           preferred_element_type=jnp.float32)

        relu = jax.nn.relu

        # Fused layer-1 + skip-term matmul: enc @ [W0 | W4_enc] -> (tm, 2W).
        h0s = mm(enc, w01)
        skip = h0s[:, W:].astype(elem_dtype)                        # enc @ W4_enc
        h = relu(h0s[:, :W].astype(elem_dtype) + b0[...])           # layer 1 (i=0)
        h = relu(mm(h, w1).astype(elem_dtype) + b1[...])            # layer 2 (i=1)
        h = relu(mm(h, w2).astype(elem_dtype) + b2[...])            # layer 3 (i=2)
        h = relu(mm(h, w3).astype(elem_dtype) + b3[...])            # layer 4 (i=3)
        h = relu(mm(h, w4h).astype(elem_dtype) + skip + b4[...])    # layer 5 (i=4, skip)
        h = relu(mm(h, w5).astype(elem_dtype) + b5[...])            # layer 6 (i=5)

        res = mm(h, wout)                                           # (tm, PAD) f32
        out_ref[...] = (res[:, :OUT_CH] + bout[...]).astype(out_ref.dtype)

    return derf_kernel


def make_params(key):
    """Deterministic params with the exact shapes of the PyTorch module."""
    in_dims = [IN_CH, W, W, W, W + IN_CH, W]     # layer i input width
    keys = jax.random.split(key, 2 * D + 2)

    def init(k, shape, fan_in):
        bound = 1.0 / jnp.sqrt(jnp.float32(fan_in))
        return jax.random.uniform(k, shape, jnp.float32, -bound, bound)

    p = {}
    ki = 0
    for i in range(D):
        p[f"w{i}"] = init(keys[ki], (W, in_dims[i]), in_dims[i]); ki += 1
        p[f"b{i}"] = init(keys[ki], (W,), in_dims[i]); ki += 1
    p["w_out"] = init(keys[ki], (OUT_CH, W), W); ki += 1
    p["b_out"] = init(keys[ki], (OUT_CH,), W)
    return p


def derf_ref(params, xyz):
    """Pure-JAX reference mirroring the PyTorch forward."""
    parts = [xyz]
    for k in range(FREQS):
        f = 2.0 ** k
        parts += [jnp.sin(f * xyz), jnp.cos(f * xyz)]
    enc = jnp.concatenate(parts, axis=-1)
    h = enc
    for i in range(D):
        if i in SKIPS:
            h = jnp.concatenate([enc, h], axis=-1)
        h = jax.nn.relu(h @ params[f"w{i}"].T + params[f"b{i}"])
    return h @ params["w_out"].T + params["b_out"]


def _encoding_tables():
    """(3, PAD) frequency matrix + (1, PAD) phase vector for lane-dense encoding."""
    fmat = np.zeros((3, PAD), np.float32)
    phase = np.zeros((1, PAD), np.float32)
    for j in range(3):
        fmat[j, j] = 1.0                      # identity lanes 0..2
    for k in range(FREQS):
        for j in range(3):
            fmat[j, 3 + 6 * k + j] = 2.0 ** k          # sin lanes
            fmat[j, 3 + 6 * k + 3 + j] = 2.0 ** k      # cos lanes
            phase[0, 3 + 6 * k + 3 + j] = np.pi / 2.0  # cos(x) = sin(x + pi/2)
    return jnp.asarray(fmat), jnp.asarray(phase)


def derf_pallas(params, xyz, tm=2048):
    """DeRF forward.  xyz is (..., 3); returns (..., 3)."""
    lead_shape = xyz.shape[:-1]
    xyz = xyz.reshape(-1, 3)
    N = xyz.shape[0]

    # Row-tile heuristic:
    #   * large tiles (>=1024 rows) amortise the ~0.35 us/step pipeline
    #     overhead and per-dot MXU weight (RHS) loads;
    #   * keep at least 2 tiles when possible so the "parallel" grid axis can
    #     be sharded across v7x's two TensorCores.
    tm = int(max(8, min(tm, _round_up(max(int(pl.cdiv(N, 2)), 1), 8))))
    n_tiles = int(pl.cdiv(N, tm))
    Np = n_tiles * tm
    xyz_p = jnp.pad(xyz.astype(jnp.float32), ((0, Np - N), (0, 0)))

    # Elementwise dtype per generation (bf16 VALU only on v6e / v7x).
    elem_dtype = jnp.bfloat16 if _bf16_elementwise_ok() else jnp.float32

    fmat, phase = _encoding_tables()

    def pad_in(wT):   # (in, out) -> pad input rows up to PAD with zeros
        return jnp.pad(wT, ((0, PAD - wT.shape[0]), (0, 0)))

    bf16 = jnp.bfloat16
    # Fused layer-0 / skip-encoded weight: (128, 256).
    w01 = jnp.concatenate(
        [pad_in(params["w0"].T), pad_in(params["w4"][:, :IN_CH].T)],
        axis=1).astype(bf16)
    w1 = params["w1"].T.astype(bf16)
    w2 = params["w2"].T.astype(bf16)
    w3 = params["w3"].T.astype(bf16)
    w4h = params["w4"][:, IN_CH:].T.astype(bf16)       # hidden half of skip layer
    w5 = params["w5"].T.astype(bf16)
    wout = jnp.pad(params["w_out"].T, ((0, 0), (0, PAD - OUT_CH))).astype(bf16)
    bs = [params[f"b{i}"].reshape(1, W).astype(elem_dtype) for i in range(D)]
    bout = params["b_out"].reshape(1, OUT_CH).astype(jnp.float32)

    consts = (fmat, phase,
              w01, bs[0], w1, bs[1], w2, bs[2], w3, bs[3],
              w4h, bs[4], w5, bs[5], wout, bout)

    def const(shape):
        # Grid-invariant (resident) operand.  (Single-buffering them via
        # pl.Buffered(1) would save ~0.3 MiB of VMEM; skipped — noise here.)
        return pl.BlockSpec(shape, lambda i: (0, 0))

    # Advisory scheduling hint: ~262 KFLOP and one 128-lane sin per point.
    flops_per_pt = 2 * (PAD * 2 * W + 5 * W * W + W * PAD)
    const_bytes = sum(_nbytes(c) for c in consts)
    cost = pl.CostEstimate(flops=flops_per_pt * Np,
                           transcendentals=PAD * Np,
                           bytes_accessed=24 * Np + const_bytes)

    # Actual footprint is ~1-12 MiB; size the limit from tm and cap well below
    # v7x's 64 MiB per-TC VMEM (v5e/v6e have 128 MiB, so the cap is harmless).
    vmem_limit = int(min(40 * 1024 * 1024, max(16 * 1024 * 1024, tm * 12 * 1024)))

    out = pl.pallas_call(
        make_derf_kernel(elem_dtype),
        out_shape=jax.ShapeDtypeStruct((Np, OUT_CH), jnp.float32),
        grid_spec=pltpu.PrefetchScalarGridSpec(
            num_scalar_prefetch=0,
            grid=(n_tiles,),
            in_specs=[
                pl.BlockSpec((tm, 3), lambda i: (i, 0)),   # xyz row tile
                const((3, PAD)), const((1, PAD)),          # encoding tables
                const((PAD, 2 * W)), const((1, W)),        # fused layer 1 + skip-enc
                const((W, W)), const((1, W)),              # layer 2
                const((W, W)), const((1, W)),              # layer 3
                const((W, W)), const((1, W)),              # layer 4
                const((W, W)), const((1, W)),              # layer 5 (hidden half)
                const((W, W)), const((1, W)),              # layer 6
                const((PAD, PAD)), const((1, OUT_CH)),     # output head
            ],
            out_specs=pl.BlockSpec((tm, OUT_CH), lambda i: (i, 0)),
        ),
        compiler_params=pltpu.CompilerParams(
            dimension_semantics=("parallel",),
            vmem_limit_bytes=vmem_limit),
        cost_estimate=cost,
    )(xyz_p, *consts)

    return out[:N].reshape(*lead_shape, OUT_CH)


if __name__ == "__main__":
    key = jax.random.PRNGKey(0)
    pkey, xkey = jax.random.split(key)
    params = make_params(pkey)

    # Small deterministic input: 512 sample points in [-1, 1]^3.  The tm
    # heuristic clamps the default 2048-row tile to 256 rows -> 2 grid steps
    # (exercises the pipeline loop and keeps both v7x TensorCores busy).
    xyz = jax.random.uniform(xkey, (512, 3), jnp.float32, minval=-1.0, maxval=1.0)

    out = derf_pallas(params, xyz)
    out = jax.block_until_ready(out)

    ref = derf_ref(params, xyz)
    assert out.shape == (512, OUT_CH)
    err = float(jnp.max(jnp.abs(out - ref)))
    # bf16 MXU matmuls (+ bf16 elementwise on v6e/v7x), f32 accumulation.
    assert err < 3e-2, f"max abs err {err}"
    print("KERNEL_OK")
</pallas_src>

<mosaic_0001>
module attributes {stable_mosaic.version = 11 : i64} {
  func.func @derf_kernel(%arg0: i32, %arg1: memref<256x3xf32, #tpu.memory_space<vmem>>, %arg2: memref<3x128xf32, #tpu.memory_space<vmem>>, %arg3: memref<1x128xf32, #tpu.memory_space<vmem>>, %arg4: memref<128x256xbf16, #tpu.memory_space<vmem>>, %arg5: memref<1x128xf32, #tpu.memory_space<vmem>>, %arg6: memref<128x128xbf16, #tpu.memory_space<vmem>>, %arg7: memref<1x128xf32, #tpu.memory_space<vmem>>, %arg8: memref<128x128xbf16, #tpu.memory_space<vmem>>, %arg9: memref<1x128xf32, #tpu.memory_space<vmem>>, %arg10: memref<128x128xbf16, #tpu.memory_space<vmem>>, %arg11: memref<1x128xf32, #tpu.memory_space<vmem>>, %arg12: memref<128x128xbf16, #tpu.memory_space<vmem>>, %arg13: memref<1x128xf32, #tpu.memory_space<vmem>>, %arg14: memref<128x128xbf16, #tpu.memory_space<vmem>>, %arg15: memref<1x128xf32, #tpu.memory_space<vmem>>, %arg16: memref<128x128xbf16, #tpu.memory_space<vmem>>, %arg17: memref<1x3xf32, #tpu.memory_space<vmem>>, %arg18: memref<256x3xf32, #tpu.memory_space<vmem>>) attributes {dimension_semantics = [#tpu.dimension_semantics<parallel>], iteration_bounds = array<i64: 2>, scalar_prefetch = 0 : i64, scratch_operands = 0 : i64, tpu.core_type = #tpu.core_type<tc>, window_params = [{transform_indices = @transform_0, window_bounds = array<i64: 256, 3>}, {pipeline_mode = #tpu.pipeline_mode<synchronous>, transform_indices = @transform_1, window_bounds = array<i64: 3, 128>}, {pipeline_mode = #tpu.pipeline_mode<synchronous>, transform_indices = @transform_2, window_bounds = array<i64: 1, 128>}, {pipeline_mode = #tpu.pipeline_mode<synchronous>, transform_indices = @transform_3, window_bounds = array<i64: 128, 256>}, {pipeline_mode = #tpu.pipeline_mode<synchronous>, transform_indices = @transform_4, window_bounds = array<i64: 1, 128>}, {pipeline_mode = #tpu.pipeline_mode<synchronous>, transform_indices = @transform_5, window_bounds = array<i64: 128, 128>}, {pipeline_mode = #tpu.pipeline_mode<synchronous>, transform_indices = @transform_6, window_bounds = array<i64: 1, 128>}, {pipeline_mode = #tpu.pipeline_mode<synchronous>, transform_indices = @transform_7, window_bounds = array<i64: 128, 128>}, {pipeline_mode = #tpu.pipeline_mode<synchronous>, transform_indices = @transform_8, window_bounds = array<i64: 1, 128>}, {pipeline_mode = #tpu.pipeline_mode<synchronous>, transform_indices = @transform_9, window_bounds = array<i64: 128, 128>}, {pipeline_mode = #tpu.pipeline_mode<synchronous>, transform_indices = @transform_10, window_bounds = array<i64: 1, 128>}, {pipeline_mode = #tpu.pipeline_mode<synchronous>, transform_indices = @transform_11, window_bounds = array<i64: 128, 128>}, {pipeline_mode = #tpu.pipeline_mode<synchronous>, transform_indices = @transform_12, window_bounds = array<i64: 1, 128>}, {pipeline_mode = #tpu.pipeline_mode<synchronous>, transform_indices = @transform_13, window_bounds = array<i64: 128, 128>}, {pipeline_mode = #tpu.pipeline_mode<synchronous>, transform_indices = @transform_14, window_bounds = array<i64: 1, 128>}, {pipeline_mode = #tpu.pipeline_mode<synchronous>, transform_indices = @transform_15, window_bounds = array<i64: 128, 128>}, {pipeline_mode = #tpu.pipeline_mode<synchronous>, transform_indices = @transform_16, window_bounds = array<i64: 1, 3>}, {transform_indices = @transform_17, window_bounds = array<i64: 256, 3>}]} {
    %c0 = arith.constant 0 : index
    %c0_0 = arith.constant 0 : index
    %0 = vector.load %arg1[%c0, %c0_0] : memref<256x3xf32, #tpu.memory_space<vmem>>, vector<256x3xf32>
    %c0_1 = arith.constant 0 : index
    %c0_2 = arith.constant 0 : index
    %1 = vector.load %arg2[%c0_1, %c0_2] : memref<3x128xf32, #tpu.memory_space<vmem>>, vector<3x128xf32>
    %c0_3 = arith.constant 0 : index
    %c0_4 = arith.constant 0 : index
    %2 = vector.load %arg3[%c0_3, %c0_4] : memref<1x128xf32, #tpu.memory_space<vmem>>, vector<1x128xf32>
    %3 = vector.extract_strided_slice %0 {offsets = [0, 0], sizes = [256, 1], strides = [1, 1]} : vector<256x3xf32> to vector<256x1xf32>
    %4 = vector.extract_strided_slice %1 {offsets = [0, 0], sizes = [1, 128], strides = [1, 1]} : vector<3x128xf32> to vector<1x128xf32>
    %5 = vector.broadcast %3 : vector<256x1xf32> to vector<256x128xf32>
    %6 = vector.broadcast %4 : vector<1x128xf32> to vector<256x128xf32>
    %7 = arith.mulf %5, %6 : vector<256x128xf32>
    %8 = vector.broadcast %2 : vector<1x128xf32> to vector<256x128xf32>
    %9 = arith.addf %8, %7 : vector<256x128xf32>
    %10 = vector.extract_strided_slice %0 {offsets = [0, 1], sizes = [256, 1], strides = [1, 1]} : vector<256x3xf32> to vector<256x1xf32>
    %11 = vector.extract_strided_slice %1 {offsets = [1, 0], sizes = [1, 128], strides = [1, 1]} : vector<3x128xf32> to vector<1x128xf32>
    %12 = vector.broadcast %10 : vector<256x1xf32> to vector<256x128xf32>
    %13 = vector.broadcast %11 : vector<1x128xf32> to vector<256x128xf32>
    %14 = arith.mulf %12, %13 : vector<256x128xf32>
    %15 = arith.addf %9, %14 : vector<256x128xf32>
    %16 = vector.extract_strided_slice %0 {offsets = [0, 2], sizes = [256, 1], strides = [1, 1]} : vector<256x3xf32> to vector<256x1xf32>
    %17 = vector.extract_strided_slice %1 {offsets = [2, 0], sizes = [1, 128], strides = [1, 1]} : vector<3x128xf32> to vector<1x128xf32>
    %18 = vector.broadcast %16 : vector<256x1xf32> to vector<256x128xf32>
    %19 = vector.broadcast %17 : vector<1x128xf32> to vector<256x128xf32>
    %20 = arith.mulf %18, %19 : vector<256x128xf32>
    %21 = arith.addf %15, %20 : vector<256x128xf32>
    %22 = tpu.iota {dimensions = array<i32: 1>} : vector<1x128xi32>
    %c3_i32 = arith.constant 3 : i32
    %23 = vector.broadcast %c3_i32 : i32 to vector<1x128xi32>
    %24 = arith.cmpi slt, %22, %23 : vector<1x128xi32>
    %25 = math.sin %21 : vector<256x128xf32>
    %26 = vector.shape_cast %24 : vector<1x128xi1> to vector<1x128xi1>
    %27 = vector.broadcast %26 : vector<1x128xi1> to vector<256x128xi1>
    %28 = arith.select %27, %21, %25 : vector<256x128xi1>, vector<256x128xf32>
    %29 = arith.truncf %28 : vector<256x128xf32> to vector<256x128xbf16>
    %c0_5 = arith.constant 0 : index
    %c0_6 = arith.constant 0 : index
    %30 = vector.load %arg4[%c0_5, %c0_6] : memref<128x256xbf16, #tpu.memory_space<vmem>>, vector<128x256xbf16>
    %cst = arith.constant dense<0.000000e+00> : vector<256x256xf32>
    %31 = tpu.matmul %29, %30, %cst {dimension_numbers = #tpu.dot_dimension_numbers<[1], [0], [0], [1], [0, 0, 1, 1], [], []>} : vector<256x128xbf16>, vector<128x256xbf16>, vector<256x256xf32> -> vector<256x256xf32>
    %32 = vector.extract_strided_slice %31 {offsets = [0, 128], sizes = [256, 128], strides = [1, 1]} : vector<256x256xf32> to vector<256x128xf32>
    %33 = vector.extract_strided_slice %31 {offsets = [0, 0], sizes = [256, 128], strides = [1, 1]} : vector<256x256xf32> to vector<256x128xf32>
    %c0_7 = arith.constant 0 : index
    %c0_8 = arith.constant 0 : index
    %34 = vector.load %arg5[%c0_7, %c0_8] : memref<1x128xf32, #tpu.memory_space<vmem>>, vector<1x128xf32>
    %35 = vector.broadcast %34 : vector<1x128xf32> to vector<256x128xf32>
    %36 = arith.addf %33, %35 : vector<256x128xf32>
    %cst_9 = arith.constant 0.000000e+00 : f32
    %37 = vector.broadcast %cst_9 : f32 to vector<256x128xf32>
    %38 = arith.maximumf %36, %37 : vector<256x128xf32>
    %39 = arith.truncf %38 : vector<256x128xf32> to vector<256x128xbf16>
    %c0_10 = arith.constant 0 : index
    %c0_11 = arith.constant 0 : index
    %40 = vector.load %arg6[%c0_10, %c0_11] : memref<128x128xbf16, #tpu.memory_space<vmem>>, vector<128x128xbf16>
    %cst_12 = arith.constant dense<0.000000e+00> : vector<256x128xf32>
    %41 = tpu.matmul %39, %40, %cst_12 {dimension_numbers = #tpu.dot_dimension_numbers<[1], [0], [0], [1], [0, 0, 1, 1], [], []>} : vector<256x128xbf16>, vector<128x128xbf16>, vector<256x128xf32> -> vector<256x128xf32>
    %c0_13 = arith.constant 0 : index
    %c0_14 = arith.constant 0 : index
    %42 = vector.load %arg7[%c0_13, %c0_14] : memref<1x128xf32, #tpu.memory_space<vmem>>, vector<1x128xf32>
    %43 = vector.broadcast %42 : vector<1x128xf32> to vector<256x128xf32>
    %44 = arith.addf %41, %43 : vector<256x128xf32>
    %cst_15 = arith.constant 0.000000e+00 : f32
    %45 = vector.broadcast %cst_15 : f32 to vector<256x128xf32>
    %46 = arith.maximumf %44, %45 : vector<256x128xf32>
    %47 = arith.truncf %46 : vector<256x128xf32> to vector<256x128xbf16>
    %c0_16 = arith.constant 0 : index
    %c0_17 = arith.constant 0 : index
    %48 = vector.load %arg8[%c0_16, %c0_17] : memref<128x128xbf16, #tpu.memory_space<vmem>>, vector<128x128xbf16>
    %cst_18 = arith.constant dense<0.000000e+00> : vector<256x128xf32>
    %49 = tpu.matmul %47, %48, %cst_18 {dimension_numbers = #tpu.dot_dimension_numbers<[1], [0], [0], [1], [0, 0, 1, 1], [], []>} : vector<256x128xbf16>, vector<128x128xbf16>, vector<256x128xf32> -> vector<256x128xf32>
    %c0_19 = arith.constant 0 : index
    %c0_20 = arith.constant 0 : index
    %50 = vector.load %arg9[%c0_19, %c0_20] : memref<1x128xf32, #tpu.memory_space<vmem>>, vector<1x128xf32>
    %51 = vector.broadcast %50 : vector<1x128xf32> to vector<256x128xf32>
    %52 = arith.addf %49, %51 : vector<256x128xf32>
    %cst_21 = arith.constant 0.000000e+00 : f32
    %53 = vector.broadcast %cst_21 : f32 to vector<256x128xf32>
    %54 = arith.maximumf %52, %53 : vector<256x128xf32>
    %55 = arith.truncf %54 : vector<256x128xf32> to vector<256x128xbf16>
    %c0_22 = arith.constant 0 : index
    %c0_23 = arith.constant 0 : index
    %56 = vector.load %arg10[%c0_22, %c0_23] : memref<128x128xbf16, #tpu.memory_space<vmem>>, vector<128x128xbf16>
    %cst_24 = arith.constant dense<0.000000e+00> : vector<256x128xf32>
    %57 = tpu.matmul %55, %56, %cst_24 {dimension_numbers = #tpu.dot_dimension_numbers<[1], [0], [0], [1], [0, 0, 1, 1], [], []>} : vector<256x128xbf16>, vector<128x128xbf16>, vector<256x128xf32> -> vector<256x128xf32>
    %c0_25 = arith.constant 0 : index
    %c0_26 = arith.constant 0 : index
    %58 = vector.load %arg11[%c0_25, %c0_26] : memref<1x128xf32, #tpu.memory_space<vmem>>, vector<1x128xf32>
    %59 = vector.broadcast %58 : vector<1x128xf32> to vector<256x128xf32>
    %60 = arith.addf %57, %59 : vector<256x128xf32>
    %cst_27 = arith.constant 0.000000e+00 : f32
    %61 = vector.broadcast %cst_27 : f32 to vector<256x128xf32>
    %62 = arith.maximumf %60, %61 : vector<256x128xf32>
    %63 = arith.truncf %62 : vector<256x128xf32> to vector<256x128xbf16>
    %c0_28 = arith.constant 0 : index
    %c0_29 = arith.constant 0 : index
    %64 = vector.load %arg12[%c0_28, %c0_29] : memref<128x128xbf16, #tpu.memory_space<vmem>>, vector<128x128xbf16>
    %cst_30 = arith.constant dense<0.000000e+00> : vector<256x128xf32>
    %65 = tpu.matmul %63, %64, %cst_30 {dimension_numbers = #tpu.dot_dimension_numbers<[1], [0], [0], [1], [0, 0, 1, 1], [], []>} : vector<256x128xbf16>, vector<128x128xbf16>, vector<256x128xf32> -> vector<256x128xf32>
    %66 = arith.addf %65, %32 : vector<256x128xf32>
    %c0_31 = arith.constant 0 : index
    %c0_32 = arith.constant 0 : index
    %67 = vector.load %arg13[%c0_31, %c0_32] : memref<1x128xf32, #tpu.memory_space<vmem>>, vector<1x128xf32>
    %68 = vector.broadcast %67 : vector<1x128xf32> to vector<256x128xf32>
    %69 = arith.addf %66, %68 : vector<256x128xf32>
    %cst_33 = arith.constant 0.000000e+00 : f32
    %70 = vector.broadcast %cst_33 : f32 to vector<256x128xf32>
    %71 = arith.maximumf %69, %70 : vector<256x128xf32>
    %72 = arith.truncf %71 : vector<256x128xf32> to vector<256x128xbf16>
    %c0_34 = arith.constant 0 : index
    %c0_35 = arith.constant 0 : index
    %73 = vector.load %arg14[%c0_34, %c0_35] : memref<128x128xbf16, #tpu.memory_space<vmem>>, vector<128x128xbf16>
    %cst_36 = arith.constant dense<0.000000e+00> : vector<256x128xf32>
    %74 = tpu.matmul %72, %73, %cst_36 {dimension_numbers = #tpu.dot_dimension_numbers<[1], [0], [0], [1], [0, 0, 1, 1], [], []>} : vector<256x128xbf16>, vector<128x128xbf16>, vector<256x128xf32> -> vector<256x128xf32>
    %c0_37 = arith.constant 0 : index
    %c0_38 = arith.constant 0 : index
    %75 = vector.load %arg15[%c0_37, %c0_38] : memref<1x128xf32, #tpu.memory_space<vmem>>, vector<1x128xf32>
    %76 = vector.broadcast %75 : vector<1x128xf32> to vector<256x128xf32>
    %77 = arith.addf %74, %76 : vector<256x128xf32>
    %cst_39 = arith.constant 0.000000e+00 : f32
    %78 = vector.broadcast %cst_39 : f32 to vector<256x128xf32>
    %79 = arith.maximumf %77, %78 : vector<256x128xf32>
    %80 = arith.truncf %79 : vector<256x128xf32> to vector<256x128xbf16>
    %c0_40 = arith.constant 0 : index
    %c0_41 = arith.constant 0 : index
    %81 = vector.load %arg16[%c0_40, %c0_41] : memref<128x128xbf16, #tpu.memory_space<vmem>>, vector<128x128xbf16>
    %cst_42 = arith.constant dense<0.000000e+00> : vector<256x128xf32>
    %82 = tpu.matmul %80, %81, %cst_42 {dimension_numbers = #tpu.dot_dimension_numbers<[1], [0], [0], [1], [0, 0, 1, 1], [], []>} : vector<256x128xbf16>, vector<128x128xbf16>, vector<256x128xf32> -> vector<256x128xf32>
    %83 = vector.extract_strided_slice %82 {offsets = [0, 0], sizes = [256, 3], strides = [1, 1]} : vector<256x128xf32> to vector<256x3xf32>
    %c0_43 = arith.constant 0 : index
    %c0_44 = arith.constant 0 : index
    %84 = vector.load %arg17[%c0_43, %c0_44] : memref<1x3xf32, #tpu.memory_space<vmem>>, vector<1x3xf32>
    %85 = vector.broadcast %84 : vector<1x3xf32> to vector<256x3xf32>
    %86 = arith.addf %83, %85 : vector<256x3xf32>
    %c0_45 = arith.constant 0 : index
    %c0_46 = arith.constant 0 : index
    %87 = vector.load %arg18[%c0_45, %c0_46] : memref<256x3xf32, #tpu.memory_space<vmem>>, vector<256x3xf32>
    tpu.vector_store %arg18[%c0_45, %c0_46], %86 {strides = array<i32>} : memref<256x3xf32, #tpu.memory_space<vmem>>, vector<256x3xf32>,
    return
  }
  func.func @transform_0(%arg0: i32) -> (i32, i32) {
    %c0_i32 = arith.constant 0 : i32
    %c0_i32_0 = arith.constant 0 : i32
    return %arg0, %c0_i32 : i32, i32
  }
  func.func @transform_1(%arg0: i32) -> (i32, i32) {
    %c0_i32 = arith.constant 0 : i32
    %c0_i32_0 = arith.constant 0 : i32
    %c0_i32_1 = arith.constant 0 : i32
    return %c0_i32, %c0_i32_0 : i32, i32
  }
  func.func @transform_2(%arg0: i32) -> (i32, i32) {
    %c0_i32 = arith.constant 0 : i32
    %c0_i32_0 = arith.constant 0 : i32
    %c0_i32_1 = arith.constant 0 : i32
    return %c0_i32, %c0_i32_0 : i32, i32
  }
  func.func @transform_3(%arg0: i32) -> (i32, i32) {
    %c0_i32 = arith.constant 0 : i32
    %c0_i32_0 = arith.constant 0 : i32
    %c0_i32_1 = arith.constant 0 : i32
    return %c0_i32, %c0_i32_0 : i32, i32
  }
  func.func @transform_4(%arg0: i32) -> (i32, i32) {
    %c0_i32 = arith.constant 0 : i32
    %c0_i32_0 = arith.constant 0 : i32
    %c0_i32_1 = arith.constant 0 : i32
    return %c0_i32, %c0_i32_0 : i32, i32
  }
  func.func @transform_5(%arg0: i32) -> (i32, i32) {
    %c0_i32 = arith.constant 0 : i32
    %c0_i32_0 = arith.constant 0 : i32
    %c0_i32_1 = arith.constant 0 : i32
    return %c0_i32, %c0_i32_0 : i32, i32
  }
  func.func @transform_6(%arg0: i32) -> (i32, i32) {
    %c0_i32 = arith.constant 0 : i32
    %c0_i32_0 = arith.constant 0 : i32
    %c0_i32_1 = arith.constant 0 : i32
    return %c0_i32, %c0_i32_0 : i32, i32
  }
  func.func @transform_7(%arg0: i32) -> (i32, i32) {
    %c0_i32 = arith.constant 0 : i32
    %c0_i32_0 = arith.constant 0 : i32
    %c0_i32_1 = arith.constant 0 : i32
    return %c0_i32, %c0_i32_0 : i32, i32
  }
  func.func @transform_8(%arg0: i32) -> (i32, i32) {
    %c0_i32 = arith.constant 0 : i32
    %c0_i32_0 = arith.constant 0 : i32
    %c0_i32_1 = arith.constant 0 : i32
    return %c0_i32, %c0_i32_0 : i32, i32
  }
  func.func @transform_9(%arg0: i32) -> (i32, i32) {
    %c0_i32 = arith.constant 0 : i32
    %c0_i32_0 = arith.constant 0 : i32
    %c0_i32_1 = arith.constant 0 : i32
    return %c0_i32, %c0_i32_0 : i32, i32
  }
  func.func @transform_10(%arg0: i32) -> (i32, i32) {
    %c0_i32 = arith.constant 0 : i32
    %c0_i32_0 = arith.constant 0 : i32
    %c0_i32_1 = arith.constant 0 : i32
    return %c0_i32, %c0_i32_0 : i32, i32
  }
  func.func @transform_11(%arg0: i32) -> (i32, i32) {
    %c0_i32 = arith.constant 0 : i32
    %c0_i32_0 = arith.constant 0 : i32
    %c0_i32_1 = arith.constant 0 : i32
    return %c0_i32, %c0_i32_0 : i32, i32
  }
  func.func @transform_12(%arg0: i32) -> (i32, i32) {
    %c0_i32 = arith.constant 0 : i32
    %c0_i32_0 = arith.constant 0 : i32
    %c0_i32_1 = arith.constant 0 : i32
    return %c0_i32, %c0_i32_0 : i32, i32
  }
  func.func @transform_13(%arg0: i32) -> (i32, i32) {
    %c0_i32 = arith.constant 0 : i32
    %c0_i32_0 = arith.constant 0 : i32
    %c0_i32_1 = arith.constant 0 : i32
    return %c0_i32, %c0_i32_0 : i32, i32
  }
  func.func @transform_14(%arg0: i32) -> (i32, i32) {
    %c0_i32 = arith.constant 0 : i32
    %c0_i32_0 = arith.constant 0 : i32
    %c0_i32_1 = arith.constant 0 : i32
    return %c0_i32, %c0_i32_0 : i32, i32
  }
  func.func @transform_15(%arg0: i32) -> (i32, i32) {
    %c0_i32 = arith.constant 0 : i32
    %c0_i32_0 = arith.constant 0 : i32
    %c0_i32_1 = arith.constant 0 : i32
    return %c0_i32, %c0_i32_0 : i32, i32
  }
  func.func @transform_16(%arg0: i32) -> (i32, i32) {
    %c0_i32 = arith.constant 0 : i32
    %c0_i32_0 = arith.constant 0 : i32
    %c0_i32_1 = arith.constant 0 : i32
    return %c0_i32, %c0_i32_0 : i32, i32
  }
  func.func @transform_17(%arg0: i32) -> (i32, i32) {
    %c0_i32 = arith.constant 0 : i32
    %c0_i32_0 = arith.constant 0 : i32
    return %arg0, %c0_i32 : i32, i32
  }
}

</mosaic_0001>

<bundles_post_ra>
// kernel: tpu_custom_call.1
= control target key start
LH: loop header
LB: loop body
LE: loop exit
PB: predicated region body
PF: predicated region fallthrough
CT: control target
= control target key end

     0   :  { %s7909_s24 = smov 0   ;;  %s13053_s0 = inlined_call_operand.vmem [shape: f32[512,3], index: 0, kind: input, shape index: {}]   ;;  %s13054_s1 = inlined_call_operand.vmem [shape: f32[3,128], index: 1, kind: input, shape index: {}]   ;;  %s13055_s2 = inlined_call_operand.vmem [shape: f32[1,128], index: 2, kind: input, shape index: {}]   ;;  %s13056_s3 = inlined_call_operand.vmem [shape: bf16[128,256], index: 3, kind: input, shape index: {}]   ;;  %s13057_s4 = inlined_call_operand.vmem [shape: f32[1,128], index: 4, kind: input, shape index: {}]   ;;  %s13058_s5 = inlined_call_operand.vmem [shape: bf16[128,128], index: 5, kind: input, shape index: {}]   ;;  %s13059_s6 = inlined_call_operand.vmem [shape: f32[1,128], index: 6, kind: input, shape index: {}]   ;;  %s13060_s7 = inlined_call_operand.vmem [shape: bf16[128,128], index: 7, kind: input, shape index: {}]   ;;  %s13061_s8 = inlined_call_operand.vmem [shape: f32[1,128], index: 8, kind: input, shape index: {}]   ;;  %s13062_s9 = inlined_call_operand.vmem [shape: bf16[128,128], index: 9, kind: input, shape index: {}]   ;;  %s13063_s10 = inlined_call_operand.vmem [shape: f32[1,128], index: 10, kind: input, shape index: {}]   ;;  %s13064_s11 = inlined_call_operand.vmem [shape: bf16[128,128], index: 11, kind: input, shape index: {}]   ;;  %s13065_s12 = inlined_call_operand.vmem [shape: f32[1,128], index: 12, kind: input, shape index: {}]   ;;  %s13066_s13 = inlined_call_operand.vmem [shape: bf16[128,128], index: 13, kind: input, shape index: {}]   ;;  %s13067_s14 = inlined_call_operand.vmem [shape: f32[1,128], index: 14, kind: input, shape index: {}]   ;;  %s13068_s15 = inlined_call_operand.vmem [shape: bf16[128,128], index: 15, kind: input, shape index: {}]   ;;  %s13069_s16 = inlined_call_operand.vmem [shape: f32[1,3], index: 16, kind: input, shape index: {}]   ;;  %s13070_s17 = inlined_call_operand.vmem [shape: f32[512,3], index: 17, kind: output, shape index: {}]  }
   0x1   :  { %13307 = sst [smem:[#allocation50_spill]] %s13053_s0 }
   0x2   :  { %13308 = sst [smem:[#allocation51_spill]] %s13054_s1 }
   0x3 LB: > { %s6755_s25 = sadd.s32 4294967295, %s7808_s24   ;;  %p6759_p0 = scmp.ge.s32.totalorder %s7808_s24, 1  ;;  %s7808_s24 = sphi %s7909_s24, %s27_s24  }
   0x4   : > { %p488_p1 = scmp.lt.s32.totalorder %s7808_s24, 3 }
   0x6   : > { %p489_p2 = pnand %p6759_p0, %p488_p1 }
   0x8   : > { %492 = sbr.rel (%p489_p2) target bundleno = 2625 (0xa41), region = 88 }
   0xf   : > { %s6760_s26 = sshll.u32 %s6755_s25, 5  ;;  %v13077_v0 = vmov 2   ;;  %v13081_v1 = vmov 1   ;;  %v13087_v2 = vmov 0   ;;  %s13309_s0 = sld [smem:[#allocation50_spill]]  ;;  %v747_v46 = vlaneseq }
  0x10   : > { %7544 = vset.pattern.permute.xlu0 %v13077_v0  ;;  %7543 = vset.pattern.permute.xlu1 %v13081_v1  ;;  %p541_p3 = scmp.lt.s32.totalorder %s6760_s26, 63  ;;  %v7597_v22 = vld [vmem:[%s13056_s3 + $0x4] ss:$8 sps:$4 sm:$0xff]   ;;  %v7599_v23 = vld [vmem:[%s13056_s3] ss:$8 sps:$4 sm:$0xff]   ;;  %s13310_s19 = sld [smem:[#allocation51_spill]] }
  0x11   : > { %4722 = vmatprep.mubr.bf16.mxu0 %v13087_v2  ;;  %4690 = vmatprep.subr.bf16.mxu0 %v7597_v22  ;;  %v7600_v24 = vld [vmem:[%s13056_s3 + $0x14] ss:$8 sps:$4 sm:$0xff]   ;;  %v7602_v26 = vld [vmem:[%s13056_s3 + $0x10] ss:$8 sps:$4 sm:$0xff]   ;;  %v7603_v27 = vld [vmem:[%s13056_s3 + $0x24] ss:$8 sps:$4 sm:$0xff]  }
  0x12   : > { %s13745_s26 = smov (!%p541_p3, %s6760_s26), 63  ;;  %4691 = vmatpush1.bf16.msra.mxu0 %v7599_v23  ;;  %v7605_v29 = vld [vmem:[%s13056_s3 + $0x20] ss:$8 sps:$4 sm:$0xff]   ;;  %v7606_v30 = vld [vmem:[%s13056_s3 + $0x34] ss:$8 sps:$4 sm:$0xff]   ;;  %v748_v49 = vshrl.u32 %v747_v46, 7 }
  0x13   : > { %s6761_s27 = sshll.u32 %s13745_s26, 3  ;;  %4692 = vmatprep.subr.bf16.mxu0 %v7600_v24  ;;  %v7608_v32 = vld [vmem:[%s13056_s3 + $0x30] ss:$8 sps:$4 sm:$0xff]   ;;  %v7609_v33 = vld [vmem:[%s13056_s3 + $0x44] ss:$8 sps:$4 sm:$0xff]  }
  0x14   : > { %v7611_v35 = vld [vmem:[%s13056_s3 + $0x40] ss:$8 sps:$4 sm:$0xff]   ;;  %v7612_v36 = vld [vmem:[%s13056_s3 + $0x54] ss:$8 sps:$4 sm:$0xff]   ;;  %v7614_v38 = vld [vmem:[%s13056_s3 + $0x50] ss:$8 sps:$4 sm:$0xff]  }
  0x15   : > { %s7928_s30 = scalar_lea.vmem %s13309_s0, %s6761_s27  ;;  %v7615_v40 = vld [vmem:[%s13056_s3 + $0x64] ss:$8 sps:$4 sm:$0xff]   ;;  %v7617_v41 = vld [vmem:[%s13056_s3 + $0x60] ss:$8 sps:$4 sm:$0xff]   ;;  %v7618_v42 = vld [vmem:[%s13056_s3 + $0x74] ss:$8 sps:$4 sm:$0xff]  }
  0x16   : > { %v553_v3 = vld [vmem:[%s7928_s30] sm:$0xff]  ;;  %v555_v4 = vld [vmem:[%s7928_s30 + $0x10] sm:$0xff]  ;;  %v554_v5 = vld [vmem:[%s7928_s30 + $0x8] sm:$0xff]  ;;  %4693 = vmatpush1.bf16.msra.mxu0 %v7602_v26  ;;  %v749_v52 = vsub.s32 0, %v748_v49  ;;  %v951_v53 = vsub.s32 1, %v748_v49  ;;  %v1147_v57 = vsub.s32 2, %v748_v49 }
  0x17   : > { %1018 = vperm.xlu0 %7544, %v553_v3   ;;  %822 = vperm.xlu1 %7543, %v553_v3   ;;  %v557_v6 = vld [vmem:[%s7928_s30 + $0x20] sm:$0xff]  ;;  %v556_v7 = vld [vmem:[%s7928_s30 + $0x18] sm:$0xff]  ;;  %v558_v8 = vld [vmem:[%s7928_s30 + $0x28] sm:$0xff] }
  0x18   : > { %v560_v9 = vld [vmem:[%s7928_s30 + $0x38] sm:$0xff]  ;;  %v562_v10 = vld [vmem:[%s7928_s30 + $0x48] sm:$0xff]  ;;  %v559_v14 = vld [vmem:[%s7928_s30 + $0x30] sm:$0xff]  ;;  %4694 = vmatprep.subr.bf16.mxu0 %v7603_v27 }
  0x19   : > { %v7945_v11 = vld [vmem:[%s7928_s30 + $0x58] sm:$0xff]  ;;  %v7950_v12 = vld [vmem:[%s7928_s30 + $0x68] sm:$0xff]  ;;  %v561_v15 = vld [vmem:[%s7928_s30 + $0x40] sm:$0xff] }
  0x1a   : > { %v7954_v13 = vld [vmem:[%s7928_s30 + $0x78] sm:$0xff]  ;;  %v563_v16 = vld [vmem:[%s7928_s30 + $0x50] sm:$0xff]  ;;  %v7965_v17 = vld [vmem:[%s7928_s30 + $0x60] sm:$0xff]  ;;  %4695 = vmatpush1.bf16.msra.mxu0 %v7605_v29 }
  0x1b   : > { %1026 = vperm.xlu0 %7544, %v555_v4   ;;  %826 = vperm.xlu1 %7543, %v554_v5   ;;  %v7970_v18 = vld [vmem:[%s7928_s30 + $0x70] sm:$0xff]  ;;  %v7974_v19 = vld [vmem:[%s7928_s30 + $0x80] sm:$0xff]  ;;  %v7997_v25 = vld [vmem:[%s7928_s30 + $0x88] sm:$0xff] }
  0x1c   : > { %v7979_v20 = vld [vmem:[%s7928_s30 + $0x90] sm:$0xff]  ;;  %v7984_v21 = vld [vmem:[%s7928_s30 + $0xa0] sm:$0xff]  ;;  %v8009_v28 = vld [vmem:[%s7928_s30 + $0x98] sm:$0xff]  ;;  %4696 = vmatprep.subr.bf16.mxu0 %v7606_v30 }
  0x1d   : > { %v8019_v31 = vld [vmem:[%s7928_s30 + $0xa8] sm:$0xff]  ;;  %v8030_v34 = vld [vmem:[%s7928_s30 + $0xb8] sm:$0xff]  ;;  %v8067_v44 = vld [vmem:[%s7928_s30 + $0xb0] sm:$0xff] }
  0x1e   : > { %4697 = vmatpush1.bf16.msra.mxu0 %v7608_v32  ;;  %v8041_v37 = vld [vmem:[%s7928_s30 + $0xc8] sm:$0xff]  ;;  %v8049_v39 = vld [vmem:[%s7928_s30 + $0xd8] sm:$0xff]  ;;  %v8074_v45 = vld [vmem:[%s7928_s30 + $0xc0] sm:$0xff] }
  0x1f   : > { %1034 = vperm.xlu0 %7544, %v557_v6   ;;  %7545 = vset.pattern.permute.xlu1 %v13077_v0  ;;  %v7620_v43 = vld [vmem:[%s13056_s3 + $0x70] ss:$8 sps:$4 sm:$0xff]   ;;  %v585_v55 = vld [vmem:[%s13310_s19] sm:$0x7] }
  0x20   : > { %1022 = vperm.xlu1 %7545, %v554_v5   ;;  %4698 = vmatprep.subr.bf16.mxu0 %v7609_v33  ;;  %v8095_v58 = vrot.slane %v585_v55, %v749_v52  ;;  %v8097_v59 = vrot.slane %v585_v55, %v951_v53  ;;  %v8102_v60 = vld [vmem:[%s13055_s2] ss:$0 sm:$0xff]  ;;  %v8104_v62 = vrot.slane %v585_v55, %v1147_v57  ;;  %v8128_v22 = vld [vmem:[%s7928_s30 + $0xd0] sm:$0xff]  ;;  %v13079_v52 = vmov 2131351028  }
  0x21   : > { %v13095_v55 = vmov 2102212464  }
  0x22   : > { %4699 = vmatpush1.bf16.msra.mxu0 %v7611_v35  ;;  %13311 = vst [vmem:[#allocation2_spill] sm:$0xff] %v8104_v62 }
  0x23   : > { %7551 = vset.pattern.permute.xlu0 %v13087_v2  ;;  %4700 = vmatprep.subr.bf16.mxu0 %v7612_v36 }
  0x24   : > { %589 = vperm.xlu0 %7551, %v553_v3   ;;  %7546 = vset.pattern.permute.xlu1 %v13087_v2 }
  0x25   : > { %599 = vperm.xlu1 %7546, %v555_v4  }
  0x26   : > { %4701 = vmatpush1.bf16.msra.mxu0 %v7614_v38 }
  0x27   : > { %4702 = vmatprep.subr.bf16.mxu0 %v7615_v40 }
  0x28   : > { %594 = vperm.xlu0 %7551, %v554_v5  }
  0x29   : > { %7547 = vset.pattern.permute.xlu1 %v13081_v1 }
  0x2a   : > { %830 = vperm.xlu1 %7547, %v555_v4   ;;  %4703 = vmatpush1.bf16.msra.mxu0 %v7617_v41 }
  0x2b   : > { %4704 = vmatprep.subr.bf16.mxu0 %v7618_v42 }
  0x2c   : > { %604 = vperm.xlu0 %7551, %v556_v7  }
  0x2e   : > { %834 = vperm.xlu1 %7547, %v556_v7   ;;  %4705 = vmatpush1.bf16.msra.mxu0 %v7620_v43 }
  0x30   : > { %614 = vperm.xlu0 %7551, %v558_v8  }
  0x32   : > { %7548 = vset.pattern.permute.xlu1 %v13077_v0 }
  0x33   : > { %1030 = vperm.xlu1 %7548, %v556_v7  }
  0x34   : > { %624 = vperm.xlu0 %7551, %v560_v9  }
  0x37   : > { %7549 = vset.pattern.permute.xlu1 %v13087_v2 }
  0x38   : > { %609 = vperm.xlu1 %7549, %v557_v6   ;;  %634 = vperm.xlu0 %7551, %v562_v10  }
  0x3c   : > { %7550 = vset.pattern.permute.xlu1 %v13081_v1  ;;  %644 = vperm.xlu0 %7551, %v7945_v11  }
  0x3d   : > { %838 = vperm.xlu1 %7550, %v557_v6  }
  0x40   : > { %654 = vperm.xlu0 %7551, %v7950_v12  }
  0x41   : > { %842 = vperm.xlu1 %7550, %v558_v8  }
  0x44   : > { %664 = vperm.xlu0 %7551, %v7954_v13  }
  0x45   : > { %7552 = vset.pattern.permute.xlu1 %v13077_v0 }
  0x46   : > { %1038 = vperm.xlu1 %7552, %v558_v8  }
  0x48   : > { %7566 = vset.pattern.permute.xlu0 %v13077_v0 }
  0x49   : > { %1042 = vperm.xlu0 %7566, %v559_v14  }
  0x4a   : > { %7553 = vset.pattern.permute.xlu1 %v13087_v2 }
  0x4b   : > { %619 = vperm.xlu1 %7553, %v559_v14  }
  0x4d   : > { %1050 = vperm.xlu0 %7566, %v561_v15  }
  0x4f   : > { %7554 = vset.pattern.permute.xlu1 %v13081_v1 }
  0x50   : > { %846 = vperm.xlu1 %7554, %v559_v14  }
  0x51   : > { %1058 = vperm.xlu0 %7566, %v563_v16  }
  0x54   : > { %850 = vperm.xlu1 %7554, %v560_v9  }
  0x55   : > { %1066 = vperm.xlu0 %7566, %v7965_v17  }
  0x58   : > { %7555 = vset.pattern.permute.xlu1 %v13077_v0 }
  0x59   : > { %1046 = vperm.xlu1 %7555, %v560_v9   ;;  %1074 = vperm.xlu0 %7566, %v7970_v18  }
  0x5d   : > { %7556 = vset.pattern.permute.xlu1 %v13087_v2  ;;  %1082 = vperm.xlu0 %7566, %v7974_v19  }
  0x5e   : > { %629 = vperm.xlu1 %7556, %v561_v15  }
  0x61   : > { %1090 = vperm.xlu0 %7566, %v7979_v20  }
  0x62   : > { %7557 = vset.pattern.permute.xlu1 %v13081_v1 }
  0x63   : > { %854 = vperm.xlu1 %7557, %v561_v15  }
  0x65   : > { %1098 = vperm.xlu0 %7566, %v7984_v21  }
  0x67   : > { %858 = vperm.xlu1 %7557, %v562_v10  }
  0x69   : > { %7577 = vset.pattern.permute.xlu0 %v13087_v2 }
  0x6a   : > { %674 = vperm.xlu0 %7577, %v7997_v25  }
  0x6b   : > { %7558 = vset.pattern.permute.xlu1 %v13077_v0 }
  0x6c   : > { %1054 = vperm.xlu1 %7558, %v562_v10  }
  0x6e   : > { %684 = vperm.xlu0 %7577, %v8009_v28  }
  0x70   : > { %7559 = vset.pattern.permute.xlu1 %v13087_v2 }
  0x71   : > { %639 = vperm.xlu1 %7559, %v563_v16  }
  0x72   : > { %694 = vperm.xlu0 %7577, %v8019_v31  }
  0x75   : > { %7560 = vset.pattern.permute.xlu1 %v13081_v1 }
  0x76   : > { %862 = vperm.xlu1 %7560, %v563_v16   ;;  %704 = vperm.xlu0 %7577, %v8030_v34  }
  0x7a   : > { %866 = vperm.xlu1 %7560, %v7945_v11   ;;  %714 = vperm.xlu0 %7577, %v8041_v37  }
  0x7e   : > { %7561 = vset.pattern.permute.xlu1 %v13077_v0  ;;  %724 = vperm.xlu0 %7577, %v8049_v39  }
  0x7f   : > { %1062 = vperm.xlu1 %7561, %v7945_v11  }
  0x82   : > { %7586 = vset.pattern.permute.xlu0 %v13077_v0 }
  0x83   : > { %7562 = vset.pattern.permute.xlu1 %v13087_v2  ;;  %1106 = vperm.xlu0 %7586, %v8067_v44  }
  0x84   : > { %649 = vperm.xlu1 %7562, %v7965_v17  }
  0x87   : > { %1114 = vperm.xlu0 %7586, %v8074_v45  }
  0x88   : > { %7563 = vset.pattern.permute.xlu1 %v13081_v1 }
  0x89   : > { %870 = vperm.xlu1 %7563, %v7965_v17  }
  0x8b   : > { %1122 = vperm.xlu0 %7586, %v8128_v22  }
  0x8d   : > { %874 = vperm.xlu1 %7563, %v7950_v12  }
  0x91   : > { %7564 = vset.pattern.permute.xlu1 %v13077_v0 }
  0x92   : > { %1070 = vperm.xlu1 %7564, %v7950_v12  }
  0x96   : > { %7565 = vset.pattern.permute.xlu1 %v13087_v2  ;;  %v823_v47 = vpop.permute.xlu1 %822  ;;  %v1019_v48 = vpop.permute.xlu0 %1018 }
  0x97   : > { %659 = vperm.xlu1 %7565, %v7970_v18   ;;  %v953_v4 = vmul.f32 %v8097_v59, %v823_v47  ;;  %v1149_v5 = vmul.f32 %v8104_v62, %v1019_v48 }
  0x9a   : > { %v827_v50 = vpop.permute.xlu1 %826  ;;  %v8085_v51 = vpop.permute.xlu0 %1026 }
  0x9b   : > { %7567 = vset.pattern.permute.xlu1 %v13081_v1  ;;  %v954_v23 = vmul.f32 %v8097_v59, %v827_v50  ;;  %v1151_v57 = vmul.f32 %v8104_v62, %v8085_v51 }
  0x9c   : > { %878 = vperm.xlu1 %7567, %v7970_v18  }
  0x9e   : > { %v8089_v54 = vpop.permute.xlu0 %1034 }
  0x9f   : > { %v1023_v56 = vpop.permute.xlu1 %1022 }
  0xa0   : > { %882 = vperm.xlu1 %7567, %v7954_v13  }
  0xa3   : > { %v590_v61 = vpop.permute.xlu0 %589 }
  0xa4   : > { %v751_v63 = vmul.f32 %v8095_v58, %v590_v61  ;;  %7568 = vset.pattern.permute.xlu1 %v13077_v0  ;;  %v600_v3 = vpop.permute.xlu1 %599  ;;  %v13083_v61 = vmov 683565275  }
  0xa5   : > { %1078 = vperm.xlu1 %7568, %v7954_v13   ;;  %v753_v40 = vmul.f32 %v8095_v58, %v600_v3 }
  0xa6   : > { %v789_v6 = vadd.f32 %v8102_v60, %v751_v63 }
  0xa7   : > { %v595_v7 = vpop.permute.xlu0 %594  ;;  %v791_v50 = vadd.f32 %v8102_v60, %v753_v40 }
  0xa8   : > { %v985_v8 = vadd.f32 %v953_v4, %v789_v6  ;;  %v752_v12 = vmul.f32 %v8095_v58, %v595_v7 }
  0xa9   : > { %7569 = vset.pattern.permute.xlu1 %v13087_v2  ;;  %v831_v9 = vpop.permute.xlu1 %830 }
  0xaa   : > { %v8113_v10 = vadd.f32 %v1149_v5, %v985_v8  ;;  %669 = vperm.xlu1 %7569, %v7974_v19   ;;  %v790_v17 = vadd.f32 %v8102_v60, %v752_v12  ;;  %v955_v42 = vmul.f32 %v8097_v59, %v831_v9 }
  0xab   : > { %v8118_v13 = vpop.permute.xlu0 %604 }
  0xac   : > { %v1219_v11 = vand.u32 2139095040, %v8113_v10  ;;  %v986_v27 = vadd.f32 %v954_v23, %v790_v17  ;;  %v13076_v36 = vand.u32 2147483647, %v8113_v10  ;;  %v987_v5 = vadd.f32 %v955_v42, %v791_v50 }
  0xad   : > { %v8120_v14 = vpop.permute.xlu1 %834  ;;  %v13074_v17 = vmov 920167782   ;;  %v754_v42 = vmul.f32 %v8095_v58, %v8118_v13 }
  0xae   : > { %v1220_v15 = vshrl.u32 %v1219_v11, 23  ;;  %7570 = vset.pattern.permute.xlu1 %v13081_v1  ;;  %v1223_v48 = vand.u32 8388607, %v13076_v36 }
  0xaf   : > { %886 = vperm.xlu1 %7570, %v7974_v19   ;;  %v8125_v18 = vpop.permute.xlu0 %614  ;;  %v1150_v19 = vmul.f32 %v8104_v62, %v1023_v56 }
  0xb0   : > { %v6765_v16 = vadd.s32 4294967169, %v1220_v15  ;;  %v1224_v7 = vor.u32 8388608, %v1223_v48 }
  0xb1   : > { %v8141_v35 = vadd.f32 %v1150_v19, %v986_v27  ;;  %v13072_v27 = vmov 1326507024  }
  0xb2   : > { %v1226_v24 = vadd.s32 1, %v6765_v16  ;;  %v8132_v26 = vpop.permute.xlu1 %1030  ;;  %v1264_v50 = vshll.u32 %v1224_v7, 8 }
  0xb3   : > { %890 = vperm.xlu1 %7570, %v7997_v25   ;;  %v8136_v32 = vpop.permute.xlu0 %624  ;;  %v1323_v41 = vand.u32 2139095040, %v8141_v35 }
  0xb4   : > { %vm1227_vm0 = vcmp.gt.s32.totalorder %v1226_v24, 0 }
  0xb5   : > { %v1228_v29 = vsel %vm1227_vm0, %v1226_v24, 0  ;;  %v1324_v4 = vshrl.u32 %v1323_v41, 23  ;;  %vm1218_vm0 = vcmp.lt.s32.totalorder %v8113_v10, 0 }
  0xb6   : > { %v1230_v30 = vand.u32 31, %v1228_v29  ;;  %v1229_v9 = vshrl.u32 %v1228_v29, 5 }
  0xb7   : > { %7571 = vset.pattern.permute.xlu1 %v13077_v0  ;;  %v8139_v33 = vpop.permute.xlu1 %609  ;;  %v8151_v47 = vpop.permute.xlu0 %634  ;;  %v6769_v29 = vadd.s32 4294967169, %v1324_v4 }
  0xb8   : > { %1086 = vperm.xlu1 %7571, %v7997_v25   ;;  %v1231_v38 = vsub.s32 32, %v1230_v30  ;;  %v13085_v25 = vmov 2475754826   ;;  %v1233_v63 = vshll.u32 %v13083_v61, %v1230_v30  ;;  %v1239_v8 = vshll.u32 %v13079_v52, %v1230_v30 }
  0xb9   : > { %v1236_v3 = vshll.u32 %v13085_v25, %v1230_v30  ;;  %v1242_v15 = vshll.u32 %v13095_v55, %v1230_v30  ;;  %v1245_v24 = vshll.u32 %v13074_v17, %v1230_v30  ;;  %vm1248_vm1 = vcmp.lt.s32.totalorder %v1229_v9, 1 }
  0xba   : > { %v1234_v49 = vshrl.u32 %v13085_v25, %v1231_v38  ;;  %v1237_v53 = vshrl.u32 %v13079_v52, %v1231_v38  ;;  %v1240_v56 = vshrl.u32 %v13095_v55, %v1231_v38  ;;  %v1243_v23 = vshrl.u32 %v13074_v17, %v1231_v38 }
  0xbb   : > { %v8170_v51 = vpop.permute.xlu0 %644  ;;  %v1246_v19 = vshrl.u32 %v13072_v27, %v1231_v38  ;;  %vm1251_vm2 = vcmp.lt.s32.totalorder %v1229_v9, 4  ;;  %vm1250_vm3 = vcmp.lt.s32.totalorder %v1229_v9, 3  ;;  %vm1249_vm4 = vcmp.lt.s32.totalorder %v1229_v9, 2 }
  0xbc   : > { %7572 = vset.pattern.permute.xlu1 %v13087_v2  ;;  %v8149_v43 = vpop.permute.xlu1 %838  ;;  %v1235_v11 = vor.u32 %v1234_v49, %v1233_v63  ;;  %v1238_v12 = vor.u32 %v1237_v53, %v1236_v3  ;;  %v1241_v16 = vor.u32 %v1240_v56, %v1239_v8  ;;  %v1244_v40 = vor.u32 %v1243_v23, %v1242_v15 }
  0xbd   : > { %679 = vperm.xlu1 %7572, %v7979_v20   ;;  %v1247_v41 = vor.u32 %v1246_v19, %v1245_v24  ;;  %v1232_v53 = vshrl.u32 %v13083_v61, %v1231_v38  ;;  %v1330_v3 = vadd.s32 1, %v6769_v29  ;;  %v957_v9 = vmul.f32 %v8097_v59, %v8149_v43 }
  0xbe   : > { %v1253_v49 = vsel %vm1251_vm2, %v1241_v16, 2102212464  ;;  %v1256_v30 = vsel %vm1248_vm1, %v1235_v11, %v1238_v12  ;;  %v1257_v56 = vsel %vm1251_vm2, %v1244_v40, 920167782  ;;  %v1260_v63 = vsel %vm1248_vm1, %v1238_v12, %v1241_v16 }
  0xbf   : > { %v8185_v13 = vpop.permute.xlu0 %654  ;;  %v1258_v4 = vsel %vm1250_vm3, %v1241_v16, %v1257_v56  ;;  %v1261_v8 = vsel %vm1251_vm2, %v1247_v41, 1326507024  ;;  %vm1331_vm5 = vcmp.gt.s32.totalorder %v1330_v3, 0  ;;  %v1153_v43 = vmul.f32 %v8104_v62, %v8089_v54 }
  0xc0   : > { %v8164_v6 = vpop.permute.xlu1 %842  ;;  %v1259_v15 = vsel %vm1249_vm4, %v1256_v30, %v1258_v4  ;;  %v1262_v23 = vsel %vm1250_vm3, %v1244_v40, %v1261_v8  ;;  %v755_v30 = vmul.f32 %v8095_v58, %v8139_v33  ;;  %v1332_v56 = vsel %vm1331_vm5, %v1330_v3, 0 }
  0xc1   : > { %7573 = vset.pattern.permute.xlu1 %v13081_v1  ;;  %v1263_v38 = vsel %vm1249_vm4, %v1260_v63, %v1262_v23  ;;  %v8191_v24 = vmul.u32.u64.low %v1264_v50, %v1259_v15  ;;  %v8192_v19 = vmul.u32.u64.high %v1264_v50, %v1259_v15, %v8191_v24  ;;  %v13071_v3 = vand.u32 2147483647, %v8141_v35 }
  0xc2   : > { %894 = vperm.xlu1 %7573, %v7979_v20   ;;  %v8179_v20 = vadd.f32 %v1151_v57, %v987_v5  ;;  %v1252_v57 = vsel %vm1248_vm1, %v1232_v53, %v1235_v11  ;;  %v1254_v5 = vsel %vm1250_vm3, %v1238_v12, %v1253_v49  ;;  %v792_v11 = vadd.f32 %v8102_v60, %v754_v42 }
  0xc3   : > { %v8196_v29 = vmul.u32.u64.low %v1264_v50, %v1263_v38  ;;  %v8197_v16 = vmul.u32.u64.high %v1264_v50, %v1263_v38, %v8196_v29  ;;  %v956_v12 = vmul.f32 %v8097_v59, %v8120_v14  ;;  %v1255_v40 = vsel %vm1249_vm4, %v1252_v57, %v1254_v5 }
  0xc4   : > { %13312 = vst [vmem:[#allocation3_spill] sm:$0xff] %v8179_v20  ;;  %v1427_v41 = vand.u32 2139095040, %v8179_v20  ;;  %v1152_v49 = vmul.f32 %v8104_v62, %v8132_v26  ;;  %v1274_v53 = vadd.s32 1, %v8192_v19  ;;  %v1271_v63 = vmul.u32 %v1264_v50, %v1255_v40 }
  0xc5   : > { %v8177_v48 = vpop.permute.xlu1 %1038  ;;  %vm1273_vm6 = vc.u32 %v8197_v16, %v8191_v24  ;;  %v988_v14 = vadd.f32 %v956_v12, %v792_v11  ;;  %v1334_v57 = vand.u32 31, %v1332_v56  ;;  %v793_v50 = vadd.f32 %v8102_v60, %v755_v30 }
  0xc6   : > { %898 = vperm.xlu1 %7573, %v8009_v28   ;;  %v1275_v26 = vsel %vm1273_vm6, %v1274_v53, %v8192_v19  ;;  %v1428_v33 = vshrl.u32 %v1427_v41, 23  ;;  %v756_v19 = vmul.f32 %v8095_v58, %v8125_v18  ;;  %v8235_v41 = vand.u32 8388607, %v13071_v3 }
  0xc7   : > { %v1276_v8 = vadd.s32 %v1275_v26, %v1271_v63  ;;  %v8220_v5 = vadd.f32 %v1152_v49, %v988_v14  ;;  %v989_v29 = vadd.f32 %v957_v9, %v793_v50  ;;  %v8237_v49 = vsub.s32 32, %v1334_v57 }
  0xc8   : > { %v6773_v11 = vadd.s32 4294967169, %v1428_v33  ;;  %v758_v18 = vmul.f32 %v8095_v58, %v8136_v32  ;;  %v794_v14 = vadd.f32 %v8102_v60, %v756_v19  ;;  %v1328_v33 = vor.u32 8388608, %v8235_v41 }
  0xc9   : > { %v1277_v38 = vadd.s32 536870912, %v1276_v8  ;;  %v1531_v54 = vand.u32 2139095040, %v8220_v5  ;;  %v8244_v63 = vadd.f32 %v1153_v43, %v989_v29  ;;  %v958_v43 = vmul.f32 %v8097_v59, %v8164_v6 }
  0xca   : > { %7574 = vset.pattern.permute.xlu1 %v13077_v0  ;;  %v620_v7 = vpop.permute.xlu1 %619  ;;  %v796_v32 = vadd.f32 %v8102_v60, %v758_v18  ;;  %v1344_v41 = vshrl.u32 %v13095_v55, %v8237_v49  ;;  %v1338_v18 = vshrl.u32 %v13085_v25, %v8237_v49  ;;  %v1343_v3 = vshll.u32 %v13079_v52, %v1334_v57 }
  0xcb   : > { %1094 = vperm.xlu1 %7574, %v8009_v28   ;;  %v8208_v28 = vpop.permute.xlu0 %664  ;;  %v757_v4 = vmul.f32 %v8095_v58, %v620_v7  ;;  %v8231_v40 = vshrl.u32 %v1277_v38, 30  ;;  %13313 = vst [vmem:[#allocation4_spill] sm:$0xff] %v8244_v63  ;;  %v8255_v38 = vshrl.u32 %v1332_v56, 5  ;;  %v1635_v29 = vand.u32 2139095040, %v8244_v63 }
  0xcc   : > { %v1154_v56 = vmul.f32 %v8104_v62, %v8177_v48 }
  0xcd   : > { %v795_v12 = vadd.f32 %v8102_v60, %v757_v4  ;;  %v1532_v4 = vshrl.u32 %v1531_v54, 23  ;;  %vm1355_vm7 = vcmp.lt.s32.totalorder %v8255_v38, 4  ;;  %vm1352_vm10 = vcmp.lt.s32.totalorder %v8255_v38, 1 }
  0xce   : > { %vm1354_vm11 = vcmp.lt.s32.totalorder %v8255_v38, 3  ;;  %vm1353_vm12 = vcmp.lt.s32.totalorder %v8255_v38, 2 }
  0xcf   : > { %7575 = vset.pattern.permute.xlu1 %v13087_v2  ;;  %v847_v42 = vpop.permute.xlu1 %846  ;;  %v1043_v7 = vpop.permute.xlu0 %1042 }
  0xd0   : > { %689 = vperm.xlu1 %7575, %v7984_v21   ;;  %v959_v15 = vmul.f32 %v8097_v59, %v847_v42  ;;  %v1155_v53 = vmul.f32 %v8104_v62, %v1043_v7  ;;  %v1279_v42 = vshll.u32 %v8231_v40, 30 }
  0xd2   : > { %v991_v30 = vadd.f32 %v959_v15, %v795_v12  ;;  %v8248_v26 = vsub.s32 %v1276_v8, %v1279_v42  ;;  %v1350_v15 = vshrl.u32 %v13072_v27, %v8237_v49  ;;  %v1341_v12 = vshrl.u32 %v13079_v52, %v8237_v49 }
  0xd3   : > { %v851_v23 = vpop.permute.xlu1 %850  ;;  %v990_v27 = vadd.f32 %v958_v43, %v794_v14 }
  0xd4   : > { %7576 = vset.pattern.permute.xlu1 %v13081_v1  ;;  %v960_v50 = vmul.f32 %v8097_v59, %v851_v23  ;;  %v8259_v19 = vadd.f32 %v1155_v53, %v991_v30  ;;  %v1282_v8 = vsub.s32 0, %v8248_v26  ;;  %v1349_v23 = vshll.u32 %v13074_v17, %v1334_v57 }
  0xd5   : > { %902 = vperm.xlu1 %7576, %v7984_v21   ;;  %v1434_v21 = vadd.s32 1, %v6773_v11  ;;  %v1347_v11 = vshrl.u32 %v13074_v17, %v8237_v49  ;;  %v1346_v30 = vshll.u32 %v13095_v55, %v1334_v57 }
  0xd6   : > { %13314 = vst [vmem:[#allocation5_spill] sm:$0xff] %v8259_v19  ;;  %v6766_v6 = vmin.u32 %v1282_v8, %v8248_v26  ;;  %v992_v54 = vadd.f32 %v960_v50, %v796_v32  ;;  %v1351_v53 = vor.u32 %v1350_v15, %v1349_v23  ;;  %v1843_v48 = vand.u32 2139095040, %v8259_v19 }
  0xd7   : > { %v1340_v8 = vshll.u32 %v13085_v25, %v1334_v57  ;;  %v1337_v32 = vshll.u32 %v13083_v61, %v1334_v57  ;;  %vm1435_vm8 = vcmp.gt.s32.totalorder %v1434_v21, 0  ;;  %v6777_v15 = vadd.s32 4294967169, %v1532_v4 }
  0xd8   : > { %v1047_v9 = vpop.permute.xlu1 %1046  ;;  %v8286_v23 = vadd.f32 %v1154_v56, %v990_v27  ;;  %v1844_v14 = vshrl.u32 %v1843_v48, 23  ;;  %v1636_v4 = vshrl.u32 %v1635_v29, 23  ;;  %v1051_v29 = vpop.permute.xlu0 %1050 }
  0xd9   : > { %906 = vperm.xlu1 %7576, %v8019_v31   ;;  %v1156_v7 = vmul.f32 %v8104_v62, %v1047_v9  ;;  %v1284_v9 = vclz %v6766_v6  ;;  %v1342_v36 = vor.u32 %v1341_v12, %v1340_v8  ;;  %v1365_v6 = vsel %vm1355_vm7, %v1351_v53, 1326507024 }
  0xda   : > { %13316 = vst [vmem:[#allocation7_spill] sm:$0xff] %v8286_v23  ;;  %v1339_v57 = vor.u32 %v1338_v18, %v1337_v32  ;;  %v8303_v12 = vshll.u32 %v1328_v33, 8  ;;  %v8309_v53 = vadd.s32 1, %v6777_v15  ;;  %v6781_v32 = vadd.s32 4294967169, %v1636_v4 }
  0xdb   : > { %v8282_v17 = vadd.f32 %v1156_v7, %v992_v54  ;;  %v6767_v50 = vadd.s32 4294967294, %v1284_v9  ;;  %v1739_v54 = vand.u32 2139095040, %v8286_v23 }
  0xdc   : > { %v1360_v48 = vsel %vm1352_vm10, %v1339_v57, %v1342_v36  ;;  %vm1539_vm13 = vcmp.gt.s32.totalorder %v8309_v53, 0 }
  0xdd   : > { %7578 = vset.pattern.permute.xlu1 %v13077_v0  ;;  %v630_v42 = vpop.permute.xlu1 %629  ;;  %13315 = vst [vmem:[#allocation6_spill] sm:$0xff] %v8282_v17  ;;  %v1345_v0 = vor.u32 %v1344_v41, %v1343_v3  ;;  %vm6768_vm9 = vcmp.lt.s32.totalorder %v6767_v50, 0  ;;  %v1947_v3 = vand.u32 2139095040, %v8282_v17  ;;  %v1436_v41 = vsel %vm1435_vm8, %v1434_v21, 0 }
  0xde   : > { %1102 = vperm.xlu1 %7578, %v8019_v31   ;;  %v1348_v31 = vor.u32 %v1347_v11, %v1346_v30  ;;  %v8294_v43 = vsel %vm6768_vm9, 0, %v6767_v50  ;;  %v759_v18 = vmul.f32 %v8095_v58, %v630_v42  ;;  %v6789_v21 = vadd.s32 4294967169, %v1844_v14 }
  0xdf   : > { %v1364_v11 = vsel %vm1352_vm10, %v1342_v36, %v1345_v0  ;;  %v1292_v30 = vsub.s32 4294967266, %v8294_v43  ;;  %v1948_v9 = vshrl.u32 %v1947_v3, 23  ;;  %v1336_v50 = vshrl.u32 %v13083_v61, %v8237_v49 }
  0xe0   : > { %v1361_v27 = vsel %vm1355_vm7, %v1348_v31, 920167782  ;;  %v1366_v56 = vsel %vm1354_vm11, %v1348_v31, %v1365_v6  ;;  %v1357_v15 = vsel %vm1355_vm7, %v1345_v0, 2102212464  ;;  %v1740_v6 = vshrl.u32 %v1739_v54, 23 }
  0xe1   : > { %v1362_v33 = vsel %vm1354_vm11, %v1345_v0, %v1361_v27  ;;  %v1367_v42 = vsel %vm1353_vm12, %v1364_v11, %v1366_v56  ;;  %v1293_v31 = vadd.s32 127, %v1292_v30  ;;  %v797_v27 = vadd.f32 %v8102_v60, %v759_v18 }
  0xe2   : > { %7579 = vset.pattern.permute.xlu1 %v13087_v2  ;;  %v855_v7 = vpop.permute.xlu1 %854  ;;  %v1157_v14 = vmul.f32 %v8104_v62, %v1051_v29  ;;  %v1363_v3 = vsel %vm1353_vm12, %v1360_v48, %v1362_v33  ;;  %v1356_v4 = vsel %vm1352_vm10, %v1336_v50, %v1339_v57  ;;  %v1850_v49 = vadd.s32 1, %v6789_v21 }
  0xe3   : > { %699 = vperm.xlu1 %7579, %v8067_v44   ;;  %v961_v8 = vmul.f32 %v8097_v59, %v855_v7  ;;  %v8333_v7 = vmul.u32.u64.low %v8303_v12, %v1367_v42  ;;  %v8334_v11 = vmul.u32.u64.high %v8303_v12, %v1367_v42, %v8333_v7  ;;  %v6793_v56 = vadd.s32 4294967169, %v1948_v9 }
  0xe4   : > { %v1358_v18 = vsel %vm1354_vm11, %v1342_v36, %v1357_v15  ;;  %v1272_v30 = vadd.s32 %v8191_v24, %v8197_v16  ;;  %v1294_v29 = vshll.u32 %v1293_v31, 23  ;;  %v1642_v33 = vadd.s32 1, %v6781_v32 }
  0xe5   : > { %v993_v0 = vadd.f32 %v961_v8, %v797_v27  ;;  %v8342_v57 = vmul.u32.u64.low %v8303_v12, %v1363_v3  ;;  %v8343_v48 = vmul.u32.u64.high %v8303_v12, %v1363_v3, %v8342_v57  ;;  %v760_v21 = vmul.f32 %v8095_v58, %v8151_v47 }
  0xe6   : > { %v859_v54 = vpop.permute.xlu1 %858  ;;  %v8349_v9 = vand.u32 127, %v747_v46  ;;  %v8352_v36 = vshrl.u32 %v1436_v41, 5  ;;  %v1359_v16 = vsel %vm1353_vm12, %v1356_v4, %v1358_v18  ;;  %vm1851_vm14 = vcmp.gt.s32.totalorder %v1850_v49, 0  ;;  %v8363_v46 = vld [vmem:[%s7928_s30 + $0xe0] sm:$0xff] }
  0xe7   : > { %7580 = vset.pattern.permute.xlu1 %v13081_v1  ;;  %v1954_v42 = vadd.s32 1, %v6793_v56  ;;  %v8357_v31 = vadd.f32 %v1157_v14, %v993_v0  ;;  %v13318_v32 = vmov 2   ;;  %vm1377_vm15 = vc.u32 %v8334_v11, %v8342_v57  ;;  %1130 = vperm.xlu0 %7586, %v8363_v46  }
  0xe8   : > { %910 = vperm.xlu1 %7580, %v8067_v44   ;;  %v1288_v44 = vsub.s32 32, %v8294_v43  ;;  %v6785_v47 = vadd.s32 4294967169, %v1740_v6  ;;  %v1289_v38 = vshll.u32 %v8248_v26, %v8294_v43  ;;  %v1295_v50 = vor.u32 4788187, %v1294_v29 }
  0xe9   : > { %13317 = vst [vmem:[#allocation8_spill] sm:$0xff] %v8357_v31  ;;  %v1378_v15 = vadd.s32 1, %v8343_v48  ;;  %v8371_v27 = vand.u32 31, %v1436_v41  ;;  %vm1643_vm1 = vcmp.gt.s32.totalorder %v1642_v33, 0  ;;  %v798_v14 = vadd.f32 %v8102_v60, %v760_v21 }
  0xea   : > { %v1290_v24 = vshrl.u32 %v1272_v30, %v1288_v44  ;;  %v762_v6 = vmul.f32 %v8095_v58, %v8170_v51  ;;  %v1375_v26 = vmul.u32 %v8303_v12, %v1359_v16  ;;  %v1540_v41 = vsel %vm1539_vm13, %v8309_v53, 0 }
  0xeb   : > { %v1055_v3 = vpop.permute.xlu1 %1054  ;;  %v1379_v43 = vsel %vm1377_vm15, %v1378_v15, %v8343_v48  ;;  %vm1955_vm2 = vcmp.gt.s32.totalorder %v1954_v42, 0  ;;  %v2051_v4 = vand.u32 2139095040, %v8357_v31  ;;  %v962_v51 = vmul.f32 %v8097_v59, %v859_v54  ;;  %7591 = vset.pattern.permute.xlu0 %v13087_v2 }
  0xec   : > { %914 = vperm.xlu1 %7580, %v8030_v34   ;;  %v1291_v44 = vor.u32 %v1290_v24, %v1289_v38  ;;  %v13319_v7 = vand.u32 2147483647, %v8113_v10  ;;  %v1746_v12 = vadd.s32 1, %v6785_v47  ;;  %v764_v56 = vmul.f32 %v8095_v58, %v8185_v13 }
  0xed   : > { %v1296_v0 = vand.u32 2147483647, %v1295_v50  ;;  %v1380_v18 = vadd.s32 %v1379_v43, %v1375_v26  ;;  %v1644_v53 = vsel %vm1643_vm1, %v1642_v33, 0  ;;  %v1158_v54 = vmul.f32 %v8104_v62, %v1055_v3 }
  0xee   : > { %vm8391_vm3 = vcmp.le.f32.partialorder %v13319_v7, 0.7853982  ;;  %v1302_v29 = vsub.s32 4, %v8231_v40  ;;  %v8406_v48 = vand.u32 31, %v1540_v41  ;;  %v1956_v13 = vsel %vm1955_vm2, %v1954_v42, 0  ;;  %v1059_v7 = vpop.permute.xlu0 %1058 }
  0xef   : > { %v1298_v21 = vcvt.s32.f32 %v1291_v44  ;;  %v1381_v24 = vadd.s32 536870912, %v1380_v18  ;;  %v8410_v16 = vsub.s32 32, %v8371_v27  ;;  %v8413_v33 = vadd.f32 %v8102_v60, %v762_v6 }
  0xf0   : > { %7581 = vset.pattern.permute.xlu1 %v13318_v32  ;;  %v2052_v47 = vshrl.u32 %v2051_v4, 23  ;;  %v994_v38 = vadd.f32 %v962_v51, %v798_v14  ;;  %v640_v50 = vpop.permute.xlu1 %639  ;;  %v8415_v15 = vand.u32 31, %v1644_v53  ;;  %vm1747_vm4 = vcmp.gt.s32.totalorder %v1746_v12, 0 }
  0xf1   : > { %1110 = vperm.xlu1 %7581, %v8030_v34   ;;  %v8377_v34 = vsel %vm1851_vm14, %v1850_v49, 0  ;;  %v1299_v3 = vmul.f32 %v1298_v21, %v1296_v0  ;;  %v8417_v26 = vshrl.u32 %v1381_v24, 30  ;;  %v8422_v42 = vand.u32 31, %v1956_v13 }
  0xf2   : > { %v8400_v30 = vand.u32 31, %v8377_v34  ;;  %13323 = vst [vmem:[#allocation10_spill] sm:$0xff] %v8415_v15  ;;  %v8424_v44 = vadd.f32 %v1158_v54, %v994_v38  ;;  %v1303_v14 = vsel %vm1218_vm0, %v1302_v29, %v8231_v40  ;;  %v8430_v6 = vshrl.u32 %v1540_v41, 5 }
  0xf3   : > { %13325 = vst [vmem:[#allocation12_spill] sm:$0xff] %v8422_v42  ;;  %v8433_v4 = vsub.s32 32, %v8406_v48  ;;  %v8436_v51 = vadd.f32 %v8102_v60, %v764_v56  ;;  %v1383_v0 = vshll.u32 %v8417_v26, 30  ;;  %v8440_v54 = vshrl.u32 %v1644_v53, 5 }
  0xf4   : > { %13322 = vst [vmem:[#allocation9_spill] sm:$0xff] %v8400_v30  ;;  %v8420_v43 = vsub.s32 32, %v8400_v30  ;;  %13326 = vst [vmem:[#allocation13_spill] sm:$0xff] %v8424_v44  ;;  %v1748_v21 = vsel %vm1747_vm4, %v1746_v12, 0  ;;  %v8444_v24 = vmul.f32 %v8095_v58, %v8208_v28  ;;  %v6797_v40 = vadd.s32 4294967169, %v2052_v47 }
  0xf5   : > { %7582 = vset.pattern.permute.xlu1 %v13087_v2  ;;  %13327 = vst [vmem:[#allocation14_spill] sm:$0xff] %v8436_v51  ;;  %13328 = vst [vmem:[#allocation15_spill] sm:$0xff] %v8440_v54  ;;  %v8447_v41 = vsub.s32 32, %v8415_v15  ;;  %v1159_v29 = vmul.f32 %v8104_v62, %v1059_v7  ;;  %v1300_v38 = vxor.u32 2147483648, %v1299_v3  ;;  %v1305_v56 = vsel %vm8391_vm3, 0, %v1303_v14  ;;  %v863_v28 = vpop.permute.xlu1 %862 }
  0xf6   : > { %709 = vperm.xlu1 %7582, %v8074_v45   ;;  %13324 = vst [vmem:[#allocation11_spill] sm:$0xff] %v8420_v43  ;;  %13329 = vst [vmem:[#allocation16_spill] sm:$0xff] %v8444_v24  ;;  %v8455_v53 = vsub.s32 32, %v8422_v42  ;;  %v2155_v12 = vand.u32 2139095040, %v8424_v44  ;;  %v8460_v47 = vshrl.u32 %v1748_v21, 5  ;;  %v8462_v61 = vand.u32 31, %v1748_v21 }
  0xf7   : > { %13330 = vst [vmem:[#allocation17_spill] sm:$0xff] %v8447_v41  ;;  %v13335_v7 = vmov 1326507024   ;;  %v761_v14 = vmul.f32 %v8095_v58, %v640_v50  ;;  %v1866_v8 = vshll.u32 %v13095_v55, %v8400_v30  ;;  %v2058_v2 = vadd.s32 1, %v6797_v40 }
  0xf8   : > { %13332 = vst [vmem:[#allocation18_spill] sm:$0xff] %v8455_v53  ;;  %13333 = vst [vmem:[#allocation19_spill] sm:$0xff] %v8460_v47  ;;  %v1870_v25 = vshrl.u32 %v13335_v7, %v8420_v43  ;;  %v1309_v31 = vadd.s32 3, %v1305_v56  ;;  %v963_v21 = vmul.f32 %v8097_v59, %v863_v28  ;;  %v1301_v50 = vsel %vm1218_vm0, %v1300_v38, %v1299_v3 }
  0xf9   : > { %13334 = vst [vmem:[#allocation20_spill] sm:$0xff] %v8462_v61  ;;  %v2156_v40 = vshrl.u32 %v2155_v12, 23  ;;  %v8487_v19 = vshrl.u32 %v1956_v13, 5  ;;  %v13339_v3 = vmov 2102212464   ;;  %vm2059_vm5 = vcmp.gt.s32.totalorder %v2058_v2, 0 }
  0xfa   : > { %7583 = vset.pattern.permute.xlu1 %v13081_v1  ;;  %v8458_v1 = vsub.s32 %v1380_v18, %v1383_v0  ;;  %v8472_v18 = vshrl.u32 %v8377_v34, 5  ;;  %vm1322_vm7 = vcmp.lt.s32.totalorder %v8141_v35, 0  ;;  %v13353_v47 = vmov 1  }
  0xfb   : > { %918 = vperm.xlu1 %7583, %v8074_v45   ;;  %v13331_v45 = vmov 920167782   ;;  %v6801_v28 = vadd.s32 4294967169, %v2156_v40  ;;  %vm1979_vm8 = vcmp.lt.s32.totalorder %v8487_v19, 4  ;;  %v13346_v40 = vmov 0  }
  0xfc   : > { %v1867_v52 = vshrl.u32 %v13331_v45, %v8420_v43  ;;  %v1386_v44 = vsub.s32 0, %v8458_v1  ;;  %13336 = vst [vmem:[#allocation21_spill] sm:$0xff] %v8472_v18  ;;  %v1869_v0 = vshll.u32 %v13331_v45, %v8400_v30  ;;  %v1971_v55 = vshrl.u32 %v13331_v45, %v8455_v53 }
  0xfd   : > { %v8485_v43 = vsub.s32 32, %v8462_v61  ;;  %v799_v30 = vadd.f32 %v8102_v60, %v761_v14  ;;  %vm1875_vm6 = vcmp.lt.s32.totalorder %v8472_v18, 4  ;;  %vm1459_vm15 = vcmp.lt.s32.totalorder %v8352_v36, 4 }
  0xfe   : > { %v8479_v17 = vor.u32 %v1867_v52, %v1866_v8  ;;  %v6770_v56 = vmin.u32 %v1386_v44, %v8458_v1  ;;  %v1871_v34 = vor.u32 %v1870_v25, %v1869_v0  ;;  %v1970_v52 = vshll.u32 %v13339_v3, %v8422_v42  ;;  %v1067_v0 = vpop.permute.xlu0 %1066 }
  0xff   : > { %922 = vperm.xlu1 %7583, %v8041_v37   ;;  %13338 = vst [vmem:[#allocation23_spill] sm:$0xff] %v8485_v43  ;;  %v1304_v8 = vsel %vm8391_vm3, %v8113_v10, %v1301_v50  ;;  %v8500_v25 = vshrl.u32 %v13335_v7, %v8455_v53  ;;  %v995_v13 = vadd.f32 %v963_v21, %v799_v30  ;;  %v8502_v44 = vand.u32 3, %v1309_v31 }
 0x100   : > { %13337 = vst [vmem:[#allocation22_spill] sm:$0xff] %v8479_v17  ;;  %v1388_v38 = vclz %v6770_v56  ;;  %v8508_v12 = vsel %vm1875_vm6, %v8479_v17, 920167782  ;;  %v8510_v49 = vor.u32 %v1971_v55, %v1970_v52  ;;  %v8514_v50 = vsel %vm1875_vm6, %v1871_v34, 1326507024 }
 0x101   : > { %13340 = vst [vmem:[#allocation24_spill] sm:$0xff] %v8508_v12  ;;  %13342 = vst [vmem:[#allocation26_spill] sm:$0xff] %v8514_v50  ;;  %v8518_v31 = vshll.u32 %v13331_v45, %v8422_v42  ;;  %v2060_v30 = vsel %vm2059_vm5, %v2058_v2, 0  ;;  %7669 = vcosq.f32 %v1304_v8  ;;  %v13343_v55 = vand.u32 2147483647, %v8141_v35 }
 0x102   : > { %13341 = vst [vmem:[#allocation25_spill] sm:$0xff] %v8510_v49  ;;  %v6771_v14 = vadd.s32 4294967294, %v1388_v38  ;;  %7671 = vsinq.f32 %v1304_v8  ;;  %v13347_v56 = vand.u32 2147483647, %v8179_v20  ;;  %v8535_v52 = vadd.f32 %v1159_v29, %v995_v13 }
 0x103   : > { %7584 = vset.pattern.permute.xlu1 %v13318_v32  ;;  %vm8524_vm9 = vcmp.le.f32.partialorder %v13343_v55, 0.7853982  ;;  %v8539_v8 = vmul.f32 %v8104_v62, %v1067_v0  ;;  %v8544_v55 = vsel %vm1979_vm8, %v8510_v49, 920167782  ;;  %v8546_v42 = vand.u32 31, %v2060_v30 }
 0x104   : > { %1118 = vperm.xlu1 %7584, %v8041_v37   ;;  %v867_v37 = vpop.permute.xlu1 %866  ;;  %vm6772_vm10 = vcmp.lt.s32.totalorder %v6771_v14, 0  ;;  %v8531_v34 = vand.u32 8388607, %v13347_v56  ;;  %13348 = vst [vmem:[#allocation27_spill] sm:$0xff] %v8535_v52  ;;  %13349 = vst [vmem:[#allocation28_spill] sm:$0xff] %v8544_v55  ;;  %v2162_v56 = vadd.s32 1, %v6801_v28  ;;  %v1376_v29 = vadd.s32 %v8342_v57, %v8334_v11 }
 0x105   : > { %v1391_v38 = vsel %vm6772_vm10, 0, %v6771_v14  ;;  %v1406_v53 = vsub.s32 4, %v8417_v26  ;;  %v13350_v2 = vmov 2475754826   ;;  %v8553_v0 = vshrl.u32 %v2060_v30, 5 }
 0x106   : > { %v1392_v13 = vsub.s32 32, %v1391_v38  ;;  %v1396_v14 = vsub.s32 4294967266, %v1391_v38  ;;  %v1442_v17 = vshrl.u32 %v13350_v2, %v8410_v16  ;;  %v13352_v49 = vmov 683565275  }
 0x107   : > { %13351 = vst [vmem:[#allocation29_spill] sm:$0xff] %v8553_v0  ;;  %v8558_v55 = vshrl.u32 %v13352_v49, %v8410_v16  ;;  %v1441_v28 = vshll.u32 %v13352_v49, %v8371_v27  ;;  %v2259_v18 = vand.u32 2139095040, %v8535_v52  ;;  %v964_v11 = vmul.f32 %v8097_v59, %v867_v37 }
 0x108   : > { %7585 = vset.pattern.permute.xlu1 %v13346_v40  ;;  %v1063_v50 = vpop.permute.xlu1 %1062  ;;  %v1394_v57 = vshrl.u32 %v1376_v29, %v1392_v13  ;;  %v1397_v24 = vadd.s32 127, %v1396_v14  ;;  %v8566_v30 = vsub.s32 32, %v8546_v42  ;;  %vm2163_vm11 = vcmp.gt.s32.totalorder %v2162_v56, 0 }
 0x109   : > { %719 = vperm.xlu1 %7585, %v8128_v22   ;;  %v1393_v12 = vshll.u32 %v8458_v1, %v1391_v38  ;;  %v1407_v43 = vsel %vm1322_vm7, %v1406_v53, %v8417_v26  ;;  %v8575_v52 = vshll.u32 %v13339_v3, %v8546_v42  ;;  %v1160_v37 = vmul.f32 %v8104_v62, %v1063_v50 }
 0x10a   : > { %v8578_v29 = vor.u32 %v1442_v17, %v1441_v28  ;;  %v13354_v13 = vmov 2131351028   ;;  %vm1312_vm12 = vcmp.eq.s32.totalorder %v8502_v44, 0  ;;  %vm1315_vm13 = vcmp.eq.s32.totalorder %v8502_v44, 2 }
 0x10b   : > { %v1445_v14 = vshrl.u32 %v13354_v13, %v8410_v16  ;;  %v1395_v1 = vor.u32 %v1394_v57, %v1393_v12  ;;  %v1398_v38 = vshll.u32 %v1397_v24, 23  ;;  %v1448_v26 = vshrl.u32 %v13339_v3, %v8410_v16  ;;  %v7670_v53 = vpop.eup %7669 }
 0x10c   : > { %v8588_v61 = vsel %vm2163_vm11, %v2162_v56, 0  ;;  %v2260_v17 = vshrl.u32 %v2259_v18, 23  ;;  %v996_v50 = vadd.f32 %v964_v11, %v8413_v33  ;;  %v1409_v28 = vsel %vm8524_vm9, 0, %v1407_v43  ;;  %v7672_v23 = vpop.eup %7671 }
 0x10d   : > { %7587 = vset.pattern.permute.xlu1 %v13353_v47  ;;  %v1399_v54 = vor.u32 4788187, %v1398_v38  ;;  %v1447_v24 = vshll.u32 %v13354_v13, %v8371_v27  ;;  %v1450_v12 = vshll.u32 %v13339_v3, %v8371_v27  ;;  %v1451_v57 = vshrl.u32 %v13331_v45, %v8410_v16 }
 0x10e   : > { %926 = vperm.xlu1 %7587, %v8128_v22   ;;  %v1444_v22 = vshll.u32 %v13350_v2, %v8371_v27  ;;  %v8600_v56 = vadd.f32 %v1160_v37, %v996_v50  ;;  %vm1311_vm14 = vcmp.lt.s32.totalorder %v8502_v44, 2  ;;  %v1453_v43 = vshll.u32 %v13331_v45, %v8371_v27 }
 0x10f   : > { %v1454_v18 = vshrl.u32 %v13335_v7, %v8410_v16  ;;  %v1400_v11 = vand.u32 2147483647, %v1399_v54  ;;  %v1402_v38 = vcvt.s32.f32 %v1395_v1  ;;  %v1449_v15 = vor.u32 %v1448_v26, %v1447_v24 }
 0x110   : > { %13355 = vst [vmem:[#allocation30_spill] sm:$0xff] %v8600_v56  ;;  %v1446_v33 = vor.u32 %v1445_v14, %v1444_v22  ;;  %v1452_v41 = vor.u32 %v1451_v57, %v1450_v12  ;;  %v8608_v63 = vand.u32 31, %v8588_v61  ;;  %v1313_v51 = vxor.u32 2147483648, %v7672_v23  ;;  %v650_v14 = vpop.permute.xlu1 %649 }
 0x111   : > { %v1316_v62 = vxor.u32 2147483648, %v7670_v53  ;;  %v1455_v37 = vor.u32 %v1454_v18, %v1453_v43  ;;  %v6805_v50 = vadd.s32 4294967169, %v2260_v17  ;;  %v1403_v0 = vmul.f32 %v1402_v38, %v1400_v11 }
 0x112   : > { %930 = vperm.xlu1 %7587, %v8049_v39   ;;  %13356 = vst [vmem:[#allocation31_spill] sm:$0xff] %v8608_v63  ;;  %v1413_v20 = vadd.s32 3, %v1409_v28  ;;  %v2363_v27 = vand.u32 2139095040, %v8600_v56  ;;  %vm1308_vm0 = vweird.f32 %v8113_v10  ;;  %vm1456_vm1 = vcmp.lt.s32.totalorder %v8352_v36, 1 }
 0x113   : > { %vm1458_vm2 = vcmp.lt.s32.totalorder %v8352_v36, 3  ;;  %v1465_v16 = vsel %vm1459_vm15, %v1452_v41, 920167782  ;;  %vm1215_vm3 = vcmp.lt.s32.totalorder %v8349_v9, 3  ;;  %v1404_v54 = vxor.u32 2147483648, %v1403_v0 }
 0x114   : > { %v1464_v1 = vsel %vm1456_vm1, %v8578_v29, %v1446_v33  ;;  %v1466_v22 = vsel %vm1458_vm2, %v1449_v15, %v1465_v16  ;;  %v1468_v26 = vsel %vm1456_vm1, %v1446_v33, %v1449_v15  ;;  %v1314_v17 = vsel %vm1312_vm12, %v7670_v53, %v1313_v51 }
 0x115   : > { %v1317_v28 = vsel %vm1315_vm13, %v1316_v62, %v7672_v23  ;;  %vm1457_vm4 = vcmp.lt.s32.totalorder %v8352_v36, 2  ;;  %v1405_v24 = vsel %vm1322_vm7, %v1404_v54, %v1403_v0  ;;  %v1461_v12 = vsel %vm1459_vm15, %v1449_v15, 2102212464 }
 0x116   : > { %7588 = vset.pattern.permute.xlu1 %v13318_v32  ;;  %v13357_v43 = vor.u32 8388608, %v8531_v34  ;;  %v1408_v62 = vsel %vm8524_vm9, %v8141_v35, %v1405_v24  ;;  %v8645_v23 = vand.u32 3, %v1413_v20  ;;  %v1467_v53 = vsel %vm1457_vm4, %v1464_v1, %v1466_v22 }
 0x117   : > { %1126 = vperm.xlu1 %7588, %v8049_v39   ;;  %v1469_v39 = vsel %vm1459_vm15, %v1455_v37, 1326507024  ;;  %v1318_v15 = vsel %vm1311_vm14, %v1314_v17, %v1317_v28  ;;  %7673 = vcosq.f32 %v1408_v62  ;;  %v763_v20 = vmul.f32 %v8095_v58, %v650_v14 }
 0x118   : > { %v1470_v57 = vsel %vm1458_vm2, %v1452_v41, %v1469_v39  ;;  %v1472_v51 = vshll.u32 %v13357_v43, 8  ;;  %v871_v41 = vpop.permute.xlu1 %870  ;;  %7675 = vsinq.f32 %v1408_v62  ;;  %v1460_v21 = vsel %vm1456_vm1, %v8558_v55, %v8578_v29 }
 0x119   : > { %v1471_v0 = vsel %vm1457_vm4, %v1468_v26, %v1470_v57  ;;  %v1462_v11 = vsel %vm1458_vm2, %v1446_v33, %v1461_v12  ;;  %v8667_v44 = vshll.u32 %v13331_v45, %v8546_v42  ;;  %v2364_v38 = vshrl.u32 %v2363_v27, 23 }
 0x11a   : > { %v8654_v34 = vmul.u32.u64.low %v1472_v51, %v1471_v0  ;;  %v8655_v18 = vmul.u32.u64.high %v1472_v51, %v1471_v0, %v8654_v34  ;;  %v8669_v37 = vmul.u32.u64.low %v1472_v51, %v1467_v53  ;;  %v8670_v16 = vmul.u32.u64.high %v1472_v51, %v1467_v53, %v8669_v37 }
 0x11b   : > { %7589 = vset.pattern.permute.xlu1 %v13346_v40  ;;  %v8675_v14 = vshrl.u32 %v13331_v45, %v8566_v30  ;;  %v8679_v54 = vshrl.u32 %v13335_v7, %v8566_v30  ;;  %v8682_v55 = vsub.s32 32, %v8608_v63  ;;  %v965_v29 = vmul.f32 %v8097_v59, %v871_v41 }
 0x11c   : > { %729 = vperm.xlu1 %7589, %v8363_v46   ;;  %v8685_v33 = vadd.s32 1, %v6805_v50  ;;  %v1319_v27 = vsel %vm1308_vm0, nan, %v1318_v15  ;;  %v1463_v1 = vsel %vm1457_vm4, %v1460_v21, %v1462_v11  ;;  %v13130_v22 = vand.u32 2147483647, %v8220_v5  ;;  %v582_v11 = vld [vmem:[%s7928_s30 + $0xe8] sm:$0xff] }
 0x11d   : > { %13358 = vst [vmem:[#allocation32_spill] sm:$0xff] %v8682_v55  ;;  %vm1416_vm5 = vcmp.eq.s32.totalorder %v8645_v23, 0  ;;  %vm1419_vm7 = vcmp.eq.s32.totalorder %v8645_v23, 2  ;;  %v801_v26 = vadd.f32 %v8102_v60, %v763_v20  ;;  %vm1481_vm9 = vc.u32 %v8655_v18, %v8669_v37  ;;  %734 = vperm.xlu0 %7591, %v582_v11  }
 0x11e   : > { %v8699_v50 = vadd.s32 4294967169, %v2364_v38  ;;  %vm1415_vm10 = vcmp.lt.s32.totalorder %v8645_v23, 2  ;;  %v1482_v36 = vadd.s32 1, %v8670_v16  ;;  %v1546_v17 = vshrl.u32 %v13350_v2, %v8433_v4 }
 0x11f   : > { %v1549_v28 = vshrl.u32 %v13354_v13, %v8433_v4  ;;  %vm1412_vm11 = vweird.f32 %v8141_v35  ;;  %v8711_v60 = vsel %vm1215_vm3, %v8113_v10, %v1319_v27  ;;  %v1479_v39 = vmul.u32 %v1472_v51, %v1463_v1 }
 0x120   : > { %7590 = vset.pattern.permute.xlu1 %v13353_v47  ;;  %v1545_v24 = vshll.u32 %v13352_v49, %v8406_v48  ;;  %v1483_v12 = vsel %vm1481_vm9, %v1482_v36, %v8670_v16  ;;  %v1535_v57 = vand.u32 8388607, %v13130_v22  ;;  %v1548_v43 = vshll.u32 %v13350_v2, %v8406_v48 }
 0x121   : > { %934 = vperm.xlu1 %7590, %v8363_v46   ;;  %v997_v46 = vadd.f32 %v965_v29, %v801_v26  ;;  %v1552_v62 = vshrl.u32 %v13339_v3, %v8433_v4  ;;  %v1484_v53 = vadd.s32 %v1483_v12, %v1479_v39  ;;  %v1551_v10 = vshll.u32 %v13354_v13, %v8406_v48  ;;  %v7674_v15 = vpop.eup %7673 }
 0x122   : > { %v1554_v51 = vshll.u32 %v13339_v3, %v8406_v48  ;;  %v1555_v0 = vshrl.u32 %v13331_v45, %v8433_v4  ;;  %v1547_v41 = vor.u32 %v1546_v17, %v1545_v24  ;;  %v1550_v34 = vor.u32 %v1549_v28, %v1548_v43  ;;  %v7676_v38 = vpop.eup %7675 }
 0x123   : > { %v1557_v20 = vshll.u32 %v13331_v45, %v8406_v48  ;;  %v1558_v21 = vshrl.u32 %v13335_v7, %v8433_v4  ;;  %v1420_v16 = vxor.u32 2147483648, %v7674_v15  ;;  %v1485_v29 = vadd.s32 536870912, %v1484_v53 }
 0x124   : > { %v1553_v27 = vor.u32 %v1552_v62, %v1551_v10  ;;  %v1556_v1 = vor.u32 %v1555_v0, %v1554_v51  ;;  %vm2267_vm12 = vcmp.gt.s32.totalorder %v8685_v33, 0  ;;  %v1417_v26 = vxor.u32 2147483648, %v7676_v38 }
 0x125   : > { %938 = vperm.xlu1 %7590, %v582_v11   ;;  %v8735_v36 = vadd.f32 %v8539_v8, %v997_v46  ;;  %v1536_v17 = vor.u32 8388608, %v1535_v57  ;;  %v1559_v28 = vor.u32 %v1558_v21, %v1557_v20  ;;  %v1421_v48 = vsel %vm1419_vm7, %v1420_v16, %v7676_v38  ;;  %v8768_v38 = vpop.permute.xlu1 %874 }
 0x126   : > { %v8739_v39 = vshrl.u32 %v1485_v29, 30  ;;  %vm1560_vm13 = vcmp.lt.s32.totalorder %v8430_v6, 1  ;;  %vm1563_vm14 = vcmp.lt.s32.totalorder %v8430_v6, 4  ;;  %v1418_v24 = vsel %vm1416_vm5, %v7674_v15, %v1417_v26  ;;  %v8775_v26 = vld [vmem:[%s7928_s30 + $0xf0] sm:$0xff] }
 0x127   : > { %13359 = vst [vmem:[#allocation33_spill] sm:$0xff] %v8735_v36  ;;  %vm1561_vm15 = vcmp.lt.s32.totalorder %v8430_v6, 2  ;;  %v1568_v8 = vsel %vm1560_vm13, %v1547_v41, %v1550_v34  ;;  %v1569_v46 = vsel %vm1563_vm14, %v1556_v1, 920167782  ;;  %v1422_v12 = vsel %vm1415_vm10, %v1418_v24, %v1421_v48 }
 0x128   : > { %v1487_v57 = vshll.u32 %v8739_v39, 30  ;;  %vm1562_vm0 = vcmp.lt.s32.totalorder %v8430_v6, 3  ;;  %v1565_v43 = vsel %vm1563_vm14, %v1553_v27, 2102212464  ;;  %v1423_v62 = vsel %vm1412_vm11, nan, %v1422_v12 }
 0x129   : > { %7592 = vset.pattern.permute.xlu1 %v13318_v32  ;;  %v1570_v10 = vsel %vm1562_vm0, %v1553_v27, %v1569_v46  ;;  %v1572_v51 = vsel %vm1560_vm13, %v1550_v34, %v1553_v27  ;;  %v1573_v0 = vsel %vm1563_vm14, %v1559_v28, 1326507024  ;;  %v4547_v23 = vsel %vm1215_vm3, %v8141_v35, %v1423_v62 }
 0x12a   : > { %1134 = vperm.xlu1 %7592, %v582_v11   ;;  %v8762_v15 = vsub.s32 %v1484_v53, %v1487_v57  ;;  %v1544_v20 = vshrl.u32 %v13352_v49, %v8433_v4  ;;  %v1571_v21 = vsel %vm1561_vm15, %v1568_v8, %v1570_v10  ;;  %v4578_v16 = vpack.c.bf16 %v4547_v23, %v8711_v60  ;;  %v13362_v8 = vld [vmem:[#allocation3_spill] sm:$0xff] }
 0x12b   : > { %v2467_v29 = vand.u32 2139095040, %v8735_v36  ;;  %v1574_v11 = vsel %vm1562_vm0, %v1556_v1, %v1573_v0  ;;  %v1576_v27 = vshll.u32 %v1536_v17, 8  ;;  %v1566_v53 = vsel %vm1562_vm0, %v1550_v34, %v1565_v43  ;;  %v13382_v36 = vld [vmem:[#allocation17_spill] sm:$0xff] }
 0x12c   : > { %v1490_v35 = vsub.s32 0, %v8762_v15  ;;  %v1564_v4 = vsel %vm1560_vm13, %v1544_v20, %v1547_v41  ;;  %v1575_v28 = vsel %vm1561_vm15, %v1572_v51, %v1574_v11  ;;  %4723 = vmatmul.mubr.bf16.vlgmr.msra.gmra.mrb[0].mxu0 %v4578_v16  ;;  %v13360_v17 = vor.u32 %v8500_v25, %v8518_v31  ;;  %v13363_v25 = vld [vmem:[#allocation29_spill] sm:$0xff] }
 0x12d   : > { %v8784_v60 = vmul.u32.u64.low %v1576_v27, %v1575_v28  ;;  %v8785_v48 = vmul.u32.u64.high %v1576_v27, %v1575_v28, %v8784_v60  ;;  %v8787_v24 = vmul.u32.u64.low %v1576_v27, %v1571_v21  ;;  %v8788_v1 = vmul.u32.u64.high %v1576_v27, %v1571_v21, %v8787_v24  ;;  %4732 = vmatprep.mubr.bf16.mxu0 %v13346_v40 }
 0x12e   : > { %7593 = vset.pattern.permute.xlu1 %v13346_v40  ;;  %v8797_v41 = vsel %vm1979_vm8, %v13360_v17, 1326507024  ;;  %v8801_v34 = vor.u32 %v8675_v14, %v8575_v52  ;;  %vm1426_vm1 = vcmp.lt.s32.totalorder %v13362_v8, 0  ;;  %v6774_v46 = vmin.u32 %v1490_v35, %v8762_v15 }
 0x12f   : > { %739 = vperm.xlu1 %7593, %v8775_v26   ;;  %v2079_v12 = vor.u32 %v8679_v54, %v8667_v44  ;;  %vm2083_vm2 = vcmp.lt.s32.totalorder %v13363_v25, 4  ;;  %v8811_v31 = vshrl.u32 %v8588_v61, 5  ;;  %v1567_v52 = vsel %vm1561_vm15, %v1564_v4, %v1566_v53  ;;  %v1071_v44 = vpop.permute.xlu1 %1070 }
 0x130   : > { %13361 = vst [vmem:[#allocation34_spill] sm:$0xff] %v8801_v34  ;;  %v2179_v14 = vshrl.u32 %v13331_v45, %v8682_v55  ;;  %v2182_v57 = vshrl.u32 %v13335_v7, %v8682_v55  ;;  %v2268_v43 = vsel %vm2267_vm12, %v8685_v33, 0  ;;  %v1492_v62 = vclz %v6774_v46 }
 0x131   : > { %13364 = vst [vmem:[#allocation3_spill] sm:$0xff] %v8811_v31  ;;  %v2370_v54 = vadd.s32 1, %v8699_v50  ;;  %v2468_v10 = vshrl.u32 %v2467_v29, 23  ;;  %vm1585_vm4 = vc.u32 %v8785_v48, %v8787_v24  ;;  %v1586_v61 = vadd.s32 1, %v8788_v1 }
 0x132   : > { %v8829_v6 = vsel %vm2083_vm2, %v8801_v34, 920167782  ;;  %v2178_v51 = vshll.u32 %v13339_v3, %v8608_v63  ;;  %v13366_v33 = vand.u32 2147483647, %v13362_v8  ;;  %v6775_v50 = vadd.s32 4294967294, %v1492_v62 }
 0x133   : > { %13365 = vst [vmem:[#allocation35_spill] sm:$0xff] %v8829_v6  ;;  %v1583_v23 = vmul.u32 %v1576_v27, %v1567_v52  ;;  %7594 = vset.pattern.permute.xlu1 %v13353_v47  ;;  %v2181_v20 = vshll.u32 %v13331_v45, %v8608_v63  ;;  %v8842_v21 = vand.u32 31, %v2268_v43  ;;  %v1510_v16 = vsub.s32 4, %v8739_v39  ;;  %v660_v46 = vpop.permute.xlu1 %659 }
 0x134   : > { %vm8835_vm5 = vcmp.le.f32.partialorder %v13366_v33, 0.7853982  ;;  %v1587_v29 = vsel %vm1585_vm4, %v1586_v61, %v8788_v1  ;;  %942 = vperm.xlu1 %7594, %v8775_v26   ;;  %v8849_v11 = vsel %vm2083_vm2, %v2079_v12, 1326507024  ;;  %v8851_v35 = vor.u32 %v2179_v14, %v2178_v51  ;;  %v13374_v33 = vld [vmem:[#allocation2_spill] sm:$0xff] }
 0x135   : > { %13369 = vst [vmem:[#allocation36_spill] sm:$0xff] %v8842_v21  ;;  %13370 = vst [vmem:[#allocation37_spill] sm:$0xff] %v8849_v11  ;;  %vm6776_vm7 = vcmp.lt.s32.totalorder %v6775_v50, 0  ;;  %v1588_v27 = vadd.s32 %v1587_v29, %v1583_v23  ;;  %v2183_v47 = vor.u32 %v2182_v57, %v2181_v20  ;;  %vm2371_vm9 = vcmp.gt.s32.totalorder %v2370_v54, 0 }
 0x136   : > { %13371 = vst [vmem:[#allocation38_spill] sm:$0xff] %v8851_v35  ;;  %v6813_v4 = vadd.s32 4294967169, %v2468_v10  ;;  %v1495_v53 = vsel %vm6776_vm7, 0, %v6775_v50  ;;  %v1480_v28 = vadd.s32 %v8669_v37, %v8655_v18  ;;  %vm2187_vm10 = vcmp.lt.s32.totalorder %v8811_v31, 4 }
 0x137   : > { %v1496_v60 = vsub.s32 32, %v1495_v53  ;;  %v1500_v17 = vsub.s32 4294967266, %v1495_v53  ;;  %v1589_v1 = vadd.s32 536870912, %v1588_v27  ;;  %v8857_v12 = vsub.s32 32, %v8842_v21 }
 0x138   : > { %v1511_v52 = vsel %vm1426_vm1, %v1510_v16, %v8739_v39  ;;  %v966_v14 = vmul.f32 %v8097_v59, %v8768_v38  ;;  %v1497_v57 = vshll.u32 %v8762_v15, %v1495_v53  ;;  %v8870_v10 = vsel %vm2187_vm10, %v8851_v35, 920167782 }
 0x139   : > { %13372 = vst [vmem:[#allocation39_spill] sm:$0xff] %v8857_v12  ;;  %v1498_v62 = vshrl.u32 %v1480_v28, %v1496_v60  ;;  %v1501_v18 = vadd.s32 127, %v1500_v17  ;;  %v8865_v37 = vshrl.u32 %v1589_v1, 30  ;;  %13373 = vst [vmem:[#allocation40_spill] sm:$0xff] %v8870_v10  ;;  %v2372_v61 = vsel %vm2371_vm9, %v2370_v54, 0  ;;  %v13376_v54 = vld [vmem:[#allocation14_spill] sm:$0xff]  ;;  %v879_v60 = vpop.permute.xlu1 %878 }
 0x13a   : > { %v2474_v51 = vadd.s32 1, %v6813_v4  ;;  %v1162_v50 = vmul.f32 %v13374_v33, %v1071_v44  ;;  %v8876_v39 = vsel %vm2187_vm10, %v2183_v47, 1326507024  ;;  %v8879_v20 = vshrl.u32 %v2268_v43, 5 }
 0x13b   : > { %13375 = vst [vmem:[#allocation2_spill] sm:$0xff] %v8876_v39  ;;  %v1499_v38 = vor.u32 %v1498_v62, %v1497_v57  ;;  %v1502_v15 = vshll.u32 %v1501_v18, 23  ;;  %v1591_v23 = vshll.u32 %v8865_v37, 30  ;;  %v2282_v16 = vshll.u32 %v13339_v3, %v8842_v21 }
 0x13c   : > { %v1513_v29 = vsel %vm8835_vm5, 0, %v1511_v52  ;;  %v998_v4 = vadd.f32 %v966_v14, %v13376_v54  ;;  %v2283_v44 = vshrl.u32 %v13331_v45, %v8857_v12  ;;  %v8888_v53 = vand.u32 31, %v2372_v61  ;;  %v13380_v54 = vld [vmem:[#allocation4_spill] sm:$0xff] }
 0x13d   : > { %v1503_v47 = vor.u32 4788187, %v1502_v15  ;;  %v8890_v28 = vsub.s32 %v1588_v27, %v1591_v23  ;;  %v8894_v43 = vshll.u32 %v13331_v45, %v8842_v21  ;;  %vm2475_vm11 = vcmp.gt.s32.totalorder %v2474_v51, 0  ;;  %v1075_v23 = vpop.permute.xlu0 %1074 }
 0x13e   : > { %13377 = vst [vmem:[#allocation14_spill] sm:$0xff] %v8888_v53  ;;  %v8896_v17 = vadd.f32 %v1162_v50, %v998_v4  ;;  %v765_v1 = vmul.f32 %v8095_v58, %v660_v46  ;;  %v1506_v14 = vcvt.s32.f32 %v1499_v38  ;;  %v1517_v57 = vadd.s32 3, %v1513_v29 }
 0x13f   : > { %v1504_v52 = vand.u32 2147483647, %v1503_v47  ;;  %v1594_v62 = vsub.s32 0, %v8890_v28  ;;  %v8902_v18 = vshrl.u32 %v13335_v7, %v8857_v12  ;;  %v8904_v27 = vshrl.u32 %v2372_v61, 5  ;;  %v8922_v47 = vld [vmem:[%s13055_s2] ss:$0 sm:$0xff] }
 0x140   : > { %13378 = vst [vmem:[#allocation41_spill] sm:$0xff] %v8896_v17  ;;  %v967_v15 = vmul.f32 %v8097_v59, %v879_v60  ;;  %v13139_v22 = vand.u32 2147483647, %v13380_v54  ;;  %v8908_v50 = vor.u32 %v2283_v44, %v2282_v16  ;;  %v8911_v46 = vsub.s32 32, %v8888_v53 }
 0x141   : > { %13379 = vst [vmem:[#allocation42_spill] sm:$0xff] %v8904_v27  ;;  %v1507_v38 = vmul.f32 %v1506_v14, %v1504_v52  ;;  %v6778_v29 = vmin.u32 %v1594_v62, %v8890_v28  ;;  %v8915_v4 = vsel %vm2475_vm11, %v2474_v51, 0  ;;  %vm1530_vm12 = vcmp.lt.s32.totalorder %v8220_v5, 0 }
 0x142   : > { %13381 = vst [vmem:[#allocation4_spill] sm:$0xff] %v8911_v46  ;;  %v2571_v61 = vand.u32 2139095040, %v8896_v17  ;;  %v803_v16 = vadd.f32 %v8922_v47, %v765_v1  ;;  %v8925_v60 = vand.u32 3, %v1517_v57  ;;  %v1163_v14 = vmul.f32 %v13374_v33, %v1075_v23 }
 0x143   : > { %v1508_v44 = vxor.u32 2147483648, %v1507_v38  ;;  %v1596_v52 = vclz %v6778_v29  ;;  %v1584_v51 = vadd.s32 %v8787_v24, %v8785_v48  ;;  %v1639_v17 = vand.u32 8388607, %v13139_v22 }
 0x144   : > { %v999_v62 = vadd.f32 %v967_v15, %v803_v16  ;;  %v1650_v56 = vshrl.u32 %v13350_v2, %v13382_v36  ;;  %v13383_v1 = vand.u32 2147483647, %v8220_v5  ;;  %v1653_v48 = vshrl.u32 %v13354_v13, %v13382_v36  ;;  %v13386_v16 = vld [vmem:[#allocation10_spill] sm:$0xff] }
 0x145   : > { %v1509_v21 = vsel %vm1426_vm1, %v1508_v44, %v1507_v38  ;;  %v6779_v23 = vadd.s32 4294967294, %v1596_v52  ;;  %v1656_v24 = vshrl.u32 %v13339_v3, %v13382_v36  ;;  %v1614_v15 = vsub.s32 4, %v8865_v37 }
 0x146   : > { %vm8938_vm13 = vcmp.le.f32.partialorder %v13383_v1, 0.7853982  ;;  %v2572_v29 = vshrl.u32 %v2571_v61, 23  ;;  %v1649_v22 = vshll.u32 %v13352_v49, %v13386_v16  ;;  %v1659_v38 = vshrl.u32 %v13331_v45, %v13382_v36 }
 0x147   : > { %v1512_v44 = vsel %vm8835_vm5, %v13362_v8, %v1509_v21  ;;  %vm6780_vm14 = vcmp.lt.s32.totalorder %v6779_v23, 0  ;;  %v1652_v52 = vshll.u32 %v13350_v2, %v13386_v16  ;;  %v1655_v1 = vshll.u32 %v13354_v13, %v13386_v16 }
 0x148   : > { %v1599_v12 = vsel %vm6780_vm14, 0, %v6779_v23  ;;  %v1651_v35 = vor.u32 %v1650_v56, %v1649_v22  ;;  %v1658_v61 = vshll.u32 %v13339_v3, %v13386_v16  ;;  %v1662_v39 = vshrl.u32 %v13335_v7, %v13382_v36 }
 0x149   : > { %v1600_v10 = vsub.s32 32, %v1599_v12  ;;  %v1604_v31 = vsub.s32 4294967266, %v1599_v12  ;;  %v1654_v63 = vor.u32 %v1653_v48, %v1652_v52  ;;  %v1657_v0 = vor.u32 %v1656_v24, %v1655_v1 }
 0x14a   : > { %7677 = vcosq.f32 %v1512_v44  ;;  %v1615_v21 = vsel %vm1530_vm12, %v1614_v15, %v8865_v37  ;;  %v1660_v55 = vor.u32 %v1659_v38, %v1658_v61  ;;  %v1661_v23 = vshll.u32 %v13331_v45, %v13386_v16  ;;  %v13388_v37 = vld [vmem:[#allocation15_spill] sm:$0xff] }
 0x14b   : > { %7679 = vsinq.f32 %v1512_v44  ;;  %v1601_v56 = vshll.u32 %v8890_v28, %v1599_v12  ;;  %v1602_v22 = vshrl.u32 %v1584_v51, %v1600_v10  ;;  %v1605_v34 = vadd.s32 127, %v1604_v31 }
 0x14c   : > { %v8968_v11 = vadd.f32 %v1163_v14, %v999_v62  ;;  %v1640_v6 = vor.u32 8388608, %v1639_v17  ;;  %v1648_v48 = vshrl.u32 %v13352_v49, %v13382_v36  ;;  %v1663_v24 = vor.u32 %v1662_v39, %v1661_v23 }
 0x14d   : > { %v1603_v52 = vor.u32 %v1602_v22, %v1601_v56  ;;  %v1606_v1 = vshll.u32 %v1605_v34, 23  ;;  %v6817_v25 = vadd.s32 4294967169, %v2572_v29  ;;  %vm1667_vm15 = vcmp.lt.s32.totalorder %v13388_v37, 4 }
 0x14e   : > { %13387 = vst [vmem:[#allocation17_spill] sm:$0xff] %v8968_v11  ;;  %v1617_v15 = vsel %vm8938_vm13, 0, %v1615_v21  ;;  %vm1664_vm0 = vcmp.lt.s32.totalorder %v13388_v37, 1  ;;  %v1669_v12 = vsel %vm1667_vm15, %v1657_v0, 2102212464  ;;  %vm1665_vm1 = vcmp.lt.s32.totalorder %v13388_v37, 2 }
 0x14f   : > { %v1673_v10 = vsel %vm1667_vm15, %v1660_v55, 920167782  ;;  %v1607_v31 = vor.u32 4788187, %v1606_v1  ;;  %vm1666_vm4 = vcmp.lt.s32.totalorder %v13388_v37, 3  ;;  %v1672_v28 = vsel %vm1664_vm0, %v1651_v35, %v1654_v63 }
 0x150   : > { %v1668_v36 = vsel %vm1664_vm0, %v1648_v48, %v1651_v35  ;;  %v1674_v39 = vsel %vm1666_vm4, %v1657_v0, %v1673_v10  ;;  %v1676_v17 = vsel %vm1664_vm0, %v1654_v63, %v1657_v0  ;;  %v1677_v34 = vsel %vm1667_vm15, %v1663_v24, 1326507024 }
 0x151   : > { %v1608_v14 = vand.u32 2147483647, %v1607_v31  ;;  %v1610_v51 = vcvt.s32.f32 %v1603_v52  ;;  %v1670_v62 = vsel %vm1666_vm4, %v1654_v63, %v1669_v12  ;;  %v1678_v29 = vsel %vm1666_vm4, %v1660_v55, %v1677_v34  ;;  %v13392_v34 = vld [vmem:[#allocation23_spill] sm:$0xff] }
 0x152   : > { %v1621_v16 = vadd.s32 3, %v1617_v15  ;;  %v1675_v38 = vsel %vm1665_vm1, %v1672_v28, %v1674_v39  ;;  %v1679_v44 = vsel %vm1665_vm1, %v1676_v17, %v1678_v29  ;;  %v1680_v61 = vshll.u32 %v1640_v6, 8  ;;  %v13390_v15 = vld [vmem:[#allocation7_spill] sm:$0xff]  ;;  %v13391_v39 = vld [vmem:[#allocation20_spill] sm:$0xff] }
 0x153   : > { %v8986_v35 = vshll.u32 %v13339_v3, %v8888_v53  ;;  %v8990_v0 = vshrl.u32 %v13331_v45, %v8911_v46  ;;  %v1611_v63 = vmul.f32 %v1610_v51, %v1608_v14  ;;  %v8993_v23 = vand.u32 31, %v8915_v4  ;;  %v584_v51 = vld [vmem:[%s7928_s30 + $0xf8] sm:$0xff]  ;;  %s12952_s30 = scalar_lea.vmem %s13070_s17, %s6761_s27 }
 0x154   : > { %v7678_v55 = vpop.eup %7677  ;;  %v1671_v6 = vsel %vm1665_vm1, %v1668_v36, %v1670_v62  ;;  %v8997_v56 = vmul.u32.u64.low %v1680_v61, %v1679_v44  ;;  %v8998_v22 = vmul.u32.u64.high %v1680_v61, %v1679_v44, %v8997_v56  ;;  %v13151_v12 = vand.u32 2147483647, %v13390_v15  ;;  %744 = vperm.xlu0 %7591, %v584_v51   ;;  %946 = vperm.xlu1 %7594, %v584_v51  }
 0x155   : > { %13389 = vst [vmem:[#allocation10_spill] sm:$0xff] %v8993_v23  ;;  %v7680_v48 = vpop.eup %7679  ;;  %v1612_v24 = vxor.u32 2147483648, %v1611_v63  ;;  %v9000_v52 = vmul.u32.u64.low %v1680_v61, %v1675_v38  ;;  %v9001_v1 = vmul.u32.u64.high %v1680_v61, %v1675_v38, %v9000_v52  ;;  %vm1520_vm5 = vcmp.eq.s32.totalorder %v8925_v60, 0 }
 0x156   : > { %vm1523_vm7 = vcmp.eq.s32.totalorder %v8925_v60, 2  ;;  %v9007_v10 = vand.u32 3, %v1621_v16  ;;  %v9009_v37 = vadd.s32 1, %v6817_v25  ;;  %v2675_v31 = vand.u32 2139095040, %v8968_v11 }
 0x157   : > { %v1524_v28 = vxor.u32 2147483648, %v7678_v55  ;;  %v1613_v36 = vsel %vm1530_vm12, %v1612_v24, %v1611_v63  ;;  %v1753_v17 = vshll.u32 %v13352_v49, %v13391_v39  ;;  %v1754_v14 = vshrl.u32 %v13350_v2, %v13392_v34 }
 0x158   : > { %v1521_v62 = vxor.u32 2147483648, %v7680_v48  ;;  %v1616_v29 = vsel %vm8938_vm13, %v8220_v5, %v1613_v36  ;;  %v1687_v25 = vmul.u32 %v1680_v61, %v1671_v6  ;;  %vm1689_vm9 = vc.u32 %v8998_v22, %v9000_v52  ;;  %7595 = vset.pattern.permute.xlu0 %v13318_v32  ;;  %7596 = vset.pattern.permute.xlu1 %v13318_v32 }
 0x159   : > { %7681 = vcosq.f32 %v1616_v29  ;;  %v1690_v16 = vadd.s32 1, %v9001_v1  ;;  %v1743_v38 = vand.u32 8388607, %v13151_v12  ;;  %v1755_v44 = vor.u32 %v1754_v14, %v1753_v17  ;;  %1138 = vperm.xlu0 %7595, %v8775_v26   ;;  %1142 = vperm.xlu1 %7596, %v584_v51  }
 0x15a   : > { %vm1519_vm11 = vcmp.lt.s32.totalorder %v8925_v60, 2  ;;  %7683 = vsinq.f32 %v1616_v29  ;;  %v1756_v57 = vshll.u32 %v13350_v2, %v13391_v39  ;;  %v1757_v61 = vshrl.u32 %v13354_v13, %v13392_v34 }
 0x15b   : > { %v1759_v63 = vshll.u32 %v13354_v13, %v13391_v39  ;;  %v1691_v6 = vsel %vm1689_vm9, %v1690_v16, %v9001_v1  ;;  %v1760_v56 = vshrl.u32 %v13339_v3, %v13392_v34  ;;  %v1762_v24 = vshll.u32 %v13339_v3, %v13391_v39 }
 0x15c   : > { %v1763_v36 = vshrl.u32 %v13331_v45, %v13392_v34  ;;  %v1692_v17 = vadd.s32 %v1691_v6, %v1687_v25  ;;  %v1758_v14 = vor.u32 %v1757_v61, %v1756_v57  ;;  %v1765_v29 = vshll.u32 %v13331_v45, %v13391_v39  ;;  %v13393_v39 = vld [vmem:[#allocation19_spill] sm:$0xff] }
 0x15d   : > { %v1766_v12 = vshrl.u32 %v13335_v7, %v13392_v34  ;;  %v1525_v1 = vsel %vm1523_vm7, %v1524_v28, %v7680_v48  ;;  %v1744_v16 = vor.u32 8388608, %v1743_v38  ;;  %v1761_v21 = vor.u32 %v1760_v56, %v1759_v63 }
 0x15e   : > { %v1764_v11 = vor.u32 %v1763_v36, %v1762_v24  ;;  %vm1516_vm12 = vweird.f32 %v13362_v8  ;;  %v1693_v25 = vadd.s32 536870912, %v1692_v17  ;;  %vm1768_vm13 = vcmp.lt.s32.totalorder %v13393_v39, 1 }
 0x15f   : > { %v1767_v57 = vor.u32 %v1766_v12, %v1765_v29  ;;  %vm1771_vm14 = vcmp.lt.s32.totalorder %v13393_v39, 4  ;;  %v1522_v61 = vsel %vm1520_vm5, %v7678_v55, %v1521_v62  ;;  %vm1770_vm15 = vcmp.lt.s32.totalorder %v13393_v39, 3 }
 0x160   : > { %v1776_v48 = vsel %vm1768_vm13, %v1755_v44, %v1758_v14  ;;  %v1777_v26 = vsel %vm1771_vm14, %v1764_v11, 920167782  ;;  %v9058_v28 = vshrl.u32 %v1693_v25, 30  ;;  %vm1769_vm0 = vcmp.lt.s32.totalorder %v13393_v39, 2 }
 0x161   : > { %v1778_v32 = vsel %vm1770_vm15, %v1761_v21, %v1777_v26  ;;  %v1780_v12 = vsel %vm1768_vm13, %v1758_v14, %v1761_v21  ;;  %v1773_v51 = vsel %vm1771_vm14, %v1761_v21, 2102212464  ;;  %v1781_v62 = vsel %vm1771_vm14, %v1767_v57, 1326507024 }
 0x162   : > { %v1779_v55 = vsel %vm1769_vm0, %v1776_v48, %v1778_v32  ;;  %v1784_v38 = vshll.u32 %v1744_v16, 8  ;;  %v2676_v63 = vshrl.u32 %v2675_v31, 23  ;;  %v1695_v6 = vshll.u32 %v9058_v28, 30 }
 0x163   : > { %v1752_v56 = vshrl.u32 %v13352_v49, %v13392_v34  ;;  %v1782_v24 = vsel %vm1770_vm15, %v1764_v11, %v1781_v62  ;;  %v7682_v36 = vpop.eup %7681  ;;  %vm2291_vm1 = vcmp.lt.s32.totalorder %v8879_v20, 4  ;;  %v1526_v21 = vsel %vm1519_vm11, %v1522_v61, %v1525_v1 }
 0x164   : > { %v1783_v29 = vsel %vm1769_vm0, %v1780_v12, %v1782_v24  ;;  %v9077_v25 = vmul.u32.u64.low %v1784_v38, %v1779_v55  ;;  %v9078_v16 = vmul.u32.u64.high %v1784_v38, %v1779_v55, %v9077_v25  ;;  %v7684_v31 = vpop.eup %7683  ;;  %v1628_v57 = vxor.u32 2147483648, %v7682_v36 }
 0x165   : > { %v9081_v48 = vsub.s32 %v1692_v17, %v1695_v6  ;;  %v1772_v11 = vsel %vm1768_vm13, %v1752_v56, %v1755_v44  ;;  %v1774_v34 = vsel %vm1770_vm15, %v1758_v14, %v1773_v51  ;;  %v1625_v26 = vxor.u32 2147483648, %v7684_v31 }
 0x166   : > { %vm1627_vm4 = vcmp.eq.s32.totalorder %v9007_v10, 2  ;;  %v9088_v60 = vmul.u32.u64.low %v1784_v38, %v1783_v29  ;;  %v9089_v1 = vmul.u32.u64.high %v1784_v38, %v1783_v29, %v9088_v60  ;;  %vm1623_vm5 = vcmp.lt.s32.totalorder %v9007_v10, 2 }
 0x167   : > { %vm1624_vm7 = vcmp.eq.s32.totalorder %v9007_v10, 0  ;;  %v1629_v61 = vsel %vm1627_vm4, %v1628_v57, %v7684_v31  ;;  %v1698_v17 = vsub.s32 0, %v9081_v48  ;;  %v1527_v32 = vsel %vm1516_vm12, nan, %v1526_v21 }
 0x168   : > { %v1626_v44 = vsel %vm1624_vm7, %v7682_v36, %v1625_v26  ;;  %v1775_v14 = vsel %vm1769_vm0, %v1772_v11, %v1774_v34  ;;  %v1794_v12 = vadd.s32 1, %v9078_v16  ;;  %v9100_v51 = vsub.s32 32, %v8993_v23 }
 0x169   : > { %vm1620_vm9 = vweird.f32 %v8220_v5  ;;  %v1630_v55 = vsel %vm1623_vm5, %v1626_v44, %v1629_v61  ;;  %v6782_v10 = vmin.u32 %v1698_v17, %v9081_v48  ;;  %vm2579_vm11 = vcmp.gt.s32.totalorder %v9009_v37, 0 }
 0x16a   : > { %13394 = vst [vmem:[#allocation15_spill] sm:$0xff] %v9100_v51  ;;  %v1631_v62 = vsel %vm1620_vm9, nan, %v1630_v55  ;;  %v6821_v6 = vadd.s32 4294967169, %v2676_v63  ;;  %vm1793_vm12 = vc.u32 %v9089_v1, %v9077_v25  ;;  %v4548_v39 = vsel %vm1215_vm3, %v13362_v8, %v1527_v32 }
 0x16b   : > { %v4549_v56 = vsel %vm1215_vm3, %v8220_v5, %v1631_v62  ;;  %v1700_v24 = vclz %v6782_v10  ;;  %v1791_v36 = vmul.u32 %v1784_v38, %v1775_v14  ;;  %v2389_v21 = vshll.u32 %v13331_v45, %v8888_v53 }
 0x16c   : > { %vm2395_vm13 = vcmp.lt.s32.totalorder %v8904_v27, 4  ;;  %v4579_v29 = vpack.c.bf16 %v4549_v56, %v4548_v39  ;;  %v1795_v63 = vsel %vm1793_vm12, %v1794_v12, %v9078_v16  ;;  %v9120_v31 = vsel %vm2291_vm1, %v8908_v50, 920167782  ;;  %v883_v12 = vpop.permute.xlu1 %882 }
 0x16d   : > { %v2580_v8 = vsel %vm2579_vm11, %v9009_v37, 0  ;;  %v6783_v57 = vadd.s32 4294967294, %v1700_v24  ;;  %v1796_v11 = vadd.s32 %v1795_v63, %v1791_v36  ;;  %v2390_v5 = vshrl.u32 %v13335_v7, %v8911_v46 }
 0x16e   : > { %v2491_v38 = vshrl.u32 %v13331_v45, %v9100_v51  ;;  %v2494_v34 = vshrl.u32 %v13335_v7, %v9100_v51  ;;  %4733 = vmatmul.mubr.bf16.gmra.mrb[4].mxu0 %v4579_v29  ;;  %v2682_v16 = vadd.s32 1, %v6821_v6  ;;  %v9131_v26 = vor.u32 %v8990_v0, %v8986_v35 }
 0x16f   : > { %v9134_v60 = vshrl.u32 %v8915_v4, 5  ;;  %4742 = vmatprep.mubr.bf16.mxu0 %v13346_v40  ;;  %vm6784_vm14 = vcmp.lt.s32.totalorder %v6783_v57, 0  ;;  %v1797_v37 = vadd.s32 536870912, %v1796_v11  ;;  %v2490_v61 = vshll.u32 %v13339_v3, %v8993_v23 }
 0x170   : > { %13395 = vst [vmem:[#allocation7_spill] sm:$0xff] %v9131_v26  ;;  %v2493_v17 = vshll.u32 %v13331_v45, %v8993_v23  ;;  %v9141_v32 = vand.u32 31, %v2580_v8  ;;  %v1703_v44 = vsel %vm6784_vm14, 0, %v6783_v57  ;;  %v1688_v35 = vadd.s32 %v9000_v52, %v8998_v22 }
 0x171   : > { %13396 = vst [vmem:[#allocation20_spill] sm:$0xff] %v9134_v60  ;;  %v1704_v0 = vsub.s32 32, %v1703_v44  ;;  %v1708_v14 = vsub.s32 4294967266, %v1703_v44  ;;  %v9145_v4 = vshrl.u32 %v1797_v37, 30  ;;  %v2391_v55 = vor.u32 %v2390_v5, %v2389_v21 }
 0x172   : > { %13397 = vst [vmem:[#allocation23_spill] sm:$0xff] %v9141_v32  ;;  %v9147_v10 = vor.u32 %v2491_v38, %v2490_v61  ;;  %v2495_v62 = vor.u32 %v2494_v34, %v2493_v17  ;;  %vm2683_vm15 = vcmp.gt.s32.totalorder %v2682_v16, 0  ;;  %v1705_v6 = vshll.u32 %v9081_v48, %v1703_v44  ;;  %v1079_v17 = vpop.permute.xlu1 %1078 }
 0x173   : > { %v1706_v39 = vshrl.u32 %v1688_v35, %v1704_v0  ;;  %v1709_v56 = vadd.s32 127, %v1708_v14  ;;  %v1799_v24 = vshll.u32 %v9145_v4, 30  ;;  %v13399_v36 = vor.u32 %v8902_v18, %v8894_v43  ;;  %v13402_v43 = vld [vmem:[#allocation16_spill] sm:$0xff] }
 0x174   : > { %13398 = vst [vmem:[#allocation19_spill] sm:$0xff] %v9147_v10  ;;  %v9161_v52 = vsel %vm2395_vm13, %v9131_v26, 920167782  ;;  %v9164_v21 = vsub.s32 32, %v9141_v32  ;;  %v1718_v48 = vsub.s32 4, %v9058_v28  ;;  %vm2499_vm0 = vcmp.lt.s32.totalorder %v9134_v60, 4 }
 0x175   : > { %v9156_v22 = vsel %vm2291_vm1, %v13399_v36, 1326507024  ;;  %13400 = vst [vmem:[#allocation43_spill] sm:$0xff] %v9161_v52  ;;  %v1707_v29 = vor.u32 %v1706_v39, %v1705_v6  ;;  %v1710_v63 = vshll.u32 %v1709_v56, 23  ;;  %v9168_v57 = vsub.s32 %v1796_v11, %v1799_v24  ;;  %v13421_v26 = vld [vmem:[#allocation21_spill] sm:$0xff] }
 0x176   : > { %13401 = vst [vmem:[#allocation44_spill] sm:$0xff] %v9164_v21  ;;  %v804_v18 = vadd.f32 %v8922_v47, %v13402_v43  ;;  %v9174_v5 = vsel %vm2395_vm13, %v2391_v55, 1326507024  ;;  %v9179_v38 = vsel %vm2499_vm0, %v9147_v10, 920167782  ;;  %v9182_v34 = vsel %vm2683_vm15, %v2682_v16, 0 }
 0x177   : > { %13403 = vst [vmem:[#allocation16_spill] sm:$0xff] %v9174_v5  ;;  %13404 = vst [vmem:[#allocation45_spill] sm:$0xff] %v9179_v38  ;;  %v9186_v37 = vsel %vm2499_vm0, %v2495_v62, 1326507024  ;;  %vm1634_vm4 = vcmp.lt.s32.totalorder %v13380_v54, 0  ;;  %v1802_v61 = vsub.s32 0, %v9168_v57  ;;  %v2595_v44 = vshrl.u32 %v13331_v45, %v9164_v21 }
 0x178   : > { %13405 = vst [vmem:[#allocation46_spill] sm:$0xff] %v9186_v37  ;;  %v1711_v11 = vor.u32 4788187, %v1710_v63  ;;  %v13406_v35 = vand.u32 2147483647, %v13380_v54  ;;  %v1719_v16 = vsel %vm1634_vm4, %v1718_v48, %v9058_v28  ;;  %v968_v14 = vmul.f32 %v8097_v59, %v883_v12 }
 0x179   : > { %v9203_v55 = vand.u32 31, %v9182_v34  ;;  %v1714_v6 = vcvt.s32.f32 %v1707_v29  ;;  %v6786_v39 = vmin.u32 %v1802_v61, %v9168_v57  ;;  %v9206_v56 = vshrl.u32 %v2580_v8, 5 }
 0x17a   : > { %vm9194_vm5 = vcmp.le.f32.partialorder %v13406_v35, 0.7853982  ;;  %v1712_v62 = vand.u32 2147483647, %v1711_v11  ;;  %v2594_v24 = vshll.u32 %v13339_v3, %v9141_v32  ;;  %v9212_v36 = vshll.u32 %v13331_v45, %v9141_v32  ;;  %v13412_v11 = vld [vmem:[#allocation5_spill] sm:$0xff]  ;;  %v13413_v35 = vld [vmem:[#allocation11_spill] sm:$0xff] }
 0x17b   : > { %13409 = vst [vmem:[#allocation47_spill] sm:$0xff] %v9203_v55  ;;  %13410 = vst [vmem:[#allocation48_spill] sm:$0xff] %v9206_v56  ;;  %v1164_v28 = vmul.f32 %v13374_v33, %v1079_v17  ;;  %v9217_v12 = vshrl.u32 %v13335_v7, %v9164_v21  ;;  %v1721_v29 = vsel %vm9194_vm5, 0, %v1719_v16  ;;  %v1804_v63 = vclz %v6786_v39 }
 0x17c   : > { %v1715_v48 = vmul.f32 %v1714_v6, %v1712_v62  ;;  %v9221_v8 = vor.u32 %v2595_v44, %v2594_v24  ;;  %v1000_v43 = vadd.f32 %v968_v14, %v804_v18  ;;  %v1858_v32 = vshrl.u32 %v13350_v2, %v13413_v35  ;;  %v13416_v44 = vld [vmem:[#allocation9_spill] sm:$0xff] }
 0x17d   : > { %v9227_v10 = vsub.s32 32, %v9203_v55  ;;  %v6787_v37 = vadd.s32 4294967294, %v1804_v63  ;;  %v1861_v62 = vshrl.u32 %v13354_v13, %v13413_v35  ;;  %v1725_v6 = vadd.s32 3, %v1721_v29  ;;  %v670_v63 = vpop.permute.xlu1 %669 }
 0x17e   : > { %13411 = vst [vmem:[#allocation49_spill] sm:$0xff] %v9221_v8  ;;  %v1716_v17 = vxor.u32 2147483648, %v1715_v48  ;;  %vm1738_vm7 = vcmp.lt.s32.totalorder %v13390_v15, 0  ;;  %v9232_v16 = vadd.f32 %v1164_v28, %v1000_v43  ;;  %v1857_v18 = vshll.u32 %v13352_v49, %v13416_v44 }
 0x17f   : > { %13414 = vst [vmem:[#allocation5_spill] sm:$0xff] %v9227_v10  ;;  %v1864_v14 = vshrl.u32 %v13339_v3, %v13413_v35  ;;  %v1792_v24 = vadd.s32 %v9077_v25, %v9089_v1  ;;  %vm6788_vm9 = vcmp.lt.s32.totalorder %v6787_v37, 0  ;;  %v1860_v29 = vshll.u32 %v13350_v2, %v13416_v44  ;;  %v1083_v25 = vpop.permute.xlu0 %1082 }
 0x180   : > { %13415 = vst [vmem:[#allocation11_spill] sm:$0xff] %v9232_v16  ;;  %v1717_v39 = vsel %vm1634_vm4, %v1716_v17, %v1715_v48  ;;  %v1807_v61 = vsel %vm6788_vm9, 0, %v6787_v37  ;;  %v13417_v28 = vand.u32 2147483647, %v13412_v11  ;;  %v1859_v21 = vor.u32 %v1858_v32, %v1857_v18 }
 0x181   : > { %v1863_v38 = vshll.u32 %v13354_v13, %v13416_v44  ;;  %v1720_v48 = vsel %vm9194_vm5, %v13380_v54, %v1717_v39  ;;  %v1808_v17 = vsub.s32 32, %v1807_v61  ;;  %v1812_v60 = vsub.s32 4294967266, %v1807_v61 }
 0x182   : > { %v1847_v43 = vand.u32 8388607, %v13417_v28  ;;  %v1862_v1 = vor.u32 %v1861_v62, %v1860_v29  ;;  %v13418_v23 = vand.u32 2147483647, %v13390_v15  ;;  %v9258_v37 = vmul.f32 %v13374_v33, %v1083_v25 }
 0x183   : > { %v2779_v32 = vand.u32 2139095040, %v9232_v16  ;;  %v767_v44 = vmul.f32 %v8095_v58, %v670_v63  ;;  %v1865_v18 = vor.u32 %v1864_v14, %v1863_v38  ;;  %v1809_v0 = vshll.u32 %v9168_v57, %v1807_v61  ;;  %v13423_v63 = vld [vmem:[#allocation26_spill] sm:$0xff] }
 0x184   : > { %vm9253_vm11 = vcmp.le.f32.partialorder %v13418_v23, 0.7853982  ;;  %v1810_v39 = vshrl.u32 %v1792_v24, %v1808_v17  ;;  %v1813_v28 = vadd.s32 127, %v1812_v60  ;;  %v1822_v62 = vsub.s32 4, %v9145_v4  ;;  %v13422_v60 = vld [vmem:[#allocation24_spill] sm:$0xff] }
 0x185   : > { %7685 = vcosq.f32 %v1720_v48  ;;  %v1848_v29 = vor.u32 8388608, %v1847_v43  ;;  %v1856_v23 = vshrl.u32 %v13352_v49, %v13413_v35  ;;  %vm1872_vm12 = vcmp.lt.s32.totalorder %v13421_v26, 1  ;;  %v13424_v43 = vld [vmem:[#allocation22_spill] sm:$0xff] }
 0x186   : > { %v1811_v25 = vor.u32 %v1810_v39, %v1809_v0  ;;  %v1814_v5 = vshll.u32 %v1813_v28, 23  ;;  %vm1874_vm14 = vcmp.lt.s32.totalorder %v13421_v26, 3  ;;  %v1880_v16 = vsel %vm1872_vm12, %v1859_v21, %v1862_v1 }
 0x187   : > { %vm1873_vm15 = vcmp.lt.s32.totalorder %v13421_v26, 2  ;;  %v1877_v57 = vsel %vm1875_vm6, %v1865_v18, 2102212464  ;;  %v1882_v38 = vsel %vm1874_vm14, %v1865_v18, %v13422_v60  ;;  %v1884_v61 = vsel %vm1872_vm12, %v1862_v1, %v1865_v18  ;;  %v887_v60 = vpop.permute.xlu1 %886 }
 0x188   : > { %v1815_v14 = vor.u32 4788187, %v1814_v5  ;;  %v1823_v35 = vsel %vm1738_vm7, %v1822_v62, %v9145_v4  ;;  %v1883_v24 = vsel %vm1873_vm15, %v1880_v16, %v1882_v38  ;;  %v1886_v17 = vsel %vm1874_vm14, %v13424_v43, %v13423_v63  ;;  %v13425_v62 = vld [vmem:[#allocation6_spill] sm:$0xff]  ;;  %v13427_v63 = vld [vmem:[#allocation12_spill] sm:$0xff] }
 0x189   : > { %7687 = vsinq.f32 %v1720_v48  ;;  %v1876_v0 = vsel %vm1872_vm12, %v1856_v23, %v1859_v21  ;;  %v1887_v39 = vsel %vm1873_vm15, %v1884_v61, %v1886_v17  ;;  %v1888_v28 = vshll.u32 %v1848_v29, 8 }
 0x18a   : > { %v1816_v18 = vand.u32 2147483647, %v1815_v14  ;;  %v1818_v5 = vcvt.s32.f32 %v1811_v25  ;;  %v1878_v4 = vsel %vm1874_vm14, %v1862_v1, %v1877_v57  ;;  %v13174_v52 = vand.u32 2147483647, %v13425_v62  ;;  %v13426_v57 = vld [vmem:[#allocation18_spill] sm:$0xff] }
 0x18b   : > { %v9288_v16 = vmul.u32.u64.low %v1888_v28, %v1887_v39  ;;  %v9289_v38 = vmul.u32.u64.high %v1888_v28, %v1887_v39, %v9288_v16  ;;  %v9291_v27 = vmul.u32.u64.low %v1888_v28, %v1883_v24  ;;  %v9292_v46 = vmul.u32.u64.high %v1888_v28, %v1883_v24, %v9291_v27 }
 0x18c   : > { %v9295_v21 = vand.u32 3, %v1725_v6  ;;  %v1819_v48 = vmul.f32 %v1818_v5, %v1816_v18  ;;  %v1825_v29 = vsel %vm9253_vm11, 0, %v1823_v35  ;;  %v2780_v23 = vshrl.u32 %v2779_v32, 23 }
 0x18d   : > { %v969_v25 = vmul.f32 %v8097_v59, %v887_v60  ;;  %v1879_v1 = vsel %vm1873_vm15, %v1876_v0, %v1878_v4  ;;  %v1962_v61 = vshrl.u32 %v13350_v2, %v13426_v57  ;;  %v1965_v14 = vshrl.u32 %v13354_v13, %v13426_v57 }
 0x18e   : > { %v1820_v24 = vxor.u32 2147483648, %v1819_v48  ;;  %v805_v6 = vadd.f32 %v8922_v47, %v767_v44  ;;  %v1961_v43 = vshll.u32 %v13352_v49, %v13427_v63  ;;  %v1964_v32 = vshll.u32 %v13350_v2, %v13427_v63 }
 0x18f   : > { %v7686_v35 = vpop.eup %7685  ;;  %v1829_v17 = vadd.s32 3, %v1825_v29  ;;  %vm1897_vm6 = vc.u32 %v9289_v38, %v9291_v27  ;;  %v1898_v26 = vadd.s32 1, %v9292_v46  ;;  %v1951_v0 = vand.u32 8388607, %v13174_v52 }
 0x190   : > { %v1821_v39 = vsel %vm1738_vm7, %v1820_v24, %v1819_v48  ;;  %v1895_v44 = vmul.u32 %v1888_v28, %v1879_v1  ;;  %v1963_v18 = vor.u32 %v1962_v61, %v1961_v43  ;;  %v1966_v5 = vor.u32 %v1965_v14, %v1964_v32  ;;  %v13428_v24 = vld [vmem:[#allocation28_spill] sm:$0xff]  ;;  %v13429_v43 = vld [vmem:[#allocation25_spill] sm:$0xff] }
 0x191   : > { %v1824_v60 = vsel %vm9253_vm11, %v13390_v15, %v1821_v39  ;;  %v1899_v4 = vsel %vm1897_vm6, %v1898_v26, %v9292_v46  ;;  %v1967_v16 = vshll.u32 %v13354_v13, %v13427_v63  ;;  %v1968_v29 = vshrl.u32 %v13339_v3, %v13426_v57 }
 0x192   : > { %v1732_v53 = vxor.u32 2147483648, %v7686_v35  ;;  %7689 = vcosq.f32 %v1824_v60  ;;  %v1900_v52 = vadd.s32 %v1899_v4, %v1895_v44  ;;  %v1960_v28 = vshrl.u32 %v13352_v49, %v13426_v57 }
 0x193   : > { %v7688_v48 = vpop.eup %7687  ;;  %7691 = vsinq.f32 %v1824_v60  ;;  %v1952_v1 = vor.u32 8388608, %v1951_v0  ;;  %v1969_v61 = vor.u32 %v1968_v29, %v1967_v16  ;;  %vm1976_vm4 = vcmp.lt.s32.totalorder %v8487_v19, 1  ;;  %v9352_v16 = vpop.permute.xlu0 %1090 }
 0x194   : > { %v1901_v51 = vadd.s32 536870912, %v1900_v52  ;;  %vm1977_vm5 = vcmp.lt.s32.totalorder %v8487_v19, 2  ;;  %vm1978_vm7 = vcmp.lt.s32.totalorder %v8487_v19, 3  ;;  %v1984_v46 = vsel %vm1976_vm4, %v1963_v18, %v1966_v5 }
 0x195   : > { %v1981_v14 = vsel %vm1979_vm8, %v1969_v61, 2102212464  ;;  %v1986_v57 = vsel %vm1978_vm7, %v1969_v61, %v13428_v24  ;;  %v1988_v63 = vsel %vm1976_vm4, %v1966_v5, %v1969_v61  ;;  %v1990_v32 = vsel %vm1978_vm7, %v13429_v43, %v8797_v41 }
 0x196   : > { %v1729_v26 = vxor.u32 2147483648, %v7688_v48  ;;  %v9344_v0 = vshrl.u32 %v1901_v51, 30  ;;  %v1987_v39 = vsel %vm1977_vm5, %v1984_v46, %v1986_v57  ;;  %v1991_v44 = vsel %vm1977_vm5, %v1988_v63, %v1990_v32 }
 0x197   : > { %vm1728_vm8 = vcmp.eq.s32.totalorder %v9295_v21, 0  ;;  %vm1731_vm9 = vcmp.eq.s32.totalorder %v9295_v21, 2  ;;  %v6825_v60 = vadd.s32 4294967169, %v2780_v23  ;;  %v1992_v4 = vshll.u32 %v1952_v1, 8 }
 0x198   : > { %v1001_v29 = vadd.f32 %v969_v25, %v805_v6  ;;  %v1903_v41 = vshll.u32 %v9344_v0, 30  ;;  %v1980_v61 = vsel %vm1976_vm4, %v1960_v28, %v1963_v18  ;;  %v1982_v51 = vsel %vm1978_vm7, %v1966_v5, %v1981_v14 }
 0x199   : > { %v9359_v46 = vmul.u32.u64.low %v1992_v4, %v1991_v44  ;;  %v9360_v24 = vmul.u32.u64.high %v1992_v4, %v1991_v44, %v9359_v46  ;;  %v9362_v57 = vmul.u32.u64.low %v1992_v4, %v1987_v39  ;;  %v9363_v63 = vmul.u32.u64.high %v1992_v4, %v1987_v39, %v9362_v57  ;;  %v9385_v39 = vpop.permute.xlu0 %1098 }
 0x19a   : > { %v1730_v23 = vsel %vm1728_vm8, %v7686_v35, %v1729_v26  ;;  %v1733_v1 = vsel %vm1731_vm9, %v1732_v53, %v7688_v48  ;;  %v1830_v43 = vand.u32 3, %v1829_v17  ;;  %v9366_v32 = vsub.s32 %v1900_v52, %v1903_v41 }
 0x19b   : > { %v2599_v25 = vor.u32 %v9217_v12, %v9212_v36  ;;  %v2699_v6 = vshrl.u32 %v13331_v45, %v9227_v10  ;;  %v9374_v18 = vshrl.u32 %v13335_v7, %v9227_v10  ;;  %vm1724_vm11 = vweird.f32 %v13380_v54 }
 0x19c   : > { %v7690_v5 = vpop.eup %7689  ;;  %vm1727_vm12 = vcmp.lt.s32.totalorder %v9295_v21, 2  ;;  %v2786_v35 = vadd.s32 1, %v6825_v60  ;;  %v1906_v53 = vsub.s32 0, %v9366_v32  ;;  %v1983_v52 = vsel %vm1977_vm5, %v1980_v61, %v1982_v51 }
 0x19d   : > { %v7692_v17 = vpop.eup %7691  ;;  %vm2603_vm14 = vcmp.lt.s32.totalorder %v9206_v56, 4  ;;  %v1734_v28 = vsel %vm1727_vm12, %v1730_v23, %v1733_v1  ;;  %v1836_v48 = vxor.u32 2147483648, %v7690_v5  ;;  %vm2001_vm15 = vc.u32 %v9360_v24, %v9362_v57  ;;  %v13453_v56 = vld [vmem:[#allocation3_spill] sm:$0xff] }
 0x19e   : > { %v2002_v14 = vadd.s32 1, %v9363_v63  ;;  %v1833_v26 = vxor.u32 2147483648, %v7692_v17  ;;  %vm1835_vm6 = vcmp.eq.s32.totalorder %v1830_v43, 2  ;;  %v9388_v21 = vadd.f32 %v9258_v37, %v1001_v29  ;;  %v891_v37 = vpop.permute.xlu1 %890 }
 0x19f   : > { %v6790_v19 = vmin.u32 %v1906_v53, %v9366_v32  ;;  %vm1832_vm4 = vcmp.eq.s32.totalorder %v1830_v43, 0  ;;  %v1837_v44 = vsel %vm1835_vm6, %v1836_v48, %v7692_v17  ;;  %v1999_v60 = vmul.u32 %v1992_v4, %v1983_v52 }
 0x1a0   : > { %13430 = vst [vmem:[#allocation9_spill] sm:$0xff] %v9388_v21  ;;  %v2003_v41 = vsel %vm2001_vm15, %v2002_v14, %v9363_v63  ;;  %v1735_v61 = vsel %vm1724_vm11, nan, %v1734_v28  ;;  %vm1831_vm5 = vcmp.lt.s32.totalorder %v1830_v43, 2  ;;  %v1834_v51 = vsel %vm1832_vm4, %v7690_v5, %v1833_v26  ;;  %v675_v14 = vpop.permute.xlu0 %674 }
 0x1a1   : > { %v1908_v46 = vclz %v6790_v19  ;;  %vm1828_vm7 = vweird.f32 %v13390_v15  ;;  %v1838_v23 = vsel %vm1831_vm5, %v1834_v51, %v1837_v44  ;;  %vm2787_vm8 = vcmp.gt.s32.totalorder %v2786_v35, 0 }
 0x1a2   : > { %v2004_v1 = vadd.s32 %v2003_v41, %v1999_v60  ;;  %v9396_v29 = vshrl.u32 %v9182_v34, 5  ;;  %v2698_v4 = vshll.u32 %v13339_v3, %v9203_v55  ;;  %v1839_v53 = vsel %vm1828_vm7, nan, %v1838_v23  ;;  %v1087_v51 = vpop.permute.xlu1 %1086 }
 0x1a3   : > { %v6791_v63 = vadd.s32 4294967294, %v1908_v46  ;;  %v2701_v52 = vshll.u32 %v13331_v45, %v9203_v55  ;;  %v4550_v43 = vsel %vm1215_vm3, %v13380_v54, %v1735_v61  ;;  %v4551_v5 = vsel %vm1215_vm3, %v13390_v15, %v1839_v53 }
 0x1a4   : > { %13431 = vst [vmem:[#allocation21_spill] sm:$0xff] %v9396_v29  ;;  %v2005_v17 = vadd.s32 536870912, %v2004_v1  ;;  %v4580_v28 = vpack.c.bf16 %v4551_v5, %v4550_v43  ;;  %v2788_v34 = vsel %vm2787_vm8, %v2786_v35, 0  ;;  %v2883_v48 = vand.u32 2139095040, %v9388_v21 }
 0x1a5   : > { %vm6792_vm9 = vcmp.lt.s32.totalorder %v6791_v63, 0  ;;  %v9409_v26 = vor.u32 %v2699_v6, %v2698_v4  ;;  %v2703_v19 = vor.u32 %v9374_v18, %v2701_v52  ;;  %v9417_v54 = vsel %vm2603_vm14, %v9221_v8, 920167782 }
 0x1a6   : > { %v1911_v44 = vsel %vm6792_vm9, 0, %v6791_v63  ;;  %v9412_v60 = vshrl.u32 %v2005_v17, 30  ;;  %13433 = vst [vmem:[#allocation26_spill] sm:$0xff] %v9417_v54  ;;  %4743 = vmatmul.mubr.bf16.gmra.mrb[8].mxu0 %v4580_v28  ;;  %v1896_v15 = vadd.s32 %v9291_v27, %v9289_v38  ;;  %vm2707_vm11 = vcmp.lt.s32.totalorder %v9396_v29, 4 }
 0x1a7   : > { %13432 = vst [vmem:[#allocation24_spill] sm:$0xff] %v9409_v26  ;;  %v1912_v35 = vsub.s32 32, %v1911_v44  ;;  %v1916_v41 = vsub.s32 4294967266, %v1911_v44  ;;  %v9422_v6 = vand.u32 31, %v2788_v34  ;;  %4752 = vmatprep.mubr.bf16.mxu0 %v13346_v40  ;;  %v768_v18 = vmul.f32 %v8095_v58, %v675_v14 }
 0x1a8   : > { %v2007_v61 = vshll.u32 %v9412_v60, 30  ;;  %v2884_v46 = vshrl.u32 %v2883_v48, 23  ;;  %v1913_v23 = vshll.u32 %v9366_v32, %v1911_v44  ;;  %v9433_v27 = vsel %vm2603_vm14, %v2599_v25, 1326507024  ;;  %v13444_v48 = vld [vmem:[#allocation35_spill] sm:$0xff] }
 0x1a9   : > { %13434 = vst [vmem:[#allocation22_spill] sm:$0xff] %v9422_v6  ;;  %v1914_v4 = vshrl.u32 %v1896_v15, %v1912_v35  ;;  %v1917_v53 = vadd.s32 127, %v1916_v41  ;;  %13435 = vst [vmem:[#allocation6_spill] sm:$0xff] %v9433_v27  ;;  %v9438_v38 = vsel %vm2707_vm11, %v9409_v26, 920167782  ;;  %v9448_v32 = vmul.f32 %v13374_v33, %v9352_v16  ;;  %v680_v15 = vpop.permute.xlu1 %679  ;;  %v13441_v35 = vld [vmem:[#allocation8_spill] sm:$0xff] }
 0x1aa   : > { %13436 = vst [vmem:[#allocation18_spill] sm:$0xff] %v9438_v38  ;;  %v9442_v63 = vsel %vm2707_vm11, %v2703_v19, 1326507024  ;;  %v9444_v52 = vsub.s32 %v2004_v1, %v2007_v61  ;;  %v1926_v25 = vsub.s32 4, %v9344_v0  ;;  %v9452_v43 = vsub.s32 32, %v9422_v6 }
 0x1ab   : > { %13437 = vst [vmem:[#allocation12_spill] sm:$0xff] %v9442_v63  ;;  %v1915_v36 = vor.u32 %v1914_v4, %v1913_v23  ;;  %v1918_v12 = vshll.u32 %v1917_v53, 23  ;;  %v806_v5 = vadd.f32 %v8922_v47, %v768_v18  ;;  %vm1842_vm12 = vcmp.lt.s32.totalorder %v13412_v11, 0 }
 0x1ac   : > { %v2010_v17 = vsub.s32 0, %v9444_v52  ;;  %v6829_v28 = vadd.s32 4294967169, %v2884_v46  ;;  %v13438_v1 = vand.u32 2147483647, %v13412_v11  ;;  %v970_v14 = vmul.f32 %v8097_v59, %v891_v37 }
 0x1ad   : > { %v1919_v16 = vor.u32 4788187, %v1918_v12  ;;  %v9464_v19 = vshrl.u32 %v2788_v34, 5  ;;  %v9468_v44 = vshll.u32 %v13339_v3, %v9422_v6  ;;  %v13177_v41 = vand.u32 2147483647, %v13441_v35  ;;  %v895_v26 = vpop.permute.xlu1 %894 }
 0x1ae   : > { %vm9459_vm15 = vcmp.le.f32.partialorder %v13438_v1, 0.7853982  ;;  %v6794_v47 = vmin.u32 %v2010_v17, %v9444_v52  ;;  %v1922_v61 = vcvt.s32.f32 %v1915_v36  ;;  %v9475_v46 = vsel %vm1842_vm12, %v1926_v25, %v9344_v0 }
 0x1af   : > { %v1920_v18 = vand.u32 2147483647, %v1919_v16  ;;  %v1166_v37 = vmul.f32 %v13374_v33, %v1087_v51  ;;  %v9480_v34 = vshrl.u32 %v13331_v45, %v9452_v43  ;;  %v9484_v23 = vshll.u32 %v13331_v45, %v9422_v6 }
 0x1b0   : > { %v2012_v4 = vclz %v6794_v47  ;;  %v2066_v53 = vshrl.u32 %v13350_v2, %v8566_v30  ;;  %v9488_v36 = vadd.s32 1, %v6829_v28  ;;  %v1002_v17 = vadd.f32 %v970_v14, %v806_v5 }
 0x1b1   : > { %v1923_v12 = vmul.f32 %v1922_v61, %v1920_v18  ;;  %v769_v0 = vmul.f32 %v8095_v58, %v680_v15  ;;  %v1929_v51 = vsel %vm9459_vm15, 0, %v9475_v46  ;;  %v2055_v1 = vand.u32 8388607, %v13177_v41 }
 0x1b2   : > { %v6795_v25 = vadd.s32 4294967294, %v2012_v4  ;;  %v2065_v16 = vshll.u32 %v13352_v49, %v8546_v42  ;;  %v2000_v28 = vadd.s32 %v9362_v57, %v9360_v24  ;;  %v9500_v21 = vadd.f32 %v1166_v37, %v1002_v17 }
 0x1b3   : > { %v1924_v47 = vxor.u32 2147483648, %v1923_v12  ;;  %v2064_v5 = vshrl.u32 %v13352_v49, %v8566_v30  ;;  %v2068_v15 = vshll.u32 %v13350_v2, %v8546_v42  ;;  %v2069_v18 = vshrl.u32 %v13354_v13, %v8566_v30 }
 0x1b4   : > { %13442 = vst [vmem:[#allocation28_spill] sm:$0xff] %v9500_v21  ;;  %vm6796_vm6 = vcmp.lt.s32.totalorder %v6795_v25, 0  ;;  %v2067_v14 = vor.u32 %v2066_v53, %v2065_v16  ;;  %vm1946_vm4 = vcmp.lt.s32.totalorder %v13425_v62, 0  ;;  %v2071_v24 = vshll.u32 %v13354_v13, %v8546_v42 }
 0x1b5   : > { %v1925_v61 = vsel %vm1842_vm12, %v1924_v47, %v1923_v12  ;;  %v2015_v46 = vsel %vm6796_vm6, 0, %v6795_v25  ;;  %v2072_v57 = vshrl.u32 %v13339_v3, %v8566_v30  ;;  %v2030_v53 = vsub.s32 4, %v9412_v60  ;;  %v13443_v47 = vld [vmem:[#allocation29_spill] sm:$0xff] }
 0x1b6   : > { %v2016_v37 = vsub.s32 32, %v2015_v46  ;;  %v2020_v4 = vsub.s32 4294967266, %v2015_v46  ;;  %v2056_v17 = vor.u32 8388608, %v2055_v1  ;;  %v1928_v16 = vsel %vm9459_vm15, %v13412_v11, %v1925_v61 }
 0x1b7   : > { %v2070_v41 = vor.u32 %v2069_v18, %v2068_v15  ;;  %v2073_v12 = vor.u32 %v2072_v57, %v2071_v24  ;;  %vm2080_vm5 = vcmp.lt.s32.totalorder %v13443_v47, 1  ;;  %v2017_v25 = vshll.u32 %v9444_v52, %v2015_v46  ;;  %v13445_v46 = vld [vmem:[#allocation37_spill] sm:$0xff]  ;;  %v13446_v24 = vld [vmem:[#allocation34_spill] sm:$0xff] }
 0x1b8   : > { %v2018_v6 = vshrl.u32 %v2000_v28, %v2016_v37  ;;  %v2021_v42 = vadd.s32 127, %v2020_v4  ;;  %vm2082_vm7 = vcmp.lt.s32.totalorder %v13443_v47, 3  ;;  %vm2081_vm8 = vcmp.lt.s32.totalorder %v13443_v47, 2 }
 0x1b9   : > { %v2085_v30 = vsel %vm2083_vm2, %v2073_v12, 2102212464  ;;  %v2088_v1 = vsel %vm2080_vm5, %v2067_v14, %v2070_v41  ;;  %v2090_v15 = vsel %vm2082_vm7, %v2073_v12, %v13444_v48  ;;  %7693 = vcosq.f32 %v1928_v16 }
 0x1ba   : > { %v2019_v18 = vor.u32 %v2018_v6, %v2017_v25  ;;  %v2022_v61 = vshll.u32 %v2021_v42, 23  ;;  %v2091_v52 = vsel %vm2081_vm8, %v2088_v1, %v2090_v15  ;;  %7695 = vsinq.f32 %v1928_v16 }
 0x1bb   : > { %v2092_v28 = vsel %vm2080_vm5, %v2070_v41, %v2073_v12  ;;  %v2094_v57 = vsel %vm2082_vm7, %v13446_v24, %v13445_v46  ;;  %v2096_v37 = vshll.u32 %v2056_v17, 8  ;;  %v2084_v48 = vsel %vm2080_vm5, %v2064_v5, %v2067_v14  ;;  %v13450_v46 = vld [vmem:[#allocation13_spill] sm:$0xff] }
 0x1bc   : > { %v2023_v4 = vor.u32 4788187, %v2022_v61  ;;  %v2086_v6 = vsel %vm2082_vm7, %v2070_v41, %v2085_v30  ;;  %v2095_v16 = vsel %vm2081_vm8, %v2092_v28, %v2094_v57  ;;  %v13447_v17 = vand.u32 2147483647, %v13425_v62  ;;  %v9563_v30 = vld [vmem:[%s13055_s2] ss:$0 sm:$0xff] }
 0x1bd   : > { %v9544_v25 = vmul.u32.u64.low %v2096_v37, %v2095_v16  ;;  %v9545_v42 = vmul.u32.u64.high %v2096_v37, %v2095_v16, %v9544_v25  ;;  %v9547_v12 = vmul.u32.u64.low %v2096_v37, %v2091_v52  ;;  %v9548_v1 = vmul.u32.u64.high %v2096_v37, %v2091_v52, %v9547_v12 }
 0x1be   : > { %vm9553_vm2 = vcmp.le.f32.partialorder %v13447_v17, 0.7853982  ;;  %v2024_v5 = vand.u32 2147483647, %v2023_v4  ;;  %v2026_v14 = vcvt.s32.f32 %v2019_v18  ;;  %v2031_v41 = vsel %vm1946_vm4, %v2030_v53, %v9412_v60  ;;  %v13451_v4 = vld [vmem:[#allocation32_spill] sm:$0xff] }
 0x1bf   : > { %v807_v61 = vadd.f32 %v9563_v30, %v769_v0  ;;  %v971_v52 = vmul.f32 %v8097_v59, %v895_v26  ;;  %v2087_v28 = vsel %vm2081_vm8, %v2084_v48, %v2086_v6  ;;  %v13187_v24 = vand.u32 2147483647, %v13450_v46 }
 0x1c0   : > { %v1933_v57 = vadd.s32 3, %v1929_v51  ;;  %v2027_v18 = vmul.f32 %v2026_v14, %v2024_v5  ;;  %v2170_v16 = vshrl.u32 %v13350_v2, %v13451_v4  ;;  %v2173_v60 = vshrl.u32 %v13354_v13, %v13451_v4  ;;  %v13452_v51 = vld [vmem:[#allocation31_spill] sm:$0xff] }
 0x1c1   : > { %v2033_v53 = vsel %vm9553_vm2, 0, %v2031_v41  ;;  %v2987_v0 = vand.u32 2139095040, %v9500_v21  ;;  %vm2105_vm9 = vc.u32 %v9545_v42, %v9547_v12  ;;  %v2106_v26 = vadd.s32 1, %v9548_v1 }
 0x1c2   : > { %v2028_v47 = vxor.u32 2147483648, %v2027_v18  ;;  %v2103_v48 = vmul.u32 %v2096_v37, %v2087_v28  ;;  %v2169_v6 = vshll.u32 %v13352_v49, %v13452_v51  ;;  %v2172_v25 = vshll.u32 %v13350_v2, %v13452_v51 }
 0x1c3   : > { %v2107_v17 = vsel %vm2105_vm9, %v2106_v26, %v9548_v1  ;;  %v2159_v5 = vand.u32 8388607, %v13187_v24  ;;  %v2175_v14 = vshll.u32 %v13354_v13, %v13452_v51  ;;  %v2176_v41 = vshrl.u32 %v13339_v3, %v13451_v4  ;;  %v7694_v21 = vpop.eup %7693 }
 0x1c4   : > { %v2029_v37 = vsel %vm1946_vm4, %v2028_v47, %v2027_v18  ;;  %v2108_v28 = vadd.s32 %v2107_v17, %v2103_v48  ;;  %v2171_v63 = vor.u32 %v2170_v16, %v2169_v6  ;;  %v2174_v38 = vor.u32 %v2173_v60, %v2172_v25  ;;  %v7696_v29 = vpop.eup %7695  ;;  %v13455_v60 = vld [vmem:[#allocation2_spill] sm:$0xff] }
 0x1c5   : > { %v1934_v55 = vand.u32 3, %v1933_v57  ;;  %v2032_v1 = vsel %vm9553_vm2, %v13425_v62, %v2029_v37  ;;  %v1003_v26 = vadd.f32 %v971_v52, %v807_v61  ;;  %v2177_v24 = vor.u32 %v2176_v41, %v2175_v14  ;;  %v13454_v61 = vld [vmem:[#allocation40_spill] sm:$0xff] }
 0x1c6   : > { %7697 = vcosq.f32 %v2032_v1  ;;  %v2037_v51 = vadd.s32 3, %v2033_v53  ;;  %v2988_v10 = vshrl.u32 %v2987_v0, 23  ;;  %v2109_v54 = vadd.s32 536870912, %v2108_v28  ;;  %v13456_v53 = vld [vmem:[#allocation38_spill] sm:$0xff] }
 0x1c7   : > { %v1940_v8 = vxor.u32 2147483648, %v7694_v21  ;;  %7699 = vsinq.f32 %v2032_v1  ;;  %v2160_v27 = vor.u32 8388608, %v2159_v5  ;;  %vm2184_vm12 = vcmp.lt.s32.totalorder %v13453_v56, 1 }
 0x1c8   : > { %v1937_v18 = vxor.u32 2147483648, %v7696_v29  ;;  %v9597_v16 = vshrl.u32 %v2109_v54, 30  ;;  %vm2186_vm15 = vcmp.lt.s32.totalorder %v13453_v56, 3  ;;  %v2192_v15 = vsel %vm2184_vm12, %v2171_v63, %v2174_v38 }
 0x1c9   : > { %vm2185_vm6 = vcmp.lt.s32.totalorder %v13453_v56, 2  ;;  %v2194_v52 = vsel %vm2186_vm15, %v2177_v24, %v13454_v61  ;;  %v2196_v57 = vsel %vm2184_vm12, %v2174_v38, %v2177_v24  ;;  %v2198_v54 = vsel %vm2186_vm15, %v13456_v53, %v13455_v60 }
 0x1ca   : > { %vm1936_vm4 = vcmp.eq.s32.totalorder %v1934_v55, 0  ;;  %vm1939_vm5 = vcmp.eq.s32.totalorder %v1934_v55, 2  ;;  %v2111_v0 = vshll.u32 %v9597_v16, 30  ;;  %v2199_v47 = vsel %vm2185_vm6, %v2196_v57, %v2198_v54 }
 0x1cb   : > { %v2168_v48 = vshrl.u32 %v13352_v49, %v13451_v4  ;;  %v2189_v6 = vsel %vm2187_vm10, %v2177_v24, 2102212464  ;;  %v2195_v25 = vsel %vm2185_vm6, %v2192_v15, %v2194_v52  ;;  %v2200_v17 = vshll.u32 %v2160_v27, 8 }
 0x1cc   : > { %v1941_v5 = vsel %vm1939_vm5, %v1940_v8, %v7696_v29  ;;  %v2038_v14 = vand.u32 3, %v2037_v51  ;;  %v6833_v41 = vadd.s32 4294967169, %v2988_v10  ;;  %v9621_v37 = vsub.s32 %v2108_v28, %v2111_v0 }
 0x1cd   : > { %v1938_v1 = vsel %vm1936_vm4, %v7694_v21, %v1937_v18  ;;  %v2188_v61 = vsel %vm2184_vm12, %v2168_v48, %v2171_v63  ;;  %v9625_v57 = vmul.u32.u64.low %v2200_v17, %v2199_v47  ;;  %v9626_v60 = vmul.u32.u64.high %v2200_v17, %v2199_v47, %v9625_v57  ;;  %v685_v18 = vpop.permute.xlu0 %684 }
 0x1ce   : > { %v2114_v4 = vsub.s32 0, %v9621_v37  ;;  %v2190_v24 = vsel %vm2186_vm15, %v2174_v38, %v2189_v6  ;;  %v9631_v53 = vmul.u32.u64.low %v2200_v17, %v2195_v25  ;;  %v9632_v15 = vmul.u32.u64.high %v2200_v17, %v2195_v25, %v9631_v53 }
 0x1cf   : > { %v9637_v10 = vor.u32 %v9480_v34, %v9468_v44  ;;  %v9641_v8 = vshrl.u32 %v13335_v7, %v9452_v43  ;;  %vm2891_vm10 = vcmp.gt.s32.totalorder %v9488_v36, 0  ;;  %vm1932_vm7 = vweird.f32 %v13412_v11 }
 0x1d0   : > { %v7698_v21 = vpop.eup %7697  ;;  %vm1935_vm8 = vcmp.lt.s32.totalorder %v1934_v55, 2  ;;  %vm2036_vm2 = vweird.f32 %v13425_v62  ;;  %v9647_v29 = vadd.f32 %v9448_v32, %v1003_v26  ;;  %v6798_v27 = vmin.u32 %v2114_v4, %v9621_v37  ;;  %v899_v55 = vpop.permute.xlu1 %898 }
 0x1d1   : > { %v7700_v38 = vpop.eup %7699  ;;  %v1942_v63 = vsel %vm1935_vm8, %v1938_v1, %v1941_v5  ;;  %v2044_v44 = vxor.u32 2147483648, %v7698_v21  ;;  %v2994_v34 = vadd.s32 1, %v6833_v41  ;;  %v2191_v28 = vsel %vm2185_vm6, %v2188_v61, %v2190_v24 }
 0x1d2   : > { %13457 = vst [vmem:[#allocation25_spill] sm:$0xff] %v9647_v29  ;;  %v2041_v51 = vxor.u32 2147483648, %v7700_v38  ;;  %vm2043_vm9 = vcmp.eq.s32.totalorder %v2038_v14, 2  ;;  %v2116_v52 = vclz %v6798_v27  ;;  %vm2209_vm12 = vc.u32 %v9626_v60, %v9631_v53 }
 0x1d3   : > { %vm2039_vm15 = vcmp.lt.s32.totalorder %v2038_v14, 2  ;;  %vm2040_vm4 = vcmp.eq.s32.totalorder %v2038_v14, 0  ;;  %v2045_v32 = vsel %vm2043_vm9, %v2044_v44, %v7700_v38  ;;  %v2210_v26 = vadd.s32 1, %v9632_v15 }
 0x1d4   : > { %v1943_v54 = vsel %vm1932_vm7, nan, %v1942_v63  ;;  %v2042_v0 = vsel %vm2040_vm4, %v7698_v21, %v2041_v51  ;;  %v6799_v47 = vadd.s32 4294967294, %v2116_v52  ;;  %v2207_v56 = vmul.u32 %v2200_v17, %v2191_v28  ;;  %v1095_v21 = vpop.permute.xlu1 %1094 }
 0x1d5   : > { %v2046_v48 = vsel %vm2039_vm15, %v2042_v0, %v2045_v32  ;;  %v3091_v6 = vand.u32 2139095040, %v9647_v29  ;;  %v770_v25 = vmul.f32 %v8095_v58, %v685_v18  ;;  %v2211_v5 = vsel %vm2209_vm12, %v2210_v26, %v9632_v15 }
 0x1d6   : > { %v2892_v14 = vsel %vm2891_vm10, %v9488_v36, 0  ;;  %v2047_v41 = vsel %vm2036_vm2, nan, %v2046_v48  ;;  %vm6800_vm6 = vcmp.lt.s32.totalorder %v6799_v47, 0  ;;  %v2212_v1 = vadd.s32 %v2211_v5, %v2207_v56 }
 0x1d7   : > { %v4552_v17 = vsel %vm1215_vm3, %v13412_v11, %v1943_v54  ;;  %v4553_v61 = vsel %vm1215_vm3, %v13425_v62, %v2047_v41  ;;  %vm2995_vm5 = vcmp.gt.s32.totalorder %v2994_v34, 0  ;;  %v2119_v57 = vsel %vm6800_vm6, 0, %v6799_v47 }
 0x1d8   : > { %v4581_v4 = vpack.c.bf16 %v4553_v61, %v4552_v17  ;;  %v2104_v24 = vadd.s32 %v9547_v12, %v9545_v42  ;;  %v2120_v36 = vsub.s32 32, %v2119_v57  ;;  %v2124_v15 = vsub.s32 4294967266, %v2119_v57  ;;  %v690_v56 = vpop.permute.xlu1 %689 }
 0x1d9   : > { %v3092_v27 = vshrl.u32 %v3091_v6, 23  ;;  %v808_v38 = vadd.f32 %v9563_v30, %v770_v25  ;;  %v2213_v63 = vadd.s32 536870912, %v2212_v1  ;;  %v972_v44 = vmul.f32 %v8097_v59, %v899_v55 }
 0x1da   : > { %v2807_v11 = vor.u32 %v9641_v8, %v9484_v23  ;;  %4753 = vmatmul.mubr.bf16.gmra.mrb[12].mxu0 %v4581_v4  ;;  %v2121_v62 = vshll.u32 %v9621_v37, %v2119_v57  ;;  %v2122_v28 = vshrl.u32 %v2104_v24, %v2120_v36  ;;  %v2125_v51 = vadd.s32 127, %v2124_v15 }
 0x1db   : > { %v9678_v18 = vand.u32 31, %v2892_v14  ;;  %v2996_v42 = vsel %vm2995_vm5, %v2994_v34, 0  ;;  %4762 = vmatprep.mubr.bf16.mxu0 %v13346_v40  ;;  %v9682_v12 = vshrl.u32 %v2213_v63, 30  ;;  %v1168_v52 = vmul.f32 %v13374_v33, %v1095_v21 }
 0x1dc   : > { %vm2811_vm10 = vcmp.lt.s32.totalorder %v9464_v19, 4  ;;  %v9688_v23 = vmul.f32 %v13374_v33, %v9385_v39  ;;  %v2123_v8 = vor.u32 %v2122_v28, %v2121_v62  ;;  %v2126_v37 = vshll.u32 %v2125_v51, 23 }
 0x1dd   : > { %v9693_v55 = vsel %vm2811_vm10, %v9637_v10, 920167782  ;;  %v6837_v34 = vadd.s32 4294967169, %v3092_v27  ;;  %v2215_v32 = vshll.u32 %v9682_v12, 30  ;;  %v1004_v26 = vadd.f32 %v972_v44, %v808_v38  ;;  %v13467_v27 = vld [vmem:[#allocation39_spill] sm:$0xff] }
 0x1de   : > { %v9698_v54 = vsel %vm2811_vm10, %v2807_v11, 1326507024  ;;  %v9700_v0 = vshrl.u32 %v2892_v14, 5  ;;  %v9702_v47 = vand.u32 31, %v2996_v42  ;;  %v2127_v39 = vor.u32 4788187, %v2126_v37 }
 0x1df   : > { %v9705_v48 = vsub.s32 32, %v9678_v18  ;;  %v2134_v6 = vsub.s32 4, %v9597_v16  ;;  %v9708_v25 = vsub.s32 %v2212_v1, %v2215_v32  ;;  %v9710_v5 = vadd.f32 %v1168_v52, %v1004_v26  ;;  %v13465_v1 = vld [vmem:[#allocation27_spill] sm:$0xff]  ;;  %v13468_v52 = vld [vmem:[#allocation36_spill] sm:$0xff] }
 0x1e0   : > { %13458 = vst [vmem:[#allocation8_spill] sm:$0xff] %v9700_v0  ;;  %13459 = vst [vmem:[#allocation29_spill] sm:$0xff] %v9702_v47  ;;  %v13461_v41 = vand.u32 2147483647, %v13441_v35  ;;  %vm2050_vm8 = vcmp.lt.s32.totalorder %v13441_v35, 0  ;;  %v2130_v61 = vcvt.s32.f32 %v2123_v8  ;;  %v9719_v57 = vshrl.u32 %v2996_v42, 5  ;;  %v903_v42 = vpop.permute.xlu1 %902 }
 0x1e1   : > { %13460 = vst [vmem:[#allocation35_spill] sm:$0xff] %v9710_v5  ;;  %v2128_v14 = vand.u32 2147483647, %v2127_v39  ;;  %v9721_v4 = vadd.s32 1, %v6837_v34  ;;  %v2218_v24 = vsub.s32 0, %v9708_v25  ;;  %v9726_v15 = vsub.s32 32, %v9702_v47 }
 0x1e2   : > { %vm9714_vm7 = vcmp.le.f32.partialorder %v13461_v41, 0.7853982  ;;  %13464 = vst [vmem:[#allocation37_spill] sm:$0xff] %v9719_v57  ;;  %v13195_v36 = vand.u32 2147483647, %v13465_v1  ;;  %v2274_v38 = vshrl.u32 %v13350_v2, %v13467_v27  ;;  %v2277_v63 = vshrl.u32 %v13354_v13, %v13467_v27 }
 0x1e3   : > { %13466 = vst [vmem:[#allocation34_spill] sm:$0xff] %v9726_v15  ;;  %v2131_v21 = vmul.f32 %v2130_v61, %v2128_v14  ;;  %v9734_v44 = vshll.u32 %v13339_v3, %v9702_v47  ;;  %v2135_v11 = vsel %vm2050_vm8, %v2134_v6, %v9597_v16  ;;  %v6802_v62 = vmin.u32 %v2218_v24, %v9708_v25 }
 0x1e4   : > { %v3195_v28 = vand.u32 2139095040, %v9710_v5  ;;  %v2273_v8 = vshll.u32 %v13352_v49, %v13468_v52  ;;  %v2276_v37 = vshll.u32 %v13350_v2, %v13468_v52  ;;  %v2280_v34 = vshrl.u32 %v13339_v3, %v13467_v27 }
 0x1e5   : > { %v2132_v51 = vxor.u32 2147483648, %v2131_v21  ;;  %v9749_v32 = vshll.u32 %v13331_v45, %v9702_v47  ;;  %v2220_v16 = vclz %v6802_v62  ;;  %v771_v26 = vmul.f32 %v8095_v58, %v690_v56 }
 0x1e6   : > { %v2263_v39 = vand.u32 8388607, %v13195_v36  ;;  %v2275_v41 = vor.u32 %v2274_v38, %v2273_v8  ;;  %v2278_v14 = vor.u32 %v2277_v63, %v2276_v37  ;;  %v2279_v61 = vshll.u32 %v13354_v13, %v13468_v52 }
 0x1e7   : > { %v2133_v6 = vsel %vm2050_vm8, %v2132_v51, %v2131_v21  ;;  %v2137_v62 = vsel %vm9714_vm7, 0, %v2135_v11  ;;  %v6803_v5 = vadd.s32 4294967294, %v2220_v16  ;;  %v973_v56 = vmul.f32 %v8097_v59, %v903_v42 }
 0x1e8   : > { %v2136_v24 = vsel %vm9714_vm7, %v13441_v35, %v2133_v6  ;;  %v2208_v36 = vadd.s32 %v9631_v53, %v9626_v60  ;;  %v3196_v29 = vshrl.u32 %v3195_v28, 23  ;;  %v2272_v21 = vshrl.u32 %v13352_v49, %v13467_v27 }
 0x1e9   : > { %v2281_v38 = vor.u32 %v2280_v34, %v2279_v61  ;;  %vm2154_vm2 = vcmp.lt.s32.totalorder %v13450_v46, 0  ;;  %vm6804_vm9 = vcmp.lt.s32.totalorder %v6803_v5, 0  ;;  %v2264_v63 = vor.u32 8388608, %v2263_v39  ;;  %v13477_v61 = vld [vmem:[#allocation16_spill] sm:$0xff] }
 0x1ea   : > { %vm2288_vm12 = vcmp.lt.s32.totalorder %v8879_v20, 1  ;;  %vm2290_vm15 = vcmp.lt.s32.totalorder %v8879_v20, 3  ;;  %7701 = vcosq.f32 %v2136_v24  ;;  %v2223_v17 = vsel %vm6804_vm9, 0, %v6803_v5 }
 0x1eb   : > { %v2296_v11 = vsel %vm2288_vm12, %v2275_v41, %v2278_v14  ;;  %v2298_v60 = vsel %vm2290_vm15, %v2281_v38, %v9120_v31  ;;  %v2224_v53 = vsub.s32 32, %v2223_v17  ;;  %v2228_v27 = vsub.s32 4294967266, %v2223_v17 }
 0x1ec   : > { %vm2289_vm4 = vcmp.lt.s32.totalorder %v8879_v20, 2  ;;  %v2293_v28 = vsel %vm2291_vm1, %v2281_v38, 2102212464  ;;  %v2225_v51 = vshll.u32 %v9708_v25, %v2223_v17  ;;  %v2300_v5 = vsel %vm2288_vm12, %v2278_v14, %v2281_v38 }
 0x1ed   : > { %v2299_v42 = vsel %vm2289_vm4, %v2296_v11, %v2298_v60  ;;  %v2302_v31 = vsel %vm2290_vm15, %v8908_v50, %v9156_v22  ;;  %v2226_v52 = vshrl.u32 %v2208_v36, %v2224_v53  ;;  %v2229_v8 = vadd.s32 127, %v2228_v27 }
 0x1ee   : > { %v2303_v37 = vsel %vm2289_vm4, %v2300_v5, %v2302_v31  ;;  %v2304_v34 = vshll.u32 %v2264_v63, 8  ;;  %7703 = vsinq.f32 %v2136_v24  ;;  %v2238_v25 = vsub.s32 4, %v9682_v12 }
 0x1ef   : > { %v2292_v16 = vsel %vm2288_vm12, %v2272_v21, %v2275_v41  ;;  %v2294_v39 = vsel %vm2290_vm15, %v2278_v14, %v2293_v28  ;;  %v13469_v6 = vand.u32 2147483647, %v13450_v46  ;;  %v2227_v50 = vor.u32 %v2226_v52, %v2225_v51  ;;  %v13472_v41 = vld [vmem:[#allocation30_spill] sm:$0xff]  ;;  %v13474_v51 = vld [vmem:[#allocation4_spill] sm:$0xff] }
 0x1f0   : > { %v2230_v22 = vshll.u32 %v2229_v8, 23  ;;  %v9801_v36 = vmul.u32.u64.low %v2304_v34, %v2303_v37  ;;  %v9802_v38 = vmul.u32.u64.high %v2304_v34, %v2303_v37, %v9801_v36  ;;  %v2141_v24 = vadd.s32 3, %v2137_v62  ;;  %v13473_v28 = vld [vmem:[#allocation14_spill] sm:$0xff] }
 0x1f1   : > { %vm9797_vm1 = vcmp.le.f32.partialorder %v13469_v6, 0.7853982  ;;  %v9804_v63 = vmul.u32.u64.low %v2304_v34, %v2299_v42  ;;  %v9805_v17 = vmul.u32.u64.high %v2304_v34, %v2299_v42, %v9804_v63  ;;  %v13200_v21 = vand.u32 2147483647, %v13472_v41 }
 0x1f2   : > { %v2231_v11 = vor.u32 4788187, %v2230_v22  ;;  %v6841_v14 = vadd.s32 4294967169, %v3196_v29  ;;  %v809_v60 = vadd.f32 %v9563_v30, %v771_v26  ;;  %v2295_v53 = vsel %vm2289_vm4, %v2292_v16, %v2294_v39 }
 0x1f3   : > { %v2239_v27 = vsel %vm2154_vm2, %v2238_v25, %v9682_v12  ;;  %v2377_v62 = vshll.u32 %v13352_v49, %v13473_v28  ;;  %v2378_v42 = vshrl.u32 %v13350_v2, %v13474_v51  ;;  %v2381_v5 = vshrl.u32 %v13354_v13, %v13474_v51 }
 0x1f4   : > { %v2232_v31 = vand.u32 2147483647, %v2231_v11  ;;  %v2234_v29 = vcvt.s32.f32 %v2227_v50  ;;  %vm2313_vm6 = vc.u32 %v9802_v38, %v9804_v63  ;;  %v2380_v20 = vshll.u32 %v13350_v2, %v13473_v28  ;;  %v7702_v26 = vpop.eup %7701 }
 0x1f5   : > { %v2311_v52 = vmul.u32 %v2304_v34, %v2295_v53  ;;  %v2314_v12 = vadd.s32 1, %v9805_v17  ;;  %v2367_v8 = vand.u32 8388607, %v13200_v21  ;;  %v2379_v37 = vor.u32 %v2378_v42, %v2377_v62  ;;  %v13475_v21 = vld [vmem:[#allocation42_spill] sm:$0xff] }
 0x1f6   : > { %v2235_v25 = vmul.f32 %v2234_v29, %v2232_v31  ;;  %v2382_v16 = vor.u32 %v2381_v5, %v2380_v20  ;;  %v2383_v39 = vshll.u32 %v13354_v13, %v13473_v28  ;;  %v2384_v6 = vshrl.u32 %v13339_v3, %v13474_v51 }
 0x1f7   : > { %v9832_v50 = vand.u32 3, %v2141_v24  ;;  %v9834_v22 = vadd.s32 1, %v6841_v14  ;;  %v1005_v36 = vadd.f32 %v973_v56, %v809_v60  ;;  %v2315_v34 = vsel %vm2313_vm6, %v2314_v12, %v9805_v17 }
 0x1f8   : > { %v2236_v11 = vxor.u32 2147483648, %v2235_v25  ;;  %v2316_v53 = vadd.s32 %v2315_v34, %v2311_v52  ;;  %v2385_v47 = vor.u32 %v2384_v6, %v2383_v39  ;;  %vm2392_vm5 = vcmp.lt.s32.totalorder %v13475_v21, 1  ;;  %v7704_v62 = vpop.eup %7703  ;;  %v695_v6 = vpop.permute.xlu0 %694 }
 0x1f9   : > { %v2241_v42 = vsel %vm9797_vm1, 0, %v2239_v27  ;;  %v2368_v28 = vor.u32 8388608, %v2367_v8  ;;  %v2376_v5 = vshrl.u32 %v13352_v49, %v13474_v51  ;;  %v2400_v24 = vsel %vm2392_vm5, %v2379_v37, %v2382_v16  ;;  %v13476_v27 = vld [vmem:[#allocation43_spill] sm:$0xff] }
 0x1fa   : > { %v2237_v56 = vsel %vm2154_vm2, %v2236_v11, %v2235_v25  ;;  %v2317_v17 = vadd.s32 536870912, %v2316_v53  ;;  %vm2393_vm7 = vcmp.lt.s32.totalorder %v13475_v21, 2  ;;  %vm2394_vm8 = vcmp.lt.s32.totalorder %v13475_v21, 3  ;;  %v13478_v8 = vld [vmem:[#allocation7_spill] sm:$0xff] }
 0x1fb   : > { %v2240_v14 = vsel %vm9797_vm1, %v13450_v46, %v2237_v56  ;;  %v2397_v60 = vsel %vm2395_vm13, %v2385_v47, 2102212464  ;;  %v2402_v51 = vsel %vm2394_vm8, %v2385_v47, %v13476_v27  ;;  %v2404_v31 = vsel %vm2392_vm5, %v2382_v16, %v2385_v47 }
 0x1fc   : > { %v2148_v29 = vxor.u32 2147483648, %v7702_v26  ;;  %7705 = vcosq.f32 %v2240_v14  ;;  %v9858_v20 = vshrl.u32 %v2317_v17, 30  ;;  %v2403_v52 = vsel %vm2393_vm7, %v2400_v24, %v2402_v51  ;;  %v9907_v21 = vpop.permute.xlu0 %704 }
 0x1fd   : > { %v2145_v12 = vxor.u32 2147483648, %v7704_v62  ;;  %7707 = vsinq.f32 %v2240_v14  ;;  %v2406_v25 = vsel %vm2394_vm8, %v13478_v8, %v13477_v61  ;;  %v2408_v39 = vshll.u32 %v2368_v28, 8 }
 0x1fe   : > { %v2319_v34 = vshll.u32 %v9858_v20, 30  ;;  %v2396_v47 = vsel %vm2392_vm5, %v2376_v5, %v2379_v37  ;;  %v2398_v11 = vsel %vm2394_vm8, %v2382_v16, %v2397_v60  ;;  %v2407_v24 = vsel %vm2393_vm7, %v2404_v31, %v2406_v25  ;;  %v907_v16 = vpop.permute.xlu1 %906 }
 0x1ff   : > { %v9873_v56 = vmul.u32.u64.low %v2408_v39, %v2407_v24  ;;  %v9874_v17 = vmul.u32.u64.high %v2408_v39, %v2407_v24, %v9873_v56  ;;  %v9876_v14 = vmul.u32.u64.low %v2408_v39, %v2403_v52  ;;  %v9877_v27 = vmul.u32.u64.high %v2408_v39, %v2403_v52, %v9876_v14 }
 0x200   : > { %v3011_v28 = vshrl.u32 %v13331_v45, %v9726_v15  ;;  %v9884_v51 = vshrl.u32 %v13335_v7, %v9726_v15  ;;  %v2245_v37 = vadd.s32 3, %v2241_v42  ;;  %v9886_v5 = vsub.s32 %v2316_v53, %v2319_v34 }
 0x201   : > { %vm3099_vm13 = vcmp.gt.s32.totalorder %v9721_v4, 0  ;;  %vm2144_vm2 = vcmp.eq.s32.totalorder %v9832_v50, 0  ;;  %vm2147_vm9 = vcmp.eq.s32.totalorder %v9832_v50, 2  ;;  %v772_v60 = vmul.f32 %v8095_v58, %v695_v6 }
 0x202   : > { %v2146_v31 = vsel %vm2144_vm2, %v7702_v26, %v2145_v12  ;;  %v2149_v52 = vsel %vm2147_vm9, %v2148_v29, %v7704_v62  ;;  %v2322_v61 = vsub.s32 0, %v9886_v5  ;;  %v2399_v8 = vsel %vm2393_vm7, %v2396_v47, %v2398_v11  ;;  %v1103_v34 = vpop.permute.xlu1 %1102 }
 0x203   : > { %vm3203_vm12 = vcmp.gt.s32.totalorder %v9834_v22, 0  ;;  %v9897_v53 = vadd.f32 %v9688_v23, %v1005_v36  ;;  %vm2417_vm15 = vc.u32 %v9874_v17, %v9876_v14  ;;  %v2418_v42 = vadd.s32 1, %v9877_v27 }
 0x204   : > { %v9903_v25 = vor.u32 %v3011_v28, %v9734_v44  ;;  %vm2143_vm4 = vcmp.lt.s32.totalorder %v9832_v50, 2  ;;  %v2246_v26 = vand.u32 3, %v2245_v37  ;;  %v6806_v62 = vmin.u32 %v2322_v61, %v9886_v5 }
 0x205   : > { %13479 = vst [vmem:[#allocation13_spill] sm:$0xff] %v9897_v53  ;;  %v3100_v23 = vsel %vm3099_vm13, %v9721_v4, 0  ;;  %v2150_v36 = vsel %vm2143_vm4, %v2146_v31, %v2149_v52  ;;  %v2415_v29 = vmul.u32 %v2408_v39, %v2399_v8  ;;  %v2419_v12 = vsel %vm2417_vm15, %v2418_v42, %v9877_v27  ;;  %v9927_v8 = vpop.permute.xlu0 %714 }
 0x206   : > { %13480 = vst [vmem:[#allocation32_spill] sm:$0xff] %v9903_v25  ;;  %v7706_v6 = vpop.eup %7705  ;;  %vm2140_vm1 = vweird.f32 %v13441_v35  ;;  %vm2244_vm6 = vweird.f32 %v13450_v46  ;;  %v9918_v44 = vsel %vm3203_vm12, %v9834_v22, 0  ;;  %v2324_v50 = vclz %v6806_v62 }
 0x207   : > { %v7708_v47 = vpop.eup %7707  ;;  %v2252_v11 = vxor.u32 2147483648, %v7706_v6  ;;  %v3299_v4 = vand.u32 2139095040, %v9897_v53  ;;  %v810_v39 = vadd.f32 %v9563_v30, %v772_v60  ;;  %v2420_v24 = vadd.s32 %v2419_v12, %v2415_v29 }
 0x208   : > { %v2151_v56 = vsel %vm2140_vm1, nan, %v2150_v36  ;;  %v2249_v27 = vxor.u32 2147483648, %v7708_v47  ;;  %vm2251_vm5 = vcmp.eq.s32.totalorder %v2246_v26, 2  ;;  %v6807_v28 = vadd.s32 4294967294, %v2324_v50  ;;  %v700_v50 = vpop.permute.xlu1 %699 }
 0x209   : > { %vm2248_vm7 = vcmp.eq.s32.totalorder %v2246_v26, 0  ;;  %v2253_v37 = vsel %vm2251_vm5, %v2252_v11, %v7708_v47  ;;  %v9923_v31 = vand.u32 31, %v9918_v44  ;;  %v2421_v22 = vadd.s32 536870912, %v2420_v24 }
 0x20a   : > { %vm2247_vm8 = vcmp.lt.s32.totalorder %v2246_v26, 2  ;;  %v2250_v52 = vsel %vm2248_vm7, %v7706_v6, %v2249_v27  ;;  %v2312_v61 = vadd.s32 %v9804_v63, %v9802_v38  ;;  %vm6808_vm13 = vcmp.lt.s32.totalorder %v6807_v28, 0 }
 0x20b   : > { %13481 = vst [vmem:[#allocation31_spill] sm:$0xff] %v9923_v31  ;;  %v2254_v60 = vsel %vm2247_vm8, %v2250_v52, %v2253_v37  ;;  %v4554_v42 = vsel %vm1215_vm3, %v13441_v35, %v2151_v56  ;;  %v2327_v62 = vsel %vm6808_vm13, 0, %v6807_v28  ;;  %v9932_v36 = vshrl.u32 %v2421_v22, 30 }
 0x20c   : > { %v2255_v29 = vsel %vm2244_vm6, nan, %v2254_v60  ;;  %v2328_v12 = vsub.s32 32, %v2327_v62  ;;  %v2332_v26 = vsub.s32 4294967266, %v2327_v62  ;;  %v974_v6 = vmul.f32 %v8097_v59, %v907_v16 }
 0x20d   : > { %v4555_v38 = vsel %vm1215_vm3, %v13450_v46, %v2255_v29  ;;  %v2342_v63 = vsub.s32 4, %v9858_v20  ;;  %v2423_v47 = vshll.u32 %v9932_v36, 30  ;;  %v1170_v35 = vmul.f32 %v13374_v33, %v1103_v34  ;;  %v9951_v34 = vpop.permute.xlu0 %724 }
 0x20e   : > { %v4582_v11 = vpack.c.bf16 %v4555_v38, %v4554_v42  ;;  %v2329_v56 = vshll.u32 %v9886_v5, %v2327_v62  ;;  %v2330_v27 = vshrl.u32 %v2312_v61, %v2328_v12  ;;  %v2333_v28 = vadd.s32 127, %v2332_v26  ;;  %v911_v42 = vpop.permute.xlu1 %910 }
 0x20f   : > { %v3015_v37 = vor.u32 %v9884_v51, %v9749_v32  ;;  %vm3019_vm2 = vcmp.lt.s32.totalorder %v9719_v57, 4  ;;  %v3300_v16 = vshrl.u32 %v3299_v4, 23  ;;  %v9947_v22 = vsub.s32 %v2420_v24, %v2423_v47 }
 0x210   : > { %v9949_v46 = vand.u32 31, %v3100_v23  ;;  %4763 = vmatmul.mubr.bf16.gmra.mrb[16].mxu0 %v4582_v11  ;;  %v2331_v52 = vor.u32 %v2330_v27, %v2329_v56  ;;  %v2334_v60 = vshll.u32 %v2333_v28, 23  ;;  %v1006_v29 = vadd.f32 %v974_v6, %v810_v39 }
 0x211   : > { %v9956_v5 = vsel %vm3019_vm2, %v9903_v25, 920167782  ;;  %v9958_v61 = vshrl.u32 %v3100_v23, 5  ;;  %4772 = vmatprep.mubr.bf16.mxu0 %v13346_v40  ;;  %vm2258_vm9 = vcmp.lt.s32.totalorder %v13465_v1, 0  ;;  %v2426_v32 = vsub.s32 0, %v9947_v22 }
 0x212   : > { %13482 = vst [vmem:[#allocation3_spill] sm:$0xff] %v9949_v46  ;;  %13483 = vst [vmem:[#allocation40_spill] sm:$0xff] %v9956_v5  ;;  %v9964_v51 = vsub.s32 32, %v9923_v31  ;;  %v2335_v4 = vor.u32 4788187, %v2334_v60  ;;  %v2343_v39 = vsel %vm2258_vm9, %v2342_v63, %v9858_v20  ;;  %v9969_v24 = vadd.f32 %v1170_v35, %v1006_v29 }
 0x213   : > { %13484 = vst [vmem:[#allocation2_spill] sm:$0xff] %v9958_v61  ;;  %v9973_v23 = vsel %vm3019_vm2, %v3015_v37, 1326507024  ;;  %v6845_v62 = vadd.s32 4294967169, %v3300_v16  ;;  %v6810_v12 = vmin.u32 %v2426_v32, %v9947_v22  ;;  %v773_v26 = vmul.f32 %v8095_v58, %v700_v50 }
 0x214   : > { %13485 = vst [vmem:[#allocation38_spill] sm:$0xff] %v9964_v51  ;;  %13486 = vst [vmem:[#allocation27_spill] sm:$0xff] %v9969_v24  ;;  %v9978_v6 = vsub.s32 32, %v9949_v46  ;;  %v13489_v38 = vand.u32 2147483647, %v13465_v1  ;;  %v2338_v63 = vcvt.s32.f32 %v2331_v52  ;;  %v9988_v35 = vshll.u32 %v13339_v3, %v9923_v31  ;;  %v1107_v52 = vpop.permute.xlu0 %1106 }
 0x215   : > { %13487 = vst [vmem:[#allocation39_spill] sm:$0xff] %v9973_v23  ;;  %v2336_v20 = vand.u32 2147483647, %v2335_v4  ;;  %v2428_v56 = vclz %v6810_v12  ;;  %v975_v50 = vmul.f32 %v8097_v59, %v911_v42  ;;  %v9995_v27 = vshrl.u32 %v13331_v45, %v9964_v51  ;;  %v13492_v12 = vld [vmem:[#allocation33_spill] sm:$0xff] }
 0x216   : > { %13488 = vst [vmem:[#allocation36_spill] sm:$0xff] %v9978_v6  ;;  %vm9982_vm12 = vcmp.le.f32.partialorder %v13489_v38, 0.7853982  ;;  %v9999_v28 = vshll.u32 %v13331_v45, %v9923_v31  ;;  %v3403_v16 = vand.u32 2139095040, %v9969_v24  ;;  %v10004_v60 = vshrl.u32 %v13335_v7, %v9964_v51  ;;  %v13493_v31 = vld [vmem:[#allocation15_spill] sm:$0xff]  ;;  %v13511_v23 = vld [vmem:[#allocation49_spill] sm:$0xff] }
 0x217   : > { %v2345_v11 = vsel %vm9982_vm12, 0, %v2343_v39  ;;  %v2339_v37 = vmul.f32 %v2338_v63, %v2336_v20  ;;  %v10006_v29 = vadd.s32 1, %v6845_v62  ;;  %v6811_v32 = vadd.s32 4294967294, %v2428_v56 }
 0x218   : > { %v811_v4 = vadd.f32 %v9563_v30, %v773_v26  ;;  %v2349_v42 = vadd.s32 3, %v2345_v11  ;;  %vm2362_vm15 = vcmp.lt.s32.totalorder %v13472_v41, 0  ;;  %v2416_v20 = vadd.s32 %v9876_v14, %v9874_v17 }
 0x219   : > { %v2340_v39 = vxor.u32 2147483648, %v2339_v37  ;;  %vm6812_vm4 = vcmp.lt.s32.totalorder %v6811_v32, 0  ;;  %v1171_v24 = vmul.f32 %v13374_v33, %v1107_v52  ;;  %v3404_v56 = vshrl.u32 %v3403_v16, 23  ;;  %v13495_v52 = vld [vmem:[#allocation10_spill] sm:$0xff] }
 0x21a   : > { %v1007_v63 = vadd.f32 %v975_v50, %v811_v4  ;;  %v2431_v53 = vsel %vm6812_vm4, 0, %v6811_v32  ;;  %v2482_v30 = vshrl.u32 %v13350_v2, %v13493_v31  ;;  %v2446_v17 = vsub.s32 4, %v9932_v36 }
 0x21b   : > { %v2341_v62 = vsel %vm2258_vm9, %v2340_v39, %v2339_v37  ;;  %v2432_v11 = vsub.s32 32, %v2431_v53  ;;  %v2436_v38 = vsub.s32 4294967266, %v2431_v53  ;;  %v13494_v14 = vand.u32 2147483647, %v13492_v12 }
 0x21c   : > { %v2344_v26 = vsel %vm9982_vm12, %v13465_v1, %v2341_v62  ;;  %v2481_v4 = vshll.u32 %v13352_v49, %v13495_v52  ;;  %v2484_v37 = vshll.u32 %v13350_v2, %v13495_v52  ;;  %v2485_v16 = vshrl.u32 %v13354_v13, %v13493_v31 }
 0x21d   : > { %v2471_v50 = vand.u32 8388607, %v13494_v14  ;;  %7709 = vcosq.f32 %v2344_v26  ;;  %v2433_v47 = vshll.u32 %v9947_v22, %v2431_v53  ;;  %v2434_v32 = vshrl.u32 %v2416_v20, %v2432_v11  ;;  %v13500_v11 = vld [vmem:[#allocation20_spill] sm:$0xff]  ;;  %v13507_v22 = vld [vmem:[#allocation23_spill] sm:$0xff] }
 0x21e   : > { %v2437_v39 = vadd.s32 127, %v2436_v38  ;;  %vm3307_vm1 = vcmp.gt.s32.totalorder %v10006_v29, 0  ;;  %7711 = vsinq.f32 %v2344_v26  ;;  %v6849_v62 = vadd.s32 4294967169, %v3404_v56 }
 0x21f   : > { %v2483_v51 = vor.u32 %v2482_v30, %v2481_v4  ;;  %v2487_v14 = vshll.u32 %v13354_v13, %v13495_v52  ;;  %v2435_v61 = vor.u32 %v2434_v32, %v2433_v47  ;;  %v2486_v6 = vor.u32 %v2485_v16, %v2484_v37  ;;  %v13502_v47 = vld [vmem:[#allocation46_spill] sm:$0xff]  ;;  %v13503_v32 = vld [vmem:[#allocation19_spill] sm:$0xff] }
 0x220   : > { %v2438_v46 = vshll.u32 %v2437_v39, 23  ;;  %v2488_v5 = vshrl.u32 %v13339_v3, %v13493_v31  ;;  %v10036_v25 = vand.u32 3, %v2349_v42  ;;  %v13496_v53 = vand.u32 2147483647, %v13472_v41 }
 0x221   : > { %v2447_v38 = vsel %vm2362_vm15, %v2446_v17, %v9932_v36  ;;  %v10047_v20 = vadd.f32 %v1171_v24, %v1007_v63  ;;  %v2472_v30 = vor.u32 8388608, %v2471_v50  ;;  %vm2496_vm5 = vcmp.lt.s32.totalorder %v13500_v11, 1  ;;  %v13501_v36 = vld [vmem:[#allocation45_spill] sm:$0xff] }
 0x222   : > { %vm10040_vm6 = vcmp.le.f32.partialorder %v13496_v53, 0.7853982  ;;  %v2439_v56 = vor.u32 4788187, %v2438_v46  ;;  %v2489_v26 = vor.u32 %v2488_v5, %v2487_v14  ;;  %v2442_v52 = vcvt.s32.f32 %v2435_v61 }
 0x223   : > { %13499 = vst [vmem:[#allocation30_spill] sm:$0xff] %v10047_v20  ;;  %v10050_v42 = vadd.s32 1, %v6849_v62  ;;  %vm2498_vm7 = vcmp.lt.s32.totalorder %v13500_v11, 3  ;;  %v2504_v4 = vsel %vm2496_vm5, %v2483_v51, %v2486_v6  ;;  %v2449_v5 = vsel %vm10040_vm6, 0, %v2447_v38 }
 0x224   : > { %v2440_v37 = vand.u32 2147483647, %v2439_v56  ;;  %v2501_v16 = vsel %vm2499_vm0, %v2489_v26, 2102212464  ;;  %v2506_v24 = vsel %vm2498_vm7, %v2489_v26, %v13501_v36  ;;  %v2508_v46 = vsel %vm2496_vm5, %v2486_v6, %v2489_v26  ;;  %v13504_v56 = vld [vmem:[#allocation41_spill] sm:$0xff] }
 0x225   : > { %v3507_v61 = vand.u32 2139095040, %v10047_v20  ;;  %v2480_v63 = vshrl.u32 %v13352_v49, %v13493_v31  ;;  %vm2497_vm8 = vcmp.lt.s32.totalorder %v13500_v11, 2  ;;  %v2510_v39 = vsel %vm2498_vm7, %v13503_v32, %v13502_v47  ;;  %v13508_v32 = vld [vmem:[#allocation44_spill] sm:$0xff] }
 0x226   : > { %v2443_v17 = vmul.f32 %v2442_v52, %v2440_v37  ;;  %v2507_v50 = vsel %vm2497_vm8, %v2504_v4, %v2506_v24  ;;  %v2512_v62 = vshll.u32 %v2472_v30, 8  ;;  %v2502_v53 = vsel %vm2498_vm7, %v2486_v6, %v2501_v16 }
 0x227   : > { %v2500_v14 = vsel %vm2496_vm5, %v2480_v63, %v2483_v51  ;;  %v2511_v38 = vsel %vm2497_vm8, %v2508_v46, %v2510_v39  ;;  %v13216_v26 = vand.u32 2147483647, %v13504_v56  ;;  %v7710_v31 = vpop.eup %7709  ;;  %v2453_v20 = vadd.s32 3, %v2449_v5 }
 0x228   : > { %v2444_v36 = vxor.u32 2147483648, %v2443_v17  ;;  %v10075_v52 = vmul.u32.u64.low %v2512_v62, %v2511_v38  ;;  %v10076_v37 = vmul.u32.u64.high %v2512_v62, %v2511_v38, %v10075_v52  ;;  %v7712_v4 = vpop.eup %7711  ;;  %v10079_v24 = vshrl.u32 %v9918_v44, 5 }
 0x229   : > { %v10083_v30 = vor.u32 %v9995_v27, %v9988_v35  ;;  %v10085_v51 = vmul.u32.u64.low %v2512_v62, %v2507_v50  ;;  %v10086_v6 = vmul.u32.u64.high %v2512_v62, %v2507_v50, %v10085_v51  ;;  %v10094_v46 = vsel %vm3307_vm1, %v10006_v29, 0 }
 0x22a   : > { %13505 = vst [vmem:[#allocation14_spill] sm:$0xff] %v10079_v24  ;;  %v2445_v44 = vsel %vm2362_vm15, %v2444_v36, %v2443_v17  ;;  %v2503_v5 = vsel %vm2497_vm8, %v2500_v14, %v2502_v53  ;;  %vm2352_vm0 = vcmp.eq.s32.totalorder %v10036_v25, 0  ;;  %vm2355_vm13 = vcmp.eq.s32.totalorder %v10036_v25, 2 }
 0x22b   : > { %13506 = vst [vmem:[#allocation4_spill] sm:$0xff] %v10083_v30  ;;  %v2448_v35 = vsel %vm10040_vm6, %v13472_v41, %v2445_v44  ;;  %v3508_v27 = vshrl.u32 %v3507_v61, 23  ;;  %v2575_v63 = vand.u32 8388607, %v13216_v26  ;;  %v2356_v29 = vxor.u32 2147483648, %v7710_v31 }
 0x22c   : > { %7713 = vcosq.f32 %v2448_v35  ;;  %v10107_v50 = vand.u32 3, %v2453_v20  ;;  %vm3411_vm9 = vcmp.gt.s32.totalorder %v10050_v42, 0  ;;  %vm2521_vm12 = vc.u32 %v10076_v37, %v10085_v51 }
 0x22d   : > { %v2353_v11 = vxor.u32 2147483648, %v7712_v4  ;;  %7715 = vsinq.f32 %v2448_v35  ;;  %v2519_v17 = vmul.u32 %v2512_v62, %v2503_v5  ;;  %v2522_v47 = vadd.s32 1, %v10086_v6 }
 0x22e   : > { %v2585_v61 = vshll.u32 %v13352_v49, %v13507_v22  ;;  %v2586_v39 = vshrl.u32 %v13350_v2, %v13508_v32  ;;  %v2588_v20 = vshll.u32 %v13350_v2, %v13507_v22  ;;  %v2589_v14 = vshrl.u32 %v13354_v13, %v13508_v32 }
 0x22f   : > { %v2523_v53 = vsel %vm2521_vm12, %v2522_v47, %v10086_v6  ;;  %v2576_v38 = vor.u32 8388608, %v2575_v63  ;;  %v2591_v62 = vshll.u32 %v13354_v13, %v13507_v22  ;;  %v2592_v36 = vshrl.u32 %v13339_v3, %v13508_v32  ;;  %v13509_v6 = vld [vmem:[#allocation48_spill] sm:$0xff]  ;;  %v13510_v22 = vld [vmem:[#allocation6_spill] sm:$0xff] }
 0x230   : > { %v2357_v52 = vsel %vm2355_vm13, %v2356_v29, %v7712_v4  ;;  %v2524_v44 = vadd.s32 %v2523_v53, %v2519_v17  ;;  %v2587_v5 = vor.u32 %v2586_v39, %v2585_v61  ;;  %v2590_v35 = vor.u32 %v2589_v14, %v2588_v20  ;;  %v13512_v17 = vld [vmem:[#allocation26_spill] sm:$0xff] }
 0x231   : > { %vm2348_vm15 = vweird.f32 %v13465_v1  ;;  %v2584_v26 = vshrl.u32 %v13352_v49, %v13508_v32  ;;  %v2593_v16 = vor.u32 %v2592_v36, %v2591_v62  ;;  %vm2600_vm4 = vcmp.lt.s32.totalorder %v13509_v6, 1 }
 0x232   : > { %vm2602_vm1 = vcmp.lt.s32.totalorder %v13509_v6, 3  ;;  %v2525_v63 = vadd.s32 536870912, %v2524_v44  ;;  %vm2601_vm6 = vcmp.lt.s32.totalorder %v13509_v6, 2  ;;  %v2608_v47 = vsel %vm2600_vm4, %v2587_v5, %v2590_v35 }
 0x233   : > { %v2614_v4 = vsel %vm2602_vm1, %v13511_v23, %v13510_v22  ;;  %vm2452_vm5 = vweird.f32 %v13472_v41  ;;  %v2605_v29 = vsel %vm2603_vm14, %v2593_v16, 2102212464  ;;  %v2610_v61 = vsel %vm2602_vm1, %v2593_v16, %v13512_v17 }
 0x234   : > { %v2612_v32 = vsel %vm2600_vm4, %v2590_v35, %v2593_v16  ;;  %v2616_v39 = vshll.u32 %v2576_v38, 8  ;;  %v2354_v20 = vsel %vm2352_vm0, %v7710_v31, %v2353_v11  ;;  %v10142_v14 = vshrl.u32 %v2525_v63, 30  ;;  %v915_v11 = vpop.permute.xlu1 %914 }
 0x235   : > { %v2611_v53 = vsel %vm2601_vm6, %v2608_v47, %v2610_v61  ;;  %v2615_v23 = vsel %vm2601_vm6, %v2612_v32, %v2614_v4  ;;  %v2604_v62 = vsel %vm2600_vm4, %v2584_v26, %v2587_v5  ;;  %v2606_v36 = vsel %vm2602_vm1, %v2590_v35, %v2605_v29 }
 0x236   : > { %v10148_v22 = vmul.u32.u64.low %v2616_v39, %v2615_v23  ;;  %v10149_v57 = vmul.u32.u64.high %v2616_v39, %v2615_v23, %v10148_v22  ;;  %v7714_v15 = vpop.eup %7713  ;;  %vm2351_vm14 = vcmp.lt.s32.totalorder %v10036_v25, 2  ;;  %v2527_v16 = vshll.u32 %v10142_v14, 30 }
 0x237   : > { %v10153_v38 = vmul.u32.u64.low %v2616_v39, %v2611_v53  ;;  %v10154_v31 = vmul.u32.u64.high %v2616_v39, %v2611_v53, %v10153_v38  ;;  %v7716_v63 = vpop.eup %7715  ;;  %v2358_v47 = vsel %vm2351_vm14, %v2354_v20, %v2357_v52  ;;  %v2460_v17 = vxor.u32 2147483648, %v7714_v15 }
 0x238   : > { %v10160_v26 = vsel %vm3411_vm9, %v10050_v42, 0  ;;  %v6853_v5 = vadd.s32 4294967169, %v3508_v27  ;;  %v2457_v35 = vxor.u32 2147483648, %v7716_v63  ;;  %vm2459_vm7 = vcmp.eq.s32.totalorder %v10107_v50, 2 }
 0x239   : > { %v10163_v25 = vsub.s32 %v2524_v44, %v2527_v16  ;;  %v2607_v4 = vsel %vm2601_vm6, %v2604_v62, %v2606_v36  ;;  %vm2455_vm8 = vcmp.lt.s32.totalorder %v10107_v50, 2  ;;  %vm2456_vm0 = vcmp.eq.s32.totalorder %v10107_v50, 0  ;;  %v1111_v62 = vpop.permute.xlu1 %1110 }
 0x23a   : > { %v2461_v52 = vsel %vm2459_vm7, %v2460_v17, %v7716_v63  ;;  %vm2625_vm13 = vc.u32 %v10149_v57, %v10153_v38  ;;  %v2359_v42 = vsel %vm2348_vm15, nan, %v2358_v47  ;;  %v2458_v27 = vsel %vm2456_vm0, %v7714_v15, %v2457_v35 }
 0x23b   : > { %v2530_v29 = vsub.s32 0, %v10163_v25  ;;  %v2626_v44 = vadd.s32 1, %v10154_v31  ;;  %v2462_v61 = vsel %vm2455_vm8, %v2458_v27, %v2461_v52  ;;  %v774_v6 = vmul.f32 %v8095_v58, %v9907_v21 }
 0x23c   : > { %v3514_v32 = vadd.s32 1, %v6853_v5  ;;  %v2623_v20 = vmul.u32 %v2616_v39, %v2607_v4  ;;  %v2463_v50 = vsel %vm2452_vm5, nan, %v2462_v61  ;;  %v776_v53 = vmul.f32 %v8095_v58, %v9927_v8  ;;  %v10216_v5 = vld [vmem:[%s13055_s2] ss:$0 sm:$0xff] }
 0x23d   : > { %v6814_v23 = vmin.u32 %v2530_v29, %v10163_v25  ;;  %v2627_v15 = vsel %vm2625_vm13, %v2626_v44, %v10154_v31  ;;  %v4556_v36 = vsel %vm1215_vm3, %v13465_v1, %v2359_v42  ;;  %v4557_v21 = vsel %vm1215_vm3, %v13472_v41, %v2463_v50  ;;  %v710_v29 = vpop.permute.xlu1 %709 }
 0x23e   : > { %v10190_v39 = vand.u32 31, %v10160_v26  ;;  %v2628_v22 = vadd.s32 %v2627_v15, %v2623_v20  ;;  %vm3227_vm9 = vcmp.lt.s32.totalorder %v10079_v24, 4  ;;  %v4583_v8 = vpack.c.bf16 %v4557_v21, %v4556_v36 }
 0x23f   : > { %v778_v16 = vmul.f32 %v8095_v58, %v9951_v34  ;;  %v2532_v31 = vclz %v6814_v23  ;;  %v10198_v63 = vsel %vm3227_vm9, %v10083_v30, 920167782  ;;  %v13515_v1 = vor.u32 %v10004_v60, %v9999_v28 }
 0x240   : > { %13513 = vst [vmem:[#allocation42_spill] sm:$0xff] %v10190_v39  ;;  %13514 = vst [vmem:[#allocation43_spill] sm:$0xff] %v10198_v63  ;;  %vm3515_vm12 = vcmp.gt.s32.totalorder %v3514_v32, 0  ;;  %v2629_v47 = vadd.s32 536870912, %v2628_v22  ;;  %v10208_v17 = vshrl.u32 %v10094_v46, 5  ;;  %v10211_v34 = vand.u32 31, %v10094_v46  ;;  %4773 = vmatmul.mubr.bf16.gmra.mrb[20].mxu0 %v4583_v8 }
 0x241   : > { %v10205_v41 = vsel %vm3227_vm9, %v13515_v1, 1326507024  ;;  %v812_v28 = vadd.f32 %v10216_v5, %v774_v6  ;;  %v6815_v60 = vadd.s32 4294967294, %v2532_v31  ;;  %v10220_v35 = vsub.s32 32, %v10190_v39  ;;  %4782 = vmatprep.mubr.bf16.mxu0 %v13346_v40 }
 0x242   : > { %13516 = vst [vmem:[#allocation16_spill] sm:$0xff] %v10205_v41  ;;  %13517 = vst [vmem:[#allocation7_spill] sm:$0xff] %v10208_v17  ;;  %v10223_v4 = vadd.f32 %v10216_v5, %v776_v53  ;;  %v10226_v52 = vshrl.u32 %v2629_v47, 30  ;;  %v976_v46 = vmul.f32 %v8097_v59, %v915_v11  ;;  %v10230_v42 = vadd.f32 %v10216_v5, %v778_v16 }
 0x243   : > { %13518 = vst [vmem:[#allocation33_spill] sm:$0xff] %v10211_v34  ;;  %13519 = vst [vmem:[#allocation15_spill] sm:$0xff] %v10220_v35  ;;  %v3516_v27 = vsel %vm3515_vm12, %v3514_v32, 0  ;;  %vm2466_vm15 = vcmp.lt.s32.totalorder %v13492_v12, 0  ;;  %vm6816_vm4 = vcmp.lt.s32.totalorder %v6815_v60, 0  ;;  %v2550_v61 = vsub.s32 4, %v10142_v14 }
 0x244   : > { %13520 = vst [vmem:[#allocation10_spill] sm:$0xff] %v10230_v42  ;;  %v2535_v44 = vsel %vm6816_vm4, 0, %v6815_v60  ;;  %v2631_v6 = vshll.u32 %v10226_v52, 30  ;;  %v1172_v20 = vmul.f32 %v13374_v33, %v1111_v62  ;;  %v3426_v50 = vshll.u32 %v13339_v3, %v10190_v39 }
 0x245   : > { %v2520_v11 = vadd.s32 %v10085_v51, %v10076_v37  ;;  %v2536_v53 = vsub.s32 32, %v2535_v44  ;;  %v2540_v23 = vsub.s32 4294967266, %v2535_v44  ;;  %v3427_v32 = vshrl.u32 %v13331_v45, %v10220_v35 }
 0x246   : > { %v10244_v15 = vshrl.u32 %v13335_v7, %v10220_v35  ;;  %v10246_v36 = vsub.s32 %v2628_v22, %v2631_v6  ;;  %v1008_v21 = vadd.f32 %v976_v46, %v812_v28  ;;  %v10248_v8 = vand.u32 31, %v3516_v27  ;;  %v13528_v35 = vld [vmem:[#allocation5_spill] sm:$0xff] }
 0x247   : > { %v2537_v62 = vshll.u32 %v10163_v25, %v2535_v44  ;;  %v2538_v16 = vshrl.u32 %v2520_v11, %v2536_v53  ;;  %v2541_v31 = vadd.s32 127, %v2540_v23  ;;  %v10253_v37 = vshll.u32 %v13331_v45, %v10190_v39  ;;  %v919_v44 = vpop.permute.xlu1 %918 }
 0x248   : > { %13521 = vst [vmem:[#allocation20_spill] sm:$0xff] %v10248_v8  ;;  %v2551_v51 = vsel %vm2466_vm15, %v2550_v61, %v10142_v14  ;;  %v2634_v1 = vsub.s32 0, %v10246_v36  ;;  %v10259_v47 = vadd.f32 %v1172_v20, %v1008_v21  ;;  %v10262_v22 = vshrl.u32 %v10160_v26, 5 }
 0x249   : > { %v13523_v28 = vand.u32 2147483647, %v13492_v12  ;;  %v2539_v60 = vor.u32 %v2538_v16, %v2537_v62  ;;  %v2542_v46 = vshll.u32 %v2541_v31, 23  ;;  %v10270_v6 = vor.u32 %v3427_v32, %v3426_v50  ;;  %v1115_v16 = vpop.permute.xlu0 %1114 }
 0x24a   : > { %13522 = vst [vmem:[#allocation45_spill] sm:$0xff] %v10259_v47  ;;  %v6818_v61 = vmin.u32 %v2634_v1, %v10246_v36  ;;  %v775_v20 = vmul.f32 %v8095_v58, %v710_v29  ;;  %v10276_v26 = vshrl.u32 %v3516_v27, 5  ;;  %v10279_v11 = vsub.s32 32, %v10248_v8 }
 0x24b   : > { %vm10266_vm1 = vcmp.le.f32.partialorder %v13523_v28, 0.7853982  ;;  %v2543_v53 = vor.u32 4788187, %v2542_v46  ;;  %v10285_v50 = vshll.u32 %v13339_v3, %v10248_v8  ;;  %v3611_v21 = vand.u32 2139095040, %v10259_v47 }
 0x24c   : > { %13526 = vst [vmem:[#allocation46_spill] sm:$0xff] %v10279_v11  ;;  %v2553_v23 = vsel %vm10266_vm1, 0, %v2551_v51  ;;  %v2636_v32 = vclz %v6818_v61  ;;  %v977_v62 = vmul.f32 %v8097_v59, %v919_v44  ;;  %v10291_v27 = vshll.u32 %v13331_v45, %v10248_v8  ;;  %v13527_v61 = vld [vmem:[#allocation17_spill] sm:$0xff] }
 0x24d   : > { %v2544_v29 = vand.u32 2147483647, %v2543_v53  ;;  %v2546_v31 = vcvt.s32.f32 %v2539_v60  ;;  %v2624_v1 = vadd.s32 %v10153_v38, %v10149_v57  ;;  %v2557_v51 = vadd.s32 3, %v2553_v23  ;;  %v13529_v38 = vld [vmem:[#allocation47_spill] sm:$0xff] }
 0x24e   : > { %vm2570_vm6 = vcmp.lt.s32.totalorder %v13504_v56, 0  ;;  %v6819_v28 = vadd.s32 4294967294, %v2636_v32  ;;  %v813_v46 = vadd.f32 %v10216_v5, %v775_v20  ;;  %v1173_v44 = vmul.f32 %v13374_v33, %v1115_v16 }
 0x24f   : > { %v2547_v47 = vmul.f32 %v2546_v31, %v2544_v29  ;;  %v2690_v8 = vshrl.u32 %v13350_v2, %v13528_v35  ;;  %v2693_v60 = vshrl.u32 %v13354_v13, %v13528_v35  ;;  %v3612_v53 = vshrl.u32 %v3611_v21, 23 }
 0x250   : > { %vm6820_vm5 = vcmp.lt.s32.totalorder %v6819_v28, 0  ;;  %v1009_v57 = vadd.f32 %v977_v62, %v813_v46  ;;  %v2689_v23 = vshll.u32 %v13352_v49, %v13529_v38  ;;  %v2692_v20 = vshll.u32 %v13350_v2, %v13529_v38 }
 0x251   : > { %v2548_v32 = vxor.u32 2147483648, %v2547_v47  ;;  %v2639_v39 = vsel %vm6820_vm5, 0, %v6819_v28  ;;  %v2696_v16 = vshrl.u32 %v13339_v3, %v13528_v35  ;;  %v2654_v14 = vsub.s32 4, %v10226_v52 }
 0x252   : > { %v2640_v29 = vsub.s32 32, %v2639_v39  ;;  %v2644_v31 = vsub.s32 4294967266, %v2639_v39  ;;  %v13530_v17 = vand.u32 2147483647, %v13527_v61  ;;  %v2691_v62 = vor.u32 %v2690_v8, %v2689_v23 }
 0x253   : > { %v2549_v21 = vsel %vm2466_vm15, %v2548_v32, %v2547_v47  ;;  %v2694_v46 = vor.u32 %v2693_v60, %v2692_v20  ;;  %v2695_v28 = vshll.u32 %v13354_v13, %v13529_v38  ;;  %v2641_v30 = vshll.u32 %v10246_v36, %v2639_v39  ;;  %v13538_v20 = vld [vmem:[#allocation24_spill] sm:$0xff] }
 0x254   : > { %v2679_v34 = vand.u32 8388607, %v13530_v17  ;;  %v2552_v63 = vsel %vm10266_vm1, %v13492_v12, %v2549_v21  ;;  %v2642_v41 = vshrl.u32 %v2624_v1, %v2640_v29  ;;  %v2645_v24 = vadd.s32 127, %v2644_v31 }
 0x255   : > { %7717 = vcosq.f32 %v2552_v63  ;;  %v13531_v42 = vand.u32 2147483647, %v13504_v56  ;;  %v10326_v8 = vadd.f32 %v1173_v44, %v1009_v57  ;;  %v2697_v47 = vor.u32 %v2696_v16, %v2695_v28  ;;  %v13537_v57 = vld [vmem:[#allocation12_spill] sm:$0xff] }
 0x256   : > { %v10328_v60 = vand.u32 3, %v2557_v51  ;;  %v2643_v38 = vor.u32 %v2642_v41, %v2641_v30  ;;  %v2646_v23 = vshll.u32 %v2645_v24, 23  ;;  %v2688_v25 = vshrl.u32 %v13352_v49, %v13528_v35  ;;  %v13536_v30 = vld [vmem:[#allocation18_spill] sm:$0xff] }
 0x257   : > { %vm10322_vm14 = vcmp.le.f32.partialorder %v13531_v42, 0.7853982  ;;  %13534 = vst [vmem:[#allocation19_spill] sm:$0xff] %v10326_v8  ;;  %v2655_v39 = vsel %vm2570_vm6, %v2654_v14, %v10226_v52  ;;  %v6857_v36 = vadd.s32 4294967169, %v3612_v53  ;;  %v2680_v1 = vor.u32 8388608, %v2679_v34  ;;  %v13535_v42 = vld [vmem:[#allocation21_spill] sm:$0xff] }
 0x258   : > { %vm2704_vm7 = vcmp.lt.s32.totalorder %v13535_v42, 1  ;;  %7719 = vsinq.f32 %v2552_v63  ;;  %v2647_v32 = vor.u32 4788187, %v2646_v23  ;;  %vm2706_vm8 = vcmp.lt.s32.totalorder %v13535_v42, 3  ;;  %v13539_v23 = vld [vmem:[#allocation11_spill] sm:$0xff] }
 0x259   : > { %v2712_v44 = vsel %vm2704_vm7, %v2691_v62, %v2694_v46  ;;  %v3715_v51 = vand.u32 2139095040, %v10326_v8  ;;  %vm2705_vm0 = vcmp.lt.s32.totalorder %v13535_v42, 2  ;;  %v2709_v24 = vsel %vm2707_vm11, %v2697_v47, 2102212464 }
 0x25a   : > { %v2714_v41 = vsel %vm2706_vm8, %v2697_v47, %v13536_v30  ;;  %v2648_v35 = vand.u32 2147483647, %v2647_v32  ;;  %v2650_v52 = vcvt.s32.f32 %v2643_v38  ;;  %v2716_v14 = vsel %vm2704_vm7, %v2694_v46, %v2697_v47 }
 0x25b   : > { %v2715_v34 = vsel %vm2705_vm0, %v2712_v44, %v2714_v41  ;;  %v2657_v63 = vsel %vm10322_vm14, 0, %v2655_v39  ;;  %v2708_v53 = vsel %vm2704_vm7, %v2688_v25, %v2691_v62  ;;  %v2718_v16 = vsel %vm2706_vm8, %v13538_v20, %v13537_v57 }
 0x25c   : > { %v2720_v29 = vshll.u32 %v2680_v1, 8  ;;  %v2651_v31 = vmul.f32 %v2650_v52, %v2648_v35  ;;  %v2710_v21 = vsel %vm2706_vm8, %v2694_v46, %v2709_v24  ;;  %v2719_v28 = vsel %vm2705_vm0, %v2716_v14, %v2718_v16 }
 0x25d   : > { %v13234_v32 = vand.u32 2147483647, %v13539_v23  ;;  %v3531_v62 = vshrl.u32 %v13331_v45, %v10279_v11  ;;  %v10362_v25 = vshrl.u32 %v13335_v7, %v10279_v11  ;;  %v3618_v39 = vadd.s32 1, %v6857_v36 }
 0x25e   : > { %v10351_v38 = vmul.u32.u64.low %v2720_v29, %v2719_v28  ;;  %v10352_v30 = vmul.u32.u64.high %v2720_v29, %v2719_v28, %v10351_v38  ;;  %v10354_v44 = vmul.u32.u64.low %v2720_v29, %v2715_v34  ;;  %v10355_v47 = vmul.u32.u64.high %v2720_v29, %v2715_v34, %v10354_v44 }
 0x25f   : > { %v2652_v46 = vxor.u32 2147483648, %v2651_v31  ;;  %v7718_v1 = vpop.eup %7717  ;;  %vm2563_vm11 = vcmp.eq.s32.totalorder %v10328_v60, 2  ;;  %v2661_v24 = vadd.s32 3, %v2657_v63  ;;  %v3716_v41 = vshrl.u32 %v3715_v51, 23  ;;  %v13540_v63 = vld [vmem:[#allocation22_spill] sm:$0xff] }
 0x260   : > { %v2794_v35 = vshrl.u32 %v13350_v2, %v9452_v43  ;;  %vm2560_vm13 = vcmp.eq.s32.totalorder %v10328_v60, 0  ;;  %v2711_v34 = vsel %vm2705_vm0, %v2708_v53, %v2710_v21  ;;  %v2783_v14 = vand.u32 8388607, %v13234_v32 }
 0x261   : > { %v2653_v52 = vsel %vm2570_vm6, %v2652_v46, %v2651_v31  ;;  %v2797_v36 = vshrl.u32 %v13354_v13, %v9452_v43  ;;  %vm2729_vm12 = vc.u32 %v10352_v30, %v10354_v44  ;;  %v2793_v57 = vshll.u32 %v13352_v49, %v13540_v63 }
 0x262   : > { %v2656_v51 = vsel %vm10322_vm14, %v13504_v56, %v2653_v52  ;;  %v2796_v42 = vshll.u32 %v13350_v2, %v13540_v63  ;;  %v7720_v53 = vpop.eup %7719  ;;  %v2564_v20 = vxor.u32 2147483648, %v7718_v1  ;;  %vm3619_vm15 = vcmp.gt.s32.totalorder %v3618_v39, 0 }
 0x263   : > { %7721 = vcosq.f32 %v2656_v51  ;;  %v2730_v16 = vadd.s32 1, %v10355_v47  ;;  %v2727_v31 = vmul.u32 %v2720_v29, %v2711_v34  ;;  %v2795_v21 = vor.u32 %v2794_v35, %v2793_v57 }
 0x264   : > { %7723 = vsinq.f32 %v2656_v51  ;;  %v2798_v17 = vor.u32 %v2797_v36, %v2796_v42  ;;  %v2784_v38 = vor.u32 8388608, %v2783_v14  ;;  %v2799_v46 = vshll.u32 %v13354_v13, %v13540_v63 }
 0x265   : > { %v2731_v28 = vsel %vm2729_vm12, %v2730_v16, %v10355_v47  ;;  %v2800_v52 = vshrl.u32 %v13339_v3, %v9452_v43  ;;  %v2561_v32 = vxor.u32 2147483648, %v7720_v53  ;;  %v2662_v8 = vand.u32 3, %v2661_v24  ;;  %v923_v47 = vpop.permute.xlu1 %922 }
 0x266   : > { %v2732_v11 = vadd.s32 %v2731_v28, %v2727_v31  ;;  %v2792_v0 = vshrl.u32 %v13352_v49, %v9452_v43  ;;  %v2565_v29 = vsel %vm2563_vm11, %v2564_v20, %v7720_v53  ;;  %vm2808_vm4 = vcmp.lt.s32.totalorder %v9464_v19, 1 }
 0x267   : > { %v2801_v35 = vor.u32 %v2800_v52, %v2799_v46  ;;  %vm2810_vm1 = vcmp.lt.s32.totalorder %v9464_v19, 3  ;;  %vm2809_vm6 = vcmp.lt.s32.totalorder %v9464_v19, 2  ;;  %v2816_v14 = vsel %vm2808_vm4, %v2795_v21, %v2798_v17 }
 0x268   : > { %v2733_v34 = vadd.s32 536870912, %v2732_v11  ;;  %v2822_v24 = vsel %vm2810_vm1, %v9637_v10, %v9698_v54  ;;  %v2824_v63 = vshll.u32 %v2784_v38, 8  ;;  %v2562_v57 = vsel %vm2560_vm13, %v7718_v1, %v2561_v32 }
 0x269   : > { %v2813_v36 = vsel %vm2811_vm10, %v2801_v35, 2102212464  ;;  %v2818_v43 = vsel %vm2810_vm1, %v2801_v35, %v9693_v55  ;;  %v2820_v51 = vsel %vm2808_vm4, %v2798_v17, %v2801_v35  ;;  %v2812_v16 = vsel %vm2808_vm4, %v2792_v0, %v2795_v21 }
 0x26a   : > { %v10405_v42 = vshrl.u32 %v2733_v34, 30  ;;  %v2819_v53 = vsel %vm2809_vm6, %v2816_v14, %v2818_v43  ;;  %v2823_v20 = vsel %vm2809_vm6, %v2820_v51, %v2822_v24  ;;  %v2814_v10 = vsel %vm2810_vm1, %v2798_v17, %v2813_v36  ;;  %v1119_v17 = vpop.permute.xlu1 %1118 }
 0x26b   : > { %v10411_v54 = vmul.u32.u64.low %v2824_v63, %v2823_v20  ;;  %v10412_v31 = vmul.u32.u64.high %v2824_v63, %v2823_v20, %v10411_v54  ;;  %v10415_v55 = vor.u32 %v3531_v62, %v10285_v50  ;;  %vm3435_vm10 = vcmp.lt.s32.totalorder %v10262_v22, 4 }
 0x26c   : > { %v2735_v28 = vshll.u32 %v10405_v42, 30  ;;  %v10418_v38 = vmul.u32.u64.low %v2824_v63, %v2819_v53  ;;  %v10419_v32 = vmul.u32.u64.high %v2824_v63, %v2819_v53, %v10418_v38  ;;  %vm2556_vm5 = vweird.f32 %v13492_v12 }
 0x26d   : > { %13541 = vst [vmem:[#allocation41_spill] sm:$0xff] %v10415_v55  ;;  %v7722_v1 = vpop.eup %7721  ;;  %vm2559_vm14 = vcmp.lt.s32.totalorder %v10328_v60, 2  ;;  %v10426_v0 = vsel %vm3619_vm15, %v3618_v39, 0  ;;  %v6861_v21 = vadd.s32 4294967169, %v3716_v41  ;;  %v2815_v35 = vsel %vm2809_vm6, %v2812_v16, %v2814_v10 }
 0x26e   : > { %v7724_v50 = vpop.eup %7723  ;;  %v2566_v62 = vsel %vm2559_vm14, %v2562_v57, %v2565_v29  ;;  %v2668_v46 = vxor.u32 2147483648, %v7722_v1  ;;  %v10428_v52 = vsub.s32 %v2732_v11, %v2735_v28  ;;  %vm2663_vm7 = vcmp.lt.s32.totalorder %v2662_v8, 2  ;;  %v720_v20 = vpop.permute.xlu1 %719 }
 0x26f   : > { %v2665_v34 = vxor.u32 2147483648, %v7724_v50  ;;  %vm2667_vm8 = vcmp.eq.s32.totalorder %v2662_v8, 2  ;;  %vm2833_vm0 = vc.u32 %v10412_v31, %v10418_v38  ;;  %vm2664_vm11 = vcmp.eq.s32.totalorder %v2662_v8, 0 }
 0x270   : > { %v2669_v60 = vsel %vm2667_vm8, %v2668_v46, %v7724_v50  ;;  %v2738_v39 = vsub.s32 0, %v10428_v52  ;;  %v2834_v41 = vadd.s32 1, %v10419_v32  ;;  %v2567_v29 = vsel %vm2556_vm5, nan, %v2566_v62 }
 0x271   : > { %v2666_v11 = vsel %vm2664_vm11, %v7722_v1, %v2665_v34  ;;  %v3722_v14 = vadd.s32 1, %v6861_v21  ;;  %v2831_v24 = vmul.u32 %v2824_v63, %v2815_v35  ;;  %vm2660_vm13 = vweird.f32 %v13504_v56 }
 0x272   : > { %v2670_v19 = vsel %vm2663_vm7, %v2666_v11, %v2669_v60  ;;  %v6822_v36 = vmin.u32 %v2738_v39, %v10428_v52  ;;  %v2835_v43 = vsel %vm2833_vm0, %v2834_v41, %v10419_v32  ;;  %v3535_v8 = vor.u32 %v10362_v25, %v10291_v27  ;;  %v927_v60 = vpop.permute.xlu1 %926 }
 0x273   : > { %v2671_v51 = vsel %vm2660_vm13, nan, %v2670_v19  ;;  %v2836_v57 = vadd.s32 %v2835_v43, %v2831_v24  ;;  %v978_v53 = vmul.f32 %v8097_v59, %v923_v47  ;;  %v4558_v16 = vsel %vm1215_vm3, %v13492_v12, %v2567_v29 }
 0x274   : > { %v4559_v63 = vsel %vm1215_vm3, %v13504_v56, %v2671_v51  ;;  %v10451_v10 = vand.u32 31, %v10426_v0  ;;  %v2740_v54 = vclz %v6822_v36  ;;  %vm3723_vm12 = vcmp.gt.s32.totalorder %v3722_v14, 0 }
 0x275   : > { %v4584_v28 = vpack.c.bf16 %v4559_v63, %v4558_v16  ;;  %v2837_v27 = vadd.s32 536870912, %v2836_v57  ;;  %v1174_v25 = vmul.f32 %v13374_v33, %v1119_v17  ;;  %v10457_v47 = vsel %vm3435_vm10, %v10270_v6, 920167782 }
 0x276   : > { %13542 = vst [vmem:[#allocation23_spill] sm:$0xff] %v10451_v10  ;;  %v13543_v12 = vor.u32 %v10244_v15, %v10253_v37  ;;  %vm3539_vm15 = vcmp.lt.s32.totalorder %v10276_v26, 4  ;;  %v6823_v32 = vadd.s32 4294967294, %v2740_v54  ;;  %v2758_v21 = vsub.s32 4, %v10405_v42 }
 0x277   : > { %v10470_v1 = vsel %vm3539_vm15, %v10415_v55, 920167782  ;;  %4783 = vmatmul.mubr.bf16.gmra.mrb[24].mxu0 %v4584_v28  ;;  %v10473_v17 = vshrl.u32 %v2837_v27, 30  ;;  %v1010_v50 = vadd.f32 %v978_v53, %v10223_v4  ;;  %v10478_v15 = vsel %vm3539_vm15, %v3535_v8, 1326507024 }
 0x278   : > { %v10464_v56 = vsel %vm3435_vm10, %v13543_v12, 1326507024  ;;  %13544 = vst [vmem:[#allocation44_spill] sm:$0xff] %v10470_v1  ;;  %13545 = vst [vmem:[#allocation48_spill] sm:$0xff] %v10478_v15  ;;  %4792 = vmatprep.mubr.bf16.mxu0 %v13346_v40  ;;  %v3724_v37 = vsel %vm3723_vm12, %v3722_v14, 0  ;;  %vm2674_vm4 = vcmp.lt.s32.totalorder %v13527_v61, 0  ;;  %v2728_v4 = vadd.s32 %v10354_v44, %v10352_v30 }
 0x279   : > { %vm6824_vm1 = vcmp.lt.s32.totalorder %v6823_v32, 0  ;;  %v10483_v62 = vsub.s32 32, %v10451_v10  ;;  %v2839_v35 = vshll.u32 %v10473_v17, 30  ;;  %v10486_v34 = vadd.f32 %v1174_v25, %v1010_v50 }
 0x27a   : > { %v2743_v46 = vsel %vm6824_vm1, 0, %v6823_v32  ;;  %v777_v29 = vmul.f32 %v8095_v58, %v720_v20  ;;  %v10491_v11 = vand.u32 31, %v3724_v37  ;;  %v13549_v14 = vand.u32 2147483647, %v13527_v61 }
 0x27b   : > { %13546 = vst [vmem:[#allocation6_spill] sm:$0xff] %v10483_v62  ;;  %13547 = vst [vmem:[#allocation49_spill] sm:$0xff] %v10486_v34  ;;  %v2744_v39 = vsub.s32 32, %v2743_v46  ;;  %v2748_v41 = vsub.s32 4294967266, %v2743_v46  ;;  %v2759_v19 = vsel %vm2674_vm4, %v2758_v21, %v10405_v42  ;;  %v10502_v36 = vsub.s32 %v2836_v57, %v2839_v35  ;;  %v1123_v42 = vpop.permute.xlu0 %1122 }
 0x27c   : > { %13548 = vst [vmem:[#allocation26_spill] sm:$0xff] %v10491_v11  ;;  %vm10495_vm6 = vcmp.le.f32.partialorder %v13549_v14, 0.7853982  ;;  %v2745_v30 = vshll.u32 %v10428_v52, %v2743_v46  ;;  %v979_v8 = vmul.f32 %v8097_v59, %v927_v60  ;;  %v3635_v51 = vshrl.u32 %v13331_v45, %v10483_v62 }
 0x27d   : > { %v2746_v44 = vshrl.u32 %v2728_v4, %v2744_v39  ;;  %v2749_v43 = vadd.s32 127, %v2748_v41  ;;  %v10510_v53 = vshrl.u32 %v13335_v7, %v10483_v62  ;;  %v2842_v20 = vsub.s32 0, %v10502_v36 }
 0x27e   : > { %v3819_v16 = vand.u32 2139095040, %v10486_v34  ;;  %v2761_v52 = vsel %vm10495_vm6, 0, %v2759_v19  ;;  %v815_v54 = vadd.f32 %v10216_v5, %v777_v29  ;;  %v10518_v28 = vshrl.u32 %v10426_v0, 5 }
 0x27f   : > { %v2747_v57 = vor.u32 %v2746_v44, %v2745_v30  ;;  %v2750_v63 = vshll.u32 %v2749_v43, 23  ;;  %v3634_v27 = vshll.u32 %v13339_v3, %v10451_v10  ;;  %v10523_v25 = vsub.s32 32, %v10491_v11 }
 0x280   : > { %v6826_v12 = vmin.u32 %v2842_v20, %v10502_v36  ;;  %v10528_v32 = vshll.u32 %v13331_v45, %v10451_v10  ;;  %v1011_v50 = vadd.f32 %v979_v8, %v815_v54  ;;  %v1175_v46 = vmul.f32 %v13374_v33, %v1123_v42  ;;  %v13555_v42 = vld [vmem:[#allocation9_spill] sm:$0xff] }
 0x281   : > { %13552 = vst [vmem:[#allocation17_spill] sm:$0xff] %v10523_v25  ;;  %v2751_v21 = vor.u32 4788187, %v2750_v63  ;;  %v10531_v35 = vor.u32 %v3635_v51, %v3634_v27  ;;  %v2765_v0 = vadd.s32 3, %v2761_v52  ;;  %v3820_v4 = vshrl.u32 %v3819_v16, 23 }
 0x282   : > { %v2844_v60 = vclz %v6826_v12  ;;  %v10535_v41 = vshrl.u32 %v3724_v37, 5  ;;  %v2754_v14 = vcvt.s32.f32 %v2747_v57  ;;  %v10539_v19 = vshll.u32 %v13339_v3, %v10491_v11 }
 0x283   : > { %v2752_v29 = vand.u32 2147483647, %v2751_v21  ;;  %v10543_v30 = vshrl.u32 %v13331_v45, %v10523_v25  ;;  %v10547_v44 = vshll.u32 %v13331_v45, %v10491_v11  ;;  %vm2778_vm5 = vcmp.lt.s32.totalorder %v13539_v23, 0 }
 0x284   : > { %13553 = vst [vmem:[#allocation5_spill] sm:$0xff] %v10535_v41  ;;  %v6827_v43 = vadd.s32 4294967294, %v2844_v60  ;;  %v2832_v37 = vadd.s32 %v10418_v38, %v10412_v31  ;;  %v10552_v51 = vadd.f32 %v1175_v46, %v1011_v50  ;;  %v10554_v20 = vand.u32 3, %v2765_v0 }
 0x285   : > { %v2755_v8 = vmul.f32 %v2754_v14, %v2752_v29  ;;  %v6865_v16 = vadd.s32 4294967169, %v3820_v4  ;;  %v13251_v57 = vand.u32 2147483647, %v13555_v42  ;;  %v2862_v54 = vsub.s32 4, %v10473_v17 }
 0x286   : > { %13554 = vst [vmem:[#allocation47_spill] sm:$0xff] %v10552_v51  ;;  %vm6828_vm14 = vcmp.lt.s32.totalorder %v6827_v43, 0  ;;  %v2896_v27 = vshrl.u32 %v13352_v49, %v9705_v48  ;;  %v13556_v12 = vand.u32 2147483647, %v13539_v23  ;;  %v2898_v50 = vshrl.u32 %v13350_v2, %v9705_v48 }
 0x287   : > { %v2756_v63 = vxor.u32 2147483648, %v2755_v8  ;;  %v2847_v52 = vsel %vm6828_vm14, 0, %v6827_v43  ;;  %v2901_v46 = vshrl.u32 %v13354_v13, %v9705_v48  ;;  %v3923_v60 = vand.u32 2139095040, %v10552_v51 }
 0x288   : > { %vm10562_vm7 = vcmp.le.f32.partialorder %v13556_v12, 0.7853982  ;;  %v2848_v31 = vsub.s32 32, %v2847_v52  ;;  %v2852_v38 = vsub.s32 4294967266, %v2847_v52  ;;  %v2897_v4 = vshll.u32 %v13352_v49, %v9678_v18 }
 0x289   : > { %v2757_v0 = vsel %vm2674_vm4, %v2756_v63, %v2755_v8  ;;  %v2900_v29 = vshll.u32 %v13350_v2, %v9678_v18  ;;  %v2849_v43 = vshll.u32 %v10502_v36, %v2847_v52  ;;  %v2863_v8 = vsel %vm2778_vm5, %v2862_v54, %v10473_v17 }
 0x28a   : > { %v2760_v14 = vsel %vm10495_vm6, %v13527_v61, %v2757_v0  ;;  %v2850_v12 = vshrl.u32 %v2832_v37, %v2848_v31  ;;  %v2853_v39 = vadd.s32 127, %v2852_v38  ;;  %v3826_v63 = vadd.s32 1, %v6865_v16 }
 0x28b   : > { %v2887_v51 = vand.u32 8388607, %v13251_v57  ;;  %v2904_v34 = vshrl.u32 %v13339_v3, %v9705_v48  ;;  %v2899_v10 = vor.u32 %v2898_v50, %v2897_v4  ;;  %v2902_v24 = vor.u32 %v2901_v46, %v2900_v29 }
 0x28c   : > { %v2851_v11 = vor.u32 %v2850_v12, %v2849_v43  ;;  %v2854_v62 = vshll.u32 %v2853_v39, 23  ;;  %7725 = vcosq.f32 %v2760_v14  ;;  %v2903_v36 = vshll.u32 %v13354_v13, %v9678_v18  ;;  %v13559_v43 = vld [vmem:[#allocation8_spill] sm:$0xff] }
 0x28d   : > { %v2906_v37 = vshll.u32 %v13339_v3, %v9678_v18  ;;  %v2907_v17 = vshrl.u32 %v13331_v45, %v9705_v48  ;;  %7727 = vsinq.f32 %v2760_v14  ;;  %v2909_v52 = vshll.u32 %v13331_v45, %v9678_v18 }
 0x28e   : > { %v2855_v16 = vor.u32 4788187, %v2854_v62  ;;  %v2910_v39 = vshrl.u32 %v13335_v7, %v9705_v48  ;;  %vm3827_vm8 = vcmp.gt.s32.totalorder %v3826_v63, 0  ;;  %v3924_v54 = vshrl.u32 %v3923_v60, 23 }
 0x28f   : > { %v2905_v31 = vor.u32 %v2904_v34, %v2903_v36  ;;  %v2908_v38 = vor.u32 %v2907_v17, %v2906_v37  ;;  %v2858_v46 = vcvt.s32.f32 %v2851_v11  ;;  %v2888_v0 = vor.u32 8388608, %v2887_v51 }
 0x290   : > { %v2856_v50 = vand.u32 2147483647, %v2855_v16  ;;  %v2911_v4 = vor.u32 %v2910_v39, %v2909_v52  ;;  %v2865_v29 = vsel %vm10562_vm7, 0, %v2863_v8  ;;  %vm2912_vm0 = vcmp.lt.s32.totalorder %v13559_v43, 1  ;;  %v13560_v52 = vld [vmem:[#allocation28_spill] sm:$0xff] }
 0x291   : > { %vm2913_vm11 = vcmp.lt.s32.totalorder %v13559_v43, 2  ;;  %vm2915_vm13 = vcmp.lt.s32.totalorder %v13559_v43, 4  ;;  %vm2914_vm12 = vcmp.lt.s32.totalorder %v13559_v43, 3  ;;  %v2920_v48 = vsel %vm2912_vm0, %v2899_v10, %v2902_v24 }
 0x292   : > { %v2859_v18 = vmul.f32 %v2858_v46, %v2856_v50  ;;  %v2921_v62 = vsel %vm2915_vm13, %v2908_v38, 920167782  ;;  %v2917_v34 = vsel %vm2915_vm13, %v2905_v31, 2102212464  ;;  %v2924_v51 = vsel %vm2912_vm0, %v2902_v24, %v2905_v31 }
 0x293   : > { %v2922_v11 = vsel %vm2914_vm12, %v2905_v31, %v2921_v62  ;;  %v2925_v60 = vsel %vm2915_vm13, %v2911_v4, 1326507024  ;;  %v2928_v36 = vshll.u32 %v2888_v0, 8  ;;  %v2869_v37 = vadd.s32 3, %v2865_v29 }
 0x294   : > { %v2860_v14 = vxor.u32 2147483648, %v2859_v18  ;;  %v2923_v12 = vsel %vm2913_vm11, %v2920_v48, %v2922_v11  ;;  %v2926_v8 = vsel %vm2914_vm12, %v2908_v38, %v2925_v60  ;;  %v2916_v17 = vsel %vm2912_vm0, %v2896_v27, %v2899_v10 }
 0x295   : > { %v2927_v16 = vsel %vm2913_vm11, %v2924_v51, %v2926_v8  ;;  %v13250_v39 = vand.u32 2147483647, %v13560_v52  ;;  %v2918_v50 = vsel %vm2914_vm12, %v2902_v24, %v2917_v34  ;;  %v10630_v10 = vsel %vm3827_vm8, %v3826_v63, 0 }
 0x296   : > { %v2861_v31 = vsel %vm2778_vm5, %v2860_v14, %v2859_v18  ;;  %v10623_v46 = vmul.u32.u64.low %v2928_v36, %v2927_v16  ;;  %v10624_v4 = vmul.u32.u64.high %v2928_v36, %v2927_v16, %v10623_v46  ;;  %v7726_v38 = vpop.eup %7725  ;;  %v10638_v18 = vshrl.u32 %v13335_v7, %v10523_v25  ;;  %v13562_v14 = vld [vmem:[#allocation29_spill] sm:$0xff] }
 0x297   : > { %v2864_v0 = vsel %vm10562_vm7, %v13539_v23, %v2861_v31  ;;  %v10632_v27 = vmul.u32.u64.low %v2928_v36, %v2923_v12  ;;  %v10633_v29 = vmul.u32.u64.high %v2928_v36, %v2923_v12, %v10632_v27  ;;  %v7728_v48 = vpop.eup %7727  ;;  %vm2768_vm4 = vcmp.eq.s32.totalorder %v10554_v20, 0  ;;  %v13563_v12 = vld [vmem:[#allocation34_spill] sm:$0xff] }
 0x298   : > { %vm2771_vm1 = vcmp.eq.s32.totalorder %v10554_v20, 2  ;;  %7729 = vcosq.f32 %v2864_v0  ;;  %v10642_v21 = vand.u32 3, %v2869_v37  ;;  %v2919_v63 = vsel %vm2913_vm11, %v2916_v17, %v2918_v50 }
 0x299   : > { %7731 = vsinq.f32 %v2864_v0  ;;  %v2991_v24 = vand.u32 8388607, %v13250_v39  ;;  %vm2767_vm6 = vcmp.lt.s32.totalorder %v10554_v20, 2  ;;  %v2772_v62 = vxor.u32 2147483648, %v7726_v38 }
 0x29a   : > { %v10650_v34 = vand.u32 31, %v10630_v10  ;;  %v6869_v11 = vadd.s32 4294967169, %v3924_v54  ;;  %vm2937_vm5 = vc.u32 %v10624_v4, %v10632_v27  ;;  %v2769_v51 = vxor.u32 2147483648, %v7728_v48 }
 0x29b   : > { %v2938_v60 = vadd.s32 1, %v10633_v29  ;;  %v3001_v43 = vshll.u32 %v13352_v49, %v13562_v14  ;;  %v3002_v8 = vshrl.u32 %v13350_v2, %v13563_v12  ;;  %v2935_v37 = vmul.u32 %v2928_v36, %v2919_v63 }
 0x29c   : > { %13561 = vst [vmem:[#allocation21_spill] sm:$0xff] %v10650_v34  ;;  %v2992_v17 = vor.u32 8388608, %v2991_v24  ;;  %v3004_v16 = vshll.u32 %v13350_v2, %v13562_v14  ;;  %v3005_v54 = vshrl.u32 %v13354_v13, %v13563_v12  ;;  %vm2764_vm14 = vweird.f32 %v13527_v61  ;;  %v13564_v24 = vld [vmem:[#allocation37_spill] sm:$0xff] }
 0x29d   : > { %vm2872_vm7 = vcmp.eq.s32.totalorder %v10642_v21, 0  ;;  %v2939_v31 = vsel %vm2937_vm5, %v2938_v60, %v10633_v29  ;;  %v3003_v50 = vor.u32 %v3002_v8, %v3001_v43  ;;  %v3007_v46 = vshll.u32 %v13354_v13, %v13562_v14  ;;  %v13565_v29 = vld [vmem:[#allocation39_spill] sm:$0xff]  ;;  %v13566_v60 = vld [vmem:[#allocation32_spill] sm:$0xff] }
 0x29e   : > { %v3008_v36 = vshrl.u32 %v13339_v3, %v13563_v12  ;;  %vm2875_vm8 = vcmp.eq.s32.totalorder %v10642_v21, 2  ;;  %v2940_v0 = vadd.s32 %v2939_v31, %v2935_v37  ;;  %v3006_v63 = vor.u32 %v3005_v54, %v3004_v16 }
 0x29f   : > { %vm3018_vm0 = vcmp.lt.s32.totalorder %v13564_v24, 3  ;;  %v2773_v39 = vsel %vm2771_vm1, %v2772_v62, %v7728_v48  ;;  %vm3016_vm11 = vcmp.lt.s32.totalorder %v13564_v24, 1  ;;  %v2770_v43 = vsel %vm2768_vm4, %v7726_v38, %v2769_v51  ;;  %v13567_v48 = vld [vmem:[#allocation40_spill] sm:$0xff] }
 0x2a0   : > { %v3009_v57 = vor.u32 %v3008_v36, %v3007_v46  ;;  %v3030_v14 = vsel %vm3018_vm0, %v13566_v60, %v13565_v29  ;;  %v2941_v8 = vadd.s32 536870912, %v2940_v0  ;;  %v3000_v37 = vshrl.u32 %v13352_v49, %v13563_v12 }
 0x2a1   : > { %v3024_v16 = vsel %vm3016_vm11, %v3003_v50, %v3006_v63  ;;  %vm3643_vm13 = vcmp.lt.s32.totalorder %v10518_v28, 4  ;;  %vm3017_vm12 = vcmp.lt.s32.totalorder %v13564_v24, 2  ;;  %v3032_v31 = vshll.u32 %v2992_v17, 8  ;;  %v931_v17 = vpop.permute.xlu1 %930 }
 0x2a2   : > { %v3026_v62 = vsel %vm3018_vm0, %v3009_v57, %v13567_v48  ;;  %v3028_v54 = vsel %vm3016_vm11, %v3006_v63, %v3009_v57  ;;  %v7730_v38 = vpop.eup %7729  ;;  %v10692_v51 = vshrl.u32 %v2941_v8, 30  ;;  %v3021_v12 = vsel %vm3019_vm2, %v3009_v57, 2102212464 }
 0x2a3   : > { %v3027_v46 = vsel %vm3017_vm12, %v3024_v16, %v3026_v62  ;;  %v3031_v36 = vsel %vm3017_vm12, %v3028_v54, %v3030_v14  ;;  %v7732_v29 = vpop.eup %7731  ;;  %v2774_v60 = vsel %vm2767_vm6, %v2770_v43, %v2773_v39  ;;  %v2876_v48 = vxor.u32 2147483648, %v7730_v38 }
 0x2a4   : > { %v10702_v25 = vmul.u32.u64.low %v3032_v31, %v3031_v36  ;;  %v10703_v55 = vmul.u32.u64.high %v3032_v31, %v3031_v36, %v10702_v25  ;;  %v2873_v8 = vxor.u32 2147483648, %v7732_v29  ;;  %v3930_v15 = vadd.s32 1, %v6869_v11 }
 0x2a5   : > { %v2943_v1 = vshll.u32 %v10692_v51, 30  ;;  %v3020_v57 = vsel %vm3016_vm11, %v3000_v37, %v3003_v50  ;;  %v2877_v16 = vsel %vm2875_vm8, %v2876_v48, %v7732_v29  ;;  %v3022_v14 = vsel %vm3018_vm0, %v3006_v63, %v3021_v12 }
 0x2a6   : > { %v10712_v20 = vmul.u32.u64.low %v3032_v31, %v3027_v46  ;;  %v10713_v39 = vmul.u32.u64.high %v3032_v31, %v3027_v46, %v10712_v20  ;;  %v2775_v25 = vsel %vm2764_vm14, nan, %v2774_v60  ;;  %vm2871_vm2 = vcmp.lt.s32.totalorder %v10642_v21, 2  ;;  %v1127_v21 = vpop.permute.xlu1 %1126 }
 0x2a7   : > { %v2874_v11 = vsel %vm2872_vm7, %v7730_v38, %v2873_v8  ;;  %v10721_v43 = vsub.s32 %v2940_v0, %v2943_v1  ;;  %v10725_v50 = vor.u32 %v10543_v30, %v10539_v19  ;;  %vm2868_vm4 = vweird.f32 %v13539_v23 }
 0x2a8   : > { %v2878_v63 = vsel %vm2871_vm2, %v2874_v11, %v2877_v16  ;;  %v10729_v37 = vsub.s32 32, %v10650_v34  ;;  %v3023_v12 = vsel %vm3017_vm12, %v3020_v57, %v3022_v14  ;;  %vm3041_vm1 = vc.u32 %v10703_v55, %v10712_v20  ;;  %v13575_v11 = vld [vmem:[#allocation10_spill] sm:$0xff] }
 0x2a9   : > { %13568 = vst [vmem:[#allocation18_spill] sm:$0xff] %v10725_v50  ;;  %v2879_v62 = vsel %vm2868_vm4, nan, %v2878_v63  ;;  %v2946_v54 = vsub.s32 0, %v10721_v43  ;;  %v4560_v1 = vsel %vm1215_vm3, %v13527_v61, %v2775_v25  ;;  %vm3931_vm6 = vcmp.gt.s32.totalorder %v3930_v15, 0 }
 0x2aa   : > { %13569 = vst [vmem:[#allocation12_spill] sm:$0xff] %v10729_v37  ;;  %v4561_v19 = vsel %vm1215_vm3, %v13539_v23, %v2879_v62  ;;  %v3042_v30 = vadd.s32 1, %v10713_v39  ;;  %v10746_v0 = vsel %vm3643_vm13, %v10531_v35, 920167782  ;;  %v3743_v24 = vor.u32 %v10638_v18, %v10547_v44  ;;  %v730_v62 = vpop.permute.xlu1 %729 }
 0x2ab   : > { %v4585_v38 = vpack.c.bf16 %v4561_v19, %v4560_v1  ;;  %v6830_v46 = vmin.u32 %v2946_v54, %v10721_v43  ;;  %v13570_v61 = vor.u32 %v10510_v53, %v10528_v32  ;;  %v3039_v36 = vmul.u32 %v3032_v31, %v3023_v12 }
 0x2ac   : > { %v3043_v29 = vsel %vm3041_vm1, %v3042_v30, %v10713_v39  ;;  %v980_v60 = vmul.f32 %v8097_v59, %v931_v17  ;;  %vm3747_vm5 = vcmp.lt.s32.totalorder %v10535_v41, 4  ;;  %v3843_v44 = vshrl.u32 %v13331_v45, %v10729_v37 }
 0x2ad   : > { %v10756_v23 = vsel %vm3643_vm13, %v13570_v61, 1326507024  ;;  %4793 = vmatmul.mubr.bf16.gmra.mrb[28].mxu0 %v4585_v38  ;;  %v3932_v18 = vsel %vm3931_vm6, %v3930_v15, 0  ;;  %v2948_v48 = vclz %v6830_v46  ;;  %v10766_v53 = vsel %vm3747_vm5, %v10725_v50, 920167782 }
 0x2ae   : > { %13571 = vst [vmem:[#allocation24_spill] sm:$0xff] %v10766_v53  ;;  %4802 = vmatprep.mubr.bf16.mxu0 %v13346_v40  ;;  %v2966_v32 = vsub.s32 4, %v10692_v51  ;;  %v3044_v31 = vadd.s32 %v3043_v29, %v3039_v36  ;;  %v1176_v17 = vmul.f32 %v13374_v33, %v1127_v21  ;;  %v10773_v8 = vsel %vm3747_vm5, %v3743_v24, 1326507024 }
 0x2af   : > { %13572 = vst [vmem:[#allocation11_spill] sm:$0xff] %v10773_v8  ;;  %v3842_v15 = vshll.u32 %v13339_v3, %v10650_v34  ;;  %v3846_v57 = vshrl.u32 %v13335_v7, %v10729_v37  ;;  %v6831_v16 = vadd.s32 4294967294, %v2948_v48  ;;  %v10780_v14 = vshrl.u32 %v10630_v10, 5 }
 0x2b0   : > { %v10782_v39 = vand.u32 31, %v3932_v18  ;;  %v3045_v25 = vadd.s32 536870912, %v3044_v31  ;;  %v1012_v63 = vadd.f32 %v980_v60, %v13575_v11  ;;  %v3845_v12 = vshll.u32 %v13331_v45, %v10650_v34 }
 0x2b1   : > { %13573 = vst [vmem:[#allocation22_spill] sm:$0xff] %v10780_v14  ;;  %v10785_v54 = vor.u32 %v3843_v44, %v3842_v15  ;;  %vm2882_vm14 = vcmp.lt.s32.totalorder %v13555_v42, 0  ;;  %vm6832_vm7 = vcmp.lt.s32.totalorder %v6831_v16, 0  ;;  %v2936_v24 = vadd.s32 %v10632_v27, %v10624_v4 }
 0x2b2   : > { %13574 = vst [vmem:[#allocation9_spill] sm:$0xff] %v10782_v39  ;;  %v2951_v1 = vsel %vm6832_vm7, 0, %v6831_v16  ;;  %v2967_v10 = vsel %vm2882_vm14, %v2966_v32, %v10692_v51  ;;  %v10793_v19 = vshrl.u32 %v3045_v25, 30  ;;  %v10795_v30 = vadd.f32 %v1176_v17, %v1012_v63  ;;  %v935_v16 = vpop.permute.xlu1 %934  ;;  %v13584_v63 = vld [vmem:[#allocation25_spill] sm:$0xff] }
 0x2b3   : > { %13576 = vst [vmem:[#allocation8_spill] sm:$0xff] %v10785_v54  ;;  %v3847_v21 = vor.u32 %v3846_v57, %v3845_v12  ;;  %v2952_v38 = vsub.s32 32, %v2951_v1  ;;  %v2956_v46 = vsub.s32 4294967266, %v2951_v1  ;;  %vm3851_vm8 = vcmp.lt.s32.totalorder %v10780_v14, 4  ;;  %v10822_v57 = vpop.permute.xlu0 %1130 }
 0x2b4   : > { %13577 = vst [vmem:[#allocation28_spill] sm:$0xff] %v10795_v30  ;;  %v10801_v61 = vsub.s32 32, %v10782_v39  ;;  %v13579_v36 = vand.u32 2147483647, %v13555_v42  ;;  %v3047_v51 = vshll.u32 %v10793_v19, 30  ;;  %v2953_v60 = vshll.u32 %v10721_v43, %v2951_v1 }
 0x2b5   : > { %v2954_v44 = vshrl.u32 %v2936_v24, %v2952_v38  ;;  %v2957_v48 = vadd.s32 127, %v2956_v46  ;;  %v10816_v27 = vsel %vm3851_vm8, %v10785_v54, 920167782  ;;  %v4027_v17 = vand.u32 2139095040, %v10795_v30 }
 0x2b6   : > { %13578 = vst [vmem:[#allocation29_spill] sm:$0xff] %v10801_v61  ;;  %vm10805_vm0 = vcmp.le.f32.partialorder %v13579_v36, 0.7853982  ;;  %13582 = vst [vmem:[#allocation34_spill] sm:$0xff] %v10816_v27  ;;  %v10818_v32 = vsub.s32 %v3044_v31, %v3047_v51  ;;  %v779_v15 = vmul.f32 %v8095_v58, %v730_v62  ;;  %v10826_v43 = vsel %vm3851_vm8, %v3847_v21, 1326507024 }
 0x2b7   : > { %v2969_v4 = vsel %vm10805_vm0, 0, %v2967_v10  ;;  %13583 = vst [vmem:[#allocation37_spill] sm:$0xff] %v10826_v43  ;;  %v2955_v25 = vor.u32 %v2954_v44, %v2953_v60  ;;  %v2958_v11 = vshll.u32 %v2957_v48, 23  ;;  %v13261_v12 = vand.u32 2147483647, %v13584_v63  ;;  %v735_v44 = vpop.permute.xlu0 %734 }
 0x2b8   : > { %v10829_v1 = vshrl.u32 %v3932_v18, 5  ;;  %v10833_v31 = vshll.u32 %v13339_v3, %v10782_v39  ;;  %v2973_v10 = vadd.s32 3, %v2969_v4  ;;  %v3050_v62 = vsub.s32 0, %v10818_v32 }
 0x2b9   : > { %v10838_v24 = vshrl.u32 %v13331_v45, %v10801_v61  ;;  %v10842_v21 = vshll.u32 %v13331_v45, %v10782_v39  ;;  %v2959_v38 = vor.u32 4788187, %v2958_v11  ;;  %v981_v46 = vmul.f32 %v8097_v59, %v935_v16  ;;  %v13585_v39 = vld [vmem:[#allocation36_spill] sm:$0xff] }
 0x2ba   : > { %v10847_v18 = vshrl.u32 %v13335_v7, %v10801_v61  ;;  %v6834_v36 = vmin.u32 %v3050_v62, %v10818_v32  ;;  %v4028_v51 = vshrl.u32 %v4027_v17, 23  ;;  %v817_v60 = vadd.f32 %v10216_v5, %v779_v15  ;;  %v13586_v15 = vld [vmem:[#allocation3_spill] sm:$0xff] }
 0x2bb   : > { %v2960_v48 = vand.u32 2147483647, %v2959_v38  ;;  %v2962_v4 = vcvt.s32.f32 %v2955_v25  ;;  %v3095_v30 = vand.u32 8388607, %v13261_v12  ;;  %v3106_v11 = vshrl.u32 %v13350_v2, %v13585_v39 }
 0x2bc   : > { %v10855_v27 = vand.u32 3, %v2973_v10  ;;  %vm2986_vm11 = vcmp.lt.s32.totalorder %v13560_v52, 0  ;;  %v3040_v16 = vadd.s32 %v10712_v20, %v10703_v55  ;;  %v3052_v62 = vclz %v6834_v36 }
 0x2bd   : > { %v2963_v17 = vmul.f32 %v2962_v4, %v2960_v48  ;;  %v10860_v61 = vadd.f32 %v981_v46, %v817_v60  ;;  %v10863_v5 = vmul.f32 %v8095_v58, %v735_v44  ;;  %v3105_v25 = vshll.u32 %v13352_v49, %v13586_v15 }
 0x2be   : > { %v6835_v38 = vadd.s32 4294967294, %v3052_v62  ;;  %v6873_v12 = vadd.s32 4294967169, %v4028_v51  ;;  %v3104_v10 = vshrl.u32 %v13352_v49, %v13585_v39  ;;  %v3109_v54 = vshrl.u32 %v13354_v13, %v13585_v39 }
 0x2bf   : > { %v2964_v43 = vxor.u32 2147483648, %v2963_v17  ;;  %v3096_v55 = vor.u32 8388608, %v3095_v30  ;;  %v3107_v20 = vor.u32 %v3106_v11, %v3105_v25  ;;  %v3112_v46 = vshrl.u32 %v13339_v3, %v13585_v39 }
 0x2c0   : > { %vm6836_vm12 = vcmp.lt.s32.totalorder %v6835_v38, 0  ;;  %v3070_v36 = vsub.s32 4, %v10793_v19  ;;  %v3108_v60 = vshll.u32 %v13350_v2, %v13586_v15  ;;  %v3111_v51 = vshll.u32 %v13354_v13, %v13586_v15 }
 0x2c1   : > { %v2965_v44 = vsel %vm2882_vm14, %v2964_v43, %v2963_v17  ;;  %v3055_v48 = vsel %vm6836_vm12, 0, %v6835_v38  ;;  %v3114_v30 = vshll.u32 %v13339_v3, %v13586_v15  ;;  %v3115_v4 = vshrl.u32 %v13331_v45, %v13585_v39 }
 0x2c2   : > { %v2968_v11 = vsel %vm10805_vm0, %v13555_v42, %v2965_v44  ;;  %v3056_v62 = vsub.s32 32, %v3055_v48  ;;  %v3060_v25 = vsub.s32 4294967266, %v3055_v48  ;;  %v3110_v14 = vor.u32 %v3109_v54, %v3108_v60 }
 0x2c3   : > { %v3113_v37 = vor.u32 %v3112_v46, %v3111_v51  ;;  %v3116_v34 = vor.u32 %v3115_v4, %v3114_v30  ;;  %v3117_v50 = vshll.u32 %v13331_v45, %v13586_v15  ;;  %v3118_v43 = vshrl.u32 %v13335_v7, %v13585_v39  ;;  %v13590_v51 = vld [vmem:[#allocation2_spill] sm:$0xff] }
 0x2c4   : > { %7733 = vcosq.f32 %v2968_v11  ;;  %v13587_v17 = vand.u32 2147483647, %v13560_v52  ;;  %v3057_v29 = vshll.u32 %v10818_v32, %v3055_v48  ;;  %v3058_v44 = vshrl.u32 %v3040_v16, %v3056_v62 }
 0x2c5   : > { %v3061_v8 = vadd.s32 127, %v3060_v25  ;;  %7735 = vsinq.f32 %v2968_v11  ;;  %v3071_v54 = vsel %vm2986_vm11, %v3070_v36, %v10793_v19  ;;  %v4034_v15 = vadd.s32 1, %v6873_v12 }
 0x2c6   : > { %vm10893_vm2 = vcmp.le.f32.partialorder %v13587_v17, 0.7853982  ;;  %v3119_v46 = vor.u32 %v3118_v43, %v3117_v50  ;;  %v3059_v60 = vor.u32 %v3058_v44, %v3057_v29  ;;  %vm3120_vm4 = vcmp.lt.s32.totalorder %v13590_v51, 1 }
 0x2c7   : > { %v3062_v39 = vshll.u32 %v3061_v8, 23  ;;  %vm3123_vm1 = vcmp.lt.s32.totalorder %v13590_v51, 4  ;;  %vm3122_vm6 = vcmp.lt.s32.totalorder %v13590_v51, 3  ;;  %v3128_v4 = vsel %vm3120_vm4, %v3107_v20, %v3110_v14 }
 0x2c8   : > { %v3125_v30 = vsel %vm3123_vm1, %v3113_v37, 2102212464  ;;  %v3129_v32 = vsel %vm3123_vm1, %v3116_v34, 920167782  ;;  %vm3121_vm14 = vcmp.lt.s32.totalorder %v13590_v51, 2  ;;  %v3132_v11 = vsel %vm3120_vm4, %v3110_v14, %v3113_v37 }
 0x2c9   : > { %v3063_v16 = vor.u32 4788187, %v3062_v39  ;;  %v3130_v48 = vsel %vm3122_vm6, %v3113_v37, %v3129_v32  ;;  %v3124_v62 = vsel %vm3120_vm4, %v3104_v10, %v3107_v20  ;;  %v3133_v19 = vsel %vm3123_vm1, %v3119_v46, 1326507024  ;;  %v13591_v39 = vld [vmem:[#allocation35_spill] sm:$0xff] }
 0x2ca   : > { %v3131_v50 = vsel %vm3121_vm14, %v3128_v4, %v3130_v48  ;;  %v3136_v8 = vshll.u32 %v3096_v55, 8  ;;  %v3066_v36 = vcvt.s32.f32 %v3059_v60  ;;  %v3126_v25 = vsel %vm3122_vm6, %v3110_v14, %v3125_v30  ;;  %v10925_v14 = vld [vmem:[%s13055_s2] ss:$0 sm:$0xff] }
 0x2cb   : > { %v3064_v12 = vand.u32 2147483647, %v3063_v16  ;;  %v3134_v43 = vsel %vm3122_vm6, %v3116_v34, %v3133_v19  ;;  %v13270_v32 = vand.u32 2147483647, %v13591_v39  ;;  %v1177_v10 = vmul.f32 %v13374_v33, %v10822_v57  ;;  %v13592_v60 = vld [vmem:[#allocation38_spill] sm:$0xff] }
 0x2cc   : > { %v3135_v17 = vsel %vm3121_vm14, %v3132_v11, %v3134_v43  ;;  %v10909_v29 = vmul.u32.u64.low %v3136_v8, %v3131_v50  ;;  %v10910_v44 = vmul.u32.u64.high %v3136_v8, %v3131_v50, %v10909_v29  ;;  %vm2979_vm7 = vcmp.eq.s32.totalorder %v10855_v27, 2 }
 0x2cd   : > { %v3067_v37 = vmul.f32 %v3066_v36, %v3064_v12  ;;  %v10916_v20 = vmul.u32.u64.low %v3136_v8, %v3135_v17  ;;  %v10917_v46 = vmul.u32.u64.high %v3136_v8, %v3135_v17, %v10916_v20  ;;  %v3073_v34 = vsel %vm10893_vm2, 0, %v3071_v54 }
 0x2ce   : > { %v10929_v55 = vadd.f32 %v10925_v14, %v10863_v5  ;;  %v3127_v57 = vsel %vm3121_vm14, %v3124_v62, %v3126_v25  ;;  %v3210_v30 = vshrl.u32 %v13350_v2, %v13592_v60  ;;  %v7734_v4 = vpop.eup %7733  ;;  %vm4035_vm0 = vcmp.gt.s32.totalorder %v4034_v15, 0  ;;  %v13594_v62 = vld [vmem:[#allocation31_spill] sm:$0xff]  ;;  %v939_v25 = vpop.permute.xlu1 %938 }
 0x2cf   : > { %v3068_v16 = vxor.u32 2147483648, %v3067_v37  ;;  %v10936_v54 = vadd.f32 %v1177_v10, %v10860_v61  ;;  %v3213_v48 = vshrl.u32 %v13354_v13, %v13592_v60  ;;  %v7736_v11 = vpop.eup %7735  ;;  %vm2976_vm12 = vcmp.eq.s32.totalorder %v10855_v27, 0 }
 0x2d0   : > { %v3146_v5 = vadd.s32 1, %v10910_v44  ;;  %v3199_v51 = vand.u32 8388607, %v13270_v32  ;;  %v3209_v50 = vshll.u32 %v13352_v49, %v13594_v62  ;;  %v3212_v19 = vshll.u32 %v13350_v2, %v13594_v62  ;;  %v7621_v32 = vld [vmem:[%s13058_s5] sm:$0xff]  }
 0x2d1   : > { %13593 = vst [vmem:[#allocation39_spill] sm:$0xff] %v10936_v54  ;;  %v3069_v61 = vsel %vm2986_vm11, %v3068_v16, %v3067_v37  ;;  %v3077_v12 = vadd.s32 3, %v3073_v34  ;;  %v3143_v36 = vmul.u32 %v3136_v8, %v3127_v57  ;;  %vm3145_vm4 = vc.u32 %v10917_v46, %v10909_v29  ;;  %7110 = vmatprep.subr.bf16.mxu1 %v7621_v32 }
 0x2d2   : > { %v3072_v43 = vsel %vm10893_vm2, %v13560_v52, %v3069_v61  ;;  %v3147_v17 = vsel %vm3145_vm4, %v3146_v5, %v10910_v44  ;;  %v3211_v10 = vor.u32 %v3210_v30, %v3209_v50  ;;  %v3214_v20 = vor.u32 %v3213_v48, %v3212_v19  ;;  %v13595_v48 = vld [vmem:[#allocation14_spill] sm:$0xff]  ;;  %7111 = vmatpush3.bf16.msra.mxu1 %v7621_v32  ;;  %v13596_v19 = vld [vmem:[#allocation16_spill] sm:$0xff] }
 0x2d3   : > { %v2980_v53 = vxor.u32 2147483648, %v7734_v4  ;;  %7737 = vcosq.f32 %v3072_v43  ;;  %v10960_v8 = vsel %vm4035_vm0, %v4034_v15, 0  ;;  %v3148_v37 = vadd.s32 %v3147_v17, %v3143_v36  ;;  %v13597_v61 = vld [vmem:[#allocation4_spill] sm:$0xff]  ;;  %v13598_v36 = vld [vmem:[#allocation43_spill] sm:$0xff] }
 0x2d4   : > { %7739 = vsinq.f32 %v3072_v43  ;;  %v3200_v34 = vor.u32 8388608, %v3199_v51  ;;  %v3215_v38 = vshll.u32 %v13354_v13, %v13594_v62  ;;  %v3216_v44 = vshrl.u32 %v13339_v3, %v13592_v60 }
 0x2d5   : > { %v2977_v57 = vxor.u32 2147483648, %v7736_v11  ;;  %v3078_v30 = vand.u32 3, %v3077_v12  ;;  %v3149_v16 = vadd.s32 536870912, %v3148_v37  ;;  %vm3224_vm11 = vcmp.lt.s32.totalorder %v13595_v48, 1  ;;  %v1135_v12 = vpop.permute.xlu1 %1134 }
 0x2d6   : > { %v3208_v15 = vshrl.u32 %v13352_v49, %v13592_v60  ;;  %v3217_v5 = vor.u32 %v3216_v44, %v3215_v38  ;;  %vm3226_vm2 = vcmp.lt.s32.totalorder %v13595_v48, 3  ;;  %v3232_v51 = vsel %vm3224_vm11, %v3211_v10, %v3214_v20 }
 0x2d7   : > { %v2981_v62 = vsel %vm2979_vm7, %v2980_v53, %v7736_v11  ;;  %v10974_v50 = vshrl.u32 %v3149_v16, 30  ;;  %vm3225_vm1 = vcmp.lt.s32.totalorder %v13595_v48, 2  ;;  %v3238_v32 = vsel %vm3226_vm2, %v13597_v61, %v13596_v19 }
 0x2d8   : > { %v3229_v60 = vsel %vm3227_vm9, %v3217_v5, 2102212464  ;;  %v3234_v43 = vsel %vm3226_vm2, %v3217_v5, %v13598_v36  ;;  %v3236_v53 = vsel %vm3224_vm11, %v3214_v20, %v3217_v5  ;;  %v3240_v11 = vshll.u32 %v3200_v34, 8 }
 0x2d9   : > { %v2978_v17 = vsel %vm2976_vm12, %v7734_v4, %v2977_v57  ;;  %v3151_v38 = vshll.u32 %v10974_v50, 30  ;;  %v3228_v44 = vsel %vm3224_vm11, %v3208_v15, %v3211_v10  ;;  %v3235_v16 = vsel %vm3225_vm1, %v3232_v51, %v3234_v43 }
 0x2da   : > { %v3239_v19 = vsel %vm3225_vm1, %v3236_v53, %v3238_v32  ;;  %v10997_v61 = vmul.u32.u64.low %v3240_v11, %v3235_v16  ;;  %v10998_v36 = vmul.u32.u64.high %v3240_v11, %v3235_v16, %v10997_v61  ;;  %v982_v34 = vmul.f32 %v8097_v59, %v939_v25 }
 0x2db   : > { %v11002_v5 = vsub.s32 %v3148_v37, %v3151_v38  ;;  %v3230_v4 = vsel %vm3226_vm2, %v3214_v20, %v3229_v60  ;;  %v11006_v57 = vmul.u32.u64.low %v3240_v11, %v3239_v19  ;;  %v11007_v41 = vmul.u32.u64.high %v3240_v11, %v3239_v19, %v11006_v57  ;;  %v740_v60 = vpop.permute.xlu1 %739 }
 0x2dc   : > { %v11011_v10 = vor.u32 %v10838_v24, %v10833_v31  ;;  %vm2972_vm9 = vweird.f32 %v13555_v42  ;;  %vm2975_vm6 = vcmp.lt.s32.totalorder %v10855_v27, 2  ;;  %v1178_v15 = vmul.f32 %v13374_v33, %v1135_v12  ;;  %v11034_v57 = vpop.permute.xlu0 %744 }
 0x2dd   : > { %v7738_v51 = vpop.eup %7737  ;;  %v2982_v25 = vsel %vm2975_vm6, %v2978_v17, %v2981_v62  ;;  %v11017_v37 = vand.u32 31, %v10960_v8  ;;  %v4131_v20 = vand.u32 2139095040, %v10936_v54  ;;  %v3154_v32 = vsub.s32 0, %v11002_v5 }
 0x2de   : > { %13599 = vst [vmem:[#allocation32_spill] sm:$0xff] %v11011_v10  ;;  %v7740_v43 = vpop.eup %7739  ;;  %v3084_v53 = vxor.u32 2147483648, %v7738_v51  ;;  %v3231_v31 = vsel %vm3225_vm1, %v3228_v44, %v3230_v4  ;;  %v3250_v24 = vadd.s32 1, %v10998_v36  ;;  %v1014_v27 = vadd.f32 %v982_v34, %v10929_v55 }
 0x2df   : > { %13600 = vst [vmem:[#allocation40_spill] sm:$0xff] %v11017_v37  ;;  %vm3079_vm14 = vcmp.lt.s32.totalorder %v3078_v30, 2  ;;  %v3081_v12 = vxor.u32 2147483648, %v7740_v43  ;;  %vm3083_vm7 = vcmp.eq.s32.totalorder %v3078_v30, 2  ;;  %v6838_v62 = vmin.u32 %v3154_v32, %v11002_v5 }
 0x2e0   : > { %vm3080_vm0 = vcmp.eq.s32.totalorder %v3078_v30, 0  ;;  %v3085_v17 = vsel %vm3083_vm7, %v3084_v53, %v7740_v43  ;;  %vm3249_vm12 = vc.u32 %v11007_v41, %v10997_v61  ;;  %v11028_v38 = vadd.f32 %v1178_v15, %v1014_v27 }
 0x2e1   : > { %v2983_v48 = vsel %vm2972_vm9, nan, %v2982_v25  ;;  %v3082_v44 = vsel %vm3080_vm0, %v7738_v51, %v3081_v12  ;;  %v3156_v16 = vclz %v6838_v62  ;;  %v3247_v19 = vmul.u32 %v3240_v11, %v3231_v31  ;;  %v943_v25 = vpop.permute.xlu1 %942 }
 0x2e2   : > { %13601 = vst [vmem:[#allocation10_spill] sm:$0xff] %v11028_v38  ;;  %vm3076_vm4 = vweird.f32 %v13560_v52  ;;  %v3086_v55 = vsel %vm3079_vm14, %v3082_v44, %v3085_v17  ;;  %v4132_v34 = vshrl.u32 %v4131_v20, 23  ;;  %v3251_v4 = vsel %vm3249_vm12, %v3250_v24, %v10998_v36 }
 0x2e3   : > { %vm3955_vm11 = vcmp.lt.s32.totalorder %v10829_v1, 4  ;;  %v3087_v30 = vsel %vm3076_vm4, nan, %v3086_v55  ;;  %v11038_v15 = vsub.s32 32, %v11017_v37  ;;  %v6839_v32 = vadd.s32 4294967294, %v3156_v16  ;;  %v1139_v16 = vpop.permute.xlu0 %1138 }
 0x2e4   : > { %v3252_v43 = vadd.s32 %v3251_v4, %v3247_v19  ;;  %v4562_v11 = vsel %vm1215_vm3, %v13555_v42, %v2983_v48  ;;  %v4563_v51 = vsel %vm1215_vm3, %v13560_v52, %v3087_v30  ;;  %v4235_v36 = vand.u32 2139095040, %v11028_v38 }
 0x2e5   : > { %13602 = vst [vmem:[#allocation25_spill] sm:$0xff] %v11038_v15  ;;  %v781_v20 = vmul.f32 %v8095_v58, %v740_v60  ;;  %v3951_v53 = vor.u32 %v10847_v18, %v10842_v21  ;;  %v4586_v31 = vpack.c.bf16 %v4563_v51, %v4562_v11  ;;  %vm6840_vm2 = vcmp.lt.s32.totalorder %v6839_v32, 0 }
 0x2e6   : > { %v3253_v24 = vadd.s32 536870912, %v3252_v43  ;;  %v6877_v27 = vadd.s32 4294967169, %v4132_v34  ;;  %v3159_v12 = vsel %vm6840_vm2, 0, %v6839_v32  ;;  %v3174_v62 = vsub.s32 4, %v10974_v50 }
 0x2e7   : > { %v983_v42 = vmul.f32 %v8097_v59, %v943_v25  ;;  %4803 = vmatmul.mubr.bf16.gmra.mrb[32].mxu0 %v4586_v31  ;;  %v3144_v52 = vadd.s32 %v10909_v29, %v10917_v46  ;;  %v3160_v17 = vsub.s32 32, %v3159_v12  ;;  %v3164_v48 = vsub.s32 4294967266, %v3159_v12 }
 0x2e8   : > { %v11054_v44 = vshrl.u32 %v3253_v24, 30  ;;  %v4051_v21 = vshrl.u32 %v13331_v45, %v11038_v15  ;;  %4812 = vmatprep.mubr.bf16.mxu0 %v13346_v40  ;;  %vm3090_vm1 = vcmp.lt.s32.totalorder %v13584_v63, 0  ;;  %v4236_v18 = vshrl.u32 %v4235_v36, 23 }
 0x2e9   : > { %v819_v60 = vadd.f32 %v10925_v14, %v781_v20  ;;  %v3161_v19 = vshll.u32 %v11002_v5, %v3159_v12  ;;  %v3162_v55 = vshrl.u32 %v3144_v52, %v3160_v17  ;;  %v3165_v34 = vadd.s32 127, %v3164_v48 }
 0x2ea   : > { %v3255_v29 = vshll.u32 %v11054_v44, 30  ;;  %v4054_v46 = vshrl.u32 %v13335_v7, %v11038_v15  ;;  %v4138_v4 = vadd.s32 1, %v6877_v27  ;;  %v3175_v30 = vsel %vm3090_vm1, %v3174_v62, %v10974_v50 }
 0x2eb   : > { %v1015_v32 = vadd.f32 %v983_v42, %v819_v60  ;;  %v3163_v25 = vor.u32 %v3162_v55, %v3161_v19  ;;  %v3166_v11 = vshll.u32 %v3165_v34, 23  ;;  %v1179_v36 = vmul.f32 %v13374_v33, %v1139_v16  ;;  %v13609_v16 = vld [vmem:[#allocation33_spill] sm:$0xff] }
 0x2ec   : > { %v11068_v51 = vsub.s32 %v3252_v43, %v3255_v29  ;;  %v11074_v5 = vsel %vm3955_vm11, %v11011_v10, 920167782  ;;  %v4050_v20 = vshll.u32 %v13339_v3, %v11017_v37  ;;  %v4053_v31 = vshll.u32 %v13331_v45, %v11017_v37  ;;  %v13610_v34 = vld [vmem:[#allocation13_spill] sm:$0xff] }
 0x2ed   : > { %v6881_v24 = vadd.s32 4294967169, %v4236_v18  ;;  %v11081_v50 = vshrl.u32 %v10960_v8, 5  ;;  %v13604_v43 = vand.u32 2147483647, %v13584_v63  ;;  %v3167_v12 = vor.u32 4788187, %v3166_v11 }
 0x2ee   : > { %v3258_v62 = vsub.s32 0, %v11068_v51  ;;  %v11090_v42 = vor.u32 %v4051_v21, %v4050_v20  ;;  %v4055_v52 = vor.u32 %v4054_v46, %v4053_v31  ;;  %vm4139_vm6 = vcmp.gt.s32.totalorder %v4138_v4, 0 }
 0x2ef   : > { %13603 = vst [vmem:[#allocation36_spill] sm:$0xff] %v11081_v50  ;;  %vm11085_vm9 = vcmp.le.f32.partialorder %v13604_v43, 0.7853982  ;;  %v3168_v48 = vand.u32 2147483647, %v3167_v12  ;;  %v3170_v18 = vcvt.s32.f32 %v3163_v25  ;;  %v11095_v60 = vadd.f32 %v1179_v36, %v1015_v32 }
 0x2f0   : > { %13607 = vst [vmem:[#allocation3_spill] sm:$0xff] %v11090_v42  ;;  %v3177_v17 = vsel %vm11085_vm9, 0, %v3175_v30  ;;  %v6842_v8 = vmin.u32 %v3258_v62, %v11068_v51  ;;  %v11098_v19 = vsub.s32 32, %v13609_v16  ;;  %v11102_v55 = vsel %vm3955_vm11, %v3951_v53, 1326507024 }
 0x2f1   : > { %13608 = vst [vmem:[#allocation2_spill] sm:$0xff] %v11095_v60  ;;  %v4242_v21 = vadd.s32 1, %v6881_v24  ;;  %v13273_v29 = vand.u32 2147483647, %v13610_v34  ;;  %vm4059_vm14 = vcmp.lt.s32.totalorder %v11081_v50, 4  ;;  %v3171_v46 = vmul.f32 %v3170_v18, %v3168_v48 }
 0x2f2   : > { %v3181_v30 = vadd.s32 3, %v3177_v17  ;;  %v3260_v11 = vclz %v6842_v8  ;;  %v11109_v32 = vsel %vm4059_vm14, %v11090_v42, 920167782  ;;  %v11113_v25 = vsel %vm4059_vm14, %v4055_v52, 1326507024 }
 0x2f3   : > { %13611 = vst [vmem:[#allocation35_spill] sm:$0xff] %v11109_v32  ;;  %13612 = vst [vmem:[#allocation38_spill] sm:$0xff] %v11113_v25  ;;  %v11116_v53 = vsel %vm4139_vm6, %v4138_v4, 0  ;;  %vm3194_vm7 = vcmp.lt.s32.totalorder %v13591_v39, 0  ;;  %v3172_v36 = vxor.u32 2147483648, %v3171_v46  ;;  %v4339_v43 = vand.u32 2139095040, %v11095_v60 }
 0x2f4   : > { %v13613_v20 = vand.u32 2147483647, %v13591_v39  ;;  %v6843_v24 = vadd.s32 4294967294, %v3260_v11  ;;  %v3278_v12 = vsub.s32 4, %v11054_v44  ;;  %vm4243_vm12 = vcmp.gt.s32.totalorder %v4242_v21, 0 }
 0x2f5   : > { %v3303_v62 = vand.u32 8388607, %v13273_v29  ;;  %v3314_v4 = vshrl.u32 %v13350_v2, %v11098_v19  ;;  %v3173_v52 = vsel %vm3090_vm1, %v3172_v36, %v3171_v46  ;;  %v11133_v17 = vand.u32 3, %v3181_v30 }
 0x2f6   : > { %vm11121_vm0 = vcmp.le.f32.partialorder %v13613_v20, 0.7853982  ;;  %v3248_v48 = vadd.s32 %v10997_v61, %v11007_v41  ;;  %vm6844_vm4 = vcmp.lt.s32.totalorder %v6843_v24, 0  ;;  %v3176_v18 = vsel %vm11085_vm9, %v13584_v63, %v3173_v52 }
 0x2f7   : > { %v3263_v8 = vsel %vm6844_vm4, 0, %v6843_v24  ;;  %v3313_v11 = vshll.u32 %v13352_v49, %v13609_v16  ;;  %v3317_v20 = vshrl.u32 %v13354_v13, %v11098_v19  ;;  %v11144_v46 = vsel %vm4243_vm12, %v4242_v21, 0 }
 0x2f8   : > { %v3264_v29 = vsub.s32 32, %v3263_v8  ;;  %v3268_v60 = vsub.s32 4294967266, %v3263_v8  ;;  %v4340_v30 = vshrl.u32 %v4339_v43, 23  ;;  %v3279_v41 = vsel %vm3194_vm7, %v3278_v12, %v11054_v44 }
 0x2f9   : > { %v3304_v61 = vor.u32 8388608, %v3303_v62  ;;  %v3315_v36 = vor.u32 %v3314_v4, %v3313_v11  ;;  %v3316_v27 = vshll.u32 %v13350_v2, %v13609_v16  ;;  %7741 = vcosq.f32 %v3176_v18 }
 0x2fa   : > { %v3265_v24 = vshll.u32 %v11068_v51, %v3263_v8  ;;  %v3266_v52 = vshrl.u32 %v3248_v48, %v3264_v29  ;;  %v3269_v38 = vadd.s32 127, %v3268_v60  ;;  %7743 = vsinq.f32 %v3176_v18 }
 0x2fb   : > { %v3318_v54 = vor.u32 %v3317_v20, %v3316_v27  ;;  %v3319_v21 = vshll.u32 %v13354_v13, %v13609_v16  ;;  %v3320_v43 = vshrl.u32 %v13339_v3, %v11098_v19  ;;  %v3322_v12 = vshll.u32 %v13339_v3, %v13609_v16  ;;  %v13617_v27 = vld [vmem:[#allocation7_spill] sm:$0xff] }
 0x2fc   : > { %v3267_v32 = vor.u32 %v3266_v52, %v3265_v24  ;;  %v3270_v44 = vshll.u32 %v3269_v38, 23  ;;  %v3323_v62 = vshrl.u32 %v13331_v45, %v11098_v19  ;;  %v3281_v51 = vsel %vm11121_vm0, 0, %v3279_v41 }
 0x2fd   : > { %v3321_v60 = vor.u32 %v3320_v43, %v3319_v21  ;;  %v3325_v29 = vshll.u32 %v13331_v45, %v13609_v16  ;;  %v3326_v4 = vshrl.u32 %v13335_v7, %v11098_v19  ;;  %v11167_v18 = vand.u32 31, %v11144_v46  ;;  %v7622_v43 = vld [vmem:[%s13058_s5 + $0x8] sm:$0xff]  }
 0x2fe   : > { %v3271_v48 = vor.u32 4788187, %v3270_v44  ;;  %v6885_v38 = vadd.s32 4294967169, %v4340_v30  ;;  %v3324_v8 = vor.u32 %v3323_v62, %v3322_v12  ;;  %v3274_v11 = vcvt.s32.f32 %v3267_v32  ;;  %v7623_v44 = vld [vmem:[%s13058_s5 + $0x10] sm:$0xff]   ;;  %7112 = vmatprep.subr.bf16.mxu1 %v7622_v43 }
 0x2ff   : > { %13616 = vst [vmem:[#allocation31_spill] sm:$0xff] %v11167_v18  ;;  %v3327_v20 = vor.u32 %v3326_v4, %v3325_v29  ;;  %vm3328_vm2 = vcmp.lt.s32.totalorder %v13617_v27, 1  ;;  %vm3331_vm1 = vcmp.lt.s32.totalorder %v13617_v27, 4  ;;  %vm3330_vm9 = vcmp.lt.s32.totalorder %v13617_v27, 3  ;;  %v11189_v29 = vpop.f32.mrb[0].mxu0  ;;  %7113 = vmatpush3.bf16.msra.mxu1 %v7622_v43 }
 0x300   : > { %v3272_v41 = vand.u32 2147483647, %v3271_v48  ;;  %v3333_v24 = vsel %vm3331_vm1, %v3321_v60, 2102212464  ;;  %v3336_v16 = vsel %vm3328_vm2, %v3315_v36, %v3318_v54  ;;  %v3312_v52 = vshrl.u32 %v13352_v49, %v11098_v19  ;;  %7114 = vmatprep.subr.bf16.mxu1 %v7623_v44 }
 0x301   : > { %v3337_v21 = vsel %vm3331_vm1, %v3324_v8, 920167782  ;;  %v3340_v30 = vsel %vm3328_vm2, %v3318_v54, %v3321_v60  ;;  %v3341_v32 = vsel %vm3331_vm1, %v3327_v20, 1326507024  ;;  %vm3329_vm6 = vcmp.lt.s32.totalorder %v13617_v27, 2 }
 0x302   : > { %v3275_v12 = vmul.f32 %v3274_v11, %v3272_v41  ;;  %v3338_v62 = vsel %vm3330_vm9, %v3321_v60, %v3337_v21  ;;  %v3342_v19 = vsel %vm3330_vm9, %v3324_v8, %v3341_v32  ;;  %v3285_v4 = vadd.s32 3, %v3281_v51  ;;  %v11195_v11 = vpop.f32.mrb[1].mxu0  ;;  %v13619_v51 = vld [vmem:[#allocation27_spill] sm:$0xff] }
 0x303   : > { %v3339_v48 = vsel %vm3329_vm6, %v3336_v16, %v3338_v62  ;;  %v3343_v20 = vsel %vm3329_vm6, %v3340_v30, %v3342_v19  ;;  %v3344_v42 = vshll.u32 %v3304_v61, 8  ;;  %13618 = vst [vmem:[#allocation14_spill] sm:$0xff] %v11195_v11  ;;  %v11197_v41 = vpop.eup %7741  ;;  %v3332_v60 = vsel %vm3328_vm2, %v3312_v52, %v3315_v36  ;;  %v11204_v16 = vpop.f32.mrb[2].mxu0  ;;  %7115 = vmatpush3.bf16.msra.mxu1 %v7623_v44 }
 0x304   : > { %v3276_v25 = vxor.u32 2147483648, %v3275_v12  ;;  %v3334_v8 = vsel %vm3330_vm9, %v3318_v54, %v3333_v24  ;;  %v13281_v21 = vand.u32 2147483647, %v13619_v51  ;;  %v7744_v32 = vpop.eup %7743  ;;  %v11208_v61 = vmul.f32 %v8095_v58, %v11034_v57  ;;  %v7624_v54 = vld [vmem:[%s13058_s5 + $0x18] sm:$0xff]   ;;  %v11218_v36 = vpop.f32.mrb[3].mxu0 }
 0x305   : > { %v11210_v30 = vadd.s32 1, %v6885_v38  ;;  %v11212_v62 = vmul.u32.u64.low %v3344_v42, %v3343_v20  ;;  %v11213_v19 = vmul.u32.u64.high %v3344_v42, %v3343_v20, %v11212_v62  ;;  %13620 = vst [vmem:[#allocation16_spill] sm:$0xff] %v11218_v36  ;;  %vm3187_vm12 = vcmp.eq.s32.totalorder %v11133_v17, 2  ;;  %7116 = vmatprep.subr.bf16.mxu1 %v7624_v54 }
 0x306   : > { %v3277_v24 = vsel %vm3194_vm7, %v3276_v25, %v3275_v12  ;;  %v11223_v52 = vmul.u32.u64.low %v3344_v42, %v3339_v48  ;;  %v11224_v58 = vmul.u32.u64.high %v3344_v42, %v3339_v48, %v11223_v52  ;;  %vm3184_vm4 = vcmp.eq.s32.totalorder %v11133_v17, 0 }
 0x307   : > { %v3280_v57 = vsel %vm11121_vm0, %v13591_v39, %v3277_v24  ;;  %v11232_v38 = vshrl.u32 %v11144_v46, 5  ;;  %v11235_v43 = vsub.s32 32, %v11167_v18  ;;  %v3335_v20 = vsel %vm3329_vm6, %v3332_v60, %v3334_v8  ;;  %v7625_v46 = vld [vmem:[%s13058_s5 + $0x20] sm:$0xff]   ;;  %v13623_v8 = vld [vmem:[#allocation15_spill] sm:$0xff]  ;;  %7117 = vmatpush3.bf16.msra.mxu1 %v7624_v54 }
 0x308   : > { %v3188_v25 = vxor.u32 2147483648, %v11197_v41  ;;  %7745 = vcosq.f32 %v3280_v57  ;;  %v11240_v12 = vand.u32 3, %v3285_v4  ;;  %v3407_v48 = vand.u32 8388607, %v13281_v21  ;;  %v13622_v60 = vld [vmem:[#allocation42_spill] sm:$0xff]  ;;  %7118 = vmatprep.subr.bf16.mxu1 %v7625_v46 }
 0x309   : > { %13621 = vst [vmem:[#allocation4_spill] sm:$0xff] %v11235_v43  ;;  %v3185_v31 = vxor.u32 2147483648, %v7744_v32  ;;  %7747 = vsinq.f32 %v3280_v57  ;;  %vm4347_vm7 = vcmp.gt.s32.totalorder %v11210_v30, 0  ;;  %vm3353_vm0 = vc.u32 %v11213_v19, %v11223_v52 }
 0x30a   : > { %vm3183_vm2 = vcmp.lt.s32.totalorder %v11133_v17, 2  ;;  %v3351_v27 = vmul.u32 %v3344_v42, %v3335_v20  ;;  %v3354_v4 = vadd.s32 1, %v11224_v58  ;;  %v3417_v44 = vshll.u32 %v13352_v49, %v13622_v60 }
 0x30b   : > { %v3418_v62 = vshrl.u32 %v13350_v2, %v13623_v8  ;;  %v3420_v24 = vshll.u32 %v13350_v2, %v13622_v60  ;;  %v3421_v57 = vshrl.u32 %v13354_v13, %v13623_v8  ;;  %v3423_v21 = vshll.u32 %v13354_v13, %v13622_v60  ;;  %7119 = vmatpush3.bf16.msra.mxu1 %v7625_v46 }
 0x30c   : > { %v3424_v42 = vshrl.u32 %v13339_v3, %v13623_v8  ;;  %v3189_v20 = vsel %vm3187_vm12, %v3188_v25, %v7744_v32  ;;  %v3355_v36 = vsel %vm3353_vm0, %v3354_v4, %v11224_v58  ;;  %v3408_v11 = vor.u32 8388608, %v3407_v48 }
 0x30d   : > { %v3419_v50 = vor.u32 %v3418_v62, %v3417_v44  ;;  %vm3180_vm1 = vweird.f32 %v13584_v63  ;;  %v3356_v37 = vadd.s32 %v3355_v36, %v3351_v27  ;;  %v3422_v15 = vor.u32 %v3421_v57, %v3420_v24  ;;  %v947_v57 = vpop.permute.xlu1 %946 }
 0x30e   : > { %v3425_v10 = vor.u32 %v3424_v42, %v3423_v21  ;;  %vm3434_vm9 = vcmp.lt.s32.totalorder %v10262_v22, 3  ;;  %v3416_v60 = vshrl.u32 %v13352_v49, %v13623_v8  ;;  %vm3432_vm6 = vcmp.lt.s32.totalorder %v10262_v22, 1 }
 0x30f   : > { %vm3433_vm12 = vcmp.lt.s32.totalorder %v10262_v22, 2  ;;  %v3446_v32 = vsel %vm3434_vm9, %v10270_v6, %v10464_v56  ;;  %vm3284_vm0 = vweird.f32 %v13591_v39  ;;  %v3357_v54 = vadd.s32 536870912, %v3356_v37 }
 0x310   : > { %v3437_v21 = vsel %vm3435_vm10, %v3425_v10, 2102212464  ;;  %v3440_v36 = vsel %vm3432_vm6, %v3419_v50, %v3422_v15  ;;  %v3442_v58 = vsel %vm3434_vm9, %v3425_v10, %v10457_v47  ;;  %v3186_v25 = vsel %vm3184_vm4, %v11197_v41, %v3185_v31 }
 0x311   : > { %v3443_v48 = vsel %vm3433_vm12, %v3440_v36, %v3442_v58  ;;  %v3444_v27 = vsel %vm3432_vm6, %v3422_v15, %v3425_v10  ;;  %v3448_v6 = vshll.u32 %v3408_v11, 8  ;;  %v11288_v56 = vshrl.u32 %v3357_v54, 30 }
 0x312   : > { %v3436_v4 = vsel %vm3432_vm6, %v3416_v60, %v3419_v50  ;;  %v3438_v44 = vsel %vm3434_vm9, %v3422_v15, %v3437_v21  ;;  %v3447_v8 = vsel %vm3433_vm12, %v3444_v27, %v3446_v32  ;;  %v7746_v47 = vpop.eup %7745  ;;  %v3190_v11 = vsel %vm3183_vm2, %v3186_v25, %v3189_v20 }
 0x313   : > { %v11294_v62 = vmul.u32.u64.low %v3448_v6, %v3447_v8  ;;  %v11295_v24 = vmul.u32.u64.high %v3448_v6, %v3447_v8, %v11294_v62  ;;  %v11297_v41 = vmul.u32.u64.low %v3448_v6, %v3443_v48  ;;  %v11298_v31 = vmul.u32.u64.high %v3448_v6, %v3443_v48, %v11297_v41  ;;  %v7748_v10 = vpop.eup %7747 }
 0x314   : > { %v3292_v46 = vxor.u32 2147483648, %v7746_v47  ;;  %v4258_v50 = vshll.u32 %v13339_v3, %v11167_v18  ;;  %v3359_v15 = vshll.u32 %v11288_v56, 30  ;;  %v3289_v42 = vxor.u32 2147483648, %v7748_v10  ;;  %v1143_v62 = vpop.permute.xlu1 %1142 }
 0x315   : > { %vm3291_vm10 = vcmp.eq.s32.totalorder %v11240_v12, 2  ;;  %v4259_v60 = vshrl.u32 %v13331_v45, %v11235_v43  ;;  %v4348_v32 = vsel %vm4347_vm7, %v11210_v30, 0  ;;  %vm3288_vm4 = vcmp.eq.s32.totalorder %v11240_v12, 0 }
 0x316   : > { %v3293_v17 = vsel %vm3291_vm10, %v3292_v46, %v7748_v10  ;;  %v11313_v20 = vsub.s32 %v3356_v37, %v3359_v15  ;;  %v3439_v54 = vsel %vm3433_vm12, %v3436_v4, %v3438_v44  ;;  %v3191_v21 = vsel %vm3180_vm1, nan, %v3190_v11 }
 0x317   : > { %vm3287_vm2 = vcmp.lt.s32.totalorder %v11240_v12, 2  ;;  %v3290_v36 = vsel %vm3288_vm4, %v7746_v47, %v3289_v42  ;;  %vm3457_vm9 = vc.u32 %v11295_v24, %v11297_v41  ;;  %v11322_v25 = vand.u32 31, %v4348_v32 }
 0x318   : > { %v3294_v58 = vsel %vm3287_vm2, %v3290_v36, %v3293_v17  ;;  %v3362_v30 = vsub.s32 0, %v11313_v20  ;;  %v3458_v37 = vadd.s32 1, %v11298_v31  ;;  %v11328_v48 = vor.u32 %v4259_v60, %v4258_v50 }
 0x319   : > { %13624 = vst [vmem:[#allocation43_spill] sm:$0xff] %v11322_v25  ;;  %v3295_v22 = vsel %vm3284_vm0, nan, %v3294_v58  ;;  %v11332_v27 = vshrl.u32 %v13335_v7, %v11235_v43  ;;  %v3455_v12 = vmul.u32 %v3448_v6, %v3439_v54  ;;  %v4564_v4 = vsel %vm1215_vm3, %v13584_v63, %v3191_v21 }
 0x31a   : > { %13625 = vst [vmem:[#allocation33_spill] sm:$0xff] %v11328_v48  ;;  %v4565_v44 = vsel %vm1215_vm3, %v13591_v39, %v3295_v22  ;;  %v6846_v8 = vmin.u32 %v3362_v30, %v11313_v20  ;;  %v3459_v47 = vsel %vm3457_vm9, %v3458_v37, %v11298_v31  ;;  %v11343_v10 = vshrl.u32 %v11116_v53, 5 }
 0x31b   : > { %v4587_v11 = vpack.c.bf16 %v4565_v44, %v4564_v4  ;;  %v3460_v46 = vadd.s32 %v3459_v47, %v3455_v12  ;;  %v984_v6 = vmul.f32 %v8097_v59, %v947_v57  ;;  %v11347_v50 = vand.u32 31, %v11116_v53  ;;  %v13634_v4 = vld [vmem:[#allocation46_spill] sm:$0xff] }
 0x31c   : > { %13626 = vst [vmem:[#allocation13_spill] sm:$0xff] %v11343_v10  ;;  %v11351_v63 = vshll.u32 %v13331_v45, %v11167_v18  ;;  %v11354_v39 = vsub.s32 32, %v11322_v25  ;;  %v3364_v15 = vclz %v6846_v8  ;;  %vm4267_vm7 = vcmp.lt.s32.totalorder %v11232_v38, 4 }
 0x31d   : > { %4813 = vmatmul.mubr.bf16.gmra.mrb[36].mxu0 %v4587_v11  ;;  %v820_v31 = vadd.f32 %v10925_v14, %v11208_v61  ;;  %v3461_v42 = vadd.s32 536870912, %v3460_v46  ;;  %v1180_v59 = vmul.f32 %v13374_v33, %v1143_v62  ;;  %v11365_v57 = vsel %vm4267_vm7, %v11328_v48, 920167782 }
 0x31e   : > { %13627 = vst [vmem:[#allocation7_spill] sm:$0xff] %v11354_v39  ;;  %13628 = vst [vmem:[#allocation27_spill] sm:$0xff] %v11365_v57  ;;  %4822 = vmatprep.mubr.bf16.mxu0 %v13346_v40  ;;  %vm3298_vm1 = vcmp.lt.s32.totalorder %v13610_v34, 0  ;;  %v6847_v60 = vadd.s32 4294967294, %v3364_v15  ;;  %v11369_v17 = vshrl.u32 %v4348_v32, 5  ;;  %v3382_v33 = vsub.s32 4, %v11288_v56 }
 0x31f   : > { %v13629_v14 = vand.u32 2147483647, %v13610_v34  ;;  %v11378_v54 = vshrl.u32 %v3461_v42, 30  ;;  %v1016_v21 = vadd.f32 %v984_v6, %v820_v31  ;;  %v11382_v36 = vshll.u32 %v13339_v3, %v11322_v25  ;;  %v13632_v32 = vld [vmem:[#allocation30_spill] sm:$0xff]  ;;  %v13635_v42 = vld [vmem:[#allocation20_spill] sm:$0xff]  ;;  %v13639_v57 = vld [vmem:[#allocation41_spill] sm:$0xff] }
 0x320   : > { %v11386_v58 = vshrl.u32 %v13331_v45, %v11354_v39  ;;  %vm6848_vm12 = vcmp.lt.s32.totalorder %v6847_v60, 0  ;;  %v13291_v30 = vand.u32 2147483647, %v13632_v32  ;;  %v3528_v44 = vshrl.u32 %v13339_v3, %v13634_v4 }
 0x321   : > { %vm11373_vm6 = vcmp.le.f32.partialorder %v13629_v14, 0.7853982  ;;  %v3367_v37 = vsel %vm6848_vm12, 0, %v6847_v60  ;;  %v3463_v22 = vshll.u32 %v11378_v54, 30  ;;  %v11390_v12 = vadd.f32 %v1180_v59, %v1016_v21 }
 0x322   : > { %v11396_v8 = vshll.u32 %v13331_v45, %v11322_v25  ;;  %v3352_v47 = vadd.s32 %v11223_v52, %v11213_v19  ;;  %v3368_v62 = vsub.s32 32, %v3367_v37  ;;  %v3372_v11 = vsub.s32 4294967266, %v3367_v37 }
 0x323   : > { %13633 = vst [vmem:[#allocation42_spill] sm:$0xff] %v11390_v12  ;;  %v11403_v6 = vsel %vm3298_vm1, %v3382_v33, %v11288_v56  ;;  %v11405_v15 = vsub.s32 %v3460_v46, %v3463_v22  ;;  %v3522_v31 = vshrl.u32 %v13350_v2, %v13634_v4  ;;  %v3527_v59 = vshll.u32 %v13354_v13, %v13635_v42 }
 0x324   : > { %v3369_v60 = vshll.u32 %v11313_v20, %v3367_v37  ;;  %v3370_v14 = vshrl.u32 %v3352_v47, %v3368_v62  ;;  %v3373_v21 = vadd.s32 127, %v3372_v11  ;;  %v3525_v19 = vshrl.u32 %v13354_v13, %v13634_v4 }
 0x325   : > { %v3466_v52 = vsub.s32 0, %v11405_v15  ;;  %v4443_v56 = vand.u32 2139095040, %v11390_v12  ;;  %v3511_v46 = vand.u32 8388607, %v13291_v30  ;;  %v3529_v33 = vor.u32 %v3528_v44, %v3527_v59 }
 0x326   : > { %v3371_v22 = vor.u32 %v3370_v14, %v3369_v60  ;;  %v3374_v53 = vshll.u32 %v3373_v21, 23  ;;  %v3521_v25 = vshll.u32 %v13352_v49, %v13635_v42  ;;  %v3524_v20 = vshll.u32 %v13350_v2, %v13635_v42 }
 0x327   : > { %v11424_v37 = vshrl.u32 %v13335_v7, %v11354_v39  ;;  %vm3402_vm0 = vcmp.lt.s32.totalorder %v13619_v51, 0  ;;  %v6850_v47 = vmin.u32 %v3466_v52, %v11405_v15  ;;  %v3520_v62 = vshrl.u32 %v13352_v49, %v13634_v4 }
 0x328   : > { %v3375_v44 = vor.u32 4788187, %v3374_v53  ;;  %v3385_v11 = vsel %vm11373_vm6, 0, %v11403_v6  ;;  %v3523_v59 = vor.u32 %v3522_v31, %v3521_v25  ;;  %v3526_v60 = vor.u32 %v3525_v19, %v3524_v20  ;;  %v7626_v53 = vld [vmem:[%s13058_s5 + $0x28] sm:$0xff]   ;;  %v11441_v6 = vpop.f32.mrb[4].mxu0  ;;  %v7627_v25 = vld [vmem:[%s13058_s5 + $0x30] sm:$0xff]  }
 0x329   : > { %v3468_v14 = vclz %v6850_v47  ;;  %v4444_v42 = vshrl.u32 %v4443_v56, 23  ;;  %v3512_v21 = vor.u32 8388608, %v3511_v46  ;;  %v3541_v30 = vsel %vm3539_vm15, %v3529_v33, 2102212464  ;;  %v13637_v46 = vld [vmem:[#allocation44_spill] sm:$0xff]  ;;  %7120 = vmatprep.subr.bf16.mxu1 %v7626_v53 }
 0x32a   : > { %v3376_v12 = vand.u32 2147483647, %v3375_v44  ;;  %v3378_v39 = vcvt.s32.f32 %v3371_v22  ;;  %v3456_v52 = vadd.s32 %v11297_v41, %v11295_v24  ;;  %v3486_v4 = vsub.s32 4, %v11378_v54  ;;  %v11449_v24 = vpop.f32.mrb[5].mxu0  ;;  %7121 = vmatpush3.bf16.msra.mxu1 %v7626_v53 }
 0x32b   : > { %v6851_v31 = vadd.s32 4294967294, %v3468_v14  ;;  %vm3536_vm15 = vcmp.lt.s32.totalorder %v10276_v26, 1  ;;  %vm3537_vm10 = vcmp.lt.s32.totalorder %v10276_v26, 2  ;;  %vm3538_vm4 = vcmp.lt.s32.totalorder %v10276_v26, 3  ;;  %13636 = vst [vmem:[#allocation15_spill] sm:$0xff] %v11449_v24  ;;  %v11452_v20 = vpop.f32.mrb[6].mxu0  ;;  %7122 = vmatprep.subr.bf16.mxu1 %v7627_v25 }
 0x32c   : > { %v3379_v41 = vmul.f32 %v3378_v39, %v3376_v12  ;;  %v3540_v19 = vsel %vm3536_vm15, %v3520_v62, %v3523_v59  ;;  %v3544_v56 = vsel %vm3536_vm15, %v3523_v59, %v3526_v60  ;;  %v3546_v22 = vsel %vm3538_vm4, %v3529_v33, %v13637_v46  ;;  %v13638_v14 = vld [vmem:[#allocation48_spill] sm:$0xff]  ;;  %v11456_v18 = vpop.f32.mrb[7].mxu0  ;;  %v7628_v62 = vld [vmem:[%s13058_s5 + $0x38] sm:$0xff]  }
 0x32d   : > { %vm6852_vm2 = vcmp.lt.s32.totalorder %v6851_v31, 0  ;;  %v3542_v47 = vsel %vm3538_vm4, %v3526_v60, %v3541_v30  ;;  %v3548_v44 = vsel %vm3536_vm15, %v3526_v60, %v3529_v33  ;;  %v3550_v48 = vsel %vm3538_vm4, %v13639_v57, %v13638_v14  ;;  %13640 = vst [vmem:[#allocation30_spill] sm:$0xff] %v11456_v18 }
 0x32e   : > { %v3380_v43 = vxor.u32 2147483648, %v3379_v41  ;;  %v3471_v10 = vsel %vm6852_vm2, 0, %v6851_v31  ;;  %v3487_v39 = vsel %vm3402_vm0, %v3486_v4, %v11378_v54  ;;  %v3552_v12 = vshll.u32 %v3512_v21, 8  ;;  %7123 = vmatpush3.bf16.msra.mxu1 %v7627_v25 }
 0x32f   : > { %v3472_v30 = vsub.s32 32, %v3471_v10  ;;  %v3476_v33 = vsub.s32 4294967266, %v3471_v10  ;;  %v3547_v57 = vsel %vm3537_vm10, %v3544_v56, %v3546_v22  ;;  %v3551_v59 = vsel %vm3537_vm10, %v3548_v44, %v3550_v48  ;;  %7124 = vmatprep.subr.bf16.mxu1 %v7628_v62 }
 0x330   : > { %v3381_v60 = vsel %vm3298_vm1, %v3380_v43, %v3379_v41  ;;  %v3543_v54 = vsel %vm3537_vm10, %v3540_v19, %v3542_v47  ;;  %v11472_v21 = vmul.u32.u64.low %v3552_v12, %v3551_v59  ;;  %v11473_v4 = vmul.u32.u64.high %v3552_v12, %v3551_v59, %v11472_v21  ;;  %v13641_v43 = vld [vmem:[#allocation45_spill] sm:$0xff] }
 0x331   : > { %v3384_v53 = vsel %vm11373_vm6, %v13610_v34, %v3381_v60  ;;  %v3473_v31 = vshll.u32 %v11405_v15, %v3471_v10  ;;  %v3474_v46 = vshrl.u32 %v3456_v52, %v3472_v30  ;;  %v3477_v56 = vadd.s32 127, %v3476_v33 }
 0x332   : > { %7749 = vcosq.f32 %v3384_v53  ;;  %v11479_v48 = vmul.u32.u64.low %v3552_v12, %v3547_v57  ;;  %v11480_v22 = vmul.u32.u64.high %v3552_v12, %v3547_v57, %v11479_v48  ;;  %v13302_v26 = vand.u32 2147483647, %v13641_v43  ;;  %7125 = vmatpush3.bf16.msra.mxu1 %v7628_v62  ;;  %v13645_v57 = vld [vmem:[#allocation23_spill] sm:$0xff] }
 0x333   : > { %7751 = vsinq.f32 %v3384_v53  ;;  %v13642_v41 = vand.u32 2147483647, %v13619_v51  ;;  %v3475_v61 = vor.u32 %v3474_v46, %v3473_v31  ;;  %v3478_v10 = vshll.u32 %v3477_v56, 23 }
 0x334   : > { %v3389_v15 = vadd.s32 3, %v3385_v11  ;;  %v6889_v25 = vadd.s32 4294967169, %v4444_v42  ;;  %v3615_v47 = vand.u32 8388607, %v13302_v26  ;;  %v3559_v30 = vmul.u32 %v3552_v12, %v3543_v54  ;;  %v13646_v11 = vld [vmem:[#allocation6_spill] sm:$0xff] }
 0x335   : > { %vm11486_vm9 = vcmp.le.f32.partialorder %v13642_v41, 0.7853982  ;;  %v3479_v44 = vor.u32 4788187, %v3478_v10  ;;  %v3482_v14 = vcvt.s32.f32 %v3475_v61  ;;  %vm3561_vm1 = vc.u32 %v11473_v4, %v11479_v48 }
 0x336   : > { %v3489_v52 = vsel %vm11486_vm9, 0, %v3487_v39  ;;  %v3562_v33 = vadd.s32 1, %v11480_v22  ;;  %v3625_v59 = vshll.u32 %v13352_v49, %v13645_v57  ;;  %v3626_v60 = vshrl.u32 %v13350_v2, %v13646_v11 }
 0x337   : > { %v3628_v42 = vshll.u32 %v13350_v2, %v13645_v57  ;;  %v3480_v39 = vand.u32 2147483647, %v3479_v44  ;;  %v3629_v21 = vshrl.u32 %v13354_v13, %v13646_v11  ;;  %v3631_v12 = vshll.u32 %v13354_v13, %v13645_v57 }
 0x338   : > { %v3632_v62 = vshrl.u32 %v13339_v3, %v13646_v11  ;;  %v11511_v54 = vor.u32 %v11386_v58, %v11382_v36  ;;  %v3563_v53 = vsel %vm3561_vm1, %v3562_v33, %v11480_v22  ;;  %v3616_v31 = vor.u32 8388608, %v3615_v47 }
 0x339   : > { %v3627_v46 = vor.u32 %v3626_v60, %v3625_v59  ;;  %v3483_v56 = vmul.f32 %v3482_v14, %v3480_v39  ;;  %v3564_v41 = vadd.s32 %v3563_v53, %v3559_v30  ;;  %v3630_v61 = vor.u32 %v3629_v21, %v3628_v42 }
 0x33a   : > { %v3633_v10 = vor.u32 %v3632_v62, %v3631_v12  ;;  %v3390_v44 = vand.u32 3, %v3389_v15  ;;  %v3493_v26 = vadd.s32 3, %v3489_v52  ;;  %v4450_v18 = vadd.s32 1, %v6889_v25 }
 0x33b   : > { %v3624_v57 = vshrl.u32 %v13352_v49, %v13646_v11  ;;  %vm4371_vm6 = vcmp.lt.s32.totalorder %v11369_v17, 4  ;;  %v3484_v24 = vxor.u32 2147483648, %v3483_v56  ;;  %v3565_v7 = vadd.s32 536870912, %v3564_v41 }
 0x33c   : > { %vm3640_vm12 = vcmp.lt.s32.totalorder %v10518_v28, 1  ;;  %vm3642_vm15 = vcmp.lt.s32.totalorder %v10518_v28, 3  ;;  %v7750_v36 = vpop.eup %7749  ;;  %vm3641_vm10 = vcmp.lt.s32.totalorder %v10518_v28, 2  ;;  %v3656_v30 = vshll.u32 %v3616_v31, 8 }
 0x33d   : > { %v3648_v58 = vsel %vm3640_vm12, %v3627_v46, %v3630_v61  ;;  %v3650_v22 = vsel %vm3642_vm15, %v3633_v10, %v10746_v0  ;;  %v3652_v15 = vsel %vm3640_vm12, %v3630_v61, %v3633_v10  ;;  %v3654_v52 = vsel %vm3642_vm15, %v10531_v35, %v10756_v23  ;;  %v7752_v25 = vpop.eup %7751 }
 0x33e   : > { %v3485_v47 = vsel %vm3402_vm0, %v3484_v24, %v3483_v56  ;;  %v11532_v14 = vshrl.u32 %v3565_v7, 30  ;;  %v3396_v33 = vxor.u32 2147483648, %v7750_v36  ;;  %v3645_v59 = vsel %vm3643_vm13, %v3633_v10, 2102212464 }
 0x33f   : > { %v3488_v0 = vsel %vm11486_vm9, %v13619_v51, %v3485_v47  ;;  %v3655_v35 = vsel %vm3641_vm10, %v3652_v15, %v3654_v52  ;;  %v3393_v23 = vxor.u32 2147483648, %v7752_v25  ;;  %v3651_v7 = vsel %vm3641_vm10, %v3648_v58, %v3650_v22 }
 0x340   : > { %7753 = vcosq.f32 %v3488_v0  ;;  %v3567_v24 = vshll.u32 %v11532_v14, 30  ;;  %v4367_v11 = vor.u32 %v11424_v37, %v11396_v8  ;;  %vm3392_vm0 = vcmp.eq.s32.totalorder %v3390_v44, 0 }
 0x341   : > { %7755 = vsinq.f32 %v3488_v0  ;;  %v11547_v60 = vmul.u32.u64.low %v3656_v30, %v3655_v35  ;;  %v11548_v19 = vmul.u32.u64.high %v3656_v30, %v3655_v35, %v11547_v60  ;;  %v3644_v39 = vsel %vm3640_vm12, %v3624_v57, %v3627_v46  ;;  %v13649_v0 = vld [vmem:[#allocation17_spill] sm:$0xff] }
 0x342   : > { %v11550_v42 = vsub.s32 %v3564_v41, %v3567_v24  ;;  %v3646_v21 = vsel %vm3642_vm15, %v3630_v61, %v3645_v59  ;;  %vm3395_vm13 = vcmp.eq.s32.totalorder %v3390_v44, 2  ;;  %vm4451_vm4 = vcmp.gt.s32.totalorder %v4450_v18, 0 }
 0x343   : > { %v11556_v12 = vmul.u32.u64.low %v3656_v30, %v3651_v7  ;;  %v11557_v62 = vmul.u32.u64.high %v3656_v30, %v3651_v7, %v11556_v12  ;;  %v3394_v8 = vsel %vm3392_vm0, %v7750_v36, %v3393_v23  ;;  %v3397_v37 = vsel %vm3395_vm13, %v3396_v33, %v7752_v25  ;;  %v13648_v36 = vld [vmem:[#allocation19_spill] sm:$0xff] }
 0x344   : > { %v3494_v53 = vand.u32 3, %v3493_v26  ;;  %v3570_v31 = vsub.s32 0, %v11550_v42  ;;  %v13647_v56 = vor.u32 %v11332_v27, %v11351_v63  ;;  %v11571_v41 = vsel %vm4371_vm6, %v11511_v54, 920167782 }
 0x345   : > { %v11575_v61 = vsel %vm4371_vm6, %v4367_v11, 1326507024  ;;  %v3647_v26 = vsel %vm3641_vm10, %v3644_v39, %v3646_v21  ;;  %vm3388_vm2 = vweird.f32 %v13610_v34  ;;  %vm3391_vm9 = vcmp.lt.s32.totalorder %v3390_v44, 2  ;;  %v13650_v11 = vld [vmem:[#allocation26_spill] sm:$0xff] }
 0x346   : > { %v11566_v46 = vsel %vm4267_vm7, %v13647_v56, 1326507024  ;;  %v6854_v27 = vmin.u32 %v3570_v31, %v11550_v42  ;;  %vm3665_vm1 = vc.u32 %v11548_v19, %v11556_v12  ;;  %v3398_v63 = vsel %vm3391_vm9, %v3394_v8, %v3397_v37 }
 0x347   : > { %vm3492_vm12 = vweird.f32 %v13619_v51  ;;  %v11585_v10 = vsel %vm4451_vm4, %v4450_v18, 0  ;;  %v3666_v57 = vadd.s32 1, %v11557_v62  ;;  %v13304_v58 = vand.u32 2147483647, %v13648_v36 }
 0x348   : > { %vm3495_vm15 = vcmp.lt.s32.totalorder %v3494_v53, 2  ;;  %vm3496_vm10 = vcmp.eq.s32.totalorder %v3494_v53, 0  ;;  %vm3506_vm0 = vcmp.lt.s32.totalorder %v13632_v32, 0  ;;  %v3572_v28 = vclz %v6854_v27 }
 0x349   : > { %v3663_v44 = vmul.u32 %v3656_v30, %v3647_v26  ;;  %vm3499_vm13 = vcmp.eq.s32.totalorder %v3494_v53, 2  ;;  %v3560_v22 = vadd.s32 %v11479_v48, %v11473_v4  ;;  %v3590_v15 = vsub.s32 4, %v11532_v14 }
 0x34a   : > { %v3667_v52 = vsel %vm3665_vm1, %v3666_v57, %v11557_v62  ;;  %v7754_v18 = vpop.eup %7753  ;;  %v3399_v25 = vsel %vm3388_vm2, nan, %v3398_v63  ;;  %v6855_v47 = vadd.s32 4294967294, %v3572_v28  ;;  %v3730_v59 = vshrl.u32 %v13350_v2, %v13649_v0 }
 0x34b   : > { %v3668_v33 = vadd.s32 %v3667_v52, %v3663_v44  ;;  %v7756_v35 = vpop.eup %7755  ;;  %v3500_v23 = vxor.u32 2147483648, %v7754_v18  ;;  %v3719_v30 = vand.u32 8388607, %v13304_v58  ;;  %v3733_v4 = vshrl.u32 %v13354_v13, %v13649_v0 }
 0x34c   : > { %v3736_v48 = vshrl.u32 %v13339_v3, %v13649_v0  ;;  %v3497_v24 = vxor.u32 2147483648, %v7756_v35  ;;  %vm6856_vm4 = vcmp.lt.s32.totalorder %v6855_v47, 0  ;;  %v3729_v60 = vshll.u32 %v13352_v49, %v13650_v11 }
 0x34d   : > { %v3669_v7 = vadd.s32 536870912, %v3668_v33  ;;  %v3501_v39 = vsel %vm3499_vm13, %v3500_v23, %v7756_v35  ;;  %v3575_v21 = vsel %vm6856_vm4, 0, %v6855_v47  ;;  %v3732_v62 = vshll.u32 %v13350_v2, %v13650_v11 }
 0x34e   : > { %v3735_v8 = vshll.u32 %v13354_v13, %v13650_v11  ;;  %v3498_v37 = vsel %vm3496_vm10, %v7754_v18, %v3497_v24  ;;  %v3576_v31 = vsub.s32 32, %v3575_v21  ;;  %v3580_v56 = vsub.s32 4294967266, %v3575_v21 }
 0x34f   : > { %v3731_v26 = vor.u32 %v3730_v59, %v3729_v60  ;;  %v3502_v27 = vsel %vm3495_vm15, %v3498_v37, %v3501_v39  ;;  %v13651_v63 = vand.u32 2147483647, %v13632_v32  ;;  %v11619_v28 = vshrl.u32 %v3669_v7, 30  ;;  %v13657_v37 = vld [vmem:[#allocation18_spill] sm:$0xff] }
 0x350   : > { %v3734_v44 = vor.u32 %v3733_v4, %v3732_v62  ;;  %v3737_v52 = vor.u32 %v3736_v48, %v3735_v8  ;;  %v3503_v47 = vsel %vm3492_vm12, nan, %v3502_v27  ;;  %v3577_v18 = vshll.u32 %v11550_v42, %v3575_v21  ;;  %v13656_v8 = vld [vmem:[#allocation11_spill] sm:$0xff] }
 0x351   : > { %vm11615_vm2 = vcmp.le.f32.partialorder %v13651_v63, 0.7853982  ;;  %v3578_v35 = vshrl.u32 %v3560_v22, %v3576_v31  ;;  %v3581_v23 = vadd.s32 127, %v3580_v56  ;;  %v4566_v53 = vsel %vm1215_vm3, %v13610_v34, %v3399_v25  ;;  %v13654_v34 = vld [vmem:[#allocation5_spill] sm:$0xff] }
 0x352   : > { %v4567_v59 = vsel %vm1215_vm3, %v13619_v51, %v3503_v47  ;;  %v3591_v4 = vsel %vm3506_vm0, %v3590_v15, %v11532_v14  ;;  %v3671_v48 = vshll.u32 %v11619_v28, 30  ;;  %v3720_v42 = vor.u32 8388608, %v3719_v30  ;;  %v13655_v30 = vld [vmem:[#allocation24_spill] sm:$0xff] }
 0x353   : > { %v4588_v24 = vpack.c.bf16 %v4567_v59, %v4566_v53  ;;  %v3579_v7 = vor.u32 %v3578_v35, %v3577_v18  ;;  %v3582_v11 = vshll.u32 %v3581_v23, 23  ;;  %v3728_v60 = vshrl.u32 %v13352_v49, %v13649_v0  ;;  %v11658_v53 = vpop.f32.mrb[8].mxu0 }
 0x354   : > { %v11634_v22 = vsub.s32 %v3668_v33, %v3671_v48  ;;  %vm3744_vm9 = vcmp.lt.s32.totalorder %v13654_v34, 1  ;;  %vm3745_vm1 = vcmp.lt.s32.totalorder %v13654_v34, 2  ;;  %vm3746_vm12 = vcmp.lt.s32.totalorder %v13654_v34, 3 }
 0x355   : > { %4823 = vmatmul.mubr.bf16.gmra.mrb[40].mxu0 %v4588_v24  ;;  %v3583_v51 = vor.u32 4788187, %v3582_v11  ;;  %v3749_v14 = vsel %vm3747_vm5, %v3737_v52, 2102212464  ;;  %v3752_v15 = vsel %vm3744_vm9, %v3731_v26, %v3734_v44  ;;  %v3748_v33 = vsel %vm3744_vm9, %v3728_v60, %v3731_v26 }
 0x356   : > { %4832 = vmatprep.mubr.bf16.mxu0 %v13346_v40  ;;  %v3674_v25 = vsub.s32 0, %v11634_v22  ;;  %v3754_v39 = vsel %vm3746_vm12, %v3737_v52, %v13655_v30  ;;  %v3756_v0 = vsel %vm3744_vm9, %v3734_v44, %v3737_v52  ;;  %v3586_v62 = vcvt.s32.f32 %v3579_v7  ;;  %v11672_v7 = vld [vmem:[%s13057_s4] ss:$0 sm:$0xff] }
 0x357   : > { %v3584_v21 = vand.u32 2147483647, %v3583_v51  ;;  %v3758_v31 = vsel %vm3746_vm12, %v13657_v37, %v13656_v8  ;;  %v3760_v56 = vshll.u32 %v3720_v42, 8  ;;  %v3750_v63 = vsel %vm3746_vm12, %v3734_v44, %v3749_v14 }
 0x358   : > { %v6858_v27 = vmin.u32 %v3674_v25, %v11634_v22  ;;  %v3755_v47 = vsel %vm3745_vm1, %v3752_v15, %v3754_v39  ;;  %v3759_v18 = vsel %vm3745_vm1, %v3756_v0, %v3758_v31  ;;  %v3593_v26 = vsel %vm11615_vm2, 0, %v3591_v4  ;;  %v11674_v4 = vpop.f32.mrb[9].mxu0  ;;  %v13659_v25 = vld [vmem:[#allocation49_spill] sm:$0xff] }
 0x359   : > { %v3587_v35 = vmul.f32 %v3586_v62, %v3584_v21  ;;  %v11655_v52 = vmul.u32.u64.low %v3760_v56, %v3759_v18  ;;  %v11656_v23 = vmul.u32.u64.high %v3760_v56, %v3759_v18, %v11655_v52  ;;  %v11661_v59 = vsub.s32 32, %v11347_v50  ;;  %13658 = vst [vmem:[#allocation46_spill] sm:$0xff] %v11674_v4  ;;  %v11682_v14 = vpop.f32.mrb[10].mxu0 }
 0x35a   : > { %v11664_v44 = vshrl.u32 %v11585_v10, 5  ;;  %v11667_v48 = vand.u32 31, %v11585_v10  ;;  %v3676_v24 = vclz %v6858_v27  ;;  %v3751_v42 = vsel %vm3745_vm1, %v3748_v33, %v3750_v63  ;;  %v11686_v39 = vpop.f32.mrb[11].mxu0  ;;  %v13665_v63 = vld [vmem:[#allocation12_spill] sm:$0xff] }
 0x35b   : > { %v3588_v11 = vxor.u32 2147483648, %v3587_v35  ;;  %v11678_v60 = vmul.u32.u64.low %v3760_v56, %v3755_v47  ;;  %v11679_v51 = vmul.u32.u64.high %v3760_v56, %v3755_v47, %v11678_v60  ;;  %v3597_v10 = vadd.s32 3, %v3593_v26  ;;  %13660 = vst [vmem:[#allocation20_spill] sm:$0xff] %v11686_v39 }
 0x35c   : > { %vm3610_vm5 = vcmp.lt.s32.totalorder %v13641_v43, 0  ;;  %v6859_v15 = vadd.s32 4294967294, %v3676_v24  ;;  %v13305_v30 = vand.u32 2147483647, %v13659_v25  ;;  %v3664_v34 = vadd.s32 %v11556_v12, %v11548_v19 }
 0x35d   : > { %v3589_v0 = vsel %vm3506_vm0, %v3588_v11, %v3587_v35  ;;  %v3694_v33 = vsub.s32 4, %v11619_v28  ;;  %v11695_v21 = vadd.f32 %v11672_v7, %v11189_v29  ;;  %v13661_v8 = vand.u32 2147483647, %v13641_v43  ;;  %v13664_v29 = vld [vmem:[#allocation21_spill] sm:$0xff] }
 0x35e   : > { %v3592_v62 = vsel %vm11615_vm2, %v13632_v32, %v3589_v0  ;;  %vm6860_vm10 = vcmp.lt.s32.totalorder %v6859_v15, 0  ;;  %v3767_v31 = vmul.u32 %v3760_v56, %v3751_v42  ;;  %vm3769_vm0 = vc.u32 %v11656_v23, %v11678_v60 }
 0x35f   : > { %vm11702_vm15 = vcmp.le.f32.partialorder %v13661_v8, 0.7853982  ;;  %v3679_v19 = vsel %vm6860_vm10, 0, %v6859_v15  ;;  %v3770_v12 = vadd.s32 1, %v11679_v51  ;;  %v3833_v27 = vshll.u32 %v13352_v49, %v13664_v29 }
 0x360   : > { %v3834_v57 = vshrl.u32 %v13350_v2, %v13665_v63  ;;  %7757 = vcosq.f32 %v3592_v62  ;;  %v3680_v47 = vsub.s32 32, %v3679_v19  ;;  %v3684_v18 = vsub.s32 4294967266, %v3679_v19 }
 0x361   : > { %v3823_v35 = vand.u32 8388607, %v13305_v30  ;;  %7759 = vsinq.f32 %v3592_v62  ;;  %v3771_v56 = vsel %vm3769_vm0, %v3770_v12, %v11679_v51  ;;  %v3836_v26 = vshll.u32 %v13350_v2, %v13664_v29 }
 0x362   : > { %v3837_v52 = vshrl.u32 %v13354_v13, %v13665_v63  ;;  %v3681_v24 = vshll.u32 %v11634_v22, %v3679_v19  ;;  %v3682_v11 = vshrl.u32 %v3664_v34, %v3680_v47  ;;  %v3685_v42 = vadd.s32 127, %v3684_v18  ;;  %v13666_v19 = vld [vmem:[#allocation22_spill] sm:$0xff]  ;;  %v13668_v47 = vld [vmem:[#allocation8_spill] sm:$0xff] }
 0x363   : > { %v3772_v15 = vadd.s32 %v3771_v56, %v3767_v31  ;;  %v3835_v0 = vor.u32 %v3834_v57, %v3833_v27  ;;  %v3839_v58 = vshll.u32 %v13354_v13, %v13664_v29  ;;  %v3840_v62 = vshrl.u32 %v13339_v3, %v13665_v63  ;;  %v13667_v29 = vld [vmem:[#allocation37_spill] sm:$0xff] }
 0x364   : > { %v3838_v8 = vor.u32 %v3837_v52, %v3836_v26  ;;  %v3683_v51 = vor.u32 %v3682_v11, %v3681_v24  ;;  %v3686_v12 = vshll.u32 %v3685_v42, 23  ;;  %v3695_v30 = vsel %vm3610_vm5, %v3694_v33, %v11619_v28  ;;  %v13669_v33 = vld [vmem:[#allocation34_spill] sm:$0xff] }
 0x365   : > { %v3773_v39 = vadd.s32 536870912, %v3772_v15  ;;  %v4891_v22 = vadd.f32 %v11672_v7, %v11204_v16  ;;  %v3824_v34 = vor.u32 8388608, %v3823_v35  ;;  %v3841_v31 = vor.u32 %v3840_v62, %v3839_v58 }
 0x366   : > { %vm3850_vm13 = vcmp.lt.s32.totalorder %v13666_v19, 3  ;;  %v3687_v27 = vor.u32 4788187, %v3686_v12  ;;  %vm3848_vm4 = vcmp.lt.s32.totalorder %v13666_v19, 1  ;;  %v3697_v28 = vsel %vm11702_vm15, 0, %v3695_v30 }
 0x367   : > { %v11731_v57 = vshrl.u32 %v3773_v39, 30  ;;  %v3862_v18 = vsel %vm3850_vm13, %v13668_v47, %v13667_v29  ;;  %v3856_v16 = vsel %vm3848_vm4, %v3835_v0, %v3838_v8  ;;  %v3858_v58 = vsel %vm3850_vm13, %v3841_v31, %v13669_v33 }
 0x368   : > { %v3860_v39 = vsel %vm3848_vm4, %v3838_v8, %v3841_v31  ;;  %v3688_v35 = vand.u32 2147483647, %v3687_v27  ;;  %v3690_v56 = vcvt.s32.f32 %v3683_v51  ;;  %vm3849_vm2 = vcmp.lt.s32.totalorder %v13666_v19, 2 }
 0x369   : > { %v3775_v26 = vshll.u32 %v11731_v57, 30  ;;  %v3598_v52 = vand.u32 3, %v3597_v10  ;;  %v3853_v30 = vsel %vm3851_vm8, %v3841_v31, 2102212464  ;;  %v3863_v24 = vsel %vm3849_vm2, %v3860_v39, %v3862_v18 }
 0x36a   : > { %v3864_v11 = vshll.u32 %v3824_v34, 8  ;;  %v7758_v42 = vpop.eup %7757  ;;  %v3691_v62 = vmul.f32 %v3690_v56, %v3688_v35  ;;  %v3832_v27 = vshrl.u32 %v13352_v49, %v13665_v63  ;;  %v3859_v51 = vsel %vm3849_vm2, %v3856_v16, %v3858_v58 }
 0x36b   : > { %v11753_v12 = vsub.s32 %v3772_v15, %v3775_v26  ;;  %v7760_v29 = vpop.eup %7759  ;;  %v3701_v47 = vadd.s32 3, %v3697_v28  ;;  %v4922_v10 = vmax.f32 %v11695_v21, 0.0  ;;  %v3854_v18 = vsel %vm3850_vm13, %v3838_v8, %v3853_v30 }
 0x36c   : > { %v11760_v33 = vmul.u32.u64.low %v3864_v11, %v3863_v24  ;;  %v11761_v31 = vmul.u32.u64.high %v3864_v11, %v3863_v24, %v11760_v33  ;;  %v3692_v4 = vxor.u32 2147483648, %v3691_v62  ;;  %v3852_v15 = vsel %vm3848_vm4, %v3832_v27, %v3835_v0 }
 0x36d   : > { %v3778_v34 = vsub.s32 0, %v11753_v12  ;;  %v4923_v63 = vmax.f32 %v4891_v22, 0.0  ;;  %vm3714_vm8 = vcmp.lt.s32.totalorder %v13648_v36, 0  ;;  %vm3600_vm9 = vcmp.eq.s32.totalorder %v3598_v52, 0 }
 0x36e   : > { %v11769_v16 = vmul.u32.u64.low %v3864_v11, %v3859_v51  ;;  %v11770_v58 = vmul.u32.u64.high %v3864_v11, %v3859_v51, %v11769_v16  ;;  %vm3603_vm1 = vcmp.eq.s32.totalorder %v3598_v52, 2  ;;  %v3693_v21 = vsel %vm3610_vm5, %v3692_v4, %v3691_v62 }
 0x36f   : > { %v6862_v28 = vmin.u32 %v3778_v34, %v11753_v12  ;;  %v3601_v39 = vxor.u32 2147483648, %v7760_v29  ;;  %v3604_v35 = vxor.u32 2147483648, %v7758_v42  ;;  %v3696_v0 = vsel %vm11702_vm15, %v13641_v43, %v3693_v21 }
 0x370   : > { %v3855_v8 = vsel %vm3849_vm2, %v3852_v15, %v3854_v18  ;;  %vm3596_vm12 = vweird.f32 %v13632_v32  ;;  %7761 = vcosq.f32 %v3696_v0  ;;  %v11782_v22 = vand.u32 3, %v3701_v47 }
 0x371   : > { %v13670_v56 = vand.u32 2147483647, %v13648_v36  ;;  %v3780_v26 = vclz %v6862_v28  ;;  %vm3873_vm5 = vc.u32 %v11761_v31, %v11769_v16  ;;  %7763 = vsinq.f32 %v3696_v0  ;;  %v13673_v28 = vld [vmem:[#allocation47_spill] sm:$0xff] }
 0x372   : > { %v3798_v37 = vsub.s32 4, %v11731_v57  ;;  %v3874_v19 = vadd.s32 1, %v11770_v58  ;;  %v4892_v30 = vadd.f32 %v11672_v7, %v11441_v6  ;;  %v3871_v62 = vmul.u32 %v3864_v11, %v3855_v8 }
 0x373   : > { %vm11786_vm10 = vcmp.le.f32.partialorder %v13670_v56, 0.7853982  ;;  %v6863_v24 = vadd.s32 4294967294, %v3780_v26  ;;  %v4954_v27 = vpack.c.bf16 %v4923_v63, %v4922_v10  ;;  %v4893_v51 = vadd.f32 %v11672_v7, %v11452_v20 }
 0x374   : > { %vm3599_vm15 = vcmp.lt.s32.totalorder %v3598_v52, 2  ;;  %v3602_v47 = vsel %vm3600_vm9, %v7758_v42, %v3601_v39  ;;  %v3605_v33 = vsel %vm3603_vm1, %v3604_v35, %v7760_v29  ;;  %v3875_v34 = vsel %vm3873_vm5, %v3874_v19, %v11770_v58 }
 0x375   : > { %vm3707_vm0 = vcmp.eq.s32.totalorder %v11782_v22, 2  ;;  %vm6864_vm13 = vcmp.lt.s32.totalorder %v6863_v24, 0  ;;  %v3876_v15 = vadd.s32 %v3875_v34, %v3871_v62  ;;  %7126 = vmatprep.mubr.bf16.mxu1 %v4954_v27  ;;  %v4925_v18 = vmax.f32 %v4893_v51, 0.0 }
 0x376   : > { %vm3704_vm4 = vcmp.eq.s32.totalorder %v11782_v22, 0  ;;  %v3768_v6 = vadd.s32 %v11678_v60, %v11656_v23  ;;  %v3783_v11 = vsel %vm6864_vm13, 0, %v6863_v24  ;;  %v3799_v20 = vsel %vm3714_vm8, %v3798_v37, %v11731_v57  ;;  %v13674_v23 = vld [vmem:[#allocation29_spill] sm:$0xff] }
 0x377   : > { %v4924_v52 = vmax.f32 %v4892_v30, 0.0  ;;  %v3606_v42 = vsel %vm3599_vm15, %v3602_v47, %v3605_v33  ;;  %vm3703_vm2 = vcmp.lt.s32.totalorder %v11782_v22, 2  ;;  %v3784_v29 = vsub.s32 32, %v3783_v11 }
 0x378   : > { %v3788_v10 = vsub.s32 4294967266, %v3783_v11  ;;  %v3877_v63 = vadd.s32 536870912, %v3876_v15  ;;  %vm3700_vm9 = vweird.f32 %v13641_v43  ;;  %v3785_v58 = vshll.u32 %v11753_v12, %v3783_v11  ;;  %v13675_v12 = vld [vmem:[#allocation9_spill] sm:$0xff] }
 0x379   : > { %v4955_v21 = vpack.c.bf16 %v4925_v18, %v4924_v52  ;;  %v3920_v39 = vand.u32 2147483647, %v13673_v28  ;;  %v3938_v60 = vshrl.u32 %v13350_v2, %v13674_v23  ;;  %v3786_v35 = vshrl.u32 %v3768_v6, %v3784_v29 }
 0x37a   : > { %v3789_v0 = vadd.s32 127, %v3788_v10  ;;  %v11814_v57 = vshrl.u32 %v3877_v63, 30  ;;  %v3941_v8 = vshrl.u32 %v13354_v13, %v13674_v23  ;;  %v3607_v56 = vsel %vm3596_vm12, nan, %v3606_v42  ;;  %v7762_v30 = vpop.eup %7761 }
 0x37b   : > { %v3801_v26 = vsel %vm11786_vm10, 0, %v3799_v20  ;;  %7127 = vmatmul.mubr.bf16.vlgmr.msra.gmra.mrb[0].mxu1 %v4955_v21  ;;  %v3937_v37 = vshll.u32 %v13352_v49, %v13675_v12  ;;  %v3944_v19 = vshrl.u32 %v13339_v3, %v13674_v23  ;;  %v3787_v24 = vor.u32 %v3786_v35, %v3785_v58  ;;  %v7764_v47 = vpop.eup %7763 }
 0x37c   : > { %v3790_v62 = vshll.u32 %v3789_v0, 23  ;;  %v3879_v27 = vshll.u32 %v11814_v57, 30  ;;  %v3940_v51 = vshll.u32 %v13350_v2, %v13675_v12  ;;  %v3708_v33 = vxor.u32 2147483648, %v7762_v30 }
 0x37d   : > { %v3927_v34 = vand.u32 8388607, %v3920_v39  ;;  %v3939_v18 = vor.u32 %v3938_v60, %v3937_v37  ;;  %v3943_v6 = vshll.u32 %v13354_v13, %v13675_v12  ;;  %v3705_v11 = vxor.u32 2147483648, %v7764_v47 }
 0x37e   : > { %v3791_v20 = vor.u32 4788187, %v3790_v62  ;;  %v11833_v52 = vsub.s32 %v3876_v15, %v3879_v27  ;;  %v3942_v42 = vor.u32 %v3941_v8, %v3940_v51  ;;  %v3709_v29 = vsel %vm3707_vm0, %v3708_v33, %v7764_v47  ;;  %v13676_v33 = vld [vmem:[#allocation32_spill] sm:$0xff] }
 0x37f   : > { %v4568_v10 = vsel %vm1215_vm3, %v13632_v32, %v3607_v56  ;;  %v3805_v63 = vadd.s32 3, %v3801_v26  ;;  %v3945_v58 = vor.u32 %v3944_v19, %v3943_v6  ;;  %v3706_v21 = vsel %vm3704_vm4, %v7762_v30, %v3705_v11 }
 0x380   : > { %v3792_v60 = vand.u32 2147483647, %v3791_v20  ;;  %v3794_v35 = vcvt.s32.f32 %v3787_v24  ;;  %v3882_v0 = vsub.s32 0, %v11833_v52  ;;  %v3710_v15 = vsel %vm3703_vm2, %v3706_v21, %v3709_v29  ;;  %v11889_v21 = vpop.f32.mrb[12].mxu0 }
 0x381   : > { %v3928_v8 = vor.u32 8388608, %v3927_v34  ;;  %vm3952_vm1 = vcmp.lt.s32.totalorder %v10829_v1, 1  ;;  %vm3954_vm12 = vcmp.lt.s32.totalorder %v10829_v1, 3  ;;  %v3711_v32 = vsel %vm3700_vm9, nan, %v3710_v15 }
 0x382   : > { %v3795_v56 = vmul.f32 %v3794_v35, %v3792_v60  ;;  %v6866_v26 = vmin.u32 %v3882_v0, %v11833_v52  ;;  %v3960_v12 = vsel %vm3952_vm1, %v3939_v18, %v3942_v42  ;;  %v4569_v37 = vsel %vm1215_vm3, %v13641_v43, %v3711_v32  ;;  %v11895_v0 = vpop.f32.mrb[13].mxu0 }
 0x383   : > { %vm3953_vm5 = vcmp.lt.s32.totalorder %v10829_v1, 2  ;;  %v3962_v22 = vsel %vm3954_vm12, %v3945_v58, %v11074_v5  ;;  %v3964_v19 = vsel %vm3952_vm1, %v3942_v42, %v3945_v58  ;;  %v4589_v30 = vpack.c.bf16 %v4569_v37, %v4568_v10  ;;  %13677 = vst [vmem:[#allocation44_spill] sm:$0xff] %v11895_v0  ;;  %v11901_v32 = vpop.f32.mrb[14].mxu0 }
 0x384   : > { %v3796_v24 = vxor.u32 2147483648, %v3795_v56  ;;  %v3884_v62 = vclz %v6866_v26  ;;  %v3957_v27 = vsel %vm3955_vm11, %v3945_v58, 2102212464  ;;  %v11863_v51 = vand.u32 3, %v3805_v63 }
 0x385   : > { %v3936_v43 = vshrl.u32 %v13352_v49, %v13674_v23  ;;  %v3963_v47 = vsel %vm3953_vm5, %v3960_v12, %v3962_v22  ;;  %v3966_v5 = vsel %vm3954_vm12, %v13676_v33, %v11102_v55  ;;  %4833 = vmatmul.mubr.bf16.gmra.mrb[44].mxu0 %v4589_v30  ;;  %v3968_v20 = vshll.u32 %v3928_v8, 8  ;;  %v13683_v33 = vld [vmem:[#allocation25_spill] sm:$0xff] }
 0x386   : > { %v3797_v34 = vsel %vm3714_vm8, %v3796_v24, %v3795_v56  ;;  %v6867_v6 = vadd.s32 4294967294, %v3884_v62  ;;  %v3967_v11 = vsel %vm3953_vm5, %v3964_v19, %v3966_v5  ;;  %4842 = vmatprep.mubr.bf16.mxu0 %v13346_v40  ;;  %v3902_v29 = vsub.s32 4, %v11814_v57  ;;  %v13682_v62 = vld [vmem:[#allocation28_spill] sm:$0xff] }
 0x387   : > { %v3800_v23 = vsel %vm11786_vm10, %v13648_v36, %v3797_v34  ;;  %v3956_v55 = vsel %vm3952_vm1, %v3936_v43, %v3939_v18  ;;  %v3958_v10 = vsel %vm3954_vm12, %v3942_v42, %v3957_v27  ;;  %v3872_v18 = vadd.s32 %v11769_v16, %v11761_v31  ;;  %v11917_v31 = vpop.f32.mrb[15].mxu0 }
 0x388   : > { %7765 = vcosq.f32 %v3800_v23  ;;  %vm6868_vm11 = vcmp.lt.s32.totalorder %v6867_v6, 0  ;;  %v11886_v63 = vmul.u32.u64.low %v3968_v20, %v3967_v11  ;;  %v11887_v58 = vmul.u32.u64.high %v3968_v20, %v3967_v11, %v11886_v63  ;;  %13681 = vst [vmem:[#allocation48_spill] sm:$0xff] %v11917_v31 }
 0x389   : > { %7767 = vsinq.f32 %v3800_v23  ;;  %v3887_v60 = vsel %vm6868_vm11, 0, %v6867_v6  ;;  %v11891_v35 = vmul.u32.u64.low %v3968_v20, %v3963_v47  ;;  %v11892_v4 = vmul.u32.u64.high %v3968_v20, %v3963_v47, %v11891_v35  ;;  %v13684_v6 = vld [vmem:[#allocation40_spill] sm:$0xff] }
 0x38a   : > { %v3888_v15 = vsub.s32 32, %v3887_v60  ;;  %v3892_v42 = vsub.s32 4294967266, %v3887_v60  ;;  %v3959_v8 = vsel %vm3953_vm5, %v3956_v55, %v3958_v10  ;;  %v11904_v56 = vsub.s32 32, %v11667_v48 }
 0x38b   : > { %v11908_v26 = vshll.u32 %v13339_v3, %v11667_v48  ;;  %v13678_v12 = vand.u32 2147483647, %v13659_v25  ;;  %vm3818_vm10 = vcmp.lt.s32.totalorder %v13659_v25, 0  ;;  %v3889_v1 = vshll.u32 %v11833_v52, %v3887_v60 }
 0x38c   : > { %v3890_v16 = vshrl.u32 %v3872_v18, %v3888_v15  ;;  %v3893_v22 = vadd.s32 127, %v3892_v42  ;;  %vm3977_vm15 = vc.u32 %v11887_v58, %v11891_v35  ;;  %v3903_v19 = vsel %vm3818_vm10, %v3902_v29, %v11814_v57 }
 0x38d   : > { %vm11912_vm8 = vcmp.le.f32.partialorder %v13678_v12, 0.7853982  ;;  %v3975_v30 = vmul.u32 %v3968_v20, %v3959_v8  ;;  %v3978_v24 = vadd.s32 1, %v11892_v4  ;;  %v4024_v27 = vand.u32 2147483647, %v13682_v62 }
 0x38e   : > { %vm3808_vm0 = vcmp.eq.s32.totalorder %v11863_v51, 0  ;;  %v3891_v43 = vor.u32 %v3890_v16, %v3889_v1  ;;  %v3894_v47 = vshll.u32 %v3893_v22, 23  ;;  %v4042_v52 = vshrl.u32 %v13350_v2, %v13683_v33 }
 0x38f   : > { %v4045_v5 = vshrl.u32 %v13354_v13, %v13683_v33  ;;  %v3979_v34 = vsel %vm3977_vm15, %v3978_v24, %v11892_v4  ;;  %v4044_v57 = vshll.u32 %v13350_v2, %v13684_v6  ;;  %v4047_v11 = vshll.u32 %v13354_v13, %v13684_v6 }
 0x390   : > { %v4048_v20 = vshrl.u32 %v13339_v3, %v13683_v33  ;;  %v3895_v23 = vor.u32 4788187, %v3894_v47  ;;  %v3905_v29 = vsel %vm11912_vm8, 0, %v3903_v19  ;;  %v3980_v55 = vadd.s32 %v3979_v34, %v3975_v30  ;;  %v13685_v30 = vld [vmem:[#allocation36_spill] sm:$0xff] }
 0x391   : > { %v4041_v10 = vshll.u32 %v13352_v49, %v13684_v6  ;;  %vm3807_vm13 = vcmp.lt.s32.totalorder %v11863_v51, 2  ;;  %vm3811_vm4 = vcmp.eq.s32.totalorder %v11863_v51, 2  ;;  %v4031_v63 = vand.u32 8388607, %v4024_v27 }
 0x392   : > { %v4046_v60 = vor.u32 %v4045_v5, %v4044_v57  ;;  %v4049_v4 = vor.u32 %v4048_v20, %v4047_v11  ;;  %v7766_v18 = vpop.eup %7765  ;;  %v3896_v15 = vand.u32 2147483647, %v3895_v23  ;;  %v3898_v42 = vcvt.s32.f32 %v3891_v43  ;;  %v13687_v57 = vld [vmem:[#allocation3_spill] sm:$0xff] }
 0x393   : > { %v3981_v8 = vadd.s32 536870912, %v3980_v55  ;;  %v4043_v12 = vor.u32 %v4042_v52, %v4041_v10  ;;  %v7768_v1 = vpop.eup %7767  ;;  %v3812_v16 = vxor.u32 2147483648, %v7766_v18  ;;  %v3909_v22 = vadd.s32 3, %v3905_v29  ;;  %v13686_v52 = vld [vmem:[#allocation38_spill] sm:$0xff]  ;;  %v13688_v29 = vld [vmem:[#allocation35_spill] sm:$0xff] }
 0x394   : > { %v4040_v19 = vshrl.u32 %v13352_v49, %v13683_v33  ;;  %vm4056_vm2 = vcmp.lt.s32.totalorder %v13685_v30, 1  ;;  %v3809_v24 = vxor.u32 2147483648, %v7768_v1  ;;  %v3899_v47 = vmul.f32 %v3898_v42, %v3896_v15 }
 0x395   : > { %v3982_v34 = vshrl.u32 %v3981_v8, 30  ;;  %vm4058_vm9 = vcmp.lt.s32.totalorder %v13685_v30, 3  ;;  %v4032_v5 = vor.u32 8388608, %v4031_v63  ;;  %v4061_v6 = vsel %vm4059_vm14, %v4049_v4, 2102212464 }
 0x396   : > { %v4068_v43 = vsel %vm4056_vm2, %v4046_v60, %v4049_v4  ;;  %v4070_v11 = vsel %vm4058_vm9, %v13687_v57, %v13686_v52  ;;  %v3900_v20 = vxor.u32 2147483648, %v3899_v47  ;;  %v4064_v33 = vsel %vm4056_vm2, %v4043_v12, %v4046_v60 }
 0x397   : > { %v3983_v23 = vshll.u32 %v3982_v34, 30  ;;  %v4066_v10 = vsel %vm4058_vm9, %v4049_v4, %v13688_v29  ;;  %v3810_v15 = vsel %vm3808_vm0, %v7766_v18, %v3809_v24  ;;  %v3813_v63 = vsel %vm3811_vm4, %v3812_v16, %v7768_v1 }
 0x398   : > { %vm4057_vm14 = vcmp.lt.s32.totalorder %v13685_v30, 2  ;;  %v4060_v42 = vsel %vm4056_vm2, %v4040_v19, %v4043_v12  ;;  %v3901_v8 = vsel %vm3818_vm10, %v3900_v20, %v3899_v47  ;;  %v4062_v57 = vsel %vm4058_vm9, %v4046_v60, %v4061_v6 }
 0x399   : > { %v11969_v52 = vsub.s32 %v3980_v55, %v3983_v23  ;;  %v4071_v4 = vsel %vm4057_vm14, %v4068_v43, %v4070_v11  ;;  %v3904_v18 = vsel %vm11912_vm8, %v13659_v25, %v3901_v8  ;;  %v4067_v1 = vsel %vm4057_vm14, %v4064_v33, %v4066_v10  ;;  %v13689_v10 = vld [vmem:[#allocation39_spill] sm:$0xff] }
 0x39a   : > { %v4072_v16 = vshll.u32 %v4032_v5, 8  ;;  %v4894_v12 = vadd.f32 %v11672_v7, %v11658_v53  ;;  %v3814_v19 = vsel %vm3807_vm13, %v3810_v15, %v3813_v63  ;;  %7769 = vcosq.f32 %v3904_v18 }
 0x39b   : > { %v3986_v55 = vsub.s32 0, %v11969_v52  ;;  %v4006_v60 = vsub.s32 4, %v3982_v34  ;;  %7771 = vsinq.f32 %v3904_v18  ;;  %v4895_v37 = vadd.f32 %v11672_v7, %v11682_v14 }
 0x39c   : > { %v11983_v24 = vmul.u32.u64.low %v4072_v16, %v4071_v4  ;;  %v11984_v47 = vmul.u32.u64.high %v4072_v16, %v4071_v4, %v11983_v24  ;;  %v3910_v6 = vand.u32 3, %v3909_v22  ;;  %v11995_v53 = vshll.u32 %v13331_v45, %v11667_v48 }
 0x39d   : > { %v6870_v5 = vmin.u32 %v3986_v55, %v11969_v52  ;;  %v11989_v43 = vmul.u32.u64.low %v4072_v16, %v4067_v1  ;;  %v11990_v11 = vmul.u32.u64.high %v4072_v16, %v4067_v1, %v11989_v43  ;;  %vm3804_vm1 = vweird.f32 %v13648_v36 }
 0x39e   : > { %v4926_v51 = vmax.f32 %v4894_v12, 0.0  ;;  %v4927_v20 = vmax.f32 %v4895_v37, 0.0  ;;  %v3815_v23 = vsel %vm3804_vm1, nan, %v3814_v19  ;;  %vm3922_vm12 = vcmp.lt.s32.totalorder %v13673_v28, 0 }
 0x39f   : > { %v3988_v33 = vclz %v6870_v5  ;;  %v4063_v14 = vsel %vm4057_vm14, %v4060_v42, %v4062_v57  ;;  %v12003_v22 = vsel %vm3922_vm12, %v4006_v60, %v3982_v34  ;;  %vm4081_vm5 = vc.u32 %v11984_v47, %v11989_v43 }
 0x3a0   : > { %v4956_v29 = vpack.c.bf16 %v4927_v20, %v4926_v51  ;;  %v13306_v15 = vand.u32 2147483647, %v13689_v10  ;;  %vm3911_vm11 = vcmp.lt.s32.totalorder %v3910_v6, 2  ;;  %vm12010_vm8 = vcmp.le.f32.partialorder %v3920_v39, 0.7853982 }
 0x3a1   : > { %v6871_v8 = vadd.s32 4294967294, %v3988_v33  ;;  %v4082_v30 = vadd.s32 1, %v11990_v11  ;;  %vm3908_vm10 = vweird.f32 %v13659_v25  ;;  %vm3912_vm15 = vcmp.eq.s32.totalorder %v3910_v6, 0 }
 0x3a2   : > { %vm3915_vm0 = vcmp.eq.s32.totalorder %v3910_v6, 2  ;;  %v3976_v34 = vadd.s32 %v11891_v35, %v11887_v58  ;;  %v4079_v42 = vmul.u32 %v4072_v16, %v4063_v14  ;;  %7130 = vmatprep.mubr.bf16.mxu1 %v4956_v29  ;;  %v4570_v57 = vsel %vm1215_vm3, %v13648_v36, %v3815_v23 }
 0x3a3   : > { %vm6872_vm13 = vcmp.lt.s32.totalorder %v6871_v8, 0  ;;  %v4009_v39 = vsel %vm12010_vm8, 0, %v12003_v22  ;;  %v4083_v4 = vsel %vm4081_vm5, %v4082_v30, %v11990_v11  ;;  %v12030_v58 = vand.u32 8388607, %v13306_v15 }
 0x3a4   : > { %v3991_v18 = vsel %vm6872_vm13, 0, %v6871_v8  ;;  %v4084_v1 = vadd.s32 %v4083_v4, %v4079_v42  ;;  %v4145_v35 = vshll.u32 %v13352_v49, %v11347_v50  ;;  %v7770_v36 = vpop.eup %7769  ;;  %v4146_v19 = vshrl.u32 %v13350_v2, %v11661_v59 }
 0x3a5   : > { %v3992_v16 = vsub.s32 32, %v3991_v18  ;;  %v3996_v12 = vsub.s32 4294967266, %v3991_v18  ;;  %v4149_v55 = vshrl.u32 %v13354_v13, %v11661_v59  ;;  %v7772_v60 = vpop.eup %7771  ;;  %v3916_v24 = vxor.u32 2147483648, %v7770_v36 }
 0x3a6   : > { %v3993_v37 = vshll.u32 %v11969_v52, %v3991_v18  ;;  %v4085_v5 = vadd.s32 536870912, %v4084_v1  ;;  %v4152_v11 = vshrl.u32 %v13339_v3, %v11661_v59  ;;  %v3913_v51 = vxor.u32 2147483648, %v7772_v60 }
 0x3a7   : > { %v3994_v20 = vshrl.u32 %v3976_v34, %v3992_v16  ;;  %v3997_v23 = vadd.s32 127, %v3996_v12  ;;  %v4155_v33 = vshrl.u32 %v13331_v45, %v11661_v59  ;;  %v3917_v14 = vsel %vm3915_vm0, %v3916_v24, %v7772_v60 }
 0x3a8   : > { %v12044_v22 = vshrl.u32 %v4085_v5, 30  ;;  %v4151_v29 = vshll.u32 %v13354_v13, %v11347_v50  ;;  %v4154_v52 = vshll.u32 %v13339_v3, %v11347_v50  ;;  %v3914_v8 = vsel %vm3912_vm15, %v7770_v36, %v3913_v51 }
 0x3a9   : > { %v3995_v30 = vor.u32 %v3994_v20, %v3993_v37  ;;  %v3998_v42 = vshll.u32 %v3997_v23, 23  ;;  %v13692_v34 = vmov 1326507024   ;;  %v3918_v18 = vsel %vm3911_vm11, %v3914_v8, %v3917_v14 }
 0x3aa   : > { %v4158_v4 = vshrl.u32 %v13692_v34, %v11661_v59  ;;  %v4087_v16 = vshll.u32 %v12044_v22, 30  ;;  %v4148_v12 = vshll.u32 %v13350_v2, %v11347_v50  ;;  %v4153_v60 = vor.u32 %v4152_v11, %v4151_v29 }
 0x3ab   : > { %v3919_v24 = vsel %vm3908_vm10, nan, %v3918_v18  ;;  %v3999_v5 = vor.u32 4788187, %v3998_v42  ;;  %v4156_v15 = vor.u32 %v4155_v33, %v4154_v52  ;;  %v4157_v36 = vshll.u32 %v13331_v45, %v11347_v50  ;;  %v13693_v33 = vld [vmem:[#allocation13_spill] sm:$0xff]  ;;  %v12081_v18 = vpop.f32.mrb[16].mxu0 }
 0x3ac   : > { %v4571_v37 = vsel %vm1215_vm3, %v13659_v25, %v3919_v24  ;;  %v12064_v6 = vsub.s32 %v4084_v1, %v4087_v16  ;;  %v4147_v51 = vor.u32 %v4146_v19, %v4145_v35  ;;  %v4150_v20 = vor.u32 %v4149_v55, %v4148_v12  ;;  %v12088_v24 = vpop.f32.mrb[17].mxu0 }
 0x3ad   : > { %v4590_v23 = vpack.c.bf16 %v4571_v37, %v4570_v57  ;;  %v4000_v14 = vand.u32 2147483647, %v3999_v5  ;;  %v4002_v8 = vcvt.s32.f32 %v3995_v30  ;;  %v4159_v11 = vor.u32 %v4158_v4, %v4157_v36  ;;  %13694 = vst [vmem:[#allocation41_spill] sm:$0xff] %v12088_v24  ;;  %v12094_v37 = vpop.f32.mrb[18].mxu0 }
 0x3ae   : > { %v4090_v29 = vsub.s32 0, %v12064_v6  ;;  %v4136_v42 = vor.u32 8388608, %v12030_v58  ;;  %vm4160_vm4 = vcmp.lt.s32.totalorder %v13693_v33, 1  ;;  %vm4163_vm2 = vcmp.lt.s32.totalorder %v13693_v33, 4 }
 0x3af   : > { %4843 = vmatmul.mubr.bf16.gmra.mrb[48].mxu0 %v4590_v23  ;;  %v4003_v50 = vmul.f32 %v4002_v8, %v4000_v14  ;;  %vm4162_vm9 = vcmp.lt.s32.totalorder %v13693_v33, 3  ;;  %v4165_v25 = vsel %vm4163_vm2, %v4153_v60, 2102212464  ;;  %v4169_v1 = vsel %vm4163_vm2, %v4156_v15, 920167782  ;;  %v12100_v8 = vpop.f32.mrb[19].mxu0 }
 0x3b0   : > { %4852 = vmatprep.mubr.bf16.mxu0 %v13346_v40  ;;  %v6874_v57 = vmin.u32 %v4090_v29, %v12064_v6  ;;  %v4144_v35 = vshrl.u32 %v13352_v49, %v11661_v59  ;;  %v4168_v58 = vsel %vm4160_vm4, %v4147_v51, %v4150_v20  ;;  %v4170_v19 = vsel %vm4162_vm9, %v4153_v60, %v4169_v1 }
 0x3b1   : > { %v4004_v55 = vxor.u32 2147483648, %v4003_v50  ;;  %v4013_v52 = vadd.s32 3, %v4009_v39  ;;  %v4172_v30 = vsel %vm4160_vm4, %v4150_v20, %v4153_v60  ;;  %v4173_v4 = vsel %vm4163_vm2, %v4159_v11, 1326507024  ;;  %13695 = vst [vmem:[#allocation45_spill] sm:$0xff] %v12100_v8 }
 0x3b2   : > { %v4092_v16 = vclz %v6874_v57  ;;  %vm4161_vm14 = vcmp.lt.s32.totalorder %v13693_v33, 2  ;;  %v4164_v59 = vsel %vm4160_vm4, %v4144_v35, %v4147_v51  ;;  %v4166_v12 = vsel %vm4162_vm9, %v4150_v20, %v4165_v25  ;;  %v12105_v33 = vpop.f32.mrb[20].mxu0 }
 0x3b3   : > { %v4005_v39 = vsel %vm3922_vm12, %v4004_v55, %v4003_v50  ;;  %v4171_v5 = vsel %vm4161_vm14, %v4168_v58, %v4170_v19  ;;  %v4174_v60 = vsel %vm4162_vm9, %v4156_v15, %v4173_v4  ;;  %v4176_v36 = vshll.u32 %v4136_v42, 8  ;;  %v12111_v63 = vpop.f32.mrb[21].mxu0  ;;  %v13699_v4 = vld [vmem:[#allocation10_spill] sm:$0xff] }
 0x3b4   : > { %v4008_v23 = vsel %vm12010_vm8, %v13673_v28, %v4005_v39  ;;  %v6875_v51 = vadd.s32 4294967294, %v4092_v16  ;;  %v4110_v14 = vsub.s32 4, %v12044_v22  ;;  %v4175_v20 = vsel %vm4161_vm14, %v4172_v30, %v4174_v60  ;;  %13696 = vst [vmem:[#allocation23_spill] sm:$0xff] %v12111_v63  ;;  %v12128_v30 = vpop.f32.mrb[22].mxu0 }
 0x3b5   : > { %7773 = vcosq.f32 %v4008_v23  ;;  %v4167_v11 = vsel %vm4161_vm14, %v4164_v59, %v4166_v12  ;;  %v12102_v29 = vmul.u32.u64.low %v4176_v36, %v4175_v20  ;;  %v12103_v50 = vmul.u32.u64.high %v4176_v36, %v4175_v20, %v12102_v29  ;;  %v12136_v59 = vpop.f32.mrb[23].mxu0 }
 0x3b6   : > { %7775 = vsinq.f32 %v4008_v23  ;;  %vm6876_vm1 = vcmp.lt.s32.totalorder %v6875_v51, 0  ;;  %v12107_v15 = vmul.u32.u64.low %v4176_v36, %v4171_v5  ;;  %v12108_v42 = vmul.u32.u64.high %v4176_v36, %v4171_v5, %v12107_v15  ;;  %13700 = vst [vmem:[#allocation6_spill] sm:$0xff] %v12136_v59  ;;  %v12140_v39 = vpop.f32.mrb[24].mxu0  ;;  %v13701_v5 = vld [vmem:[#allocation4_spill] sm:$0xff] }
 0x3b7   : > { %v12115_v25 = vshrl.u32 %v13331_v45, %v11904_v56  ;;  %vm12119_vm12 = vcmp.le.f32.partialorder %v4024_v27, 0.7853982  ;;  %vm4026_vm5 = vcmp.lt.s32.totalorder %v13682_v62, 0  ;;  %v4095_v57 = vsel %vm6876_vm1, 0, %v6875_v51 }
 0x3b8   : > { %v12124_v35 = vand.u32 3, %v4013_v52  ;;  %v4080_v58 = vadd.s32 %v11989_v43, %v11984_v47  ;;  %v4096_v19 = vsub.s32 32, %v4095_v57  ;;  %v4100_v55 = vsub.s32 4294967266, %v4095_v57 }
 0x3b9   : > { %v4111_v45 = vsel %vm4026_vm5, %v4110_v14, %v12044_v22  ;;  %v4183_v27 = vmul.u32 %v4176_v36, %v4167_v11  ;;  %vm4185_vm11 = vc.u32 %v12103_v50, %v12107_v15  ;;  %v4097_v52 = vshll.u32 %v12064_v6, %v4095_v57  ;;  %v13702_v22 = vld [vmem:[#allocation31_spill] sm:$0xff]  ;;  %v12150_v14 = vpop.f32.mrb[25].mxu0 }
 0x3ba   : > { %v4098_v12 = vshrl.u32 %v4080_v58, %v4096_v19  ;;  %v4101_v47 = vadd.s32 127, %v4100_v55  ;;  %v4186_v43 = vadd.s32 1, %v12108_v42  ;;  %v4250_v60 = vshrl.u32 %v13350_v2, %v13701_v5  ;;  %13703 = vst [vmem:[#allocation19_spill] sm:$0xff] %v12150_v14  ;;  %v12155_v57 = vpop.f32.mrb[26].mxu0 }
 0x3bb   : > { %v4252_v36 = vshll.u32 %v13350_v2, %v13702_v22  ;;  %v4253_v23 = vshrl.u32 %v13354_v13, %v13701_v5  ;;  %v4256_v51 = vshrl.u32 %v13339_v3, %v13701_v5  ;;  %v4255_v29 = vshll.u32 %v13354_v13, %v13702_v22 }
 0x3bc   : > { %v4099_v6 = vor.u32 %v4098_v12, %v4097_v52  ;;  %v4102_v20 = vshll.u32 %v4101_v47, 23  ;;  %v4187_v11 = vsel %vm4185_vm11, %v4186_v43, %v12108_v42  ;;  %v12159_v58 = vshrl.u32 %v13692_v34, %v11904_v56  ;;  %v12165_v52 = vpop.f32.mrb[27].mxu0 }
 0x3bd   : > { %v4113_v19 = vsel %vm12119_vm12, 0, %v4111_v45  ;;  %v4188_v55 = vadd.s32 %v4187_v11, %v4183_v27  ;;  %v4249_v16 = vshll.u32 %v13352_v49, %v13702_v22  ;;  %13704 = vst [vmem:[#allocation17_spill] sm:$0xff] %v12165_v52  ;;  %v13705_v42 = vand.u32 2147483647, %v13699_v4  ;;  %v12169_v8 = vpop.f32.mrb[28].mxu0 }
 0x3be   : > { %v4103_v12 = vor.u32 4788187, %v4102_v20  ;;  %v4254_v43 = vor.u32 %v4253_v23, %v4252_v36  ;;  %v4257_v14 = vor.u32 %v4256_v51, %v4255_v29  ;;  %vm4015_vm8 = vcmp.lt.s32.totalorder %v12124_v35, 2  ;;  %v12173_v27 = vpop.f32.mrb[29].mxu0 }
 0x3bf   : > { %v4239_v47 = vand.u32 8388607, %v13705_v42  ;;  %v7774_v59 = vpop.eup %7773  ;;  %vm4016_vm10 = vcmp.eq.s32.totalorder %v12124_v35, 0  ;;  %v4189_v34 = vadd.s32 536870912, %v4188_v55  ;;  %v4251_v45 = vor.u32 %v4250_v60, %v4249_v16  ;;  %13706 = vst [vmem:[#allocation26_spill] sm:$0xff] %v12173_v27  ;;  %v12175_v63 = vpop.f32.mrb[30].mxu0 }
 0x3c0   : > { %v7776_v22 = vpop.eup %7775  ;;  %v4020_v11 = vxor.u32 2147483648, %v7774_v59  ;;  %v4104_v52 = vand.u32 2147483647, %v4103_v12  ;;  %v4106_v20 = vcvt.s32.f32 %v4099_v6  ;;  %v4117_v24 = vadd.s32 3, %v4113_v19  ;;  %13707 = vst [vmem:[#allocation5_spill] sm:$0xff] %v12175_v63  ;;  %v12181_v51 = vpop.f32.mrb[31].mxu0 }
 0x3c1   : > { %v4017_v36 = vxor.u32 2147483648, %v7776_v22  ;;  %v12177_v23 = vshrl.u32 %v4189_v34, 30  ;;  %vm4264_vm15 = vcmp.lt.s32.totalorder %v11232_v38, 1  ;;  %vm4266_vm0 = vcmp.lt.s32.totalorder %v11232_v38, 3  ;;  %13708 = vst [vmem:[#allocation24_spill] sm:$0xff] %v12181_v51  ;;  %v13709_v6 = vld [vmem:[#allocation33_spill] sm:$0xff] }
 0x3c2   : > { %vm4012_vm13 = vweird.f32 %v13673_v28  ;;  %v4107_v16 = vmul.f32 %v4106_v20, %v4104_v52  ;;  %v4240_v60 = vor.u32 8388608, %v4239_v47  ;;  %v4276_v29 = vsel %vm4264_vm15, %v4254_v43, %v4257_v14  ;;  %v12190_v12 = vpop.f32.mrb[32].mxu0  ;;  %v13712_v27 = vld [vmem:[#allocation27_spill] sm:$0xff] }
 0x3c3   : > { %v4278_v19 = vsel %vm4266_vm0, %v13709_v6, %v11566_v46  ;;  %13710 = vst [vmem:[#allocation11_spill] sm:$0xff] %v12190_v12  ;;  %vm4019_vm4 = vcmp.eq.s32.totalorder %v12124_v35, 2  ;;  %v4191_v42 = vshll.u32 %v12177_v23, 30  ;;  %vm4265_vm2 = vcmp.lt.s32.totalorder %v11232_v38, 2  ;;  %v12197_v47 = vpop.f32.mrb[33].mxu0 }
 0x3c4   : > { %v4272_v52 = vsel %vm4264_vm15, %v4251_v45, %v4254_v43  ;;  %13711 = vst [vmem:[#allocation18_spill] sm:$0xff] %v12197_v47  ;;  %v4018_v34 = vsel %vm4016_vm10, %v7774_v59, %v4017_v36  ;;  %v4021_v20 = vsel %vm4019_vm4, %v4020_v11, %v7776_v22  ;;  %v4108_v51 = vxor.u32 2147483648, %v4107_v16  ;;  %v12204_v6 = vpop.f32.mrb[34].mxu0 }
 0x3c5   : > { %v4274_v46 = vsel %vm4266_vm0, %v4257_v14, %v13712_v27  ;;  %v12206_v31 = vand.u32 3, %v4117_v24  ;;  %v12208_v0 = vsub.s32 %v4188_v55, %v4191_v42  ;;  %v4248_v12 = vshrl.u32 %v13352_v49, %v13701_v5  ;;  %v12214_v63 = vpop.f32.mrb[35].mxu0 }
 0x3c6   : > { %v4279_v47 = vsel %vm4265_vm2, %v4276_v29, %v4278_v19  ;;  %v4109_v59 = vsel %vm4026_vm5, %v4108_v51, %v4107_v16  ;;  %v4269_v27 = vsel %vm4267_vm7, %v4257_v14, 2102212464  ;;  %v4280_v22 = vshll.u32 %v4240_v60, 8 }
 0x3c7   : > { %v4896_v24 = vadd.f32 %v11672_v7, %v11889_v21  ;;  %v4022_v55 = vsel %vm4015_vm8, %v4018_v34, %v4021_v20  ;;  %v4112_v5 = vsel %vm12119_vm12, %v13682_v62, %v4109_v59  ;;  %v4194_v11 = vsub.s32 0, %v12208_v0  ;;  %v13713_v34 = vld [vmem:[#allocation2_spill] sm:$0xff] }
 0x3c8   : > { %v4275_v36 = vsel %vm4265_vm2, %v4272_v52, %v4274_v46  ;;  %7777 = vcosq.f32 %v4112_v5  ;;  %v12230_v51 = vmul.u32.u64.low %v4280_v22, %v4279_v47  ;;  %v12231_v16 = vmul.u32.u64.high %v4280_v22, %v4279_v47, %v12230_v51 }
 0x3c9   : > { %v4897_v14 = vadd.f32 %v11672_v7, %v11901_v32  ;;  %7779 = vsinq.f32 %v4112_v5  ;;  %v6878_v21 = vmin.u32 %v4194_v11, %v12208_v0  ;;  %v4268_v35 = vsel %vm4264_vm15, %v4248_v12, %v4251_v45 }
 0x3ca   : > { %v4270_v1 = vsel %vm4266_vm0, %v4254_v43, %v4269_v27  ;;  %v12240_v60 = vmul.u32.u64.low %v4280_v22, %v4275_v36  ;;  %v12241_v29 = vmul.u32.u64.high %v4280_v22, %v4275_v36, %v12240_v60  ;;  %v4928_v19 = vmax.f32 %v4896_v24, 0.0  ;;  %v13715_v24 = vld [vmem:[#allocation43_spill] sm:$0xff] }
 0x3cb   : > { %v4929_v42 = vmax.f32 %v4897_v14, 0.0  ;;  %v12246_v52 = vor.u32 %v12115_v25, %v11908_v26  ;;  %v4471_v7 = vor.u32 %v12159_v58, %v11995_v53  ;;  %v4023_v32 = vsel %vm4012_vm13, nan, %v4022_v55 }
 0x3cc   : > { %v4196_v45 = vclz %v6878_v21  ;;  %vm4123_vm7 = vcmp.eq.s32.totalorder %v12206_v31, 2  ;;  %v4184_v43 = vadd.s32 %v12107_v15, %v12103_v50  ;;  %v4271_v12 = vsel %vm4265_vm2, %v4268_v35, %v4270_v1  ;;  %v13714_v15 = vld [vmem:[#allocation7_spill] sm:$0xff] }
 0x3cd   : > { %v4957_v47 = vpack.c.bf16 %v4929_v42, %v4928_v19  ;;  %vm4120_vm9 = vcmp.eq.s32.totalorder %v12206_v31, 0  ;;  %v4214_v25 = vsub.s32 4, %v12177_v23  ;;  %vm4289_vm14 = vc.u32 %v12231_v16, %v12240_v60 }
 0x3ce   : > { %v6879_v26 = vadd.s32 4294967294, %v4196_v45  ;;  %v4336_v20 = vand.u32 2147483647, %v13713_v34  ;;  %vm4119_vm1 = vcmp.lt.s32.totalorder %v12206_v31, 2  ;;  %v4572_v50 = vsel %vm1215_vm3, %v13673_v28, %v4023_v32 }
 0x3cf   : > { %v4290_v38 = vadd.s32 1, %v12241_v29  ;;  %7131 = vmatmul.mubr.bf16.gmra.mrb[4].mxu1 %v4957_v47  ;;  %v4354_v46 = vshrl.u32 %v13350_v2, %v13714_v15  ;;  %v4357_v59 = vshrl.u32 %v13354_v13, %v13714_v15  ;;  %vm4116_vm12 = vweird.f32 %v13682_v62 }
 0x3d0   : > { %vm6880_vm5 = vcmp.lt.s32.totalorder %v6879_v26, 0  ;;  %v4287_v27 = vmul.u32 %v4280_v22, %v4271_v12  ;;  %v4353_v55 = vshll.u32 %v13352_v49, %v13715_v24  ;;  %v4360_v5 = vshrl.u32 %v13339_v3, %v13714_v15 }
 0x3d1   : > { %v4199_v28 = vsel %vm6880_vm5, 0, %v6879_v26  ;;  %v4291_v11 = vsel %vm4289_vm14, %v4290_v38, %v12241_v29  ;;  %v4356_v36 = vshll.u32 %v13350_v2, %v13715_v24  ;;  %v4359_v51 = vshll.u32 %v13354_v13, %v13715_v24 }
 0x3d2   : > { %v4200_v14 = vsub.s32 32, %v4199_v28  ;;  %v4204_v21 = vsub.s32 4294967266, %v4199_v28  ;;  %v4292_v35 = vadd.s32 %v4291_v11, %v4287_v27  ;;  %v4343_v22 = vand.u32 8388607, %v4336_v20  ;;  %v7778_v1 = vpop.eup %7777 }
 0x3d3   : > { %vm4130_vm11 = vcmp.lt.s32.totalorder %v13689_v10, 0  ;;  %v4201_v19 = vshll.u32 %v12208_v0, %v4199_v28  ;;  %v4355_v42 = vor.u32 %v4354_v46, %v4353_v55  ;;  %v4358_v32 = vor.u32 %v4357_v59, %v4356_v36  ;;  %v7780_v45 = vpop.eup %7779 }
 0x3d4   : > { %v4361_v29 = vor.u32 %v4360_v5, %v4359_v51  ;;  %v4124_v12 = vxor.u32 2147483648, %v7778_v1  ;;  %v4202_v47 = vshrl.u32 %v4184_v43, %v4200_v14  ;;  %v4205_v26 = vadd.s32 127, %v4204_v21 }
 0x3d5   : > { %v4293_v38 = vadd.s32 536870912, %v4292_v35  ;;  %v4121_v24 = vxor.u32 2147483648, %v7780_v45  ;;  %v4352_v27 = vshrl.u32 %v13352_v49, %v13714_v15  ;;  %vm4368_vm8 = vcmp.lt.s32.totalorder %v11369_v17, 1 }
 0x3d6   : > { %vm4370_vm10 = vcmp.lt.s32.totalorder %v11369_v17, 3  ;;  %v4125_v11 = vsel %vm4123_vm7, %v4124_v12, %v7780_v45  ;;  %v4203_v0 = vor.u32 %v4202_v47, %v4201_v19  ;;  %v4206_v46 = vshll.u32 %v4205_v26, 23 }
 0x3d7   : > { %v12291_v59 = vshrl.u32 %v4293_v38, 30  ;;  %v4122_v43 = vsel %vm4120_vm9, %v7778_v1, %v4121_v24  ;;  %v4344_v55 = vor.u32 8388608, %v4343_v22  ;;  %v4376_v5 = vsel %vm4368_vm8, %v4355_v42, %v4358_v32 }
 0x3d8   : > { %v4378_v15 = vsel %vm4370_vm10, %v4361_v29, %v11571_v41  ;;  %v4126_v28 = vsel %vm4119_vm1, %v4122_v43, %v4125_v11  ;;  %v4207_v36 = vor.u32 4788187, %v4206_v46  ;;  %v4380_v14 = vsel %vm4368_vm8, %v4358_v32, %v4361_v29 }
 0x3d9   : > { %v4295_v51 = vshll.u32 %v12291_v59, 30  ;;  %v4127_v21 = vsel %vm4116_vm12, nan, %v4126_v28  ;;  %v4210_v22 = vcvt.s32.f32 %v4203_v0  ;;  %vm4369_vm15 = vcmp.lt.s32.totalorder %v11369_v17, 2 }
 0x3da   : > { %v4373_v1 = vsel %vm4371_vm6, %v4361_v29, 2102212464  ;;  %v4573_v41 = vsel %vm1215_vm3, %v13682_v62, %v4127_v21  ;;  %v4208_v31 = vand.u32 2147483647, %v4207_v36  ;;  %v4382_v45 = vsel %vm4370_vm10, %v11511_v54, %v11575_v61  ;;  %v13722_v21 = vld [vmem:[#allocation42_spill] sm:$0xff] }
 0x3db   : > { %v12313_v19 = vsub.s32 %v4292_v35, %v4295_v51  ;;  %v4591_v12 = vpack.c.bf16 %v4573_v41, %v4572_v50  ;;  %v4379_v47 = vsel %vm4369_vm15, %v4376_v5, %v4378_v15  ;;  %v4383_v26 = vsel %vm4369_vm15, %v4380_v14, %v4382_v45 }
 0x3dc   : > { %v4384_v29 = vshll.u32 %v4344_v55, 8  ;;  %v13716_v38 = vand.u32 2147483647, %v13689_v10  ;;  %v4211_v35 = vmul.f32 %v4210_v22, %v4208_v31  ;;  %v4215_v54 = vsel %vm4130_vm11, %v4214_v25, %v12177_v23 }
 0x3dd   : > { %v4298_v61 = vsub.s32 0, %v12313_v19  ;;  %4853 = vmatmul.mubr.bf16.gmra.mrb[52].mxu0 %v4591_v12  ;;  %v4372_v50 = vsel %vm4368_vm8, %v4352_v27, %v4355_v42  ;;  %v4374_v24 = vsel %vm4370_vm10, %v4358_v32, %v4373_v1  ;;  %vm4475_vm0 = vcmp.lt.s32.totalorder %v11664_v44, 4 }
 0x3de   : > { %vm12325_vm6 = vcmp.le.f32.partialorder %v13716_v38, 0.7853982  ;;  %v12339_v11 = vmul.u32.u64.low %v4384_v29, %v4383_v26  ;;  %v12340_v0 = vmul.u32.u64.high %v4384_v29, %v4383_v26, %v12339_v11  ;;  %4862 = vmatprep.mubr.bf16.mxu0 %v13346_v40  ;;  %v4212_v46 = vxor.u32 2147483648, %v4211_v35 }
 0x3df   : > { %v6882_v43 = vmin.u32 %v4298_v61, %v12313_v19  ;;  %v12344_v55 = vmul.u32.u64.low %v4384_v29, %v4379_v47  ;;  %v12345_v5 = vmul.u32.u64.high %v4384_v29, %v4379_v47, %v12344_v55  ;;  %v4217_v23 = vsel %vm12325_vm6, 0, %v4215_v54 }
 0x3e0   : > { %v4481_v25 = vsel %vm4475_vm0, %v12246_v52, 920167782  ;;  %v4213_v42 = vsel %vm4130_vm11, %v4212_v46, %v4211_v35  ;;  %v4485_v27 = vsel %vm4475_vm0, %v4471_v7, 1326507024  ;;  %vm4234_vm13 = vcmp.lt.s32.totalorder %v13699_v4, 0 }
 0x3e1   : > { %v4300_v32 = vclz %v6882_v43  ;;  %v4216_v15 = vsel %vm12325_vm6, %v13689_v10, %v4213_v42  ;;  %v4375_v28 = vsel %vm4369_vm15, %v4372_v50, %v4374_v24  ;;  %v4221_v36 = vadd.s32 3, %v4217_v23 }
 0x3e2   : > { %v4288_v51 = vadd.s32 %v12240_v60, %v12231_v16  ;;  %vm4393_vm4 = vc.u32 %v12340_v0, %v12344_v55  ;;  %7781 = vcosq.f32 %v4216_v15  ;;  %v13719_v53 = vand.u32 2147483647, %v13699_v4 }
 0x3e3   : > { %v6883_v14 = vadd.s32 4294967294, %v4300_v32  ;;  %v4318_v7 = vsub.s32 4, %v12291_v59  ;;  %v4394_v17 = vadd.s32 1, %v12345_v5  ;;  %v4440_v22 = vand.u32 2147483647, %v13722_v21 }
 0x3e4   : > { %vm12373_vm2 = vcmp.le.f32.partialorder %v13719_v53, 0.7853982  ;;  %7783 = vsinq.f32 %v4216_v15  ;;  %v4391_v16 = vmul.u32 %v4384_v29, %v4375_v28  ;;  %v4461_v60 = vshrl.u32 %v13354_v13, %v11904_v56 }
 0x3e5   : > { %vm6884_vm7 = vcmp.lt.s32.totalorder %v6883_v14, 0  ;;  %v4395_v41 = vsel %vm4393_vm4, %v4394_v17, %v12345_v5  ;;  %v4458_v31 = vshrl.u32 %v13350_v2, %v11904_v56  ;;  %v4460_v45 = vshll.u32 %v13350_v2, %v11667_v48 }
 0x3e6   : > { %v4303_v1 = vsel %vm6884_vm7, 0, %v6883_v14  ;;  %v4396_v26 = vadd.s32 %v4395_v41, %v4391_v16  ;;  %v4457_v38 = vshll.u32 %v13352_v49, %v11667_v48  ;;  %v4447_v29 = vand.u32 8388607, %v4440_v22 }
 0x3e7   : > { %v4304_v12 = vsub.s32 32, %v4303_v1  ;;  %v4308_v47 = vsub.s32 4294967266, %v4303_v1  ;;  %v4462_v62 = vor.u32 %v4461_v60, %v4460_v45  ;;  %v4463_v35 = vshll.u32 %v13354_v13, %v11667_v48 }
 0x3e8   : > { %v4464_v54 = vshrl.u32 %v13339_v3, %v11904_v56  ;;  %v4305_v61 = vshll.u32 %v12313_v19, %v4303_v1  ;;  %v4397_v24 = vadd.s32 536870912, %v4396_v26  ;;  %v4319_v11 = vsel %vm4234_vm13, %v4318_v7, %v12291_v59 }
 0x3e9   : > { %v4306_v50 = vshrl.u32 %v4288_v51, %v4304_v12  ;;  %v4309_v2 = vadd.s32 127, %v4308_v47  ;;  %v4459_v46 = vor.u32 %v4458_v31, %v4457_v38  ;;  %vm4472_vm9 = vcmp.lt.s32.totalorder %v11664_v44, 1 }
 0x3ea   : > { %v4465_v43 = vor.u32 %v4464_v54, %v4463_v35  ;;  %v12400_v42 = vshrl.u32 %v4397_v24, 30  ;;  %vm4474_vm14 = vcmp.lt.s32.totalorder %v11664_v44, 3  ;;  %v12403_v3 = vand.u32 3, %v4221_v36 }
 0x3eb   : > { %v4307_v5 = vor.u32 %v4306_v50, %v4305_v61  ;;  %v4310_v23 = vshll.u32 %v4309_v2, 23  ;;  %v4448_v13 = vor.u32 8388608, %v4447_v29  ;;  %v4486_v59 = vsel %vm4474_vm14, %v12246_v52, %v4485_v27 }
 0x3ec   : > { %v4484_v48 = vsel %vm4472_vm9, %v4462_v62, %v4465_v43  ;;  %v4321_v32 = vsel %vm12373_vm2, 0, %v4319_v11  ;;  %v4399_v15 = vshll.u32 %v12400_v42, 30  ;;  %v4477_v28 = vsel %vm4475_vm0, %v4465_v43, 2102212464  ;;  %v7782_v51 = vpop.eup %7781 }
 0x3ed   : > { %v4311_v19 = vor.u32 4788187, %v4310_v23  ;;  %v4456_v36 = vshrl.u32 %v13352_v49, %v11904_v56  ;;  %vm4473_vm1 = vcmp.lt.s32.totalorder %v11664_v44, 2  ;;  %v4480_v14 = vsel %vm4472_vm9, %v4459_v46, %v4462_v62  ;;  %v12456_v44 = vld [vmem:[%s13057_s4] ss:$0 sm:$0xff] }
 0x3ee   : > { %v4482_v52 = vsel %vm4474_vm14, %v4465_v43, %v4481_v25  ;;  %v7784_v27 = vpop.eup %7783  ;;  %v4314_v7 = vcvt.s32.f32 %v4307_v5  ;;  %v12422_v17 = vsub.s32 %v4396_v26, %v4399_v15  ;;  %v4487_v16 = vsel %vm4473_vm1, %v4484_v48, %v4486_v59 }
 0x3ef   : > { %v4312_v53 = vand.u32 2147483647, %v4311_v19  ;;  %v4325_v60 = vadd.s32 3, %v4321_v32  ;;  %v4476_v49 = vsel %vm4472_vm9, %v4456_v36, %v4459_v46  ;;  %v4478_v56 = vsel %vm4474_vm14, %v4462_v62, %v4477_v28 }
 0x3f0   : > { %v4488_v1 = vshll.u32 %v4448_v13, 8  ;;  %v4228_v41 = vxor.u32 2147483648, %v7782_v51  ;;  %v4402_v25 = vsub.s32 0, %v12422_v17  ;;  %v4483_v45 = vsel %vm4473_vm1, %v4480_v14, %v4482_v52 }
 0x3f1   : > { %v4315_v31 = vmul.f32 %v4314_v7, %v4312_v53  ;;  %vm4224_vm12 = vcmp.eq.s32.totalorder %v12403_v3, 0  ;;  %v4225_v12 = vxor.u32 2147483648, %v7784_v27  ;;  %vm4227_vm5 = vcmp.eq.s32.totalorder %v12403_v3, 2 }
 0x3f2   : > { %v12434_v47 = vmul.u32.u64.low %v4488_v1, %v4487_v16  ;;  %v12435_v26 = vmul.u32.u64.high %v4488_v1, %v4487_v16, %v12434_v47  ;;  %v6886_v29 = vmin.u32 %v4402_v25, %v12422_v17  ;;  %v4479_v62 = vsel %vm4473_vm1, %v4476_v49, %v4478_v56 }
 0x3f3   : > { %v4316_v38 = vxor.u32 2147483648, %v4315_v31  ;;  %v12441_v35 = vand.u32 3, %v4325_v60  ;;  %v4392_v54 = vadd.s32 %v12344_v55, %v12340_v0  ;;  %v12449_v2 = vsel %vm4227_vm5, %v4228_v41, %v7784_v27  ;;  %v13723_v41 = vld [vmem:[#allocation5_spill] sm:$0xff] }
 0x3f4   : > { %v12445_v61 = vmul.u32.u64.low %v4488_v1, %v4483_v45  ;;  %v12446_v50 = vmul.u32.u64.high %v4488_v1, %v4483_v45, %v12445_v61  ;;  %v4404_v11 = vclz %v6886_v29  ;;  %v4898_v46 = vadd.f32 %v12456_v44, %v12081_v18  ;;  %v4814_v18 = vpop.f32.mrb[36].mxu0 }
 0x3f5   : > { %v4317_v24 = vsel %vm4234_vm13, %v4316_v38, %v4315_v31  ;;  %v4226_v0 = vsel %vm4224_vm12, %v7782_v51, %v4225_v12  ;;  %v4495_v43 = vmul.u32 %v4488_v1, %v4479_v62  ;;  %v4899_v23 = vadd.f32 %v12456_v44, %v12094_v37  ;;  %v12476_v19 = vpop.f32.mrb[37].mxu0  ;;  %v13724_v12 = vld [vmem:[#allocation11_spill] sm:$0xff] }
 0x3f6   : > { %v4320_v55 = vsel %vm12373_vm2, %v13699_v4, %v4317_v24  ;;  %vm4497_vm11 = vc.u32 %v12435_v26, %v12445_v61  ;;  %v6887_v5 = vadd.s32 4294967294, %v4404_v11  ;;  %v4900_v13 = vadd.f32 %v12456_v44, %v12105_v33  ;;  %v4818_v15 = vpop.f32.mrb[38].mxu0 }
 0x3f7   : > { %7785 = vcosq.f32 %v4320_v55  ;;  %v4498_v48 = vadd.s32 1, %v12446_v50  ;;  %v4901_v58 = vadd.f32 %v12456_v44, %v12128_v30  ;;  %v4902_v59 = vadd.f32 %v12456_v44, %v12140_v39  ;;  %v12485_v39 = vpop.f32.mrb[39].mxu0 }
 0x3f8   : > { %7787 = vsinq.f32 %v4320_v55  ;;  %vm4223_vm8 = vcmp.lt.s32.totalorder %v12403_v3, 2  ;;  %vm6888_vm10 = vcmp.lt.s32.totalorder %v6887_v5, 0  ;;  %v4930_v32 = vmax.f32 %v4898_v46, 0.0 }
 0x3f9   : > { %v4931_v37 = vmax.f32 %v4899_v23, 0.0  ;;  %v4903_v33 = vadd.f32 %v12456_v44, %v12155_v57  ;;  %v4407_v28 = vsel %vm6888_vm10, 0, %v6887_v5  ;;  %v4499_v30 = vsel %vm4497_vm11, %v4498_v48, %v12446_v50 }
 0x3fa   : > { %v4932_v51 = vmax.f32 %v4900_v13, 0.0  ;;  %v4933_v36 = vmax.f32 %v4901_v58, 0.0  ;;  %v4408_v14 = vsub.s32 32, %v4407_v28  ;;  %v4412_v52 = vsub.s32 4294967266, %v4407_v28 }
 0x3fb   : > { %v4500_v27 = vadd.s32 %v4499_v30, %v4495_v43  ;;  %v4934_v53 = vmax.f32 %v4902_v59, 0.0  ;;  %vm4220_vm15 = vweird.f32 %v13689_v10  ;;  %v4958_v7 = vpack.c.bf16 %v4931_v37, %v4930_v32 }
 0x3fc   : > { %v4959_v16 = vpack.c.bf16 %v4933_v36, %v4932_v51  ;;  %v4935_v57 = vmax.f32 %v4903_v33, 0.0  ;;  %v4904_v60 = vadd.f32 %v12456_v44, %v12169_v8  ;;  %v4410_v49 = vshrl.u32 %v4392_v54, %v4408_v14 }
 0x3fd   : > { %v4413_v56 = vadd.s32 127, %v4412_v52  ;;  %v4501_v1 = vadd.s32 536870912, %v4500_v27  ;;  %v4905_v31 = vadd.f32 %v12456_v44, %v13723_v41  ;;  %v4409_v25 = vshll.u32 %v12422_v17, %v4407_v28  ;;  %7134 = vmatprep.mubr.bf16.mxu1 %v4958_v7 }
 0x3fe   : > { %v4960_v45 = vpack.c.bf16 %v4935_v57, %v4934_v53  ;;  %v4906_v47 = vadd.f32 %v12456_v44, %v13724_v12  ;;  %v4907_v38 = vadd.f32 %v12456_v44, %v12204_v6  ;;  %7135 = vmatmul.mubr.bf16.gmra.mrb[8].mxu1 %v4959_v16  ;;  %v4936_v8 = vmax.f32 %v4904_v60, 0.0 }
 0x3ff   : > { %v4414_v29 = vshll.u32 %v4413_v56, 23  ;;  %v12497_v62 = vshrl.u32 %v4501_v1, 30  ;;  %v4937_v54 = vmax.f32 %v4905_v31, 0.0  ;;  %v4908_v11 = vadd.f32 %v12456_v44, %v4814_v18 }
 0x400   : > { %7138 = vmatprep.mubr.bf16.mxu1 %v4960_v45  ;;  %v4938_v50 = vmax.f32 %v4906_v47, 0.0  ;;  %v4939_v24 = vmax.f32 %v4907_v38, 0.0  ;;  %v4909_v17 = vadd.f32 %v12456_v44, %v4818_v15  ;;  %vm4327_vm6 = vcmp.lt.s32.totalorder %v12441_v35, 2 }
 0x401   : > { %v7786_v46 = vpop.eup %7785  ;;  %v4411_v55 = vor.u32 %v4410_v49, %v4409_v25  ;;  %v4415_v43 = vor.u32 4788187, %v4414_v29  ;;  %v4503_v6 = vshll.u32 %v12497_v62, 30  ;;  %v4230_v23 = vsel %vm4223_vm8, %v4226_v0, %v12449_v2 }
 0x402   : > { %v7788_v5 = vpop.eup %7787  ;;  %v4332_v13 = vxor.u32 2147483648, %v7786_v46  ;;  %v4961_v48 = vpack.c.bf16 %v4937_v54, %v4936_v8  ;;  %v4962_v58 = vpack.c.bf16 %v4939_v24, %v4938_v50  ;;  %vm4331_vm0 = vcmp.eq.s32.totalorder %v12441_v35, 2 }
 0x403   : > { %v4329_v59 = vxor.u32 2147483648, %v7788_v5  ;;  %v4416_v18 = vand.u32 2147483647, %v4415_v43  ;;  %v4504_v32 = vsub.s32 %v4500_v27, %v4503_v6  ;;  %vm4328_vm13 = vcmp.eq.s32.totalorder %v12441_v35, 0 }
 0x404   : > { %v4333_v37 = vsel %vm4331_vm0, %v4332_v13, %v7788_v5  ;;  %v4940_v33 = vmax.f32 %v4908_v11, 0.0  ;;  %v4941_v15 = vmax.f32 %v4909_v17, 0.0  ;;  %v4231_v28 = vsel %vm4220_vm15, nan, %v4230_v23 }
 0x405   : > { %v4330_v30 = vsel %vm4328_vm13, %v7786_v46, %v4329_v59  ;;  %v4418_v51 = vcvt.s32.f32 %v4411_v55  ;;  %v4506_v3 = vsub.s32 0, %v4504_v32  ;;  %vm4324_vm4 = vweird.f32 %v13699_v4 }
 0x406   : > { %v4334_v2 = vsel %vm4327_vm6, %v4330_v30, %v4333_v37  ;;  %v4963_v0 = vpack.c.bf16 %v4941_v15, %v4940_v33  ;;  %7139 = vmatmul.mubr.bf16.gmra.mrb[12].mxu1 %v4961_v48  ;;  %v4574_v27 = vsel %vm1215_vm3, %v13689_v10, %v4231_v28  ;;  %vm4338_vm7 = vcmp.lt.s32.totalorder %v13713_v34, 0 }
 0x407   : > { %v4335_v36 = vsel %vm4324_vm4, nan, %v4334_v2  ;;  %v4419_v14 = vmul.f32 %v4418_v51, %v4416_v18  ;;  %v6890_v52 = vmin.u32 %v4506_v3, %v4504_v32  ;;  %7142 = vmatprep.mubr.bf16.mxu1 %v4962_v58  ;;  %v4496_v10 = vadd.s32 %v12445_v61, %v12435_v26 }
 0x408   : > { %v4575_v53 = vsel %vm1215_vm3, %v13699_v4, %v4335_v36  ;;  %vm12527_vm9 = vcmp.le.f32.partialorder %v4336_v20, 0.7853982  ;;  %v4422_v26 = vsub.s32 4, %v12400_v42  ;;  %v4526_v8 = vsub.s32 4, %v12497_v62 }
 0x409   : > { %v4592_v7 = vpack.c.bf16 %v4575_v53, %v4574_v27  ;;  %v4508_v16 = vclz %v6890_v52  ;;  %v4420_v57 = vxor.u32 2147483648, %v4419_v14  ;;  %vm4442_vm14 = vcmp.lt.s32.totalorder %v13722_v21, 0 }
 0x40a   : > { %v4423_v20 = vsel %vm4338_vm7, %v4422_v26, %v12400_v42  ;;  %vm4441_vm1 = vcmp.le.f32.partialorder %v4440_v22, 0.7853982  ;;  %v4527_v11 = vsel %vm4442_vm14, %v4526_v8, %v12497_v62  ;;  %vm4428_vm10 = vweird.f32 %v13713_v34 }
 0x40b   : > { %4863 = vmatmul.mubr.bf16.gmra.mrb[56].mxu0 %v4592_v7  ;;  %v6891_v35 = vadd.s32 4294967294, %v4508_v16  ;;  %v4421_v49 = vsel %vm4338_vm7, %v4420_v57, %v4419_v14  ;;  %v4425_v54 = vsel %vm12527_vm9, 0, %v4423_v20  ;;  %v4529_v43 = vsel %vm4441_vm1, 0, %v4527_v11  ;;  %v7630_v11 = vld [vmem:[%s13060_s7 + $0x8] sm:$0xff]  }
 0x40c   : > { %4872 = vmatprep.mubr.bf16.mxu0 %v13346_v40  ;;  %v4424_v25 = vsel %vm12527_vm9, %v13713_v34, %v4421_v49  ;;  %v4429_v17 = vadd.s32 3, %v4425_v54  ;;  %v4533_v13 = vadd.s32 3, %v4529_v43  ;;  %vm4532_vm0 = vweird.f32 %v13722_v21 }
 0x40d   : > { %vm6892_vm2 = vcmp.lt.s32.totalorder %v6891_v35, 0  ;;  %7789 = vcosq.f32 %v4424_v25 }
 0x40e   : > { %v4511_v60 = vsel %vm6892_vm2, 0, %v6891_v35  ;;  %7143 = vmatmul.mubr.bf16.gmra.mrb[16].mxu1 %v4963_v0  ;;  %7791 = vsinq.f32 %v4424_v25  ;;  %v4430_v6 = vand.u32 3, %v4429_v17  ;;  %v4534_v22 = vand.u32 3, %v4533_v13  ;;  %v7631_v17 = vld [vmem:[%s13060_s7 + $0x10] sm:$0xff]  }
 0x40f   : > { %v4512_v56 = vsub.s32 32, %v4511_v60  ;;  %v4516_v4 = vsub.s32 4294967266, %v4511_v60  ;;  %v4513_v40 = vshll.u32 %v4504_v32, %v4511_v60  ;;  %v12563_v60 = vld [vmem:[%s13059_s6] ss:$0 sm:$0xff] }
 0x410   : > { %vm4432_vm12 = vcmp.eq.s32.totalorder %v4430_v6, 0  ;;  %vm4435_vm5 = vcmp.eq.s32.totalorder %v4430_v6, 2  ;;  %vm4431_vm11 = vcmp.lt.s32.totalorder %v4430_v6, 2  ;;  %vm4539_vm8 = vcmp.eq.s32.totalorder %v4534_v22, 2 }
 0x411   : > { %v4514_v41 = vshrl.u32 %v4496_v10, %v4512_v56  ;;  %v4517_v31 = vadd.s32 127, %v4516_v4  ;;  %vm4536_vm15 = vcmp.eq.s32.totalorder %v4534_v22, 0  ;;  %vm4535_vm6 = vcmp.lt.s32.totalorder %v4534_v22, 2 }
 0x413   : > { %v4515_v45 = vor.u32 %v4514_v41, %v4513_v40  ;;  %v4518_v12 = vshll.u32 %v4517_v31, 23 }
 0x415   : > { %v4519_v61 = vor.u32 4788187, %v4518_v12  ;;  %v4522_v38 = vcvt.s32.f32 %v4515_v45 }
 0x417   : > { %v4520_v47 = vand.u32 2147483647, %v4519_v61  ;;  %v7790_v55 = vpop.eup %7789 }
 0x418   : > { %v7792_v42 = vpop.eup %7791  ;;  %v4436_v23 = vxor.u32 2147483648, %v7790_v55 }
 0x419   : > { %v4523_v29 = vmul.f32 %v4522_v38, %v4520_v47  ;;  %v4433_v5 = vxor.u32 2147483648, %v7792_v42 }
 0x41a   : > { %v4437_v58 = vsel %vm4435_vm5, %v4436_v23, %v7792_v42 }
 0x41b   : > { %v4524_v50 = vxor.u32 2147483648, %v4523_v29  ;;  %v4434_v48 = vsel %vm4432_vm12, %v7790_v55, %v4433_v5 }
 0x41c   : > { %v4438_v18 = vsel %vm4431_vm11, %v4434_v48, %v4437_v58  ;;  %v7633_v58 = vld [vmem:[%s13060_s7 + $0x20] sm:$0xff]  }
 0x41d   : > { %v4525_v24 = vsel %vm4442_vm14, %v4524_v50, %v4523_v29  ;;  %v4439_v15 = vsel %vm4428_vm10, nan, %v4438_v18  ;;  %v7636_v18 = vld [vmem:[%s13060_s7 + $0x38] sm:$0xff]  }
 0x41e   : > { %v4528_v46 = vsel %vm4441_vm1, %v13722_v21, %v4525_v24  ;;  %v4576_v14 = vsel %vm1215_vm3, %v13713_v34, %v4439_v15  ;;  %v7629_v24 = vld [vmem:[%s13060_s7] sm:$0xff]  }
 0x41f   : > { %7793 = vcosq.f32 %v4528_v46  ;;  %7158 = vmatprep.subr.bf16.mxu1 %v7629_v24 }
 0x420   : > { %7795 = vsinq.f32 %v4528_v46  ;;  %7159 = vmatpush3.bf16.msra.mxu1 %v7629_v24  ;;  %v7632_v46 = vld [vmem:[%s13060_s7 + $0x18] sm:$0xff]  }
 0x421   : > { %7160 = vmatprep.subr.bf16.mxu1 %v7630_v11 }
 0x424   : > { %7161 = vmatpush3.bf16.msra.mxu1 %v7630_v11 }
 0x425   : > { %7162 = vmatprep.subr.bf16.mxu1 %v7631_v17 }
 0x428   : > { %v4824_v30 = vpop.f32.mrb[40].mxu0  ;;  %7163 = vmatpush3.bf16.msra.mxu1 %v7631_v17 }
 0x429   : > { %v7794_v59 = vpop.eup %7793  ;;  %v4910_v3 = vadd.f32 %v12456_v44, %v4824_v30  ;;  %v12549_v2 = vpop.f32.mrb[41].mxu0  ;;  %7164 = vmatprep.subr.bf16.mxu1 %v7632_v46 }
 0x42a   : > { %v7796_v62 = vpop.eup %7795  ;;  %v4540_v32 = vxor.u32 2147483648, %v7794_v59  ;;  %v4828_v36 = vpop.f32.mrb[42].mxu0 }
 0x42b   : > { %v4537_v37 = vxor.u32 2147483648, %v7796_v62  ;;  %v4911_v27 = vadd.f32 %v12456_v44, %v4828_v36  ;;  %v12558_v53 = vpop.f32.mrb[43].mxu0  ;;  %v4942_v16 = vmax.f32 %v4910_v3, 0.0 }
 0x42c   : > { %v4541_v33 = vsel %vm4539_vm8, %v4540_v32, %v7796_v62  ;;  %7165 = vmatpush3.bf16.msra.mxu1 %v7632_v46  ;;  %v7635_v62 = vld [vmem:[%s13060_s7 + $0x30] sm:$0xff]  }
 0x42d   : > { %v4538_v28 = vsel %vm4536_vm15, %v7794_v59, %v4537_v37  ;;  %v4943_v57 = vmax.f32 %v4911_v27, 0.0  ;;  %7166 = vmatprep.subr.bf16.mxu1 %v7633_v58  ;;  %v7634_v59 = vld [vmem:[%s13060_s7 + $0x28] sm:$0xff]  }
 0x42e   : > { %v4542_v51 = vsel %vm4535_vm6, %v4538_v28, %v4541_v33 }
 0x42f   : > { %v4543_v0 = vsel %vm4532_vm0, nan, %v4542_v51  ;;  %v4964_v35 = vpack.c.bf16 %v4943_v57, %v4942_v16 }
 0x430   : > { %v4577_v52 = vsel %vm1215_vm3, %v13722_v21, %v4543_v0  ;;  %7167 = vmatpush3.bf16.msra.mxu1 %v7633_v58  ;;  %vm6666_vm3 = vcmask 23552  }
 0x431   : > { %v4593_v7 = vpack.c.bf16 %v4577_v52, %v4576_v14  ;;  %7146 = vmatprep.mubr.bf16.mxu1 %v4964_v35  ;;  %7168 = vmatprep.subr.bf16.mxu1 %v7634_v59 }
 0x433   : > { %4873 = vmatmul.mubr.bf16.gmra.mrb[60].mxu0 %v4593_v7 }
 0x434   : > { %7169 = vmatpush3.bf16.msra.mxu1 %v7634_v59 }
 0x435   : > { %7170 = vmatprep.subr.bf16.mxu1 %v7635_v62 }
 0x438   : > { %7171 = vmatpush3.bf16.msra.mxu1 %v7635_v62 }
 0x439   : > { %7172 = vmatprep.subr.bf16.mxu1 %v7636_v18 }
 0x43c   : > { %7173 = vmatpush3.bf16.msra.mxu1 %v7636_v18 }
 0x44e   : > { %v7128_v34 = vpop.f32.mrb[0].mxu1 }
 0x44f   : > { %v5084_v49 = vadd.f32 %v7128_v34, %v12563_v60  ;;  %v5075_v9 = vpop.f32.mrb[1].mxu1 }
 0x450   : > { %v5076_v21 = vadd.f32 %v12563_v60, %v5075_v9  ;;  %v7129_v10 = vpop.f32.mrb[2].mxu1 }
 0x451   : > { %v5087_v56 = vadd.f32 %v7129_v10, %v12563_v60  ;;  %v5078_v4 = vpop.f32.mrb[3].mxu1  ;;  %v5204_v40 = vmax.f32 %v5084_v49, 0.0 }
 0x452   : > { %v5079_v1 = vadd.f32 %v12563_v60, %v5078_v4  ;;  %v5202_v31 = vmax.f32 %v5076_v21, 0.0 }
 0x453   : > { %v5205_v41 = vmax.f32 %v5087_v56, 0.0 }
 0x454   : > { %v5203_v25 = vmax.f32 %v5079_v1, 0.0 }
 0x455   : > { %v12569_v45 = vpack.c.bf16 %v5205_v41, %v5204_v40 }
 0x456   : > { %v12571_v12 = vpack.c.bf16 %v5203_v25, %v5202_v31 }
 0x458   : > { %v4834_v26 = vpop.f32.mrb[44].mxu0 }
 0x459   : > { %v4912_v61 = vadd.f32 %v12456_v44, %v4834_v26  ;;  %v12574_v47 = vpop.f32.mrb[45].mxu0 }
 0x45a   : > { %v4838_v38 = vpop.f32.mrb[46].mxu0 }
 0x45b   : > { %v4913_v20 = vadd.f32 %v12456_v44, %v4838_v38  ;;  %v12577_v29 = vpop.f32.mrb[47].mxu0  ;;  %v4944_v8 = vmax.f32 %v4912_v61, 0.0 }
 0x45d   : > { %v4945_v54 = vmax.f32 %v4913_v20, 0.0 }
 0x45f   : > { %v4965_v50 = vpack.c.bf16 %v4945_v54, %v4944_v8 }
 0x461   : > { %7147 = vmatmul.mubr.bf16.gmra.mrb[20].mxu1 %v4965_v50 }
 0x482   : > { %v4844_v55 = vpop.f32.mrb[48].mxu0 }
 0x483   : > { %v4914_v42 = vadd.f32 %v12456_v44, %v4844_v55  ;;  %v12592_v43 = vpop.f32.mrb[49].mxu0 }
 0x484   : > { %v4848_v6 = vpop.f32.mrb[50].mxu0 }
 0x485   : > { %v4915_v5 = vadd.f32 %v12456_v44, %v4848_v6  ;;  %v12595_v23 = vpop.f32.mrb[51].mxu0  ;;  %v4946_v13 = vmax.f32 %v4914_v42, 0.0 }
 0x487   : > { %v4947_v48 = vmax.f32 %v4915_v5, 0.0 }
 0x489   : > { %v4966_v22 = vpack.c.bf16 %v4947_v48, %v4946_v13 }
 0x48b   : > { %7150 = vmatprep.mubr.bf16.mxu1 %v4966_v22 }
 0x4a2   : > { %v7132_v32 = vpop.f32.mrb[4].mxu1 }
 0x4a3   : > { %v5100_v37 = vadd.f32 %v7132_v32, %v12563_v60  ;;  %v5091_v33 = vpop.f32.mrb[5].mxu1 }
 0x4a4   : > { %v5092_v15 = vadd.f32 %v12563_v60, %v5091_v33  ;;  %v7133_v28 = vpop.f32.mrb[6].mxu1 }
 0x4a5   : > { %v5103_v30 = vadd.f32 %v7133_v28, %v12563_v60  ;;  %v5094_v51 = vpop.f32.mrb[7].mxu1  ;;  %v5208_v0 = vmax.f32 %v5100_v37, 0.0 }
 0x4a6   : > { %v5095_v3 = vadd.f32 %v12563_v60, %v5094_v51  ;;  %v5206_v14 = vmax.f32 %v5092_v15, 0.0 }
 0x4a7   : > { %v5209_v36 = vmax.f32 %v5103_v30, 0.0 }
 0x4a8   : > { %v5207_v52 = vmax.f32 %v5095_v3, 0.0 }
 0x4a9   : > { %v12613_v27 = vpack.c.bf16 %v5209_v36, %v5208_v0 }
 0x4aa   : > { %v12615_v7 = vpack.c.bf16 %v5207_v52, %v5206_v14 }
 0x4b0   : > { %v4854_v16 = vpop.f32.mrb[52].mxu0 }
 0x4b1   : > { %v4916_v57 = vadd.f32 %v12456_v44, %v4854_v16  ;;  %v12618_v35 = vpop.f32.mrb[53].mxu0 }
 0x4b2   : > { %v4858_v34 = vpop.f32.mrb[54].mxu0 }
 0x4b3   : > { %v4917_v49 = vadd.f32 %v12456_v44, %v4858_v34  ;;  %v12621_v9 = vpop.f32.mrb[55].mxu0  ;;  %v4948_v21 = vmax.f32 %v4916_v57, 0.0 }
 0x4b5   : > { %v4949_v10 = vmax.f32 %v4917_v49, 0.0 }
 0x4b7   : > { %v4967_v56 = vpack.c.bf16 %v4949_v10, %v4948_v21 }
 0x4b9   : > { %7151 = vmatmul.mubr.bf16.gmra.mrb[24].mxu1 %v4967_v56 }
 0x4d1   : > { %v7136_v4 = vpop.f32.mrb[8].mxu1 }
 0x4d2   : > { %v5116_v1 = vadd.f32 %v7136_v4, %v12563_v60  ;;  %v5107_v40 = vpop.f32.mrb[9].mxu1 }
 0x4d3   : > { %v5108_v41 = vadd.f32 %v12563_v60, %v5107_v40  ;;  %v7137_v31 = vpop.f32.mrb[10].mxu1 }
 0x4d4   : > { %v5119_v25 = vadd.f32 %v7137_v31, %v12563_v60  ;;  %v5110_v26 = vpop.f32.mrb[11].mxu1  ;;  %v5212_v38 = vmax.f32 %v5116_v1, 0.0 }
 0x4d5   : > { %v5111_v61 = vadd.f32 %v12563_v60, %v5110_v26  ;;  %v5210_v8 = vmax.f32 %v5108_v41, 0.0 }
 0x4d6   : > { %v5213_v20 = vmax.f32 %v5119_v25, 0.0 }
 0x4d7   : > { %v5211_v54 = vmax.f32 %v5111_v61, 0.0 }
 0x4d8   : > { %v12627_v50 = vpack.c.bf16 %v5213_v20, %v5212_v38 }
 0x4d9   : > { %v5238_v24 = vpack.c.bf16 %v5211_v54, %v5210_v8  ;;  %v7140_v11 = vpop.f32.mrb[12].mxu1 }
 0x4da   : > { %v5132_v17 = vadd.f32 %v7140_v11, %v12563_v60  ;;  %v5123_v46 = vpop.f32.mrb[13].mxu1 }
 0x4db   : > { %v5124_v55 = vadd.f32 %v12563_v60, %v5123_v46  ;;  %v7141_v42 = vpop.f32.mrb[14].mxu1  ;;  %v7639_v46 = vld [vmem:[%s13062_s9 + $0x10] sm:$0xff]  }
 0x4dc   : > { %v5135_v6 = vadd.f32 %v7141_v42, %v12563_v60  ;;  %v5126_v5 = vpop.f32.mrb[15].mxu1  ;;  %v5216_v59 = vmax.f32 %v5132_v17, 0.0  ;;  %v7637_v17 = vld [vmem:[%s13062_s9] sm:$0xff]  }
 0x4dd   : > { %v5127_v48 = vadd.f32 %v12563_v60, %v5126_v5  ;;  %v5214_v32 = vmax.f32 %v5124_v55, 0.0  ;;  %7206 = vmatprep.subr.bf16.mxu0 %v7637_v17 }
 0x4de   : > { %v4864_v13 = vpop.f32.mrb[56].mxu0  ;;  %v5217_v62 = vmax.f32 %v5135_v6, 0.0  ;;  %7207 = vmatpush3.bf16.msra.mxu0 %v7637_v17  ;;  %v12693_v17 = vld [vmem:[%s13061_s8] ss:$0 sm:$0xff] }
 0x4df   : > { %v4918_v58 = vadd.f32 %v12456_v44, %v4864_v13  ;;  %v12634_v22 = vpop.f32.mrb[57].mxu0  ;;  %v5215_v37 = vmax.f32 %v5127_v48, 0.0 }
 0x4e0   : > { %v4868_v18 = vpop.f32.mrb[58].mxu0  ;;  %v5241_v28 = vpack.c.bf16 %v5217_v62, %v5216_v59 }
 0x4e1   : > { %v4919_v33 = vadd.f32 %v12456_v44, %v4868_v18  ;;  %v12637_v15 = vpop.f32.mrb[59].mxu0  ;;  %v5240_v30 = vpack.c.bf16 %v5215_v37, %v5214_v32  ;;  %v7144_v51 = vpop.f32.mrb[16].mxu1  ;;  %v4950_v3 = vmax.f32 %v4918_v58, 0.0  ;;  %v7641_v18 = vld [vmem:[%s13062_s9 + $0x20] sm:$0xff]   ;;  %v7642_v32 = vld [vmem:[%s13062_s9 + $0x28] sm:$0xff]   ;;  %v7643_v37 = vld [vmem:[%s13062_s9 + $0x30] sm:$0xff]  }
 0x4e2   : > { %v5148_v36 = vadd.f32 %v7144_v51, %v12563_v60  ;;  %v5139_v14 = vpop.f32.mrb[17].mxu1 }
 0x4e3   : > { %v4951_v0 = vmax.f32 %v4919_v33, 0.0  ;;  %v5140_v52 = vadd.f32 %v12563_v60, %v5139_v14  ;;  %v7145_v16 = vpop.f32.mrb[18].mxu1  ;;  %v7644_v33 = vld [vmem:[%s13062_s9 + $0x38] sm:$0xff]  }
 0x4e4   : > { %v5151_v34 = vadd.f32 %v7145_v16, %v12563_v60  ;;  %v5142_v49 = vpop.f32.mrb[19].mxu1  ;;  %v5220_v10 = vmax.f32 %v5148_v36, 0.0 }
 0x4e5   : > { %v4968_v57 = vpack.c.bf16 %v4951_v0, %v4950_v3  ;;  %v5143_v21 = vadd.f32 %v12563_v60, %v5142_v49  ;;  %v5218_v4 = vmax.f32 %v5140_v52, 0.0 }
 0x4e6   : > { %v5221_v56 = vmax.f32 %v5151_v34, 0.0 }
 0x4e7   : > { %7154 = vmatprep.mubr.bf16.mxu1 %v4968_v57  ;;  %v5219_v1 = vmax.f32 %v5143_v21, 0.0 }
 0x4e8   : > { %v5243_v40 = vpack.c.bf16 %v5221_v56, %v5220_v10 }
 0x4e9   : > { %v5242_v41 = vpack.c.bf16 %v5219_v1, %v5218_v4 }
 0x506   : > { %v4874_v31 = vpop.f32.mrb[60].mxu0 }
 0x507   : > { %v4920_v25 = vadd.f32 %v12456_v44, %v4874_v31  ;;  %v12644_v26 = vpop.f32.mrb[61].mxu0 }
 0x508   : > { %v4878_v61 = vpop.f32.mrb[62].mxu0 }
 0x509   : > { %v4921_v38 = vadd.f32 %v12456_v44, %v4878_v61  ;;  %v12647_v20 = vpop.f32.mrb[63].mxu0  ;;  %v4952_v8 = vmax.f32 %v4920_v25, 0.0  ;;  %v7638_v44 = vld [vmem:[%s13062_s9 + $0x8] sm:$0xff]  }
 0x50a   : > { %7208 = vmatprep.subr.bf16.mxu0 %v7638_v44 }
 0x50b   : > { %v4953_v54 = vmax.f32 %v4921_v38, 0.0  ;;  %7209 = vmatpush3.bf16.msra.mxu0 %v7638_v44 }
 0x50c   : > { %7210 = vmatprep.subr.bf16.mxu0 %v7639_v46 }
 0x50d   : > { %v4969_v11 = vpack.c.bf16 %v4953_v54, %v4952_v8 }
 0x50f   : > { %7155 = vmatmul.mubr.bf16.gmra.mrb[28].mxu1 %v4969_v11  ;;  %7211 = vmatpush3.bf16.msra.mxu0 %v7639_v46 }
 0x510   : > { %7174 = vmatprep.mubr.bf16.mxu1 %v12571_v12 }
 0x517   : > { %7175 = vmatmul.mubr.bf16.vlgmr.msra.gmra.mrb[32].mxu1 %v12569_v45  ;;  %v7640_v45 = vld [vmem:[%s13062_s9 + $0x18] sm:$0xff]  }
 0x518   : > { %7178 = vmatprep.mubr.bf16.mxu1 %v12615_v7  ;;  %7212 = vmatprep.subr.bf16.mxu0 %v7640_v45 }
 0x519   : > { %7213 = vmatpush3.bf16.msra.mxu0 %v7640_v45 }
 0x51a   : > { %7214 = vmatprep.subr.bf16.mxu0 %v7641_v18 }
 0x51d   : > { %7215 = vmatpush3.bf16.msra.mxu0 %v7641_v18 }
 0x51e   : > { %7216 = vmatprep.subr.bf16.mxu0 %v7642_v32 }
 0x51f   : > { %7179 = vmatmul.mubr.bf16.gmra.mrb[36].mxu1 %v12613_v27 }
 0x520   : > { %7182 = vmatprep.mubr.bf16.mxu1 %v5238_v24 }
 0x521   : > { %7217 = vmatpush3.bf16.msra.mxu0 %v7642_v32 }
 0x522   : > { %7218 = vmatprep.subr.bf16.mxu0 %v7643_v37 }
 0x525   : > { %7219 = vmatpush3.bf16.msra.mxu0 %v7643_v37 }
 0x526   : > { %7220 = vmatprep.subr.bf16.mxu0 %v7644_v33 }
 0x527   : > { %7183 = vmatmul.mubr.bf16.gmra.mrb[40].mxu1 %v12627_v50 }
 0x528   : > { %7186 = vmatprep.mubr.bf16.mxu1 %v5240_v30 }
 0x529   : > { %7221 = vmatpush3.bf16.msra.mxu0 %v7644_v33 }
 0x52f   : > { %7187 = vmatmul.mubr.bf16.gmra.mrb[44].mxu1 %v5241_v28 }
 0x530   : > { %7190 = vmatprep.mubr.bf16.mxu1 %v5242_v41 }
 0x534   : > { %v7148_v12 = vpop.f32.mrb[20].mxu1 }
 0x535   : > { %v5164_v7 = vadd.f32 %v7148_v12, %v12563_v60  ;;  %v5155_v27 = vpop.f32.mrb[21].mxu1 }
 0x536   : > { %v5156_v24 = vadd.f32 %v12563_v60, %v5155_v27  ;;  %v7149_v55 = vpop.f32.mrb[22].mxu1 }
 0x537   : > { %7191 = vmatmul.mubr.bf16.gmra.mrb[48].mxu1 %v5243_v40  ;;  %v5167_v42 = vadd.f32 %v7149_v55, %v12563_v60  ;;  %v5158_v6 = vpop.f32.mrb[23].mxu1  ;;  %v5224_v13 = vmax.f32 %v5164_v7, 0.0 }
 0x538   : > { %v5159_v5 = vadd.f32 %v12563_v60, %v5158_v6  ;;  %v5222_v50 = vmax.f32 %v5156_v24, 0.0 }
 0x539   : > { %v5225_v48 = vmax.f32 %v5167_v42, 0.0 }
 0x53a   : > { %v5223_v58 = vmax.f32 %v5159_v5, 0.0 }
 0x53b   : > { %v5245_v59 = vpack.c.bf16 %v5225_v48, %v5224_v13 }
 0x53c   : > { %v5244_v62 = vpack.c.bf16 %v5223_v58, %v5222_v50 }
 0x53e   : > { %7194 = vmatprep.mubr.bf16.mxu1 %v5244_v62 }
 0x53f   : > { %7195 = vmatmul.mubr.bf16.gmra.mrb[52].mxu1 %v5245_v59 }
 0x58c   : > { %v7152_v28 = vpop.f32.mrb[24].mxu1 }
 0x58d   : > { %v5180_v30 = vadd.f32 %v7152_v28, %v12563_v60  ;;  %v5171_v51 = vpop.f32.mrb[25].mxu1 }
 0x58e   : > { %v5172_v3 = vadd.f32 %v12563_v60, %v5171_v51  ;;  %v7153_v0 = vpop.f32.mrb[26].mxu1  ;;  %v7645_v51 = vld [vmem:[%s13064_s11] sm:$0xff]  }
 0x58f   : > { %v5183_v36 = vadd.f32 %v7153_v0, %v12563_v60  ;;  %v5174_v14 = vpop.f32.mrb[27].mxu1  ;;  %v5228_v16 = vmax.f32 %v5180_v30, 0.0  ;;  %7254 = vmatprep.subr.bf16.mxu1 %v7645_v51 }
 0x590   : > { %v5175_v52 = vadd.f32 %v12563_v60, %v5174_v14  ;;  %v5226_v34 = vmax.f32 %v5172_v3, 0.0  ;;  %v7646_v3 = vld [vmem:[%s13064_s11 + $0x8] sm:$0xff]   ;;  %7255 = vmatpush3.bf16.msra.mxu1 %v7645_v51 }
 0x591   : > { %v5229_v57 = vmax.f32 %v5183_v36, 0.0  ;;  %7256 = vmatprep.subr.bf16.mxu1 %v7646_v3 }
 0x592   : > { %v5227_v49 = vmax.f32 %v5175_v52, 0.0 }
 0x593   : > { %v5247_v21 = vpack.c.bf16 %v5229_v57, %v5228_v16 }
 0x594   : > { %v5246_v10 = vpack.c.bf16 %v5227_v49, %v5226_v34  ;;  %v7647_v49 = vld [vmem:[%s13064_s11 + $0x10] sm:$0xff]   ;;  %7257 = vmatpush3.bf16.msra.mxu1 %v7646_v3 }
 0x595   : > { %7258 = vmatprep.subr.bf16.mxu1 %v7647_v49 }
 0x596   : > { %7198 = vmatprep.mubr.bf16.mxu1 %v5246_v10 }
 0x597   : > { %7199 = vmatmul.mubr.bf16.gmra.mrb[56].mxu1 %v5247_v21 }
 0x598   : > { %7259 = vmatpush3.bf16.msra.mxu1 %v7647_v49 }
 0x5e2   : > { %v7156_v56 = vpop.f32.mrb[28].mxu1 }
 0x5e3   : > { %v5196_v4 = vadd.f32 %v7156_v56, %v12563_v60  ;;  %v5187_v1 = vpop.f32.mrb[29].mxu1 }
 0x5e4   : > { %v5188_v40 = vadd.f32 %v12563_v60, %v5187_v1  ;;  %v7157_v41 = vpop.f32.mrb[30].mxu1 }
 0x5e5   : > { %v5199_v31 = vadd.f32 %v7157_v41, %v12563_v60  ;;  %v5190_v25 = vpop.f32.mrb[31].mxu1  ;;  %v5232_v38 = vmax.f32 %v5196_v4, 0.0 }
 0x5e6   : > { %v5191_v61 = vadd.f32 %v12563_v60, %v5190_v25  ;;  %v5230_v54 = vmax.f32 %v5188_v40, 0.0 }
 0x5e7   : > { %v5233_v8 = vmax.f32 %v5199_v31, 0.0  ;;  %v7648_v31 = vld [vmem:[%s13064_s11 + $0x18] sm:$0xff]  }
 0x5e8   : > { %v5231_v11 = vmax.f32 %v5191_v61, 0.0  ;;  %7260 = vmatprep.subr.bf16.mxu1 %v7648_v31 }
 0x5e9   : > { %v5249_v44 = vpack.c.bf16 %v5233_v8, %v5232_v38  ;;  %7261 = vmatpush3.bf16.msra.mxu1 %v7648_v31 }
 0x5ea   : > { %v5248_v46 = vpack.c.bf16 %v5231_v11, %v5230_v54  ;;  %v7176_v45 = vpop.f32.mrb[32].mxu1 }
 0x5eb   : > { %v5364_v12 = vadd.f32 %v7176_v45, %v12693_v17  ;;  %v5355_v7 = vpop.f32.mrb[33].mxu1 }
 0x5ec   : > { %v5356_v27 = vadd.f32 %v12693_v17, %v5355_v7  ;;  %v7177_v24 = vpop.f32.mrb[34].mxu1  ;;  %7202 = vmatprep.mubr.bf16.mxu1 %v5248_v46 }
 0x5ed   : > { %v5367_v60 = vadd.f32 %v7177_v24, %v12693_v17  ;;  %v5358_v55 = vpop.f32.mrb[35].mxu1  ;;  %7203 = vmatmul.mubr.bf16.gmra.mrb[60].mxu1 %v5249_v44  ;;  %v5484_v6 = vmax.f32 %v5364_v12, 0.0 }
 0x5ee   : > { %v5359_v42 = vadd.f32 %v12693_v17, %v5358_v55  ;;  %v5482_v13 = vmax.f32 %v5356_v27, 0.0 }
 0x5ef   : > { %v5485_v5 = vmax.f32 %v5367_v60, 0.0 }
 0x5f0   : > { %v5483_v48 = vmax.f32 %v5359_v42, 0.0 }
 0x5f1   : > { %v5515_v50 = vpack.c.bf16 %v5485_v5, %v5484_v6 }
 0x5f2   : > { %v5514_v58 = vpack.c.bf16 %v5483_v48, %v5482_v13  ;;  %v7180_v59 = vpop.f32.mrb[36].mxu1 }
 0x5f3   : > { %v5380_v62 = vadd.f32 %v7180_v59, %v12693_v17  ;;  %v5371_v18 = vpop.f32.mrb[37].mxu1 }
 0x5f4   : > { %v5372_v32 = vadd.f32 %v12693_v17, %v5371_v18  ;;  %v7181_v37 = vpop.f32.mrb[38].mxu1  ;;  %7222 = vmatprep.mubr.bf16.mxu0 %v5514_v58 }
 0x5f5   : > { %v5383_v33 = vadd.f32 %v7181_v37, %v12693_v17  ;;  %v5374_v28 = vpop.f32.mrb[39].mxu1  ;;  %7223 = vmatmul.mubr.bf16.vlgmr.msra.gmra.mrb[64].mxu0 %v5515_v50  ;;  %v5488_v0 = vmax.f32 %v5380_v62, 0.0 }
 0x5f6   : > { %v5375_v30 = vadd.f32 %v12693_v17, %v5374_v28  ;;  %v5486_v14 = vmax.f32 %v5372_v32, 0.0 }
 0x5f7   : > { %v5489_v36 = vmax.f32 %v5383_v33, 0.0 }
 0x5f8   : > { %v5487_v52 = vmax.f32 %v5375_v30, 0.0 }
 0x5f9   : > { %v5517_v16 = vpack.c.bf16 %v5489_v36, %v5488_v0 }
 0x5fa   : > { %v5516_v57 = vpack.c.bf16 %v5487_v52, %v5486_v14  ;;  %v7184_v34 = vpop.f32.mrb[40].mxu1 }
 0x5fb   : > { %v5396_v21 = vadd.f32 %v7184_v34, %v12693_v17  ;;  %v5387_v10 = vpop.f32.mrb[41].mxu1 }
 0x5fc   : > { %7226 = vmatprep.mubr.bf16.mxu0 %v5516_v57  ;;  %v5388_v56 = vadd.f32 %v12693_v17, %v5387_v10  ;;  %v7185_v4 = vpop.f32.mrb[42].mxu1 }
 0x5fd   : > { %7227 = vmatmul.mubr.bf16.gmra.mrb[68].mxu0 %v5517_v16  ;;  %v5399_v1 = vadd.f32 %v7185_v4, %v12693_v17  ;;  %v5390_v40 = vpop.f32.mrb[43].mxu1  ;;  %v5492_v25 = vmax.f32 %v5396_v21, 0.0 }
 0x5fe   : > { %v5391_v41 = vadd.f32 %v12693_v17, %v5390_v40  ;;  %v5490_v38 = vmax.f32 %v5388_v56, 0.0 }
 0x5ff   : > { %v5493_v61 = vmax.f32 %v5399_v1, 0.0 }
 0x600   : > { %v5491_v8 = vmax.f32 %v5391_v41, 0.0 }
 0x601   : > { %v5519_v54 = vpack.c.bf16 %v5493_v61, %v5492_v25  ;;  %v7649_v25 = vld [vmem:[%s13064_s11 + $0x20] sm:$0xff]   ;;  %v7650_v61 = vld [vmem:[%s13064_s11 + $0x28] sm:$0xff]  }
 0x602   : > { %v5518_v11 = vpack.c.bf16 %v5491_v8, %v5490_v38  ;;  %v7188_v44 = vpop.f32.mrb[44].mxu1  ;;  %7262 = vmatprep.subr.bf16.mxu1 %v7649_v25  ;;  %v7651_v38 = vld [vmem:[%s13064_s11 + $0x30] sm:$0xff]   ;;  %v7652_v8 = vld [vmem:[%s13064_s11 + $0x38] sm:$0xff]  }
 0x603   : > { %v5412_v46 = vadd.f32 %v7188_v44, %v12693_v17  ;;  %v5403_v45 = vpop.f32.mrb[45].mxu1  ;;  %7263 = vmatpush3.bf16.msra.mxu1 %v7649_v25 }
 0x604   : > { %7230 = vmatprep.mubr.bf16.mxu0 %v5518_v11  ;;  %v5404_v12 = vadd.f32 %v12693_v17, %v5403_v45  ;;  %v7189_v7 = vpop.f32.mrb[46].mxu1  ;;  %7264 = vmatprep.subr.bf16.mxu1 %v7650_v61 }
 0x605   : > { %7231 = vmatmul.mubr.bf16.gmra.mrb[72].mxu0 %v5519_v54  ;;  %v5415_v27 = vadd.f32 %v7189_v7, %v12693_v17  ;;  %v5406_v24 = vpop.f32.mrb[47].mxu1  ;;  %v5496_v55 = vmax.f32 %v5412_v46, 0.0 }
 0x606   : > { %v5407_v60 = vadd.f32 %v12693_v17, %v5406_v24  ;;  %v5494_v6 = vmax.f32 %v5404_v12, 0.0 }
 0x607   : > { %v5497_v42 = vmax.f32 %v5415_v27, 0.0  ;;  %7265 = vmatpush3.bf16.msra.mxu1 %v7650_v61 }
 0x608   : > { %v5495_v5 = vmax.f32 %v5407_v60, 0.0  ;;  %7266 = vmatprep.subr.bf16.mxu1 %v7651_v38 }
 0x609   : > { %v5521_v13 = vpack.c.bf16 %v5497_v42, %v5496_v55 }
 0x60a   : > { %v5520_v48 = vpack.c.bf16 %v5495_v5, %v5494_v6  ;;  %v7192_v50 = vpop.f32.mrb[48].mxu1 }
 0x60b   : > { %v5428_v58 = vadd.f32 %v7192_v50, %v12693_v17  ;;  %v5419_v59 = vpop.f32.mrb[49].mxu1  ;;  %7267 = vmatpush3.bf16.msra.mxu1 %v7651_v38 }
 0x60c   : > { %7234 = vmatprep.mubr.bf16.mxu0 %v5520_v48  ;;  %v5420_v62 = vadd.f32 %v12693_v17, %v5419_v59  ;;  %v7193_v18 = vpop.f32.mrb[50].mxu1  ;;  %7268 = vmatprep.subr.bf16.mxu1 %v7652_v8 }
 0x60d   : > { %7235 = vmatmul.mubr.bf16.gmra.mrb[76].mxu0 %v5521_v13  ;;  %v5431_v32 = vadd.f32 %v7193_v18, %v12693_v17  ;;  %v5422_v37 = vpop.f32.mrb[51].mxu1  ;;  %v5500_v28 = vmax.f32 %v5428_v58, 0.0 }
 0x60e   : > { %v5423_v33 = vadd.f32 %v12693_v17, %v5422_v37  ;;  %v5498_v51 = vmax.f32 %v5420_v62, 0.0 }
 0x60f   : > { %v5501_v30 = vmax.f32 %v5431_v32, 0.0  ;;  %7269 = vmatpush3.bf16.msra.mxu1 %v7652_v8 }
 0x610   : > { %v5499_v3 = vmax.f32 %v5423_v33, 0.0 }
 0x611   : > { %v5523_v0 = vpack.c.bf16 %v5501_v30, %v5500_v28 }
 0x612   : > { %v5522_v36 = vpack.c.bf16 %v5499_v3, %v5498_v51  ;;  %v7196_v14 = vpop.f32.mrb[52].mxu1  ;;  %v12754_v51 = vld [vmem:[%s13063_s10] ss:$0 sm:$0xff] }
 0x613   : > { %v5444_v52 = vadd.f32 %v7196_v14, %v12693_v17  ;;  %v5435_v16 = vpop.f32.mrb[53].mxu1 }
 0x614   : > { %7238 = vmatprep.mubr.bf16.mxu0 %v5522_v36  ;;  %v5436_v57 = vadd.f32 %v12693_v17, %v5435_v16  ;;  %v7197_v34 = vpop.f32.mrb[54].mxu1 }
 0x615   : > { %7239 = vmatmul.mubr.bf16.gmra.mrb[80].mxu0 %v5523_v0  ;;  %v5447_v49 = vadd.f32 %v7197_v34, %v12693_v17  ;;  %v5438_v21 = vpop.f32.mrb[55].mxu1  ;;  %v5504_v56 = vmax.f32 %v5444_v52, 0.0 }
 0x616   : > { %v5439_v10 = vadd.f32 %v12693_v17, %v5438_v21  ;;  %v5502_v1 = vmax.f32 %v5436_v57, 0.0 }
 0x617   : > { %v5505_v4 = vmax.f32 %v5447_v49, 0.0 }
 0x618   : > { %v5503_v40 = vmax.f32 %v5439_v10, 0.0 }
 0x619   : > { %v5525_v41 = vpack.c.bf16 %v5505_v4, %v5504_v56 }
 0x61a   : > { %v5524_v31 = vpack.c.bf16 %v5503_v40, %v5502_v1 }
 0x61c   : > { %7242 = vmatprep.mubr.bf16.mxu0 %v5524_v31 }
 0x61d   : > { %7243 = vmatmul.mubr.bf16.gmra.mrb[84].mxu0 %v5525_v41 }
 0x66a   : > { %v7200_v54 = vpop.f32.mrb[56].mxu1 }
 0x66b   : > { %v5460_v11 = vadd.f32 %v7200_v54, %v12693_v17  ;;  %v5451_v44 = vpop.f32.mrb[57].mxu1 }
 0x66c   : > { %v5452_v46 = vadd.f32 %v12693_v17, %v5451_v44  ;;  %v7201_v45 = vpop.f32.mrb[58].mxu1  ;;  %v7653_v44 = vld [vmem:[%s13066_s13] sm:$0xff]  }
 0x66d   : > { %v5463_v12 = vadd.f32 %v7201_v45, %v12693_v17  ;;  %v5454_v7 = vpop.f32.mrb[59].mxu1  ;;  %v5508_v24 = vmax.f32 %v5460_v11, 0.0  ;;  %7302 = vmatprep.subr.bf16.mxu0 %v7653_v44 }
 0x66e   : > { %v5455_v27 = vadd.f32 %v12693_v17, %v5454_v7  ;;  %v5506_v55 = vmax.f32 %v5452_v46, 0.0  ;;  %v7654_v46 = vld [vmem:[%s13066_s13 + $0x8] sm:$0xff]   ;;  %7303 = vmatpush3.bf16.msra.mxu0 %v7653_v44 }
 0x66f   : > { %v5509_v60 = vmax.f32 %v5463_v12, 0.0  ;;  %7304 = vmatprep.subr.bf16.mxu0 %v7654_v46 }
 0x670   : > { %v5507_v42 = vmax.f32 %v5455_v27, 0.0 }
 0x671   : > { %v5527_v6 = vpack.c.bf16 %v5509_v60, %v5508_v24 }
 0x672   : > { %v5526_v5 = vpack.c.bf16 %v5507_v42, %v5506_v55  ;;  %v7655_v42 = vld [vmem:[%s13066_s13 + $0x10] sm:$0xff]   ;;  %7305 = vmatpush3.bf16.msra.mxu0 %v7654_v46 }
 0x673   : > { %7306 = vmatprep.subr.bf16.mxu0 %v7655_v42 }
 0x674   : > { %7246 = vmatprep.mubr.bf16.mxu0 %v5526_v5 }
 0x675   : > { %7247 = vmatmul.mubr.bf16.gmra.mrb[88].mxu0 %v5527_v6 }
 0x676   : > { %7307 = vmatpush3.bf16.msra.mxu0 %v7655_v42 }
 0x6c0   : > { %v7204_v13 = vpop.f32.mrb[60].mxu1 }
 0x6c1   : > { %v5476_v48 = vadd.f32 %v7204_v13, %v12693_v17  ;;  %v5467_v50 = vpop.f32.mrb[61].mxu1 }
 0x6c2   : > { %v5468_v58 = vadd.f32 %v12693_v17, %v5467_v50  ;;  %v7205_v59 = vpop.f32.mrb[62].mxu1 }
 0x6c3   : > { %v5479_v62 = vadd.f32 %v7205_v59, %v12693_v17  ;;  %v5470_v18 = vpop.f32.mrb[63].mxu1  ;;  %v5512_v37 = vmax.f32 %v5476_v48, 0.0 }
 0x6c4   : > { %v5471_v32 = vadd.f32 %v12693_v17, %v5470_v18  ;;  %v5510_v28 = vmax.f32 %v5468_v58, 0.0 }
 0x6c5   : > { %v5513_v33 = vmax.f32 %v5479_v62, 0.0 }
 0x6c6   : > { %v5511_v30 = vmax.f32 %v5471_v32, 0.0 }
 0x6c7   : > { %v5529_v3 = vpack.c.bf16 %v5513_v33, %v5512_v37 }
 0x6c8   : > { %v5528_v0 = vpack.c.bf16 %v5511_v30, %v5510_v28  ;;  %v7224_v36 = vpop.f32.mrb[64].mxu0 }
 0x6c9   : > { %v5644_v14 = vadd.f32 %v7224_v36, %v12754_v51  ;;  %v5635_v52 = vpop.f32.mrb[65].mxu0 }
 0x6ca   : > { %v5636_v16 = vadd.f32 %v12754_v51, %v5635_v52  ;;  %v7225_v57 = vpop.f32.mrb[66].mxu0  ;;  %7250 = vmatprep.mubr.bf16.mxu0 %v5528_v0 }
 0x6cb   : > { %v5647_v17 = vadd.f32 %v7225_v57, %v12754_v51  ;;  %v5638_v34 = vpop.f32.mrb[67].mxu0  ;;  %7251 = vmatmul.mubr.bf16.gmra.mrb[92].mxu0 %v5529_v3  ;;  %v5764_v21 = vmax.f32 %v5644_v14, 0.0 }
 0x6cc   : > { %v5639_v49 = vadd.f32 %v12754_v51, %v5638_v34  ;;  %v5762_v56 = vmax.f32 %v5636_v16, 0.0 }
 0x6cd   : > { %v5765_v10 = vmax.f32 %v5647_v17, 0.0 }
 0x6ce   : > { %v5763_v4 = vmax.f32 %v5639_v49, 0.0 }
 0x6cf   : > { %v5795_v1 = vpack.c.bf16 %v5765_v10, %v5764_v21 }
 0x6d0   : > { %v5794_v40 = vpack.c.bf16 %v5763_v4, %v5762_v56  ;;  %v7228_v41 = vpop.f32.mrb[68].mxu0 }
 0x6d1   : > { %v5660_v31 = vadd.f32 %v7228_v41, %v12754_v51  ;;  %v5651_v25 = vpop.f32.mrb[69].mxu0 }
 0x6d2   : > { %v5652_v61 = vadd.f32 %v12754_v51, %v5651_v25  ;;  %v7229_v38 = vpop.f32.mrb[70].mxu0  ;;  %7270 = vmatprep.mubr.bf16.mxu1 %v5794_v40 }
 0x6d3   : > { %v5663_v8 = vadd.f32 %v7229_v38, %v12754_v51  ;;  %v5654_v54 = vpop.f32.mrb[71].mxu0  ;;  %7271 = vmatmul.mubr.bf16.vlgmr.msra.gmra.mrb[64].mxu1 %v5795_v1  ;;  %v5768_v45 = vmax.f32 %v5660_v31, 0.0 }
 0x6d4   : > { %v5655_v11 = vadd.f32 %v12754_v51, %v5654_v54  ;;  %v5766_v7 = vmax.f32 %v5652_v61, 0.0 }
 0x6d5   : > { %v5769_v12 = vmax.f32 %v5663_v8, 0.0 }
 0x6d6   : > { %v5767_v27 = vmax.f32 %v5655_v11, 0.0 }
 0x6d7   : > { %v5797_v24 = vpack.c.bf16 %v5769_v12, %v5768_v45 }
 0x6d8   : > { %v5796_v60 = vpack.c.bf16 %v5767_v27, %v5766_v7  ;;  %v7232_v55 = vpop.f32.mrb[72].mxu0 }
 0x6d9   : > { %v5676_v6 = vadd.f32 %v7232_v55, %v12754_v51  ;;  %v5667_v5 = vpop.f32.mrb[73].mxu0 }
 0x6da   : > { %7274 = vmatprep.mubr.bf16.mxu1 %v5796_v60  ;;  %v5668_v13 = vadd.f32 %v12754_v51, %v5667_v5  ;;  %v7233_v48 = vpop.f32.mrb[74].mxu0 }
 0x6db   : > { %7275 = vmatmul.mubr.bf16.gmra.mrb[68].mxu1 %v5797_v24  ;;  %v5679_v50 = vadd.f32 %v7233_v48, %v12754_v51  ;;  %v5670_v58 = vpop.f32.mrb[75].mxu0  ;;  %v5772_v62 = vmax.f32 %v5676_v6, 0.0 }
 0x6dc   : > { %v5671_v59 = vadd.f32 %v12754_v51, %v5670_v58  ;;  %v5770_v32 = vmax.f32 %v5668_v13, 0.0 }
 0x6dd   : > { %v5773_v18 = vmax.f32 %v5679_v50, 0.0 }
 0x6de   : > { %v5771_v37 = vmax.f32 %v5671_v59, 0.0 }
 0x6df   : > { %v5799_v33 = vpack.c.bf16 %v5773_v18, %v5772_v62  ;;  %v7656_v62 = vld [vmem:[%s13066_s13 + $0x18] sm:$0xff]   ;;  %v7657_v18 = vld [vmem:[%s13066_s13 + $0x20] sm:$0xff]  }
 0x6e0   : > { %v5798_v28 = vpack.c.bf16 %v5771_v37, %v5770_v32  ;;  %v7236_v30 = vpop.f32.mrb[76].mxu0  ;;  %7308 = vmatprep.subr.bf16.mxu0 %v7656_v62  ;;  %v7658_v32 = vld [vmem:[%s13066_s13 + $0x28] sm:$0xff]   ;;  %v7659_v37 = vld [vmem:[%s13066_s13 + $0x30] sm:$0xff]  }
 0x6e1   : > { %v5692_v3 = vadd.f32 %v7236_v30, %v12754_v51  ;;  %v5683_v0 = vpop.f32.mrb[77].mxu0  ;;  %7309 = vmatpush3.bf16.msra.mxu0 %v7656_v62 }
 0x6e2   : > { %7278 = vmatprep.mubr.bf16.mxu1 %v5798_v28  ;;  %v5684_v36 = vadd.f32 %v12754_v51, %v5683_v0  ;;  %v7237_v14 = vpop.f32.mrb[78].mxu0  ;;  %7310 = vmatprep.subr.bf16.mxu0 %v7657_v18 }
 0x6e3   : > { %7279 = vmatmul.mubr.bf16.gmra.mrb[72].mxu1 %v5799_v33  ;;  %v5695_v52 = vadd.f32 %v7237_v14, %v12754_v51  ;;  %v5686_v16 = vpop.f32.mrb[79].mxu0  ;;  %v5776_v17 = vmax.f32 %v5692_v3, 0.0  ;;  %v7660_v33 = vld [vmem:[%s13066_s13 + $0x38] sm:$0xff]  }
 0x6e4   : > { %v5687_v57 = vadd.f32 %v12754_v51, %v5686_v16  ;;  %v5774_v49 = vmax.f32 %v5684_v36, 0.0 }
 0x6e5   : > { %v5777_v34 = vmax.f32 %v5695_v52, 0.0  ;;  %7311 = vmatpush3.bf16.msra.mxu0 %v7657_v18 }
 0x6e6   : > { %v5775_v21 = vmax.f32 %v5687_v57, 0.0  ;;  %7312 = vmatprep.subr.bf16.mxu0 %v7658_v32 }
 0x6e7   : > { %v5801_v10 = vpack.c.bf16 %v5777_v34, %v5776_v17 }
 0x6e8   : > { %v5800_v56 = vpack.c.bf16 %v5775_v21, %v5774_v49  ;;  %v7240_v4 = vpop.f32.mrb[80].mxu0 }
 0x6e9   : > { %v5708_v1 = vadd.f32 %v7240_v4, %v12754_v51  ;;  %v5699_v40 = vpop.f32.mrb[81].mxu0  ;;  %7313 = vmatpush3.bf16.msra.mxu0 %v7658_v32 }
 0x6ea   : > { %7282 = vmatprep.mubr.bf16.mxu1 %v5800_v56  ;;  %v5700_v41 = vadd.f32 %v12754_v51, %v5699_v40  ;;  %v7241_v31 = vpop.f32.mrb[82].mxu0  ;;  %7314 = vmatprep.subr.bf16.mxu0 %v7659_v37 }
 0x6eb   : > { %7283 = vmatmul.mubr.bf16.gmra.mrb[76].mxu1 %v5801_v10  ;;  %v5711_v25 = vadd.f32 %v7241_v31, %v12754_v51  ;;  %v5702_v61 = vpop.f32.mrb[83].mxu0  ;;  %v5780_v8 = vmax.f32 %v5708_v1, 0.0 }
 0x6ec   : > { %v5703_v38 = vadd.f32 %v12754_v51, %v5702_v61  ;;  %v5778_v11 = vmax.f32 %v5700_v41, 0.0 }
 0x6ed   : > { %v5781_v54 = vmax.f32 %v5711_v25, 0.0  ;;  %7315 = vmatpush3.bf16.msra.mxu0 %v7659_v37 }
 0x6ee   : > { %v5779_v44 = vmax.f32 %v5703_v38, 0.0  ;;  %7316 = vmatprep.subr.bf16.mxu0 %v7660_v33 }
 0x6ef   : > { %v5803_v46 = vpack.c.bf16 %v5781_v54, %v5780_v8 }
 0x6f0   : > { %v5802_v45 = vpack.c.bf16 %v5779_v44, %v5778_v11  ;;  %v7244_v12 = vpop.f32.mrb[84].mxu0 }
 0x6f1   : > { %v5724_v7 = vadd.f32 %v7244_v12, %v12754_v51  ;;  %v5715_v27 = vpop.f32.mrb[85].mxu0  ;;  %7317 = vmatpush3.bf16.msra.mxu0 %v7660_v33  ;;  %v12815_v12 = vld [vmem:[%s13065_s12] ss:$0 sm:$0xff] }
 0x6f2   : > { %7286 = vmatprep.mubr.bf16.mxu1 %v5802_v45  ;;  %v5716_v24 = vadd.f32 %v12754_v51, %v5715_v27  ;;  %v7245_v60 = vpop.f32.mrb[86].mxu0 }
 0x6f3   : > { %7287 = vmatmul.mubr.bf16.gmra.mrb[80].mxu1 %v5803_v46  ;;  %v5727_v55 = vadd.f32 %v7245_v60, %v12754_v51  ;;  %v5718_v42 = vpop.f32.mrb[87].mxu0  ;;  %v5784_v5 = vmax.f32 %v5724_v7, 0.0  ;;  %v13727_v7 = vld [vmem:[#allocation15_spill] sm:$0xff]  ;;  %v13728_v60 = vld [vmem:[#allocation14_spill] sm:$0xff] }
 0x6f4   : > { %v5719_v6 = vadd.f32 %v12754_v51, %v5718_v42  ;;  %v5782_v48 = vmax.f32 %v5716_v24, 0.0 }
 0x6f5   : > { %v5785_v13 = vmax.f32 %v5727_v55, 0.0 }
 0x6f6   : > { %v5783_v50 = vmax.f32 %v5719_v6, 0.0  ;;  %v13729_v6 = vld [vmem:[#allocation30_spill] sm:$0xff] }
 0x6f7   : > { %v5805_v58 = vpack.c.bf16 %v5785_v13, %v5784_v5 }
 0x6f8   : > { %v5804_v59 = vpack.c.bf16 %v5783_v50, %v5782_v48  ;;  %v13730_v50 = vld [vmem:[#allocation16_spill] sm:$0xff] }
 0x6fa   : > { %7290 = vmatprep.mubr.bf16.mxu1 %v5804_v59 }
 0x6fb   : > { %7291 = vmatmul.mubr.bf16.gmra.mrb[84].mxu1 %v5805_v58 }
 0x748   : > { %v7248_v28 = vpop.f32.mrb[88].mxu0 }
 0x749   : > { %v5740_v30 = vadd.f32 %v7248_v28, %v12754_v51  ;;  %v5731_v3 = vpop.f32.mrb[89].mxu0 }
 0x74a   : > { %v5732_v0 = vadd.f32 %v12754_v51, %v5731_v3  ;;  %v7249_v36 = vpop.f32.mrb[90].mxu0  ;;  %v13731_v3 = vld [vmem:[#allocation44_spill] sm:$0xff] }
 0x74b   : > { %v5743_v14 = vadd.f32 %v7249_v36, %v12754_v51  ;;  %v5734_v52 = vpop.f32.mrb[91].mxu0  ;;  %v5788_v57 = vmax.f32 %v5740_v30, 0.0 }
 0x74c   : > { %v5735_v16 = vadd.f32 %v12754_v51, %v5734_v52  ;;  %v5786_v34 = vmax.f32 %v5732_v0, 0.0 }
 0x74d   : > { %v5789_v17 = vmax.f32 %v5743_v14, 0.0  ;;  %v13732_v14 = vld [vmem:[#allocation46_spill] sm:$0xff] }
 0x74e   : > { %v5787_v49 = vmax.f32 %v5735_v16, 0.0 }
 0x74f   : > { %v5807_v21 = vpack.c.bf16 %v5789_v17, %v5788_v57 }
 0x750   : > { %v5806_v10 = vpack.c.bf16 %v5787_v49, %v5786_v34  ;;  %v13733_v34 = vld [vmem:[#allocation48_spill] sm:$0xff] }
 0x752   : > { %7294 = vmatprep.mubr.bf16.mxu1 %v5806_v10 }
 0x753   : > { %7295 = vmatmul.mubr.bf16.gmra.mrb[88].mxu1 %v5807_v21 }
 0x79e   : > { %v7252_v56 = vpop.f32.mrb[92].mxu0 }
 0x79f   : > { %v5756_v4 = vadd.f32 %v7252_v56, %v12754_v51  ;;  %v5747_v1 = vpop.f32.mrb[93].mxu0  ;;  %v13734_v56 = vld [vmem:[#allocation20_spill] sm:$0xff] }
 0x7a0   : > { %v5748_v40 = vadd.f32 %v12754_v51, %v5747_v1  ;;  %v7253_v41 = vpop.f32.mrb[94].mxu0 }
 0x7a1   : > { %v5759_v31 = vadd.f32 %v7253_v41, %v12754_v51  ;;  %v5750_v25 = vpop.f32.mrb[95].mxu0  ;;  %v5792_v38 = vmax.f32 %v5756_v4, 0.0  ;;  %v7661_v41 = vld [vmem:[%s13068_s15] sm:$0xff]  }
 0x7a2   : > { %v5751_v61 = vadd.f32 %v12754_v51, %v5750_v25  ;;  %v5790_v54 = vmax.f32 %v5748_v40, 0.0  ;;  %7350 = vmatprep.subr.bf16.mxu1 %v7661_v41 }
 0x7a3   : > { %v5793_v8 = vmax.f32 %v5759_v31, 0.0  ;;  %v7662_v31 = vld [vmem:[%s13068_s15 + $0x8] sm:$0xff]   ;;  %7351 = vmatpush3.bf16.msra.mxu1 %v7661_v41 }
 0x7a4   : > { %v5791_v11 = vmax.f32 %v5751_v61, 0.0  ;;  %7352 = vmatprep.subr.bf16.mxu1 %v7662_v31 }
 0x7a5   : > { %v5809_v44 = vpack.c.bf16 %v5793_v8, %v5792_v38 }
 0x7a6   : > { %v5808_v46 = vpack.c.bf16 %v5791_v11, %v5790_v54  ;;  %v7272_v45 = vpop.f32.mrb[64].mxu1 }
 0x7a7   : > { %v5917_v27 = vadd.f32 %v7272_v45, %v13727_v7  ;;  %v5908_v24 = vpop.f32.mrb[65].mxu1  ;;  %7353 = vmatpush3.bf16.msra.mxu1 %v7662_v31 }
 0x7a8   : > { %v5909_v55 = vadd.f32 %v5908_v24, %v13728_v60  ;;  %v7273_v42 = vpop.f32.mrb[66].mxu1  ;;  %7298 = vmatprep.mubr.bf16.mxu1 %v5808_v46 }
 0x7a9   : > { %v6044_v51 = vadd.f32 %v12815_v12, %v5917_v27  ;;  %v5920_v5 = vadd.f32 %v7273_v42, %v13729_v6  ;;  %v5911_v13 = vpop.f32.mrb[67].mxu1  ;;  %7299 = vmatmul.mubr.bf16.gmra.mrb[92].mxu1 %v5809_v44  ;;  %v13735_v44 = vld [vmem:[#allocation23_spill] sm:$0xff]  ;;  %v13736_v27 = vld [vmem:[#allocation41_spill] sm:$0xff] }
 0x7aa   : > { %v6042_v48 = vadd.f32 %v12815_v12, %v5909_v55  ;;  %v5912_v58 = vadd.f32 %v5911_v13, %v13730_v50  ;;  %v7663_v55 = vld [vmem:[%s13068_s15 + $0x10] sm:$0xff]  }
 0x7ab   : > { %v6045_v59 = vadd.f32 %v12815_v12, %v5920_v5  ;;  %v6076_v18 = vmax.f32 %v6044_v51, 0.0  ;;  %v13737_v51 = vld [vmem:[#allocation6_spill] sm:$0xff]  ;;  %7354 = vmatprep.subr.bf16.mxu1 %v7663_v55 }
 0x7ac   : > { %v6043_v62 = vadd.f32 %v12815_v12, %v5912_v58  ;;  %v6074_v37 = vmax.f32 %v6042_v48, 0.0  ;;  %v13738_v48 = vld [vmem:[#allocation45_spill] sm:$0xff]  ;;  %7355 = vmatpush3.bf16.msra.mxu1 %v7663_v55 }
 0x7ad   : > { %v6077_v32 = vmax.f32 %v6045_v59, 0.0 }
 0x7ae   : > { %v6075_v33 = vmax.f32 %v6043_v62, 0.0  ;;  %v7276_v28 = vpop.f32.mrb[68].mxu1 }
 0x7af   : > { %v6107_v30 = vpack.c.bf16 %v6077_v32, %v6076_v18  ;;  %v5933_v0 = vadd.f32 %v7276_v28, %v13731_v3  ;;  %v5924_v36 = vpop.f32.mrb[69].mxu1 }
 0x7b0   : > { %v5925_v52 = vadd.f32 %v5924_v36, %v13732_v14  ;;  %v7277_v16 = vpop.f32.mrb[70].mxu1  ;;  %v6106_v57 = vpack.c.bf16 %v6075_v33, %v6074_v37  ;;  %v13740_v14 = vld [vmem:[#allocation19_spill] sm:$0xff] }
 0x7b1   : > { %v6048_v17 = vadd.f32 %v12815_v12, %v5933_v0  ;;  %v5936_v49 = vadd.f32 %v7277_v16, %v13733_v34  ;;  %v5927_v21 = vpop.f32.mrb[71].mxu1 }
 0x7b2   : > { %v6046_v10 = vadd.f32 %v12815_v12, %v5925_v52  ;;  %v5928_v4 = vadd.f32 %v5927_v21, %v13734_v56  ;;  %7318 = vmatprep.mubr.bf16.mxu0 %v6106_v57 }
 0x7b3   : > { %v6049_v1 = vadd.f32 %v12815_v12, %v5936_v49  ;;  %7319 = vmatmul.mubr.bf16.vlgmr.msra.gmra.mrb[96].mxu0 %v6107_v30  ;;  %v6080_v25 = vmax.f32 %v6048_v17, 0.0  ;;  %v13739_v30 = vld [vmem:[#allocation26_spill] sm:$0xff]  ;;  %v13741_v17 = vld [vmem:[#allocation24_spill] sm:$0xff] }
 0x7b4   : > { %v6047_v40 = vadd.f32 %v12815_v12, %v5928_v4  ;;  %v6078_v38 = vmax.f32 %v6046_v10, 0.0  ;;  %v13742_v10 = vld [vmem:[#allocation17_spill] sm:$0xff] }
 0x7b5   : > { %v6081_v61 = vmax.f32 %v6049_v1, 0.0 }
 0x7b6   : > { %v6079_v8 = vmax.f32 %v6047_v40, 0.0  ;;  %v7280_v54 = vpop.f32.mrb[72].mxu1 }
 0x7b7   : > { %v6109_v11 = vpack.c.bf16 %v6081_v61, %v6080_v25  ;;  %v5949_v46 = vadd.f32 %v7280_v54, %v13735_v44  ;;  %v5940_v45 = vpop.f32.mrb[73].mxu1  ;;  %v13743_v44 = vld [vmem:[#allocation18_spill] sm:$0xff] }
 0x7b8   : > { %v6108_v7 = vpack.c.bf16 %v6079_v8, %v6078_v38  ;;  %v5941_v24 = vadd.f32 %v5940_v45, %v13736_v27  ;;  %v7281_v60 = vpop.f32.mrb[74].mxu1 }
 0x7b9   : > { %v6052_v42 = vadd.f32 %v12815_v12, %v5949_v46  ;;  %v5952_v6 = vadd.f32 %v7281_v60, %v13737_v51  ;;  %v5943_v5 = vpop.f32.mrb[75].mxu1 }
 0x7ba   : > { %7322 = vmatprep.mubr.bf16.mxu0 %v6108_v7  ;;  %v6050_v13 = vadd.f32 %v12815_v12, %v5941_v24  ;;  %v5944_v50 = vadd.f32 %v5943_v5, %v13738_v48 }
 0x7bb   : > { %7323 = vmatmul.mubr.bf16.gmra.mrb[100].mxu0 %v6109_v11  ;;  %v6053_v58 = vadd.f32 %v12815_v12, %v5952_v6  ;;  %v6084_v62 = vmax.f32 %v6052_v42, 0.0 }
 0x7bc   : > { %v6051_v59 = vadd.f32 %v12815_v12, %v5944_v50  ;;  %v6082_v32 = vmax.f32 %v6050_v13, 0.0 }
 0x7bd   : > { %v6085_v18 = vmax.f32 %v6053_v58, 0.0 }
 0x7be   : > { %v6083_v37 = vmax.f32 %v6051_v59, 0.0  ;;  %v7284_v33 = vpop.f32.mrb[76].mxu1 }
 0x7bf   : > { %v6111_v28 = vpack.c.bf16 %v6085_v18, %v6084_v62  ;;  %v5965_v3 = vadd.f32 %v7284_v33, %v13739_v30  ;;  %v5956_v0 = vpop.f32.mrb[77].mxu1 }
 0x7c0   : > { %v6110_v36 = vpack.c.bf16 %v6083_v37, %v6082_v32  ;;  %v5957_v52 = vadd.f32 %v5956_v0, %v13740_v14  ;;  %v7285_v16 = vpop.f32.mrb[78].mxu1 }
 0x7c1   : > { %v6056_v57 = vadd.f32 %v12815_v12, %v5965_v3  ;;  %v5968_v34 = vadd.f32 %v7285_v16, %v13741_v17  ;;  %v5959_v49 = vpop.f32.mrb[79].mxu1  ;;  %v7666_v16 = vld [vmem:[%s13068_s15 + $0x28] sm:$0xff]   ;;  %v7668_v17 = vld [vmem:[%s13068_s15 + $0x38] sm:$0xff]  }
 0x7c2   : > { %7326 = vmatprep.mubr.bf16.mxu0 %v6110_v36  ;;  %v6054_v21 = vadd.f32 %v12815_v12, %v5957_v52  ;;  %v5960_v56 = vadd.f32 %v5959_v49, %v13742_v10 }
 0x7c3   : > { %7327 = vmatmul.mubr.bf16.gmra.mrb[104].mxu0 %v6111_v28  ;;  %v6057_v4 = vadd.f32 %v12815_v12, %v5968_v34  ;;  %v6088_v40 = vmax.f32 %v6056_v57, 0.0  ;;  %v7667_v57 = vld [vmem:[%s13068_s15 + $0x30] sm:$0xff]  }
 0x7c4   : > { %v6055_v1 = vadd.f32 %v12815_v12, %v5960_v56  ;;  %v6086_v31 = vmax.f32 %v6054_v21, 0.0 }
 0x7c5   : > { %v6089_v41 = vmax.f32 %v6057_v4, 0.0 }
 0x7c6   : > { %v6087_v25 = vmax.f32 %v6055_v1, 0.0  ;;  %v7288_v61 = vpop.f32.mrb[80].mxu1 }
 0x7c7   : > { %v6113_v38 = vpack.c.bf16 %v6089_v41, %v6088_v40  ;;  %v5981_v8 = vadd.f32 %v7288_v61, %v12476_v19  ;;  %v5972_v54 = vpop.f32.mrb[81].mxu1 }
 0x7c8   : > { %v6112_v11 = vpack.c.bf16 %v6087_v25, %v6086_v31  ;;  %v5973_v46 = vadd.f32 %v5972_v54, %v13743_v44  ;;  %v7289_v45 = vpop.f32.mrb[82].mxu1 }
 0x7c9   : > { %v6060_v7 = vadd.f32 %v12815_v12, %v5981_v8  ;;  %v5984_v27 = vadd.f32 %v7289_v45, %v12485_v39  ;;  %v5975_v24 = vpop.f32.mrb[83].mxu1 }
 0x7ca   : > { %7330 = vmatprep.mubr.bf16.mxu0 %v6112_v11  ;;  %v6058_v60 = vadd.f32 %v12815_v12, %v5973_v46  ;;  %v5976_v55 = vadd.f32 %v5975_v24, %v12214_v63 }
 0x7cb   : > { %7331 = vmatmul.mubr.bf16.gmra.mrb[108].mxu0 %v6113_v38  ;;  %v6061_v42 = vadd.f32 %v12815_v12, %v5984_v27  ;;  %v6092_v51 = vmax.f32 %v6060_v7, 0.0 }
 0x7cc   : > { %v6059_v19 = vadd.f32 %v12815_v12, %v5976_v55  ;;  %v6090_v5 = vmax.f32 %v6058_v60, 0.0 }
 0x7cd   : > { %v6093_v6 = vmax.f32 %v6061_v42, 0.0 }
 0x7ce   : > { %v6091_v13 = vmax.f32 %v6059_v19, 0.0  ;;  %v7292_v58 = vpop.f32.mrb[84].mxu1 }
 0x7cf   : > { %v6115_v48 = vpack.c.bf16 %v6093_v6, %v6092_v51  ;;  %v5997_v39 = vadd.f32 %v7292_v58, %v12574_v47  ;;  %v5988_v59 = vpop.f32.mrb[85].mxu1 }
 0x7d0   : > { %v6114_v50 = vpack.c.bf16 %v6091_v13, %v6090_v5  ;;  %v5989_v62 = vadd.f32 %v5988_v59, %v12549_v2  ;;  %v7293_v63 = vpop.f32.mrb[86].mxu1 }
 0x7d1   : > { %v6064_v18 = vadd.f32 %v12815_v12, %v5997_v39  ;;  %v6000_v32 = vadd.f32 %v7293_v63, %v12577_v29  ;;  %v5991_v37 = vpop.f32.mrb[87].mxu1  ;;  %v7664_v29 = vld [vmem:[%s13068_s15 + $0x18] sm:$0xff]  }
 0x7d2   : > { %7334 = vmatprep.mubr.bf16.mxu0 %v6114_v50  ;;  %v6062_v33 = vadd.f32 %v12815_v12, %v5989_v62  ;;  %v5992_v28 = vadd.f32 %v5991_v37, %v12558_v53  ;;  %7356 = vmatprep.subr.bf16.mxu1 %v7664_v29  ;;  %v7665_v53 = vld [vmem:[%s13068_s15 + $0x20] sm:$0xff]  }
 0x7d3   : > { %7335 = vmatmul.mubr.bf16.gmra.mrb[112].mxu0 %v6115_v48  ;;  %v6065_v30 = vadd.f32 %v12815_v12, %v6000_v32  ;;  %v6096_v0 = vmax.f32 %v6064_v18, 0.0  ;;  %7357 = vmatpush3.bf16.msra.mxu1 %v7664_v29 }
 0x7d4   : > { %v6063_v3 = vadd.f32 %v12815_v12, %v5992_v28  ;;  %v6094_v47 = vmax.f32 %v6062_v33, 0.0  ;;  %7358 = vmatprep.subr.bf16.mxu1 %v7665_v53 }
 0x7d5   : > { %v6097_v36 = vmax.f32 %v6065_v30, 0.0 }
 0x7d6   : > { %v6095_v14 = vmax.f32 %v6063_v3, 0.0 }
 0x7d7   : > { %v6117_v52 = vpack.c.bf16 %v6097_v36, %v6096_v0  ;;  %7359 = vmatpush3.bf16.msra.mxu1 %v7665_v53 }
 0x7d8   : > { %v6116_v2 = vpack.c.bf16 %v6095_v14, %v6094_v47  ;;  %7360 = vmatprep.subr.bf16.mxu1 %v7666_v16 }
 0x7da   : > { %7338 = vmatprep.mubr.bf16.mxu0 %v6116_v2 }
 0x7db   : > { %7339 = vmatmul.mubr.bf16.gmra.mrb[116].mxu0 %v6117_v52  ;;  %7361 = vmatpush3.bf16.msra.mxu1 %v7666_v16 }
 0x7dc   : > { %7362 = vmatprep.subr.bf16.mxu1 %v7667_v57 }
 0x7df   : > { %7363 = vmatpush3.bf16.msra.mxu1 %v7667_v57 }
 0x7e0   : > { %7364 = vmatprep.subr.bf16.mxu1 %v7668_v17 }
 0x7e3   : > { %7365 = vmatpush3.bf16.msra.mxu1 %v7668_v17 }
 0x826   : > { %v7296_v34 = vpop.f32.mrb[88].mxu1 }
 0x827   : > { %v6013_v49 = vadd.f32 %v7296_v34, %v12618_v35  ;;  %v6004_v21 = vpop.f32.mrb[89].mxu1 }
 0x828   : > { %v6005_v10 = vadd.f32 %v6004_v21, %v12592_v43  ;;  %v7297_v56 = vpop.f32.mrb[90].mxu1 }
 0x829   : > { %v6068_v4 = vadd.f32 %v12815_v12, %v6013_v49  ;;  %v6016_v1 = vadd.f32 %v7297_v56, %v12621_v9  ;;  %v6007_v40 = vpop.f32.mrb[91].mxu1 }
 0x82a   : > { %v6066_v41 = vadd.f32 %v12815_v12, %v6005_v10  ;;  %v6008_v31 = vadd.f32 %v6007_v40, %v12595_v23 }
 0x82b   : > { %v6069_v25 = vadd.f32 %v12815_v12, %v6016_v1  ;;  %v6100_v38 = vmax.f32 %v6068_v4, 0.0 }
 0x82c   : > { %v6067_v61 = vadd.f32 %v12815_v12, %v6008_v31  ;;  %v6098_v35 = vmax.f32 %v6066_v41, 0.0 }
 0x82d   : > { %v6101_v8 = vmax.f32 %v6069_v25, 0.0 }
 0x82e   : > { %v6099_v54 = vmax.f32 %v6067_v61, 0.0 }
 0x82f   : > { %v6119_v11 = vpack.c.bf16 %v6101_v8, %v6100_v38 }
 0x830   : > { %v6118_v43 = vpack.c.bf16 %v6099_v54, %v6098_v35 }
 0x832   : > { %7342 = vmatprep.mubr.bf16.mxu0 %v6118_v43 }
 0x833   : > { %7343 = vmatmul.mubr.bf16.gmra.mrb[120].mxu0 %v6119_v11 }
 0x87c   : > { %v7300_v44 = vpop.f32.mrb[92].mxu1 }
 0x87d   : > { %v6029_v9 = vadd.f32 %v7300_v44, %v12644_v26  ;;  %v6020_v46 = vpop.f32.mrb[93].mxu1 }
 0x87e   : > { %v6021_v45 = vadd.f32 %v6020_v46, %v12634_v22  ;;  %v7301_v7 = vpop.f32.mrb[94].mxu1  ;;  %v12908_v22 = vld [vmem:[%s13067_s14] ss:$0 sm:$0xff] }
 0x87f   : > { %v6072_v23 = vadd.f32 %v12815_v12, %v6029_v9  ;;  %v6032_v27 = vadd.f32 %v7301_v7, %v12647_v20  ;;  %v6023_v24 = vpop.f32.mrb[95].mxu1 }
 0x880   : > { %v6070_v60 = vadd.f32 %v12815_v12, %v6021_v45  ;;  %v6024_v55 = vadd.f32 %v6023_v24, %v12637_v15 }
 0x881   : > { %v6073_v42 = vadd.f32 %v12815_v12, %v6032_v27  ;;  %v6104_v51 = vmax.f32 %v6072_v23, 0.0 }
 0x882   : > { %v6071_v19 = vadd.f32 %v12815_v12, %v6024_v55  ;;  %v6102_v26 = vmax.f32 %v6070_v60, 0.0 }
 0x883   : > { %v6105_v6 = vmax.f32 %v6073_v42, 0.0 }
 0x884   : > { %v6103_v5 = vmax.f32 %v6071_v19, 0.0 }
 0x885   : > { %v6121_v13 = vpack.c.bf16 %v6105_v6, %v6104_v51 }
 0x886   : > { %v7320_v20 = vpop.f32.mrb[96].mxu0  ;;  %v6120_v48 = vpack.c.bf16 %v6103_v5, %v6102_v26 }
 0x887   : > { %v6236_v50 = vadd.f32 %v7320_v20, %v12908_v22  ;;  %v6227_v58 = vpop.f32.mrb[97].mxu0 }
 0x888   : > { %v6228_v15 = vadd.f32 %v12908_v22, %v6227_v58  ;;  %v7321_v39 = vpop.f32.mrb[98].mxu0  ;;  %7346 = vmatprep.mubr.bf16.mxu0 %v6120_v48 }
 0x889   : > { %v6239_v12 = vadd.f32 %v7321_v39, %v12908_v22  ;;  %v6230_v59 = vpop.f32.mrb[99].mxu0  ;;  %7347 = vmatmul.mubr.bf16.gmra.mrb[124].mxu0 %v6121_v13  ;;  %v6356_v63 = vmax.f32 %v6236_v50, 0.0 }
 0x88a   : > { %v6231_v62 = vadd.f32 %v12908_v22, %v6230_v59  ;;  %v6354_v32 = vmax.f32 %v6228_v15, 0.0 }
 0x88b   : > { %v6357_v18 = vmax.f32 %v6239_v12, 0.0 }
 0x88c   : > { %v6355_v37 = vmax.f32 %v6231_v62, 0.0 }
 0x88d   : > { %v6387_v33 = vpack.c.bf16 %v6357_v18, %v6356_v63 }
 0x88e   : > { %v6386_v28 = vpack.c.bf16 %v6355_v37, %v6354_v32  ;;  %v7324_v30 = vpop.f32.mrb[100].mxu0 }
 0x88f   : > { %v6252_v3 = vadd.f32 %v7324_v30, %v12908_v22  ;;  %v6243_v0 = vpop.f32.mrb[101].mxu0 }
 0x890   : > { %v6244_v36 = vadd.f32 %v12908_v22, %v6243_v0  ;;  %v7325_v47 = vpop.f32.mrb[102].mxu0  ;;  %7366 = vmatprep.mubr.bf16.mxu1 %v6386_v28 }
 0x891   : > { %v6255_v14 = vadd.f32 %v7325_v47, %v12908_v22  ;;  %v6246_v52 = vpop.f32.mrb[103].mxu0  ;;  %7367 = vmatmul.mubr.bf16.vlgmr.msra.gmra.mrb[96].mxu1 %v6387_v33  ;;  %v6360_v29 = vmax.f32 %v6252_v3, 0.0 }
 0x892   : > { %v6247_v2 = vadd.f32 %v12908_v22, %v6246_v52  ;;  %v6358_v16 = vmax.f32 %v6244_v36, 0.0 }
 0x893   : > { %v6361_v53 = vmax.f32 %v6255_v14, 0.0 }
 0x894   : > { %v6359_v57 = vmax.f32 %v6247_v2, 0.0 }
 0x895   : > { %v6389_v17 = vpack.c.bf16 %v6361_v53, %v6360_v29 }
 0x896   : > { %v6388_v34 = vpack.c.bf16 %v6359_v57, %v6358_v16  ;;  %v7328_v49 = vpop.f32.mrb[104].mxu0 }
 0x897   : > { %v6268_v21 = vadd.f32 %v7328_v49, %v12908_v22  ;;  %v6259_v10 = vpop.f32.mrb[105].mxu0 }
 0x898   : > { %7370 = vmatprep.mubr.bf16.mxu1 %v6388_v34  ;;  %v6260_v56 = vadd.f32 %v12908_v22, %v6259_v10  ;;  %v7329_v4 = vpop.f32.mrb[106].mxu0 }
 0x899   : > { %7371 = vmatmul.mubr.bf16.gmra.mrb[100].mxu1 %v6389_v17  ;;  %v6271_v1 = vadd.f32 %v7329_v4, %v12908_v22  ;;  %v6262_v40 = vpop.f32.mrb[107].mxu0  ;;  %v6364_v31 = vmax.f32 %v6268_v21, 0.0 }
 0x89a   : > { %v6263_v41 = vadd.f32 %v12908_v22, %v6262_v40  ;;  %v6362_v61 = vmax.f32 %v6260_v56, 0.0 }
 0x89b   : > { %v6365_v25 = vmax.f32 %v6271_v1, 0.0 }
 0x89c   : > { %v6363_v38 = vmax.f32 %v6263_v41, 0.0 }
 0x89d   : > { %v6391_v8 = vpack.c.bf16 %v6365_v25, %v6364_v31 }
 0x89e   : > { %v6390_v35 = vpack.c.bf16 %v6363_v38, %v6362_v61  ;;  %v7332_v54 = vpop.f32.mrb[108].mxu0 }
 0x89f   : > { %v6284_v11 = vadd.f32 %v7332_v54, %v12908_v22  ;;  %v6275_v43 = vpop.f32.mrb[109].mxu0 }
 0x8a0   : > { %7374 = vmatprep.mubr.bf16.mxu1 %v6390_v35  ;;  %v6276_v44 = vadd.f32 %v12908_v22, %v6275_v43  ;;  %v7333_v9 = vpop.f32.mrb[110].mxu0 }
 0x8a1   : > { %7375 = vmatmul.mubr.bf16.gmra.mrb[104].mxu1 %v6391_v8  ;;  %v6287_v46 = vadd.f32 %v7333_v9, %v12908_v22  ;;  %v6278_v45 = vpop.f32.mrb[111].mxu0  ;;  %v6368_v23 = vmax.f32 %v6284_v11, 0.0 }
 0x8a2   : > { %v6279_v7 = vadd.f32 %v12908_v22, %v6278_v45  ;;  %v6366_v24 = vmax.f32 %v6276_v44, 0.0 }
 0x8a3   : > { %v6369_v27 = vmax.f32 %v6287_v46, 0.0  ;;  %v12945_v46 = vld [vmem:[%s13069_s16] ss:$0 sm:$0xff] }
 0x8a4   : > { %v6367_v60 = vmax.f32 %v6279_v7, 0.0 }
 0x8a5   : > { %v6393_v55 = vpack.c.bf16 %v6369_v27, %v6368_v23 }
 0x8a6   : > { %v6392_v42 = vpack.c.bf16 %v6367_v60, %v6366_v24  ;;  %v7336_v19 = vpop.f32.mrb[112].mxu0 }
 0x8a7   : > { %v6300_v51 = vadd.f32 %v7336_v19, %v12908_v22  ;;  %v6291_v6 = vpop.f32.mrb[113].mxu0 }
 0x8a8   : > { %7378 = vmatprep.mubr.bf16.mxu1 %v6392_v42  ;;  %v6292_v26 = vadd.f32 %v12908_v22, %v6291_v6  ;;  %v7337_v5 = vpop.f32.mrb[114].mxu0 }
 0x8a9   : > { %7379 = vmatmul.mubr.bf16.gmra.mrb[108].mxu1 %v6393_v55  ;;  %v6303_v13 = vadd.f32 %v7337_v5, %v12908_v22  ;;  %v6294_v20 = vpop.f32.mrb[115].mxu0  ;;  %v6372_v50 = vmax.f32 %v6300_v51, 0.0 }
 0x8aa   : > { %v6295_v48 = vadd.f32 %v12908_v22, %v6294_v20  ;;  %v6370_v15 = vmax.f32 %v6292_v26, 0.0 }
 0x8ab   : > { %v6373_v58 = vmax.f32 %v6303_v13, 0.0 }
 0x8ac   : > { %v6371_v39 = vmax.f32 %v6295_v48, 0.0 }
 0x8ad   : > { %v6395_v12 = vpack.c.bf16 %v6373_v58, %v6372_v50 }
 0x8ae   : > { %v6394_v59 = vpack.c.bf16 %v6371_v39, %v6370_v15  ;;  %v7340_v62 = vpop.f32.mrb[116].mxu0 }
 0x8af   : > { %v6316_v63 = vadd.f32 %v7340_v62, %v12908_v22  ;;  %v6307_v18 = vpop.f32.mrb[117].mxu0 }
 0x8b0   : > { %7382 = vmatprep.mubr.bf16.mxu1 %v6394_v59  ;;  %v6308_v32 = vadd.f32 %v12908_v22, %v6307_v18  ;;  %v7341_v37 = vpop.f32.mrb[118].mxu0 }
 0x8b1   : > { %7383 = vmatmul.mubr.bf16.gmra.mrb[112].mxu1 %v6395_v12  ;;  %v6319_v33 = vadd.f32 %v7341_v37, %v12908_v22  ;;  %v6310_v28 = vpop.f32.mrb[119].mxu0  ;;  %v6376_v3 = vmax.f32 %v6316_v63, 0.0 }
 0x8b2   : > { %v6311_v30 = vadd.f32 %v12908_v22, %v6310_v28  ;;  %v6374_v36 = vmax.f32 %v6308_v32, 0.0 }
 0x8b3   : > { %v6377_v0 = vmax.f32 %v6319_v33, 0.0 }
 0x8b4   : > { %v6375_v47 = vmax.f32 %v6311_v30, 0.0 }
 0x8b5   : > { %v6397_v14 = vpack.c.bf16 %v6377_v0, %v6376_v3 }
 0x8b6   : > { %v6396_v52 = vpack.c.bf16 %v6375_v47, %v6374_v36 }
 0x8b8   : > { %7386 = vmatprep.mubr.bf16.mxu1 %v6396_v52 }
 0x8b9   : > { %7387 = vmatmul.mubr.bf16.gmra.mrb[116].mxu1 %v6397_v14 }
 0x906   : > { %v7344_v2 = vpop.f32.mrb[120].mxu0 }
 0x907   : > { %v6332_v29 = vadd.f32 %v7344_v2, %v12908_v22  ;;  %v6323_v53 = vpop.f32.mrb[121].mxu0 }
 0x908   : > { %v6324_v16 = vadd.f32 %v12908_v22, %v6323_v53  ;;  %v7345_v57 = vpop.f32.mrb[122].mxu0 }
 0x909   : > { %v6335_v17 = vadd.f32 %v7345_v57, %v12908_v22  ;;  %v6326_v34 = vpop.f32.mrb[123].mxu0  ;;  %v6380_v21 = vmax.f32 %v6332_v29, 0.0 }
 0x90a   : > { %v6327_v49 = vadd.f32 %v12908_v22, %v6326_v34  ;;  %v6378_v56 = vmax.f32 %v6324_v16, 0.0 }
 0x90b   : > { %v6381_v10 = vmax.f32 %v6335_v17, 0.0 }
 0x90c   : > { %v6379_v4 = vmax.f32 %v6327_v49, 0.0 }
 0x90d   : > { %v6399_v1 = vpack.c.bf16 %v6381_v10, %v6380_v21 }
 0x90e   : > { %v6398_v40 = vpack.c.bf16 %v6379_v4, %v6378_v56 }
 0x910   : > { %7390 = vmatprep.mubr.bf16.mxu1 %v6398_v40 }
 0x911   : > { %7391 = vmatmul.mubr.bf16.gmra.mrb[120].mxu1 %v6399_v1 }
 0x95c   : > { %v7348_v41 = vpop.f32.mrb[124].mxu0 }
 0x95d   : > { %v6348_v31 = vadd.f32 %v7348_v41, %v12908_v22  ;;  %v6339_v25 = vpop.f32.mrb[125].mxu0 }
 0x95e   : > { %v6340_v61 = vadd.f32 %v12908_v22, %v6339_v25  ;;  %v7349_v38 = vpop.f32.mrb[126].mxu0 }
 0x95f   : > { %v6351_v8 = vadd.f32 %v7349_v38, %v12908_v22  ;;  %v6342_v35 = vpop.f32.mrb[127].mxu0  ;;  %v6384_v11 = vmax.f32 %v6348_v31, 0.0 }
 0x960   : > { %v6343_v54 = vadd.f32 %v12908_v22, %v6342_v35  ;;  %v6382_v44 = vmax.f32 %v6340_v61, 0.0 }
 0x961   : > { %v6385_v43 = vmax.f32 %v6351_v8, 0.0 }
 0x962   : > { %v6383_v9 = vmax.f32 %v6343_v54, 0.0 }
 0x963   : > { %v6401_v45 = vpack.c.bf16 %v6385_v43, %v6384_v11 }
 0x964   : > { %v6400_v22 = vpack.c.bf16 %v6383_v9, %v6382_v44  ;;  %v7368_v7 = vpop.f32.mrb[96].mxu1 }
 0x965   : > { %v6636_v23 = vadd.f32 %v7368_v7, %v12945_v46  ;;  %v6500_v27 = vpop.f32.mrb[97].mxu1 }
 0x966   : > { %v6634_v24 = vadd.f32 %v12945_v46, %v6500_v27  ;;  %v7369_v60 = vpop.f32.mrb[98].mxu1  ;;  %7394 = vmatprep.mubr.bf16.mxu1 %v6400_v22 }
 0x967   : > { %6669 = vst.msk [vmem:[%s12952_s30 + $0x10] sm:$0xff] %vm6666_vm3, %v6636_v23  ;;  %v6637_v55 = vadd.f32 %v7369_v60, %v12945_v46  ;;  %v6503_v42 = vpop.f32.mrb[99].mxu1  ;;  %7395 = vmatmul.mubr.bf16.gmra.mrb[124].mxu1 %v6401_v45 }
 0x968   : > { %6667 = vst.msk [vmem:[%s12952_s30] sm:$0xff] %vm6666_vm3, %v6634_v24  ;;  %v6635_v19 = vadd.f32 %v12945_v46, %v6503_v42 }
 0x969   : > { %6670 = vst.msk [vmem:[%s12952_s30 + $0x18] sm:$0xff] %vm6666_vm3, %v6637_v55 }
 0x96a   : > { %6668 = vst.msk [vmem:[%s12952_s30 + $0x8] sm:$0xff] %vm6666_vm3, %v6635_v19 }
 0x96c   : > { %v7372_v51 = vpop.f32.mrb[100].mxu1 }
 0x96d   : > { %v6640_v6 = vadd.f32 %v7372_v51, %v12945_v46  ;;  %v6516_v26 = vpop.f32.mrb[101].mxu1 }
 0x96e   : > { %v6638_v5 = vadd.f32 %v12945_v46, %v6516_v26  ;;  %v7373_v13 = vpop.f32.mrb[102].mxu1 }
 0x96f   : > { %6673 = vst.msk [vmem:[%s12952_s30 + $0x30] sm:$0xff] %vm6666_vm3, %v6640_v6  ;;  %v6641_v20 = vadd.f32 %v7373_v13, %v12945_v46  ;;  %v6519_v48 = vpop.f32.mrb[103].mxu1 }
 0x970   : > { %6671 = vst.msk [vmem:[%s12952_s30 + $0x20] sm:$0xff] %vm6666_vm3, %v6638_v5  ;;  %v6639_v50 = vadd.f32 %v12945_v46, %v6519_v48 }
 0x971   : > { %6674 = vst.msk [vmem:[%s12952_s30 + $0x38] sm:$0xff] %vm6666_vm3, %v6641_v20 }
 0x972   : > { %6672 = vst.msk [vmem:[%s12952_s30 + $0x28] sm:$0xff] %vm6666_vm3, %v6639_v50 }
 0x974   : > { %v7376_v58 = vpop.f32.mrb[104].mxu1 }
 0x975   : > { %v6644_v15 = vadd.f32 %v7376_v58, %v12945_v46  ;;  %v6532_v39 = vpop.f32.mrb[105].mxu1 }
 0x976   : > { %v6642_v12 = vadd.f32 %v12945_v46, %v6532_v39  ;;  %v7377_v59 = vpop.f32.mrb[106].mxu1 }
 0x977   : > { %6677 = vst.msk [vmem:[%s12952_s30 + $0x50] sm:$0xff] %vm6666_vm3, %v6644_v15  ;;  %v6645_v62 = vadd.f32 %v7377_v59, %v12945_v46  ;;  %v6535_v63 = vpop.f32.mrb[107].mxu1 }
 0x978   : > { %6675 = vst.msk [vmem:[%s12952_s30 + $0x40] sm:$0xff] %vm6666_vm3, %v6642_v12  ;;  %v6643_v18 = vadd.f32 %v12945_v46, %v6535_v63 }
 0x979   : > { %6678 = vst.msk [vmem:[%s12952_s30 + $0x58] sm:$0xff] %vm6666_vm3, %v6645_v62 }
 0x97a   : > { %6676 = vst.msk [vmem:[%s12952_s30 + $0x48] sm:$0xff] %vm6666_vm3, %v6643_v18 }
 0x97c   : > { %v7380_v32 = vpop.f32.mrb[108].mxu1 }
 0x97d   : > { %v6648_v37 = vadd.f32 %v7380_v32, %v12945_v46  ;;  %v6548_v33 = vpop.f32.mrb[109].mxu1 }
 0x97e   : > { %v6646_v28 = vadd.f32 %v12945_v46, %v6548_v33  ;;  %v7381_v30 = vpop.f32.mrb[110].mxu1 }
 0x97f   : > { %6681 = vst.msk [vmem:[%s12952_s30 + $0x70] sm:$0xff] %vm6666_vm3, %v6648_v37  ;;  %v6649_v3 = vadd.f32 %v7381_v30, %v12945_v46  ;;  %v6551_v0 = vpop.f32.mrb[111].mxu1 }
 0x980   : > { %6679 = vst.msk [vmem:[%s12952_s30 + $0x60] sm:$0xff] %vm6666_vm3, %v6646_v28  ;;  %v6647_v36 = vadd.f32 %v12945_v46, %v6551_v0 }
 0x981   : > { %6682 = vst.msk [vmem:[%s12952_s30 + $0x78] sm:$0xff] %vm6666_vm3, %v6649_v3 }
 0x982   : > { %6680 = vst.msk [vmem:[%s12952_s30 + $0x68] sm:$0xff] %vm6666_vm3, %v6647_v36 }
 0x984   : > { %v7384_v47 = vpop.f32.mrb[112].mxu1 }
 0x985   : > { %v6652_v14 = vadd.f32 %v7384_v47, %v12945_v46  ;;  %v6564_v52 = vpop.f32.mrb[113].mxu1 }
 0x986   : > { %v6650_v2 = vadd.f32 %v12945_v46, %v6564_v52  ;;  %v7385_v29 = vpop.f32.mrb[114].mxu1 }
 0x987   : > { %6685 = vst.msk [vmem:[%s12952_s30 + $0x90] sm:$0xff] %vm6666_vm3, %v6652_v14  ;;  %v6653_v53 = vadd.f32 %v7385_v29, %v12945_v46  ;;  %v6567_v16 = vpop.f32.mrb[115].mxu1 }
 0x988   : > { %6683 = vst.msk [vmem:[%s12952_s30 + $0x80] sm:$0xff] %vm6666_vm3, %v6650_v2  ;;  %v6651_v57 = vadd.f32 %v12945_v46, %v6567_v16 }
 0x989   : > { %6686 = vst.msk [vmem:[%s12952_s30 + $0x98] sm:$0xff] %vm6666_vm3, %v6653_v53 }
 0x98a   : > { %6684 = vst.msk [vmem:[%s12952_s30 + $0x88] sm:$0xff] %vm6666_vm3, %v6651_v57 }
 0x98c   : > { %v7388_v17 = vpop.f32.mrb[116].mxu1 }
 0x98d   : > { %v6656_v34 = vadd.f32 %v7388_v17, %v12945_v46  ;;  %v6580_v49 = vpop.f32.mrb[117].mxu1 }
 0x98e   : > { %v6654_v21 = vadd.f32 %v12945_v46, %v6580_v49  ;;  %v7389_v10 = vpop.f32.mrb[118].mxu1 }
 0x98f   : > { %6689 = vst.msk [vmem:[%s12952_s30 + $0xb0] sm:$0xff] %vm6666_vm3, %v6656_v34  ;;  %v6657_v56 = vadd.f32 %v7389_v10, %v12945_v46  ;;  %v6583_v4 = vpop.f32.mrb[119].mxu1 }
 0x990   : > { %6687 = vst.msk [vmem:[%s12952_s30 + $0xa0] sm:$0xff] %vm6666_vm3, %v6654_v21  ;;  %v6655_v1 = vadd.f32 %v12945_v46, %v6583_v4 }
 0x991   : > { %6690 = vst.msk [vmem:[%s12952_s30 + $0xb8] sm:$0xff] %vm6666_vm3, %v6657_v56 }
 0x992   : > { %6688 = vst.msk [vmem:[%s12952_s30 + $0xa8] sm:$0xff] %vm6666_vm3, %v6655_v1 }
 0x9e4   : > { %v7392_v40 = vpop.f32.mrb[120].mxu1 }
 0x9e5   : > { %v6660_v41 = vadd.f32 %v7392_v40, %v12945_v46  ;;  %v6596_v31 = vpop.f32.mrb[121].mxu1 }
 0x9e6   : > { %v6658_v25 = vadd.f32 %v12945_v46, %v6596_v31  ;;  %v7393_v61 = vpop.f32.mrb[122].mxu1 }
 0x9e7   : > { %6693 = vst.msk [vmem:[%s12952_s30 + $0xd0] sm:$0xff] %vm6666_vm3, %v6660_v41  ;;  %v6661_v38 = vadd.f32 %v7393_v61, %v12945_v46  ;;  %v6599_v8 = vpop.f32.mrb[123].mxu1 }
 0x9e8   : > { %6691 = vst.msk [vmem:[%s12952_s30 + $0xc0] sm:$0xff] %vm6666_vm3, %v6658_v25  ;;  %v6659_v35 = vadd.f32 %v12945_v46, %v6599_v8 }
 0x9e9   : > { %6694 = vst.msk [vmem:[%s12952_s30 + $0xd8] sm:$0xff] %vm6666_vm3, %v6661_v38 }
 0x9ea   : > { %6692 = vst.msk [vmem:[%s12952_s30 + $0xc8] sm:$0xff] %vm6666_vm3, %v6659_v35 }
 0xa3a   : > { %v7396_v54 = vpop.f32.mrb[124].mxu1 }
 0xa3b   : > { %v6664_v11 = vadd.f32 %v7396_v54, %v12945_v46  ;;  %v6612_v43 = vpop.f32.mrb[125].mxu1 }
 0xa3c   : > { %v6662_v44 = vadd.f32 %v12945_v46, %v6612_v43  ;;  %v7397_v9 = vpop.f32.mrb[126].mxu1 }
 0xa3d   : > { %6697 = vst.msk [vmem:[%s12952_s30 + $0xf0] sm:$0xff] %vm6666_vm3, %v6664_v11  ;;  %v6665_v45 = vadd.f32 %v7397_v9, %v12945_v46  ;;  %v6615_v22 = vpop.f32.mrb[127].mxu1 }
 0xa3e   : > { %6695 = vst.msk [vmem:[%s12952_s30 + $0xe0] sm:$0xff] %vm6666_vm3, %v6662_v44  ;;  %v6663_v7 = vadd.f32 %v12945_v46, %v6615_v22 }
 0xa3f   : > { %6698 = vst.msk [vmem:[%s12952_s30 + $0xf8] sm:$0xff] %vm6666_vm3, %v6665_v45 }
 0xa40   : > { %6696 = vst.msk [vmem:[%s12952_s30 + $0xe8] sm:$0xff] %vm6666_vm3, %v6663_v7 }
 0xa41 PF: > { %s27_s24 = sadd.s32 1, %s7808_s24  }
 0xa42   : > { %p24_p4 = scmp.ge.s32.totalorder %s27_s24, 4  }
 0xa44   :  { %26 = sbr.rel (!%p24_p4) target bundleno = 3 (0x3), region = 118 }

</bundles_post_ra>
